<compile_context>
chip_gen: v7x
topology: tpu7x:2x2x1
jax: 0.10.0
libtpu: 0.0.40
codegen_flags: <defaults>
</compile_context>

<pallas_src>
import numpy as np
import jax
import jax.numpy as jnp
from jax.experimental import pallas as pl
from jax.experimental.pallas import tpu as pltpu


DEPTH = 17
N_CH = 64          # hidden channels
OUT_LANES = 8      # lane padding of the final (image_channels-wide) output
BN_EPS = 1e-4


def _round_up(x, m):
    return (x + m - 1) // m * m


def _geometry(H, W):
    WP = W + 2                        # padded row pitch
    NP = (H + 2) * WP                 # flattened padded-image rows
    M = H * WP                        # rows of every conv matmul / accumulator
    W_OFF = WP + 1                    # flat offset of interior pixel (1, 1)
    BUF_LEAD = (-W_OFF) % 16          # makes the per-layer store offset 16-aligned (bf16)
    P_in = _round_up(NP + 2, 16)      # +2: shifted prologue read runs 1 row past NP
    P_buf = _round_up(BUF_LEAD + NP + 2, 16)
    return WP, NP, M, W_OFF, P_in, BUF_LEAD, P_buf


# -----------------------------------------------------------------------------
# Fused all-layers kernel
# -----------------------------------------------------------------------------
def _make_dncnn_kernel(H, W, depth, n_ch):
    WP, NP, M, W_OFF, _P_in, BUF_LEAD, P_buf = _geometry(H, W)
    IN0 = BUF_LEAD                 # buffer row of flat padded pixel 0
    ROW0 = BUF_LEAD + W_OFF        # buffer row of output row m = 0 (16-aligned)
    BOT0 = ROW0 + M - 1            # first row of the bottom halo/zero region
    C2 = 2 * n_ch

    def kernel(x_ref, w_ref, shift_ref, res_ref, o_ref, buf_a, buf_b, acc_ref):
        # x_ref     : (1, P_in, n_ch) bf16   flattened, spatially+channel padded image
        # w_ref     : (depth*6, 2*n_ch, n_ch) bf16  packed RHS (scale folded in)
        # shift_ref : (depth, 1, n_ch) f32   folded conv-bias / eval-BN shift
        # res_ref   : (1, M, OUT_LANES) f32  exact-f32 residual (y) slab
        # o_ref     : (1, M, OUT_LANES) f32  flat residual output
        # buf_a/b   : (P_buf, 2*n_ch) bf16   ping-pong activations, row f = [act(f)|act(f+1)]
        # acc_ref   : (M, n_ch) f32          matmul accumulator

        # ---- prologue: re-zero ONLY the halo rows (interior is fully overwritten
        #      by the masked per-layer stores; required every step for megacore) ----
        top = jnp.zeros((ROW0, C2), jnp.bfloat16)
        bot = jnp.zeros((P_buf - BOT0, C2), jnp.bfloat16)
        buf_a[0:ROW0, :] = top
        buf_b[0:ROW0, :] = top
        buf_a[BOT0:P_buf, :] = bot
        buf_b[BOT0:P_buf, :] = bot

        # ---- stage the (bf16, zero-padded) input once into buf_a in the
        #      doubled-lane layout; layer 0 then matches the steady state ----
        buf_a[IN0:IN0 + NP, 0:n_ch] = x_ref[0, 0:NP, :]
        buf_a[IN0:IN0 + NP, n_ch:C2] = x_ref[0, 1:NP + 1, :]

        def conv_layer(l, src, dst, relu):
            """One layer: 3x3 conv as 6 (M,128)x(128,64) MXU matmuls (bf16 in, f32 acc)
            + per-channel shift (+ReLU) (+junk-column masking + doubled store)."""
            # wrap-around junk-column mask (recomputed per layer: bounds live ranges)
            col = jax.lax.broadcasted_iota(jnp.int32, (H, WP, 1), 1)
            valid = (col < W).reshape(M, 1)
            for ky in range(3):
                base = IN0 + ky * WP
                pair = src[base:base + M, :]            # lanes [act(f)      | act(f+1)]
                last = src[base + 1:base + 1 + M, :]    # lanes [act(f+1)    | act(f+2)]
                c = (jnp.dot(pair, w_ref[l * 6 + 2 * ky],
                             preferred_element_type=jnp.float32)
                     + jnp.dot(last, w_ref[l * 6 + 2 * ky + 1],
                               preferred_element_type=jnp.float32))
                if ky == 0:
                    acc_ref[...] = c
                else:
                    acc_ref[...] += c
            out = acc_ref[...] + shift_ref[l]
            if relu:
                out = jnp.maximum(out, 0.0)
            if dst is None:
                return out, valid
            ob = jnp.where(valid, out, 0.0).astype(jnp.bfloat16)   # keep halos exactly 0
            dst[ROW0:ROW0 + M, 0:n_ch] = ob                        # act(f) copy
            dst[ROW0 - 1:ROW0 - 1 + M, n_ch:C2] = ob               # act(f+1) copy, one row up
            return None, None

        # ---- hidden layers 0 .. depth-2: conv + shift + ReLU, ping-pong a <-> b ----
        for l in range(depth - 1):
            src, dst = (buf_a, buf_b) if (l % 2 == 0) else (buf_b, buf_a)
            conv_layer(l, src, dst, relu=True)

        # ---- last layer: conv only, fused residual  out = y - noise ----
        src = buf_a if ((depth - 1) % 2 == 0) else buf_b
        noise, valid = conv_layer(depth - 1, src, None, relu=False)
        o_ref[0] = jnp.where(valid,
                             res_ref[0] - noise[:, 0:OUT_LANES],
                             0.0).astype(o_ref.dtype)

    return kernel


def _vmem_cap_bytes():
    """Per-generation VMEM ceiling with headroom for Mosaic internal scratch."""
    cap = None
    try:
        info = pltpu.get_tpu_info()
        for name in ("vmem_capacity_bytes", "vmem_bytes", "vmem_size_bytes"):
            v = getattr(info, name, None)
            if v:
                cap = int(v)
                break
    except Exception:
        cap = None
    if not cap:
        cap = 64 * 2 ** 20            # conservative: v7x physical VMEM per TensorCore
    return (cap * 13) // 16           # ~52 MiB on v7x, ~104 MiB on v5e/v6e


def dncnn_pallas(x_nchw, w_packed, shift, *, image_channels=1):
    """forward(x) = x - dncnn(x).  Input/output in NCHW like the PyTorch module."""
    N, C, H, W = x_nchw.shape
    depth = shift.shape[0]
    n_ch = shift.shape[-1]
    WP, NP, M, W_OFF, P_in, _BUF_LEAD, P_buf = _geometry(H, W)

    # NCHW -> NHWC, zero-pad spatially (conv padding=1).
    x_nhwc = jnp.transpose(x_nchw, (0, 2, 3, 1)).astype(jnp.float32)
    xpad = jnp.pad(x_nhwc, ((0, 0), (1, 1), (1, 1), (0, 0)))

    # Exact-f32 residual slab aligned with the kernel's flat output rows.
    res = xpad.reshape(N, NP, C)[:, W_OFF:W_OFF + M, :]
    res = jnp.pad(res, ((0, 0), (0, 0), (0, OUT_LANES - C)))

    # bf16, channel-padded (padded weight rows are zero), flattened, row-padded input.
    xb = jnp.pad(xpad, ((0, 0), (0, 0), (0, 0), (0, n_ch - C)))
    xb = xb.reshape(N, NP, n_ch)
    xb = jnp.pad(xb, ((0, 0), (0, P_in - NP), (0, 0))).astype(jnp.bfloat16)

    kernel = _make_dncnn_kernel(H, W, depth, n_ch)

    # Rough VMEM footprint (lane dims pad to 128, pipelined blocks x2).
    lane = 128
    est = (2 * P_in * lane * 2                        # input block (bf16)
           + 2 * (depth * 6) * 2 * n_ch * lane * 2    # packed weights (bf16)
           + 2 * depth * 8 * lane * 4                 # shift
           + 2 * M * lane * 4                         # residual block (f32)
           + 2 * M * lane * 4                         # output block (f32)
           + 2 * P_buf * lane * 2                     # ping-pong activation buffers
           + M * lane * 4)                            # f32 accumulator
    vmem_limit = int(min(_vmem_cap_bytes(), max(32 * 2 ** 20, 2 * est)))

    out_flat = pl.pallas_call(
        kernel,
        out_shape=jax.ShapeDtypeStruct((N, M, OUT_LANES), x_nchw.dtype),
        grid_spec=pltpu.PrefetchScalarGridSpec(
            num_scalar_prefetch=0,
            grid=(N,),
            in_specs=[
                pl.BlockSpec((1, P_in, n_ch), lambda b: (b, 0, 0)),
                pl.BlockSpec((depth * 6, 2 * n_ch, n_ch), lambda b: (0, 0, 0)),
                pl.BlockSpec((depth, 1, n_ch), lambda b: (0, 0, 0)),
                pl.BlockSpec((1, M, OUT_LANES), lambda b: (b, 0, 0)),
            ],
            out_specs=pl.BlockSpec((1, M, OUT_LANES), lambda b: (b, 0, 0)),
            scratch_shapes=[
                pltpu.VMEM((P_buf, 2 * n_ch), jnp.bfloat16),
                pltpu.VMEM((P_buf, 2 * n_ch), jnp.bfloat16),
                pltpu.VMEM((M, n_ch), jnp.float32),
            ],
        ),
        compiler_params=pltpu.CompilerParams(
            dimension_semantics=("parallel",),
            vmem_limit_bytes=vmem_limit,
        ),
    )(xb, w_packed, shift, res)

    # (N, M, 8) -> (N, H, W+2, 8) -> drop the masked junk columns and the channel pad.
    out = out_flat.reshape(N, H, WP, OUT_LANES)[:, :, :W, :image_channels]
    return jnp.transpose(out, (0, 3, 1, 2))           # NHWC -> NCHW


# -----------------------------------------------------------------------------
# Deterministic parameter construction (mirrors DnCNN.__init__/_initialize_weights)
# -----------------------------------------------------------------------------
def _orthogonal(key, cout, cin, kh, kw):
    """Deterministic orthogonal init (same semantics as torch.nn.init.orthogonal_)."""
    rows, cols = cout, cin * kh * kw
    a = np.asarray(jax.random.normal(key, (rows, cols), dtype=jnp.float32), np.float64)
    if rows < cols:
        a = a.T
    q, r = np.linalg.qr(a)
    q = q * np.sign(np.diag(r))
    if rows < cols:
        q = q.T
    w = q.reshape(cout, cin, kh, kw).astype(np.float32)   # PyTorch (Cout,Cin,KH,KW)
    return np.transpose(w, (2, 3, 1, 0))                  # -> (KH, KW, Cin, Cout)


def build_dncnn_params(key, depth=17, n_channels=64, image_channels=1, eps=1e-4):
    keys = jax.random.split(key, depth)
    n = n_channels
    w_all = np.zeros((depth, 3, 3, n, n), np.float32)     # (l, ky, kx, cin, cout)
    scale = np.ones((depth, n), np.float32)
    shift = np.zeros((depth, n), np.float32)

    # Layer 0: Conv(image_channels -> n, bias=True, bias init 0) + ReLU.
    w_all[0, :, :, :image_channels, :] = _orthogonal(keys[0], n, image_channels, 3, 3)
    # Middle layers: Conv(n->n, bias=False) + BN(eps, gamma=1, beta=0, mean=0, var=1) + ReLU.
    bn_scale = 1.0 / np.sqrt(1.0 + eps)
    for l in range(1, depth - 1):
        w_all[l] = _orthogonal(keys[l], n, n, 3, 3)
        scale[l, :] = bn_scale
    # Last layer: Conv(n -> image_channels, bias=False), no activation.
    w_all[depth - 1, :, :, :, :image_channels] = _orthogonal(
        keys[depth - 1], image_channels, n, 3, 3)

    # Fold the (identity / eval-mode BN) per-channel scale into the weights (exact).
    w_folded = w_all * scale[:, None, None, None, :]

    # Pack kx-tap pairs into K=128 RHS for the lane-doubled activation layout:
    #   j=0: rows 0:64 = W[ky,0] (LHS lanes 0:64 = act(f)),  rows 64:128 = W[ky,1]
    #   j=1: rows 0:64 = 0,                                  rows 64:128 = W[ky,2]
    #        (its LHS is loaded at row offset +1, so lanes 64:128 = act(f+2))
    packed = np.zeros((depth, 3, 2, 2 * n, n), np.float32)
    packed[:, :, 0, 0:n, :] = w_folded[:, :, 0]
    packed[:, :, 0, n:2 * n, :] = w_folded[:, :, 1]
    packed[:, :, 1, n:2 * n, :] = w_folded[:, :, 2]
    w_packed = jnp.asarray(packed.reshape(depth * 6, 2 * n, n), dtype=jnp.bfloat16)

    return (w_packed,
            jnp.asarray(shift.reshape(depth, 1, n)),   # kernel shift
            jnp.asarray(w_folded),                     # f32 spatial weights (reference)
            jnp.asarray(shift))                        # f32 shift (reference)


# -----------------------------------------------------------------------------
# Pure-JAX reference (for self-checks); match_bf16 mimics the kernel's bf16
# weight / inter-layer-activation storage (with f32 accumulation).
# -----------------------------------------------------------------------------
def dncnn_reference(x_nchw, w_folded, shift, image_channels=1, match_bf16=False):
    f32 = jnp.float32
    q = (lambda t: t.astype(jnp.bfloat16).astype(f32)) if match_bf16 else (lambda t: t.astype(f32))
    depth = w_folded.shape[0]
    n_ch = w_folded.shape[-2]
    w = q(jnp.asarray(w_folded))
    x = jnp.transpose(x_nchw, (0, 2, 3, 1)).astype(f32)
    a = jnp.pad(x, ((0, 0), (0, 0), (0, 0), (0, n_ch - x.shape[-1])))
    for l in range(depth):
        a = q(a)
        a = jax.lax.conv_general_dilated(
            a, w[l], window_strides=(1, 1), padding="SAME",
            dimension_numbers=("NHWC", "HWIO", "NHWC"))
        a = a + shift[l]
        if l < depth - 1:
            a = jnp.maximum(a, 0.0)
    noise = jnp.transpose(a[..., :image_channels], (0, 3, 1, 2))
    return x_nchw.astype(f32) - noise


# -----------------------------------------------------------------------------
if __name__ == "__main__":
    root = jax.random.PRNGKey(0)
    k_small, k_params, k_x = jax.random.split(root, 3)
    IMG_CHANNELS = 1

    # --- structural self-check at depth=3 (activations are still O(0.1), so any
    #     tap-packing / geometry bug is clearly visible above bf16 rounding) ---
    wp3, sh3, wf3, s3 = build_dncnn_params(k_small, depth=3, n_channels=N_CH,
                                           image_channels=IMG_CHANNELS, eps=BN_EPS)
    x3 = jax.random.normal(jax.random.fold_in(k_small, 7),
                           (1, IMG_CHANNELS, 16, 16), dtype=jnp.float32)
    y3 = jax.jit(lambda a: dncnn_pallas(a, wp3, sh3, image_channels=IMG_CHANNELS))(x3)
    jax.block_until_ready(y3)
    y3_ref = dncnn_reference(x3, wf3, s3, IMG_CHANNELS, match_bf16=True)
    err3 = float(jnp.max(jnp.abs(y3 - y3_ref)))
    assert err3 < 1e-2, f"depth-3 structural check failed (max |err| = {err3})"

    # --- full DnCNN (depth=17, n_channels=64, image_channels=1) ---
    w_packed, shift_k, w_f32, shift_f32 = build_dncnn_params(
        k_params, depth=DEPTH, n_channels=N_CH,
        image_channels=IMG_CHANNELS, eps=BN_EPS)

    # Small deterministic input: batch=2, channels=1, 16x16 spatial (NCHW).
    x = jax.random.normal(k_x, (2, IMG_CHANNELS, 16, 16), dtype=jnp.float32)

    fwd = jax.jit(lambda a: dncnn_pallas(a, w_packed, shift_k,
                                         image_channels=IMG_CHANNELS))
    y = fwd(x)
    jax.block_until_ready(y)

    assert y.shape == x.shape and y.dtype == x.dtype
    assert bool(jnp.all(jnp.isfinite(y)))

    y_ref_m = dncnn_reference(x, w_f32, shift_f32, IMG_CHANNELS, match_bf16=True)
    err_m = float(jnp.max(jnp.abs(y - y_ref_m)))
    assert err_m < 1e-2, f"depth-17 structural check failed (max |err| = {err_m})"

    y_ref = dncnn_reference(x, w_f32, shift_f32, IMG_CHANNELS, match_bf16=False)
    err_f = float(jnp.max(jnp.abs(y - y_ref)))
    assert err_f < 1e-1, f"depth-17 f32-reference drift too large (max |err| = {err_f})"

    print("KERNEL_OK")
</pallas_src>

<mosaic_0001>
module attributes {stable_mosaic.version = 11 : i64} {
  func.func @kernel(%arg0: i32, %arg1: memref<1x336x64xbf16, #tpu.memory_space<vmem>>, %arg2: memref<18x128x64xbf16, #tpu.memory_space<vmem>>, %arg3: memref<3x1x64xf32, #tpu.memory_space<vmem>>, %arg4: memref<1x288x8xf32, #tpu.memory_space<vmem>>, %arg5: memref<1x288x8xf32, #tpu.memory_space<vmem>>, %arg6: memref<352x128xbf16, #tpu.memory_space<vmem>>, %arg7: memref<352x128xbf16, #tpu.memory_space<vmem>>, %arg8: memref<288x64xf32, #tpu.memory_space<vmem>>) attributes {dimension_semantics = [#tpu.dimension_semantics<parallel>], iteration_bounds = array<i64: 1>, scalar_prefetch = 0 : i64, scratch_operands = 3 : i64, tpu.core_type = #tpu.core_type<tc>, window_params = [{transform_indices = @transform_0, window_bounds = array<i64: 1, 336, 64>}, {pipeline_mode = #tpu.pipeline_mode<synchronous>, transform_indices = @transform_1, window_bounds = array<i64: 18, 128, 64>}, {pipeline_mode = #tpu.pipeline_mode<synchronous>, transform_indices = @transform_2, window_bounds = array<i64: 3, 1, 64>}, {transform_indices = @transform_3, window_bounds = array<i64: 1, 288, 8>}, {transform_indices = @transform_4, window_bounds = array<i64: 1, 288, 8>}]} {
    %cst = arith.constant 0.000000e+00 : bf16
    %0 = vector.broadcast %cst : bf16 to vector<32x128xbf16>
    %cst_0 = arith.constant 0.000000e+00 : bf16
    %1 = vector.broadcast %cst_0 : bf16 to vector<33x128xbf16>
    %c0 = arith.constant 0 : index
    %c0_1 = arith.constant 0 : index
    %2 = vector.load %arg6[%c0, %c0_1] : memref<352x128xbf16, #tpu.memory_space<vmem>>, vector<32x128xbf16>
    tpu.vector_store %arg6[%c0, %c0_1], %0 {strides = array<i32>} : memref<352x128xbf16, #tpu.memory_space<vmem>>, vector<32x128xbf16>,
    %c0_2 = arith.constant 0 : index
    %c0_3 = arith.constant 0 : index
    %3 = vector.load %arg7[%c0_2, %c0_3] : memref<352x128xbf16, #tpu.memory_space<vmem>>, vector<32x128xbf16>
    tpu.vector_store %arg7[%c0_2, %c0_3], %0 {strides = array<i32>} : memref<352x128xbf16, #tpu.memory_space<vmem>>, vector<32x128xbf16>,
    %c319 = arith.constant 319 : index
    %c0_4 = arith.constant 0 : index
    %4 = vector.load %arg6[%c319, %c0_4] : memref<352x128xbf16, #tpu.memory_space<vmem>>, vector<33x128xbf16>
    tpu.vector_store %arg6[%c319, %c0_4], %1 {strides = array<i32>} : memref<352x128xbf16, #tpu.memory_space<vmem>>, vector<33x128xbf16>,
    %c319_5 = arith.constant 319 : index
    %c0_6 = arith.constant 0 : index
    %5 = vector.load %arg7[%c319_5, %c0_6] : memref<352x128xbf16, #tpu.memory_space<vmem>>, vector<33x128xbf16>
    tpu.vector_store %arg7[%c319_5, %c0_6], %1 {strides = array<i32>} : memref<352x128xbf16, #tpu.memory_space<vmem>>, vector<33x128xbf16>,
    %c0_7 = arith.constant 0 : index
    %c0_8 = arith.constant 0 : index
    %c0_9 = arith.constant 0 : index
    %6 = vector.load %arg1[%c0_7, %c0_8, %c0_9] : memref<1x336x64xbf16, #tpu.memory_space<vmem>>, vector<1x324x64xbf16>
    %7 = vector.shape_cast %6 : vector<1x324x64xbf16> to vector<324x64xbf16>
    %c13 = arith.constant 13 : index
    %c0_10 = arith.constant 0 : index
    %8 = vector.load %arg6[%c13, %c0_10] : memref<352x128xbf16, #tpu.memory_space<vmem>>, vector<324x64xbf16>
    tpu.vector_store %arg6[%c13, %c0_10], %7 {strides = array<i32>} : memref<352x128xbf16, #tpu.memory_space<vmem>>, vector<324x64xbf16>,
    %c0_11 = arith.constant 0 : index
    %c1 = arith.constant 1 : index
    %c0_12 = arith.constant 0 : index
    %9 = vector.load %arg1[%c0_11, %c1, %c0_12] : memref<1x336x64xbf16, #tpu.memory_space<vmem>>, vector<1x324x64xbf16>
    %10 = vector.shape_cast %9 : vector<1x324x64xbf16> to vector<324x64xbf16>
    %c13_13 = arith.constant 13 : index
    %c64 = arith.constant 64 : index
    %11 = vector.load %arg6[%c13_13, %c64] : memref<352x128xbf16, #tpu.memory_space<vmem>>, vector<324x64xbf16>
    tpu.vector_store %arg6[%c13_13, %c64], %10 {strides = array<i32>} : memref<352x128xbf16, #tpu.memory_space<vmem>>, vector<324x64xbf16>,
    %12 = tpu.iota {dimensions = array<i32: 1>} : vector<16x18x1xi32>
    %c16_i32 = arith.constant 16 : i32
    %13 = vector.broadcast %c16_i32 : i32 to vector<16x18x1xi32>
    %14 = arith.cmpi slt, %12, %13 : vector<16x18x1xi32>
    %15 = vector.shape_cast %14 : vector<16x18x1xi1> to vector<288x1xi1>
    %c13_14 = arith.constant 13 : index
    %c0_15 = arith.constant 0 : index
    %16 = vector.load %arg6[%c13_14, %c0_15] : memref<352x128xbf16, #tpu.memory_space<vmem>>, vector<288x128xbf16>
    %c14 = arith.constant 14 : index
    %c0_16 = arith.constant 0 : index
    %17 = vector.load %arg6[%c14, %c0_16] : memref<352x128xbf16, #tpu.memory_space<vmem>>, vector<288x128xbf16>
    %c0_17 = arith.constant 0 : index
    %c0_18 = arith.constant 0 : index
    %c0_19 = arith.constant 0 : index
    %18 = vector.load %arg2[%c0_17, %c0_18, %c0_19] : memref<18x128x64xbf16, #tpu.memory_space<vmem>>, vector<1x128x64xbf16>
    %19 = vector.shape_cast %18 : vector<1x128x64xbf16> to vector<128x64xbf16>
    %cst_20 = arith.constant dense<0.000000e+00> : vector<288x64xf32>
    %20 = tpu.matmul %16, %19, %cst_20 {dimension_numbers = #tpu.dot_dimension_numbers<[1], [0], [0], [1], [0, 0, 1, 1], [], []>} : vector<288x128xbf16>, vector<128x64xbf16>, vector<288x64xf32> -> vector<288x64xf32>
    %c1_21 = arith.constant 1 : index
    %c0_22 = arith.constant 0 : index
    %c0_23 = arith.constant 0 : index
    %21 = vector.load %arg2[%c1_21, %c0_22, %c0_23] : memref<18x128x64xbf16, #tpu.memory_space<vmem>>, vector<1x128x64xbf16>
    %22 = vector.shape_cast %21 : vector<1x128x64xbf16> to vector<128x64xbf16>
    %cst_24 = arith.constant dense<0.000000e+00> : vector<288x64xf32>
    %23 = tpu.matmul %17, %22, %cst_24 {dimension_numbers = #tpu.dot_dimension_numbers<[1], [0], [0], [1], [0, 0, 1, 1], [], []>} : vector<288x128xbf16>, vector<128x64xbf16>, vector<288x64xf32> -> vector<288x64xf32>
    %24 = arith.addf %20, %23 : vector<288x64xf32>
    %c0_25 = arith.constant 0 : index
    %c0_26 = arith.constant 0 : index
    %25 = vector.load %arg8[%c0_25, %c0_26] : memref<288x64xf32, #tpu.memory_space<vmem>>, vector<288x64xf32>
    tpu.vector_store %arg8[%c0_25, %c0_26], %24 {strides = array<i32>} : memref<288x64xf32, #tpu.memory_space<vmem>>, vector<288x64xf32>,
    %c31 = arith.constant 31 : index
    %c0_27 = arith.constant 0 : index
    %26 = vector.load %arg6[%c31, %c0_27] : memref<352x128xbf16, #tpu.memory_space<vmem>>, vector<288x128xbf16>
    %c32 = arith.constant 32 : index
    %c0_28 = arith.constant 0 : index
    %27 = vector.load %arg6[%c32, %c0_28] : memref<352x128xbf16, #tpu.memory_space<vmem>>, vector<288x128xbf16>
    %c2 = arith.constant 2 : index
    %c0_29 = arith.constant 0 : index
    %c0_30 = arith.constant 0 : index
    %28 = vector.load %arg2[%c2, %c0_29, %c0_30] : memref<18x128x64xbf16, #tpu.memory_space<vmem>>, vector<1x128x64xbf16>
    %29 = vector.shape_cast %28 : vector<1x128x64xbf16> to vector<128x64xbf16>
    %cst_31 = arith.constant dense<0.000000e+00> : vector<288x64xf32>
    %30 = tpu.matmul %26, %29, %cst_31 {dimension_numbers = #tpu.dot_dimension_numbers<[1], [0], [0], [1], [0, 0, 1, 1], [], []>} : vector<288x128xbf16>, vector<128x64xbf16>, vector<288x64xf32> -> vector<288x64xf32>
    %c3 = arith.constant 3 : index
    %c0_32 = arith.constant 0 : index
    %c0_33 = arith.constant 0 : index
    %31 = vector.load %arg2[%c3, %c0_32, %c0_33] : memref<18x128x64xbf16, #tpu.memory_space<vmem>>, vector<1x128x64xbf16>
    %32 = vector.shape_cast %31 : vector<1x128x64xbf16> to vector<128x64xbf16>
    %cst_34 = arith.constant dense<0.000000e+00> : vector<288x64xf32>
    %33 = tpu.matmul %27, %32, %cst_34 {dimension_numbers = #tpu.dot_dimension_numbers<[1], [0], [0], [1], [0, 0, 1, 1], [], []>} : vector<288x128xbf16>, vector<128x64xbf16>, vector<288x64xf32> -> vector<288x64xf32>
    %34 = arith.addf %30, %33 : vector<288x64xf32>
    %c0_35 = arith.constant 0 : index
    %c0_36 = arith.constant 0 : index
    %35 = vector.load %arg8[%c0_35, %c0_36] : memref<288x64xf32, #tpu.memory_space<vmem>>, vector<288x64xf32>
    %36 = arith.addf %35, %34 : vector<288x64xf32>
    %c0_37 = arith.constant 0 : index
    %c0_38 = arith.constant 0 : index
    %37 = vector.load %arg8[%c0_37, %c0_38] : memref<288x64xf32, #tpu.memory_space<vmem>>, vector<288x64xf32>
    tpu.vector_store %arg8[%c0_37, %c0_38], %36 {strides = array<i32>} : memref<288x64xf32, #tpu.memory_space<vmem>>, vector<288x64xf32>,
    %c49 = arith.constant 49 : index
    %c0_39 = arith.constant 0 : index
    %38 = vector.load %arg6[%c49, %c0_39] : memref<352x128xbf16, #tpu.memory_space<vmem>>, vector<288x128xbf16>
    %c50 = arith.constant 50 : index
    %c0_40 = arith.constant 0 : index
    %39 = vector.load %arg6[%c50, %c0_40] : memref<352x128xbf16, #tpu.memory_space<vmem>>, vector<288x128xbf16>
    %c4 = arith.constant 4 : index
    %c0_41 = arith.constant 0 : index
    %c0_42 = arith.constant 0 : index
    %40 = vector.load %arg2[%c4, %c0_41, %c0_42] : memref<18x128x64xbf16, #tpu.memory_space<vmem>>, vector<1x128x64xbf16>
    %41 = vector.shape_cast %40 : vector<1x128x64xbf16> to vector<128x64xbf16>
    %cst_43 = arith.constant dense<0.000000e+00> : vector<288x64xf32>
    %42 = tpu.matmul %38, %41, %cst_43 {dimension_numbers = #tpu.dot_dimension_numbers<[1], [0], [0], [1], [0, 0, 1, 1], [], []>} : vector<288x128xbf16>, vector<128x64xbf16>, vector<288x64xf32> -> vector<288x64xf32>
    %c5 = arith.constant 5 : index
    %c0_44 = arith.constant 0 : index
    %c0_45 = arith.constant 0 : index
    %43 = vector.load %arg2[%c5, %c0_44, %c0_45] : memref<18x128x64xbf16, #tpu.memory_space<vmem>>, vector<1x128x64xbf16>
    %44 = vector.shape_cast %43 : vector<1x128x64xbf16> to vector<128x64xbf16>
    %cst_46 = arith.constant dense<0.000000e+00> : vector<288x64xf32>
    %45 = tpu.matmul %39, %44, %cst_46 {dimension_numbers = #tpu.dot_dimension_numbers<[1], [0], [0], [1], [0, 0, 1, 1], [], []>} : vector<288x128xbf16>, vector<128x64xbf16>, vector<288x64xf32> -> vector<288x64xf32>
    %46 = arith.addf %42, %45 : vector<288x64xf32>
    %c0_47 = arith.constant 0 : index
    %c0_48 = arith.constant 0 : index
    %47 = vector.load %arg8[%c0_47, %c0_48] : memref<288x64xf32, #tpu.memory_space<vmem>>, vector<288x64xf32>
    %48 = arith.addf %47, %46 : vector<288x64xf32>
    %c0_49 = arith.constant 0 : index
    %c0_50 = arith.constant 0 : index
    %49 = vector.load %arg8[%c0_49, %c0_50] : memref<288x64xf32, #tpu.memory_space<vmem>>, vector<288x64xf32>
    tpu.vector_store %arg8[%c0_49, %c0_50], %48 {strides = array<i32>} : memref<288x64xf32, #tpu.memory_space<vmem>>, vector<288x64xf32>,
    %c0_51 = arith.constant 0 : index
    %c0_52 = arith.constant 0 : index
    %50 = vector.load %arg8[%c0_51, %c0_52] : memref<288x64xf32, #tpu.memory_space<vmem>>, vector<288x64xf32>
    %c0_53 = arith.constant 0 : index
    %c0_54 = arith.constant 0 : index
    %c0_55 = arith.constant 0 : index
    %51 = vector.load %arg3[%c0_53, %c0_54, %c0_55] : memref<3x1x64xf32, #tpu.memory_space<vmem>>, vector<1x1x64xf32>
    %52 = vector.shape_cast %51 : vector<1x1x64xf32> to vector<1x64xf32>
    %53 = vector.broadcast %52 : vector<1x64xf32> to vector<288x64xf32>
    %54 = arith.addf %50, %53 : vector<288x64xf32>
    %cst_56 = arith.constant 0.000000e+00 : f32
    %55 = vector.broadcast %cst_56 : f32 to vector<288x64xf32>
    %56 = arith.maximumf %54, %55 : vector<288x64xf32>
    %cst_57 = arith.constant 0.000000e+00 : f32
    %57 = vector.shape_cast %15 : vector<288x1xi1> to vector<288x1xi1>
    %58 = vector.broadcast %57 : vector<288x1xi1> to vector<288x64xi1>
    %59 = vector.broadcast %cst_57 : f32 to vector<288x64xf32>
    %60 = arith.select %58, %56, %59 : vector<288x64xi1>, vector<288x64xf32>
    %61 = arith.truncf %60 : vector<288x64xf32> to vector<288x64xbf16>
    %c32_58 = arith.constant 32 : index
    %c0_59 = arith.constant 0 : index
    %62 = vector.load %arg7[%c32_58, %c0_59] : memref<352x128xbf16, #tpu.memory_space<vmem>>, vector<288x64xbf16>
    tpu.vector_store %arg7[%c32_58, %c0_59], %61 {strides = array<i32>} : memref<352x128xbf16, #tpu.memory_space<vmem>>, vector<288x64xbf16>,
    %c31_60 = arith.constant 31 : index
    %c64_61 = arith.constant 64 : index
    %63 = vector.load %arg7[%c31_60, %c64_61] : memref<352x128xbf16, #tpu.memory_space<vmem>>, vector<288x64xbf16>
    tpu.vector_store %arg7[%c31_60, %c64_61], %61 {strides = array<i32>} : memref<352x128xbf16, #tpu.memory_space<vmem>>, vector<288x64xbf16>,
    %64 = tpu.iota {dimensions = array<i32: 1>} : vector<16x18x1xi32>
    %c16_i32_62 = arith.constant 16 : i32
    %65 = vector.broadcast %c16_i32_62 : i32 to vector<16x18x1xi32>
    %66 = arith.cmpi slt, %64, %65 : vector<16x18x1xi32>
    %67 = vector.shape_cast %66 : vector<16x18x1xi1> to vector<288x1xi1>
    %c13_63 = arith.constant 13 : index
    %c0_64 = arith.constant 0 : index
    %68 = vector.load %arg7[%c13_63, %c0_64] : memref<352x128xbf16, #tpu.memory_space<vmem>>, vector<288x128xbf16>
    %c14_65 = arith.constant 14 : index
    %c0_66 = arith.constant 0 : index
    %69 = vector.load %arg7[%c14_65, %c0_66] : memref<352x128xbf16, #tpu.memory_space<vmem>>, vector<288x128xbf16>
    %c6 = arith.constant 6 : index
    %c0_67 = arith.constant 0 : index
    %c0_68 = arith.constant 0 : index
    %70 = vector.load %arg2[%c6, %c0_67, %c0_68] : memref<18x128x64xbf16, #tpu.memory_space<vmem>>, vector<1x128x64xbf16>
    %71 = vector.shape_cast %70 : vector<1x128x64xbf16> to vector<128x64xbf16>
    %cst_69 = arith.constant dense<0.000000e+00> : vector<288x64xf32>
    %72 = tpu.matmul %68, %71, %cst_69 {dimension_numbers = #tpu.dot_dimension_numbers<[1], [0], [0], [1], [0, 0, 1, 1], [], []>} : vector<288x128xbf16>, vector<128x64xbf16>, vector<288x64xf32> -> vector<288x64xf32>
    %c7 = arith.constant 7 : index
    %c0_70 = arith.constant 0 : index
    %c0_71 = arith.constant 0 : index
    %73 = vector.load %arg2[%c7, %c0_70, %c0_71] : memref<18x128x64xbf16, #tpu.memory_space<vmem>>, vector<1x128x64xbf16>
    %74 = vector.shape_cast %73 : vector<1x128x64xbf16> to vector<128x64xbf16>
    %cst_72 = arith.constant dense<0.000000e+00> : vector<288x64xf32>
    %75 = tpu.matmul %69, %74, %cst_72 {dimension_numbers = #tpu.dot_dimension_numbers<[1], [0], [0], [1], [0, 0, 1, 1], [], []>} : vector<288x128xbf16>, vector<128x64xbf16>, vector<288x64xf32> -> vector<288x64xf32>
    %76 = arith.addf %72, %75 : vector<288x64xf32>
    %c0_73 = arith.constant 0 : index
    %c0_74 = arith.constant 0 : index
    %77 = vector.load %arg8[%c0_73, %c0_74] : memref<288x64xf32, #tpu.memory_space<vmem>>, vector<288x64xf32>
    tpu.vector_store %arg8[%c0_73, %c0_74], %76 {strides = array<i32>} : memref<288x64xf32, #tpu.memory_space<vmem>>, vector<288x64xf32>,
    %c31_75 = arith.constant 31 : index
    %c0_76 = arith.constant 0 : index
    %78 = vector.load %arg7[%c31_75, %c0_76] : memref<352x128xbf16, #tpu.memory_space<vmem>>, vector<288x128xbf16>
    %c32_77 = arith.constant 32 : index
    %c0_78 = arith.constant 0 : index
    %79 = vector.load %arg7[%c32_77, %c0_78] : memref<352x128xbf16, #tpu.memory_space<vmem>>, vector<288x128xbf16>
    %c8 = arith.constant 8 : index
    %c0_79 = arith.constant 0 : index
    %c0_80 = arith.constant 0 : index
    %80 = vector.load %arg2[%c8, %c0_79, %c0_80] : memref<18x128x64xbf16, #tpu.memory_space<vmem>>, vector<1x128x64xbf16>
    %81 = vector.shape_cast %80 : vector<1x128x64xbf16> to vector<128x64xbf16>
    %cst_81 = arith.constant dense<0.000000e+00> : vector<288x64xf32>
    %82 = tpu.matmul %78, %81, %cst_81 {dimension_numbers = #tpu.dot_dimension_numbers<[1], [0], [0], [1], [0, 0, 1, 1], [], []>} : vector<288x128xbf16>, vector<128x64xbf16>, vector<288x64xf32> -> vector<288x64xf32>
    %c9 = arith.constant 9 : index
    %c0_82 = arith.constant 0 : index
    %c0_83 = arith.constant 0 : index
    %83 = vector.load %arg2[%c9, %c0_82, %c0_83] : memref<18x128x64xbf16, #tpu.memory_space<vmem>>, vector<1x128x64xbf16>
    %84 = vector.shape_cast %83 : vector<1x128x64xbf16> to vector<128x64xbf16>
    %cst_84 = arith.constant dense<0.000000e+00> : vector<288x64xf32>
    %85 = tpu.matmul %79, %84, %cst_84 {dimension_numbers = #tpu.dot_dimension_numbers<[1], [0], [0], [1], [0, 0, 1, 1], [], []>} : vector<288x128xbf16>, vector<128x64xbf16>, vector<288x64xf32> -> vector<288x64xf32>
    %86 = arith.addf %82, %85 : vector<288x64xf32>
    %c0_85 = arith.constant 0 : index
    %c0_86 = arith.constant 0 : index
    %87 = vector.load %arg8[%c0_85, %c0_86] : memref<288x64xf32, #tpu.memory_space<vmem>>, vector<288x64xf32>
    %88 = arith.addf %87, %86 : vector<288x64xf32>
    %c0_87 = arith.constant 0 : index
    %c0_88 = arith.constant 0 : index
    %89 = vector.load %arg8[%c0_87, %c0_88] : memref<288x64xf32, #tpu.memory_space<vmem>>, vector<288x64xf32>
    tpu.vector_store %arg8[%c0_87, %c0_88], %88 {strides = array<i32>} : memref<288x64xf32, #tpu.memory_space<vmem>>, vector<288x64xf32>,
    %c49_89 = arith.constant 49 : index
    %c0_90 = arith.constant 0 : index
    %90 = vector.load %arg7[%c49_89, %c0_90] : memref<352x128xbf16, #tpu.memory_space<vmem>>, vector<288x128xbf16>
    %c50_91 = arith.constant 50 : index
    %c0_92 = arith.constant 0 : index
    %91 = vector.load %arg7[%c50_91, %c0_92] : memref<352x128xbf16, #tpu.memory_space<vmem>>, vector<288x128xbf16>
    %c10 = arith.constant 10 : index
    %c0_93 = arith.constant 0 : index
    %c0_94 = arith.constant 0 : index
    %92 = vector.load %arg2[%c10, %c0_93, %c0_94] : memref<18x128x64xbf16, #tpu.memory_space<vmem>>, vector<1x128x64xbf16>
    %93 = vector.shape_cast %92 : vector<1x128x64xbf16> to vector<128x64xbf16>
    %cst_95 = arith.constant dense<0.000000e+00> : vector<288x64xf32>
    %94 = tpu.matmul %90, %93, %cst_95 {dimension_numbers = #tpu.dot_dimension_numbers<[1], [0], [0], [1], [0, 0, 1, 1], [], []>} : vector<288x128xbf16>, vector<128x64xbf16>, vector<288x64xf32> -> vector<288x64xf32>
    %c11 = arith.constant 11 : index
    %c0_96 = arith.constant 0 : index
    %c0_97 = arith.constant 0 : index
    %95 = vector.load %arg2[%c11, %c0_96, %c0_97] : memref<18x128x64xbf16, #tpu.memory_space<vmem>>, vector<1x128x64xbf16>
    %96 = vector.shape_cast %95 : vector<1x128x64xbf16> to vector<128x64xbf16>
    %cst_98 = arith.constant dense<0.000000e+00> : vector<288x64xf32>
    %97 = tpu.matmul %91, %96, %cst_98 {dimension_numbers = #tpu.dot_dimension_numbers<[1], [0], [0], [1], [0, 0, 1, 1], [], []>} : vector<288x128xbf16>, vector<128x64xbf16>, vector<288x64xf32> -> vector<288x64xf32>
    %98 = arith.addf %94, %97 : vector<288x64xf32>
    %c0_99 = arith.constant 0 : index
    %c0_100 = arith.constant 0 : index
    %99 = vector.load %arg8[%c0_99, %c0_100] : memref<288x64xf32, #tpu.memory_space<vmem>>, vector<288x64xf32>
    %100 = arith.addf %99, %98 : vector<288x64xf32>
    %c0_101 = arith.constant 0 : index
    %c0_102 = arith.constant 0 : index
    %101 = vector.load %arg8[%c0_101, %c0_102] : memref<288x64xf32, #tpu.memory_space<vmem>>, vector<288x64xf32>
    tpu.vector_store %arg8[%c0_101, %c0_102], %100 {strides = array<i32>} : memref<288x64xf32, #tpu.memory_space<vmem>>, vector<288x64xf32>,
    %c0_103 = arith.constant 0 : index
    %c0_104 = arith.constant 0 : index
    %102 = vector.load %arg8[%c0_103, %c0_104] : memref<288x64xf32, #tpu.memory_space<vmem>>, vector<288x64xf32>
    %c1_105 = arith.constant 1 : index
    %c0_106 = arith.constant 0 : index
    %c0_107 = arith.constant 0 : index
    %103 = vector.load %arg3[%c1_105, %c0_106, %c0_107] : memref<3x1x64xf32, #tpu.memory_space<vmem>>, vector<1x1x64xf32>
    %104 = vector.shape_cast %103 : vector<1x1x64xf32> to vector<1x64xf32>
    %105 = vector.broadcast %104 : vector<1x64xf32> to vector<288x64xf32>
    %106 = arith.addf %102, %105 : vector<288x64xf32>
    %cst_108 = arith.constant 0.000000e+00 : f32
    %107 = vector.broadcast %cst_108 : f32 to vector<288x64xf32>
    %108 = arith.maximumf %106, %107 : vector<288x64xf32>
    %cst_109 = arith.constant 0.000000e+00 : f32
    %109 = vector.shape_cast %67 : vector<288x1xi1> to vector<288x1xi1>
    %110 = vector.broadcast %109 : vector<288x1xi1> to vector<288x64xi1>
    %111 = vector.broadcast %cst_109 : f32 to vector<288x64xf32>
    %112 = arith.select %110, %108, %111 : vector<288x64xi1>, vector<288x64xf32>
    %113 = arith.truncf %112 : vector<288x64xf32> to vector<288x64xbf16>
    %c32_110 = arith.constant 32 : index
    %c0_111 = arith.constant 0 : index
    %114 = vector.load %arg6[%c32_110, %c0_111] : memref<352x128xbf16, #tpu.memory_space<vmem>>, vector<288x64xbf16>
    tpu.vector_store %arg6[%c32_110, %c0_111], %113 {strides = array<i32>} : memref<352x128xbf16, #tpu.memory_space<vmem>>, vector<288x64xbf16>,
    %c31_112 = arith.constant 31 : index
    %c64_113 = arith.constant 64 : index
    %115 = vector.load %arg6[%c31_112, %c64_113] : memref<352x128xbf16, #tpu.memory_space<vmem>>, vector<288x64xbf16>
    tpu.vector_store %arg6[%c31_112, %c64_113], %113 {strides = array<i32>} : memref<352x128xbf16, #tpu.memory_space<vmem>>, vector<288x64xbf16>,
    %116 = tpu.iota {dimensions = array<i32: 1>} : vector<16x18x1xi32>
    %c16_i32_114 = arith.constant 16 : i32
    %117 = vector.broadcast %c16_i32_114 : i32 to vector<16x18x1xi32>
    %118 = arith.cmpi slt, %116, %117 : vector<16x18x1xi32>
    %119 = vector.shape_cast %118 : vector<16x18x1xi1> to vector<288x1xi1>
    %c13_115 = arith.constant 13 : index
    %c0_116 = arith.constant 0 : index
    %120 = vector.load %arg6[%c13_115, %c0_116] : memref<352x128xbf16, #tpu.memory_space<vmem>>, vector<288x128xbf16>
    %c14_117 = arith.constant 14 : index
    %c0_118 = arith.constant 0 : index
    %121 = vector.load %arg6[%c14_117, %c0_118] : memref<352x128xbf16, #tpu.memory_space<vmem>>, vector<288x128xbf16>
    %c12 = arith.constant 12 : index
    %c0_119 = arith.constant 0 : index
    %c0_120 = arith.constant 0 : index
    %122 = vector.load %arg2[%c12, %c0_119, %c0_120] : memref<18x128x64xbf16, #tpu.memory_space<vmem>>, vector<1x128x64xbf16>
    %123 = vector.shape_cast %122 : vector<1x128x64xbf16> to vector<128x64xbf16>
    %cst_121 = arith.constant dense<0.000000e+00> : vector<288x64xf32>
    %124 = tpu.matmul %120, %123, %cst_121 {dimension_numbers = #tpu.dot_dimension_numbers<[1], [0], [0], [1], [0, 0, 1, 1], [], []>} : vector<288x128xbf16>, vector<128x64xbf16>, vector<288x64xf32> -> vector<288x64xf32>
    %c13_122 = arith.constant 13 : index
    %c0_123 = arith.constant 0 : index
    %c0_124 = arith.constant 0 : index
    %125 = vector.load %arg2[%c13_122, %c0_123, %c0_124] : memref<18x128x64xbf16, #tpu.memory_space<vmem>>, vector<1x128x64xbf16>
    %126 = vector.shape_cast %125 : vector<1x128x64xbf16> to vector<128x64xbf16>
    %cst_125 = arith.constant dense<0.000000e+00> : vector<288x64xf32>
    %127 = tpu.matmul %121, %126, %cst_125 {dimension_numbers = #tpu.dot_dimension_numbers<[1], [0], [0], [1], [0, 0, 1, 1], [], []>} : vector<288x128xbf16>, vector<128x64xbf16>, vector<288x64xf32> -> vector<288x64xf32>
    %128 = arith.addf %124, %127 : vector<288x64xf32>
    %c0_126 = arith.constant 0 : index
    %c0_127 = arith.constant 0 : index
    %129 = vector.load %arg8[%c0_126, %c0_127] : memref<288x64xf32, #tpu.memory_space<vmem>>, vector<288x64xf32>
    tpu.vector_store %arg8[%c0_126, %c0_127], %128 {strides = array<i32>} : memref<288x64xf32, #tpu.memory_space<vmem>>, vector<288x64xf32>,
    %c31_128 = arith.constant 31 : index
    %c0_129 = arith.constant 0 : index
    %130 = vector.load %arg6[%c31_128, %c0_129] : memref<352x128xbf16, #tpu.memory_space<vmem>>, vector<288x128xbf16>
    %c32_130 = arith.constant 32 : index
    %c0_131 = arith.constant 0 : index
    %131 = vector.load %arg6[%c32_130, %c0_131] : memref<352x128xbf16, #tpu.memory_space<vmem>>, vector<288x128xbf16>
    %c14_132 = arith.constant 14 : index
    %c0_133 = arith.constant 0 : index
    %c0_134 = arith.constant 0 : index
    %132 = vector.load %arg2[%c14_132, %c0_133, %c0_134] : memref<18x128x64xbf16, #tpu.memory_space<vmem>>, vector<1x128x64xbf16>
    %133 = vector.shape_cast %132 : vector<1x128x64xbf16> to vector<128x64xbf16>
    %cst_135 = arith.constant dense<0.000000e+00> : vector<288x64xf32>
    %134 = tpu.matmul %130, %133, %cst_135 {dimension_numbers = #tpu.dot_dimension_numbers<[1], [0], [0], [1], [0, 0, 1, 1], [], []>} : vector<288x128xbf16>, vector<128x64xbf16>, vector<288x64xf32> -> vector<288x64xf32>
    %c15 = arith.constant 15 : index
    %c0_136 = arith.constant 0 : index
    %c0_137 = arith.constant 0 : index
    %135 = vector.load %arg2[%c15, %c0_136, %c0_137] : memref<18x128x64xbf16, #tpu.memory_space<vmem>>, vector<1x128x64xbf16>
    %136 = vector.shape_cast %135 : vector<1x128x64xbf16> to vector<128x64xbf16>
    %cst_138 = arith.constant dense<0.000000e+00> : vector<288x64xf32>
    %137 = tpu.matmul %131, %136, %cst_138 {dimension_numbers = #tpu.dot_dimension_numbers<[1], [0], [0], [1], [0, 0, 1, 1], [], []>} : vector<288x128xbf16>, vector<128x64xbf16>, vector<288x64xf32> -> vector<288x64xf32>
    %138 = arith.addf %134, %137 : vector<288x64xf32>
    %c0_139 = arith.constant 0 : index
    %c0_140 = arith.constant 0 : index
    %139 = vector.load %arg8[%c0_139, %c0_140] : memref<288x64xf32, #tpu.memory_space<vmem>>, vector<288x64xf32>
    %140 = arith.addf %139, %138 : vector<288x64xf32>
    %c0_141 = arith.constant 0 : index
    %c0_142 = arith.constant 0 : index
    %141 = vector.load %arg8[%c0_141, %c0_142] : memref<288x64xf32, #tpu.memory_space<vmem>>, vector<288x64xf32>
    tpu.vector_store %arg8[%c0_141, %c0_142], %140 {strides = array<i32>} : memref<288x64xf32, #tpu.memory_space<vmem>>, vector<288x64xf32>,
    %c49_143 = arith.constant 49 : index
    %c0_144 = arith.constant 0 : index
    %142 = vector.load %arg6[%c49_143, %c0_144] : memref<352x128xbf16, #tpu.memory_space<vmem>>, vector<288x128xbf16>
    %c50_145 = arith.constant 50 : index
    %c0_146 = arith.constant 0 : index
    %143 = vector.load %arg6[%c50_145, %c0_146] : memref<352x128xbf16, #tpu.memory_space<vmem>>, vector<288x128xbf16>
    %c16 = arith.constant 16 : index
    %c0_147 = arith.constant 0 : index
    %c0_148 = arith.constant 0 : index
    %144 = vector.load %arg2[%c16, %c0_147, %c0_148] : memref<18x128x64xbf16, #tpu.memory_space<vmem>>, vector<1x128x64xbf16>
    %145 = vector.shape_cast %144 : vector<1x128x64xbf16> to vector<128x64xbf16>
    %cst_149 = arith.constant dense<0.000000e+00> : vector<288x64xf32>
    %146 = tpu.matmul %142, %145, %cst_149 {dimension_numbers = #tpu.dot_dimension_numbers<[1], [0], [0], [1], [0, 0, 1, 1], [], []>} : vector<288x128xbf16>, vector<128x64xbf16>, vector<288x64xf32> -> vector<288x64xf32>
    %c17 = arith.constant 17 : index
    %c0_150 = arith.constant 0 : index
    %c0_151 = arith.constant 0 : index
    %147 = vector.load %arg2[%c17, %c0_150, %c0_151] : memref<18x128x64xbf16, #tpu.memory_space<vmem>>, vector<1x128x64xbf16>
    %148 = vector.shape_cast %147 : vector<1x128x64xbf16> to vector<128x64xbf16>
    %cst_152 = arith.constant dense<0.000000e+00> : vector<288x64xf32>
    %149 = tpu.matmul %143, %148, %cst_152 {dimension_numbers = #tpu.dot_dimension_numbers<[1], [0], [0], [1], [0, 0, 1, 1], [], []>} : vector<288x128xbf16>, vector<128x64xbf16>, vector<288x64xf32> -> vector<288x64xf32>
    %150 = arith.addf %146, %149 : vector<288x64xf32>
    %c0_153 = arith.constant 0 : index
    %c0_154 = arith.constant 0 : index
    %151 = vector.load %arg8[%c0_153, %c0_154] : memref<288x64xf32, #tpu.memory_space<vmem>>, vector<288x64xf32>
    %152 = arith.addf %151, %150 : vector<288x64xf32>
    %c0_155 = arith.constant 0 : index
    %c0_156 = arith.constant 0 : index
    %153 = vector.load %arg8[%c0_155, %c0_156] : memref<288x64xf32, #tpu.memory_space<vmem>>, vector<288x64xf32>
    tpu.vector_store %arg8[%c0_155, %c0_156], %152 {strides = array<i32>} : memref<288x64xf32, #tpu.memory_space<vmem>>, vector<288x64xf32>,
    %c0_157 = arith.constant 0 : index
    %c0_158 = arith.constant 0 : index
    %154 = vector.load %arg8[%c0_157, %c0_158] : memref<288x64xf32, #tpu.memory_space<vmem>>, vector<288x64xf32>
    %c2_159 = arith.constant 2 : index
    %c0_160 = arith.constant 0 : index
    %c0_161 = arith.constant 0 : index
    %155 = vector.load %arg3[%c2_159, %c0_160, %c0_161] : memref<3x1x64xf32, #tpu.memory_space<vmem>>, vector<1x1x64xf32>
    %156 = vector.shape_cast %155 : vector<1x1x64xf32> to vector<1x64xf32>
    %157 = vector.broadcast %156 : vector<1x64xf32> to vector<288x64xf32>
    %158 = arith.addf %154, %157 : vector<288x64xf32>
    %c0_162 = arith.constant 0 : index
    %c0_163 = arith.constant 0 : index
    %c0_164 = arith.constant 0 : index
    %159 = vector.load %arg4[%c0_162, %c0_163, %c0_164] : memref<1x288x8xf32, #tpu.memory_space<vmem>>, vector<1x288x8xf32>
    %160 = vector.shape_cast %159 : vector<1x288x8xf32> to vector<288x8xf32>
    %161 = vector.extract_strided_slice %158 {offsets = [0, 0], sizes = [288, 8], strides = [1, 1]} : vector<288x64xf32> to vector<288x8xf32>
    %162 = arith.subf %160, %161 : vector<288x8xf32>
    %cst_165 = arith.constant 0.000000e+00 : f32
    %163 = vector.shape_cast %119 : vector<288x1xi1> to vector<288x1xi1>
    %164 = vector.broadcast %163 : vector<288x1xi1> to vector<288x8xi1>
    %165 = vector.broadcast %cst_165 : f32 to vector<288x8xf32>
    %166 = arith.select %164, %162, %165 : vector<288x8xi1>, vector<288x8xf32>
    %c0_166 = arith.constant 0 : index
    %c0_167 = arith.constant 0 : index
    %c0_168 = arith.constant 0 : index
    %167 = vector.load %arg5[%c0_166, %c0_167, %c0_168] : memref<1x288x8xf32, #tpu.memory_space<vmem>>, vector<1x288x8xf32>
    %168 = vector.shape_cast %167 : vector<1x288x8xf32> to vector<288x8xf32>
    %169 = vector.shape_cast %166 : vector<288x8xf32> to vector<1x288x8xf32>
    tpu.vector_store %arg5[%c0_166, %c0_167, %c0_168], %169 {strides = array<i32>} : memref<1x288x8xf32, #tpu.memory_space<vmem>>, vector<1x288x8xf32>,
    return
  }
  func.func @transform_0(%arg0: i32) -> (i32, i32, i32) {
    %c0_i32 = arith.constant 0 : i32
    %c0_i32_0 = arith.constant 0 : i32
    %c0_i32_1 = arith.constant 0 : i32
    return %arg0, %c0_i32, %c0_i32_0 : i32, i32, i32
  }
  func.func @transform_1(%arg0: i32) -> (i32, i32, i32) {
    %c0_i32 = arith.constant 0 : i32
    %c0_i32_0 = arith.constant 0 : i32
    %c0_i32_1 = arith.constant 0 : i32
    %c0_i32_2 = arith.constant 0 : i32
    return %c0_i32, %c0_i32_0, %c0_i32_1 : i32, i32, i32
  }
  func.func @transform_2(%arg0: i32) -> (i32, i32, i32) {
    %c0_i32 = arith.constant 0 : i32
    %c0_i32_0 = arith.constant 0 : i32
    %c0_i32_1 = arith.constant 0 : i32
    %c0_i32_2 = arith.constant 0 : i32
    return %c0_i32, %c0_i32_0, %c0_i32_1 : i32, i32, i32
  }
  func.func @transform_3(%arg0: i32) -> (i32, i32, i32) {
    %c0_i32 = arith.constant 0 : i32
    %c0_i32_0 = arith.constant 0 : i32
    %c0_i32_1 = arith.constant 0 : i32
    return %arg0, %c0_i32, %c0_i32_0 : i32, i32, i32
  }
  func.func @transform_4(%arg0: i32) -> (i32, i32, i32) {
    %c0_i32 = arith.constant 0 : i32
    %c0_i32_0 = arith.constant 0 : i32
    %c0_i32_1 = arith.constant 0 : i32
    return %arg0, %c0_i32, %c0_i32_0 : i32, i32, i32
  }
}

</mosaic_0001>

<bundles_post_ra>
// kernel: _lambda_.1
= control target key start
LH: loop header
LB: loop body
LE: loop exit
PB: predicated region body
PF: predicated region fallthrough
CT: control target
= control target key end

     0   :  { %v16630_v1 = vmov 0   ;;  %vm567_vm0 = vcmask 1045504   ;;  %s16631_s23 = smov 64   ;;  %vm391_vm1 = vsmask.f32 7962  ;;  %vm390_vm2 = vcmask 523270   ;;  %s21080_s0 = inlined_call_operand.vmem [shape: bf16[1,336,64], index: 0, kind: input, shape index: {}]   ;;  %s21081_s1 = inlined_call_operand.vmem [shape: bf16[18,128,64], index: 1, kind: input, shape index: {}]   ;;  %s21082_s2 = inlined_call_operand.vmem [shape: f32[3,1,64], index: 2, kind: input, shape index: {}]   ;;  %s21083_s3 = inlined_call_operand.vmem [shape: f32[1,288,8], index: 3, kind: input, shape index: {}]   ;;  %s21084_s4 = inlined_call_operand.vmem [shape: f32[1,288,8], index: 4, kind: output, shape index: {}]  }
   0x1   :  { %v16431_v0 = vld [vmem:[%s21080_s0] sm:$0xff]   ;;  %18 = vst [vmem:[#allocation2] sm:$0xff] %v16630_v1  ;;  %19 = vst [vmem:[#allocation2 + $0x8] sm:$0xff] %v16630_v1  ;;  %v16432_v3 = vld [vmem:[%s21080_s0 + $0x8] sm:$0xff]   ;;  %vm179_vm4 = vsmask.f32 6400 }
   0x2   :  { %20 = vst [vmem:[#allocation3] sm:$0xff] %v16630_v1  ;;  %21 = vst [vmem:[#allocation3 + $0x8] sm:$0xff] %v16630_v1  ;;  %v568_v2 = vrot.slane %v16431_v0, 2  ;;  %v16433_v4 = vld [vmem:[%s21080_s0 + $0x10] sm:$0xff]   ;;  %v16434_v5 = vld [vmem:[%s21080_s0 + $0x18] sm:$0xff]   ;;  %v569_v6 = vrot.slane %v16432_v3, 2 }
   0x3   :  { %28 = vst [vmem:[#allocation2 + $0xa0] sm:$0xff] %v16630_v1  ;;  %29 = vst [vmem:[#allocation2 + $0xa8] sm:$0xff] %v16630_v1  ;;  %v571_v7 = vrot.slane %v16433_v4, 2  ;;  %v573_v8 = vrot.slane %v16434_v5, 2  ;;  %v16435_v9 = vld [vmem:[%s21080_s0 + $0x20] sm:$0xff]   ;;  %v16436_v12 = vld [vmem:[%s21080_s0 + $0x28] sm:$0xff]  }
   0x4   :  { %34 = vst [vmem:[#allocation3 + $0xa8] sm:$0xff] %v16630_v1  ;;  %609 = vrot.lane.b32.xlu0 %v568_v2, %s16631_s23  ;;  %v570_v11 = vsel %vm567_vm0, %v568_v2, %v569_v6  ;;  %v575_v13 = vrot.slane %v16435_v9, 2  ;;  %v16437_v14 = vld [vmem:[%s21080_s0 + $0x30] sm:$0xff]   ;;  %v577_v16 = vrot.slane %v16436_v12, 2  ;;  %v16438_v17 = vld [vmem:[%s21080_s0 + $0x38] sm:$0xff]   ;;  %v16439_v20 = vld [vmem:[%s21080_s0 + $0x40] sm:$0xff]  }
   0x5   :  { %v572_v10 = vsel %vm567_vm0, %v569_v6, %v571_v7  ;;  %v574_v15 = vsel %vm567_vm0, %v571_v7, %v573_v8  ;;  %v579_v19 = vrot.slane %v16437_v14, 2  ;;  %v581_v22 = vrot.slane %v16438_v17, 2  ;;  %v16440_v23 = vld [vmem:[%s21080_s0 + $0x48] sm:$0xff]   ;;  %v16441_v26 = vld [vmem:[%s21080_s0 + $0x50] sm:$0xff]   ;;  %v16442_v29 = vld [vmem:[%s21080_s0 + $0x58] sm:$0xff]  }
   0x6   :  { %613 = vrot.lane.b32.xlu1 %v572_v10, %s16631_s23  ;;  %v576_v18 = vsel %vm567_vm0, %v573_v8, %v575_v13  ;;  %v578_v21 = vsel %vm567_vm0, %v575_v13, %v577_v16  ;;  %v583_v25 = vrot.slane %v16439_v20, 2  ;;  %v585_v28 = vrot.slane %v16440_v23, 2  ;;  %v16443_v32 = vld [vmem:[%s21080_s0 + $0x60] sm:$0xff]   ;;  %v16444_v33 = vld [vmem:[%s21080_s0 + $0x68] sm:$0xff]   ;;  %v16445_v36 = vld [vmem:[%s21080_s0 + $0x70] sm:$0xff]  }
   0x7   :  { %v580_v24 = vsel %vm567_vm0, %v577_v16, %v579_v19  ;;  %v582_v27 = vsel %vm567_vm0, %v579_v19, %v581_v22  ;;  %v587_v31 = vrot.slane %v16441_v26, 2  ;;  %v589_v35 = vrot.slane %v16442_v29, 2  ;;  %v16451_v39 = vld [vmem:[%s21081_s1 + $0x40] sm:$0xff]   ;;  %v16446_v40 = vld [vmem:[%s21080_s0 + $0x78] sm:$0xff]   ;;  %v16452_v41 = vld [vmem:[%s21081_s1 + $0x48] sm:$0xff]  }
   0x8   :  { %611 = vrot.lane.b32.xlu0 %v570_v11, %s16631_s23  ;;  %v584_v30 = vsel %vm567_vm0, %v581_v22, %v583_v25  ;;  %v586_v34 = vsel %vm567_vm0, %v583_v25, %v585_v28  ;;  %v591_v38 = vrot.slane %v16443_v32, 2  ;;  %v16447_v42 = vld [vmem:[%s21080_s0 + $0x80] sm:$0xff]   ;;  %15163 = vmatprep.subr.bf16.mxu1 %v16451_v39  ;;  %v593_v45 = vrot.slane %v16444_v33, 2  ;;  %v16454_v46 = vld [vmem:[%s21081_s1 + $0x50] sm:$0xff]   ;;  %v16455_v49 = vld [vmem:[%s21081_s1 + $0x8] sm:$0xff]  }
   0x9   :  { %v588_v37 = vsel %vm567_vm0, %v585_v28, %v587_v31  ;;  %v16453_v43 = vld [vmem:[%s21081_s1] sm:$0xff]   ;;  %v590_v44 = vsel %vm567_vm0, %v587_v31, %v589_v35  ;;  %15164 = vmatpush3.bf16.msra.mxu1 %v16451_v39  ;;  %v595_v48 = vrot.slane %v16445_v36, 2  ;;  %v16457_v50 = vld [vmem:[%s21081_s1 + $0x10] sm:$0xff]   ;;  %v597_v52 = vrot.slane %v16446_v40, 2  ;;  %v16448_v53 = vld [vmem:[%s21080_s0 + $0x88] sm:$0xff]  }
   0xa   :  { %615 = vrot.lane.b32.xlu1 %v574_v15, %s16631_s23  ;;  %v592_v47 = vsel %vm567_vm0, %v589_v35, %v591_v38  ;;  %15165 = vmatprep.subr.bf16.mxu1 %v16452_v41  ;;  %v594_v51 = vsel %vm567_vm0, %v591_v38, %v593_v45  ;;  %v16449_v54 = vld [vmem:[%s21080_s0 + $0x90] sm:$0xff]   ;;  %v599_v56 = vrot.slane %v16447_v42, 2  ;;  %v16456_v57 = vld [vmem:[%s21081_s1 + $0x58] sm:$0xff]   ;;  %v16458_v59 = vld [vmem:[%s21081_s1 + $0x60] sm:$0xff]   ;;  %v601_v62 = vrot.slane %v16448_v53, 2 }
   0xb   :  { %15215 = vmatprep.subr.bf16.mxu0 %v16453_v43  ;;  %v596_v55 = vsel %vm567_vm0, %v593_v45, %v595_v48  ;;  %v16771_v58 = vld [vmem:[%s21080_s0 + $0x98] sm:$0xff]   ;;  %v16459_v60 = vld [vmem:[%s21080_s0] sm:$0xff]   ;;  %v598_v61 = vsel %vm567_vm0, %v595_v48, %v597_v52  ;;  %v603_v63 = vrot.slane %v16449_v54, 2  ;;  %v16461_v1 = vld [vmem:[%s21080_s0 + $0x8] sm:$0xff]   ;;  %vm396_vm5 = vcmask 523264  }
   0xc   :  { %617 = vrot.lane.b32.xlu0 %v576_v18, %s16631_s23  ;;  %15216 = vmatpush3.bf16.msra.mxu0 %v16453_v43  ;;  %v16460_v0 = vld [vmem:[%s21081_s1 + $0x18] sm:$0xff]   ;;  %v600_v2 = vsel %vm567_vm0, %v597_v52, %v599_v56  ;;  %v181_v3 = vshrl.u32 %v16459_v60, 16  ;;  %v184_v4 = vshll.u32 %v16459_v60, 16  ;;  %v605_v5 = vrot.slane %v16771_v58, 2  ;;  %v393_v7 = vld [vmem:[#allocation2] sm:$0xc0]  ;;  %vm16802_vm3 = vmand %vm390_vm2, %vm391_vm1 }
   0xd   :  { %15217 = vmatprep.subr.bf16.mxu0 %v16455_v49  ;;  %15166 = vmatpush3.bf16.msra.mxu1 %v16452_v41  ;;  %v189_v6 = vshrl.u32 %v16461_v1, 16  ;;  %v16462_v9 = vld [vmem:[%s21080_s0 + $0x10] sm:$0xff]   ;;  %v602_v10 = vsel %vm567_vm0, %v599_v56, %v601_v62  ;;  %v16464_v12 = vld [vmem:[%s21081_s1 + $0x20] sm:$0xff]   ;;  %v604_v13 = vsel %vm567_vm0, %v601_v62, %v603_v63  ;;  %v192_v16 = vshll.u32 %v16461_v1, 16  ;;  %v16463_v17 = vld [vmem:[%s21081_s1 + $0x68] sm:$0xff]  }
   0xe   :  { %619 = vrot.lane.b32.xlu1 %v578_v21, %s16631_s23  ;;  %15167 = vmatprep.subr.bf16.mxu1 %v16454_v46  ;;  %v183_v8 = vrot.slane %v181_v3, 1  ;;  %v186_v11 = vrot.slane %v184_v4, 2  ;;  %v16465_v19 = vld [vmem:[%s21080_s0 + $0x18] sm:$0xff]   ;;  %v198_v21 = vshrl.u32 %v16462_v9, 16  ;;  %v201_v22 = vshll.u32 %v16462_v9, 16  ;;  %v16466_v23 = vld [vmem:[%s21081_s1 + $0x70] sm:$0xff]  }
   0xf   :  { %v191_v15 = vrot.slane %v189_v6, 1  ;;  %v194_v20 = vrot.slane %v192_v16, 2  ;;  %v207_v26 = vshrl.u32 %v16465_v19, 16  ;;  %v16467_v31 = vld [vmem:[%s21081_s1 + $0x28] sm:$0xff]   ;;  %v16468_v32 = vld [vmem:[%s21080_s0 + $0x20] sm:$0xff]   ;;  %v16470_v40 = vld [vmem:[%s21081_s1 + $0x78] sm:$0xff]  }
  0x10   :  { %621 = vrot.lane.b32.xlu0 %v580_v24, %s16631_s23  ;;  %15218 = vmatpush3.bf16.msra.mxu0 %v16455_v49  ;;  %v187_v18 = vor.u32 %v186_v11, %v183_v8  ;;  %v606_v24 = vsel %vm567_vm0, %v603_v63, %v605_v5  ;;  %v200_v29 = vrot.slane %v198_v21, 1  ;;  %v219_v38 = vshll.u32 %v16468_v32, 16  ;;  %v16469_v39 = vld [vmem:[%s21080_s0 + $0x28] sm:$0xff]   ;;  %v16850_v53 = vld [vmem:[%s21081_s1 + $0xc0] sm:$0xff]   ;;  %v16474_v54 = vld [vmem:[%s21080_s0 + $0x30] sm:$0xff]  }
  0x11   :  { %15219 = vmatprep.subr.bf16.mxu0 %v16457_v50  ;;  %15168 = vmatpush3.bf16.msra.mxu1 %v16454_v46  ;;  %v195_v28 = vor.u32 %v194_v20, %v191_v15  ;;  %v209_v33 = vrot.slane %v207_v26, 1  ;;  %v225_v45 = vshrl.u32 %v16469_v39, 16  ;;  %v16471_v46 = vld [vmem:[%s21081_s1 + $0x30] sm:$0xff]   ;;  %v228_v48 = vshll.u32 %v16469_v39, 16  ;;  %v16475_v60 = vld [vmem:[%s21080_s0 + $0x38] sm:$0xff]   ;;  %v16864_v1 = vld [vmem:[%s21081_s1 + $0x140] sm:$0xff]  }
  0x12   :  { %623 = vrot.lane.b32.xlu1 %v582_v27, %s16631_s23  ;;  %15169 = vmatprep.subr.bf16.mxu1 %v16456_v57  ;;  %v394_v25 = vsel %vm16802_vm3, %v187_v18, %v393_v7  ;;  %v210_v27 = vshll.u32 %v16465_v19, 16  ;;  %v16478_v3 = vld [vmem:[%s21080_s0 + $0x40] sm:$0xff]   ;;  %v16479_v7 = vld [vmem:[%s21080_s0 + $0x48] sm:$0xff]   ;;  %v16481_v11 = vld [vmem:[%s21080_s0 + $0x50] sm:$0xff]   ;;  %vm22_vm6 = vcmask 1047559   ;;  %vm675_vm9 = vcmask 1048070  }
  0x13   :  { %395 = vst [vmem:[#allocation2] sm:$0xc0] %v394_v25  ;;  %v196_v36 = vsel %vm179_vm4, %v187_v18, %v195_v28  ;;  %v230_v52 = vrot.slane %v228_v48, 2  ;;  %v252_v9 = vshrl.u32 %v16478_v3, 16  ;;  %v264_v14 = vshll.u32 %v16479_v7, 16  ;;  %v16483_v26 = vld [vmem:[%s21080_s0 + $0x58] sm:$0xff]   ;;  %vm676_vm10 = vmand %vm675_vm9, %vm391_vm1 }
  0x14   :  { %625 = vrot.lane.b32.xlu0 %v584_v30, %s16631_s23  ;;  %15220 = vmatpush3.bf16.msra.mxu0 %v16457_v50  ;;  %v203_v30 = vrot.slane %v201_v22, 2  ;;  %397 = vst.msk [vmem:[#allocation2 + $0x8] sm:$0xff] %vm396_vm5, %v196_v36  ;;  %v227_v50 = vrot.slane %v225_v45, 1  ;;  %v16480_v15 = vld [vmem:[%s21080_s0 + $0xa0] ss:$0 sps:$4 sm:$0x77]  }
  0x15   :  { %15221 = vmatprep.subr.bf16.mxu0 %v16460_v0  ;;  %15170 = vmatpush3.bf16.msra.mxu1 %v16456_v57  ;;  %v234_v57 = vshrl.u32 %v16474_v54, 16  ;;  %v266_v20 = vrot.slane %v264_v14, 2  ;;  %v607_v21 = vrot.slane %v16480_v15, 2  ;;  %v270_v22 = vshrl.u32 %v16481_v11, 16  ;;  %v16497_v15 = vld [vmem:[%s21080_s0 + $0x90] sm:$0xff]  }
  0x16   :  { %627 = vrot.lane.b32.xlu1 %v586_v34, %s16631_s23  ;;  %15171 = vmatprep.subr.bf16.mxu1 %v16458_v59  ;;  %v212_v34 = vrot.slane %v210_v27, 2  ;;  %v204_v35 = vor.u32 %v203_v30, %v200_v29  ;;  %v231_v56 = vor.u32 %v230_v52, %v227_v50  ;;  %v273_v25 = vshll.u32 %v16481_v11, 16 }
  0x17   :  { %v236_v62 = vrot.slane %v234_v57, 1  ;;  %v272_v29 = vrot.slane %v270_v22, 1  ;;  %vm23_vm7 = vsmask.f32 7966  ;;  %v345_v22 = vshll.u32 %v16497_v15, 16 }
  0x18   :  { %629 = vrot.lane.b32.xlu0 %v588_v37, %s16631_s23  ;;  %15222 = vmatpush3.bf16.msra.mxu0 %v16460_v0  ;;  %v216_v37 = vshrl.u32 %v16468_v32, 16  ;;  %v213_v41 = vor.u32 %v212_v34, %v209_v33  ;;  %v205_v42 = vsel %vm179_vm4, %v195_v28, %v204_v35  ;;  %v243_v0 = vshrl.u32 %v16475_v60, 16  ;;  %v16485_v34 = vld [vmem:[%s21080_s0 + $0x60] sm:$0xff]   ;;  %vm16934_vm8 = vmand %vm22_vm6, %vm23_vm7 }
  0x19   :  { %15223 = vmatprep.subr.bf16.mxu0 %v16464_v12  ;;  %15172 = vmatpush3.bf16.msra.mxu1 %v16458_v59  ;;  %398 = vst.msk [vmem:[#allocation2 + $0x10] sm:$0xff] %vm396_vm5, %v205_v42  ;;  %v237_v59 = vshll.u32 %v16474_v54, 16  ;;  %v608_v28 = vsel %vm567_vm0, %v605_v5, %v607_v21  ;;  %v279_v32 = vshrl.u32 %v16483_v26, 16  ;;  %v282_v33 = vshll.u32 %v16483_v26, 16 }
  0x1a   :  { %631 = vrot.lane.b32.xlu1 %v590_v44, %s16631_s23  ;;  %15173 = vmatprep.subr.bf16.mxu1 %v16463_v17  ;;  %v218_v43 = vrot.slane %v216_v37, 1  ;;  %v221_v44 = vrot.slane %v219_v38, 2  ;;  %v245_v6 = vrot.slane %v243_v0, 1  ;;  %v288_v37 = vshrl.u32 %v16485_v34, 16  ;;  %v16486_v38 = vld [vmem:[%s21080_s0 + $0x68] sm:$0xff]   ;;  %v16493_v0 = vld [vmem:[%s21080_s0 + $0x80] sm:$0xff]  }
  0x1b   :  { %v239_v63 = vrot.slane %v237_v59, 2  ;;  %v284_v36 = vrot.slane %v282_v33, 2  ;;  %v291_v39 = vshll.u32 %v16485_v34, 16  ;;  %v300_v45 = vshll.u32 %v16486_v38, 16 }
  0x1c   :  { %633 = vrot.lane.b32.xlu0 %v592_v47, %s16631_s23  ;;  %15224 = vmatpush3.bf16.msra.mxu0 %v16464_v12  ;;  %v214_v47 = vsel %vm179_vm4, %v204_v35, %v213_v41  ;;  %v222_v49 = vor.u32 %v221_v44, %v218_v43  ;;  %v281_v35 = vrot.slane %v279_v32, 1  ;;  %v290_v42 = vrot.slane %v288_v37, 1 }
  0x1d   :  { %15225 = vmatprep.subr.bf16.mxu0 %v16467_v31  ;;  %15174 = vmatpush3.bf16.msra.mxu1 %v16463_v17  ;;  %399 = vst.msk [vmem:[#allocation2 + $0x18] sm:$0xff] %vm396_vm5, %v214_v47  ;;  %v240_v4 = vor.u32 %v239_v63, %v236_v62  ;;  %v254_v17 = vrot.slane %v252_v9, 1  ;;  %v297_v43 = vshrl.u32 %v16486_v38, 16  ;;  %v293_v44 = vrot.slane %v291_v39, 2 }
  0x1e   :  { %635 = vrot.lane.b32.xlu1 %v594_v51, %s16631_s23  ;;  %15175 = vmatprep.subr.bf16.mxu1 %v16466_v23  ;;  %v16473_v51 = vld [vmem:[%s21081_s1 + $0x38] sm:$0xff]   ;;  %vm680_vm11 = vcmask 1048064   ;;  %vm860_vm12 = vcmask 1040384   ;;  %vm1141_vm13 = vsmask.f32 1280  ;;  %vm417_vm15 = vcmask 516096  }
  0x1f   :  { %v241_v12 = vsel %vm179_vm4, %v231_v56, %v240_v4  ;;  %v299_v48 = vrot.slane %v297_v43, 1  ;;  %v294_v50 = vor.u32 %v293_v44, %v290_v42  ;;  %vm418_vm14 = vsmask.f32 256 }
  0x20   :  { %637 = vrot.lane.b32.xlu0 %v596_v55, %s16631_s23  ;;  %15226 = vmatpush3.bf16.msra.mxu0 %v16467_v31  ;;  %v223_v55 = vsel %vm179_vm4, %v213_v41, %v222_v49  ;;  %402 = vst.msk [vmem:[#allocation2 + $0x30] sm:$0xff] %vm396_vm5, %v241_v12  ;;  %v275_v31 = vrot.slane %v273_v25, 2  ;;  %v285_v41 = vor.u32 %v284_v36, %v281_v35  ;;  %v677_v36 = vld [vmem:[#allocation2] sm:$0xc0]  ;;  %vm17211_vm0 = vmand %vm417_vm15, %vm418_vm14  ;;  %vm701_vm1 = vcmask 1040896  }
  0x21   :  { %15227 = vmatprep.subr.bf16.mxu0 %v16471_v46  ;;  %15176 = vmatpush3.bf16.msra.mxu1 %v16466_v23  ;;  %400 = vst.msk [vmem:[#allocation2 + $0x20] sm:$0xff] %vm396_vm5, %v223_v55  ;;  %vm17263_vm2 = vmand %vm701_vm1, %vm418_vm14  ;;  %vm2441_vm3 = vcmask 1046528   ;;  %vm5319_vm1 = vcmask 1048071  }
  0x22   :  { %639 = vrot.lane.b32.xlu1 %v598_v61, %s16631_s23  ;;  %15177 = vmatprep.subr.bf16.mxu1 %v16470_v40  ;;  %v232_v61 = vsel %vm179_vm4, %v222_v49, %v231_v56  ;;  %v276_v5 = vor.u32 %v275_v31, %v272_v29  ;;  %v16490_v49 = vld [vmem:[%s21080_s0 + $0x78] sm:$0xff]   ;;  %v295_v57 = vsel %vm179_vm4, %v285_v41, %v294_v50 }
  0x23   :  { %401 = vst.msk [vmem:[#allocation2 + $0x28] sm:$0xff] %vm396_vm5, %v232_v61  ;;  %v315_v55 = vshrl.u32 %v16490_v49, 16  ;;  %v318_v56 = vshll.u32 %v16490_v49, 16  ;;  %408 = vst.msk [vmem:[#allocation2 + $0x60] sm:$0xff] %vm396_vm5, %v295_v57 }
  0x24   :  { %641 = vrot.lane.b32.xlu0 %v600_v2, %s16631_s23  ;;  %15228 = vmatpush3.bf16.msra.mxu0 %v16471_v46  ;;  %v246_v2 = vshll.u32 %v16475_v60, 16  ;;  %v16489_v46 = vld [vmem:[%s21080_s0 + $0x70] sm:$0xff]   ;;  %v286_v47 = vsel %vm179_vm4, %v276_v5, %v285_v41 }
  0x25   :  { %15229 = vmatprep.subr.bf16.mxu0 %v16473_v51  ;;  %15178 = vmatpush3.bf16.msra.mxu1 %v16470_v40  ;;  %407 = vst.msk [vmem:[#allocation2 + $0x58] sm:$0xff] %vm396_vm5, %v286_v47  ;;  %v306_v52 = vshrl.u32 %v16489_v46, 16  ;;  %v309_v54 = vshll.u32 %v16489_v46, 16  ;;  %v317_v62 = vrot.slane %v315_v55, 1  ;;  %v320_v63 = vrot.slane %v318_v56, 2 }
  0x26   :  { %643 = vrot.lane.b32.xlu1 %v602_v10, %s16631_s23  ;;  %15267 = vmatprep.subr.bf16.mxu1 %v16850_v53  ;;  %v248_v8 = vrot.slane %v246_v2, 2  ;;  %v255_v10 = vshll.u32 %v16478_v3, 16 }
  0x27   :  { %v308_v60 = vrot.slane %v306_v52, 1  ;;  %v311_v61 = vrot.slane %v309_v54, 2 }
  0x28   :  { %645 = vrot.lane.b32.xlu0 %v604_v13, %s16631_s23  ;;  %15230 = vmatpush3.bf16.msra.mxu0 %v16473_v51  ;;  %v261_v13 = vshrl.u32 %v16479_v7, 16  ;;  %v249_v16 = vor.u32 %v248_v8, %v245_v6  ;;  %v257_v18 = vrot.slane %v255_v10, 2  ;;  %v302_v51 = vrot.slane %v300_v45, 2  ;;  %v16494_v8 = vld [vmem:[%s21080_s0 + $0x88] sm:$0xff]  }
  0x29   :  { %15371 = vmatprep.subr.bf16.mxu0 %v16864_v1  ;;  %v312_v3 = vor.u32 %v311_v61, %v308_v60  ;;  %v324_v6 = vshrl.u32 %v16493_v0, 16  ;;  %v327_v7 = vshll.u32 %v16493_v0, 16  ;;  %v336_v14 = vshll.u32 %v16494_v8, 16 }
  0x2a   :  { %647 = vrot.lane.b32.xlu1 %v606_v24, %s16631_s23  ;;  %v263_v19 = vrot.slane %v261_v13, 1  ;;  %v250_v23 = vsel %vm179_vm4, %v240_v4, %v249_v16  ;;  %v258_v24 = vor.u32 %v257_v18, %v254_v17  ;;  %v303_v59 = vor.u32 %v302_v51, %v299_v48 }
  0x2b   :  { %403 = vst.msk [vmem:[#allocation2 + $0x38] sm:$0xff] %vm396_vm5, %v250_v23  ;;  %v321_v4 = vor.u32 %v320_v63, %v317_v62  ;;  %v326_v11 = vrot.slane %v324_v6, 1  ;;  %v329_v12 = vrot.slane %v327_v7, 2  ;;  %v333_v13 = vshrl.u32 %v16494_v8, 16  ;;  %v16476_v8 = vld [vmem:[%s21081_s1 + $0xc8] sm:$0xff]  }
  0x2c   :  { %v267_v27 = vor.u32 %v266_v20, %v263_v19  ;;  %v259_v30 = vsel %vm179_vm4, %v249_v16, %v258_v24  ;;  %649 = vrot.lane.b32.xlu0 %v608_v28, %s16631_s23  ;;  %v304_v2 = vsel %vm179_vm4, %v294_v50, %v303_v59  ;;  %v313_v9 = vsel %vm179_vm4, %v303_v59, %v312_v3  ;;  %v16498_v16 = vld [vmem:[%s21080_s0 + $0x98] sm:$0xff]  }
  0x2d   :  { %404 = vst.msk [vmem:[#allocation2 + $0x40] sm:$0xff] %vm396_vm5, %v259_v30  ;;  %409 = vst.msk [vmem:[#allocation2 + $0x68] sm:$0xff] %vm396_vm5, %v304_v2  ;;  %v322_v10 = vsel %vm179_vm4, %v312_v3, %v321_v4  ;;  %v330_v17 = vor.u32 %v329_v12, %v326_v11  ;;  %v335_v18 = vrot.slane %v333_v13, 1  ;;  %v25_v19 = vld [vmem:[#allocation2 + $0x98] sm:$0x80]  ;;  %v338_v20 = vrot.slane %v336_v14, 2 }
  0x2e   :  { %651 = vrot.lane.b32.xlu1 %v607_v21, %s16631_s23  ;;  %v268_v58 = vsel %vm179_vm4, %v258_v24, %v267_v27  ;;  %v277_v40 = vsel %vm179_vm4, %v267_v27, %v276_v5  ;;  %410 = vst.msk [vmem:[#allocation2 + $0x70] sm:$0xff] %vm396_vm5, %v313_v9  ;;  %411 = vst.msk [vmem:[#allocation2 + $0x78] sm:$0xff] %vm396_vm5, %v322_v10  ;;  %v342_v21 = vshrl.u32 %v16497_v15, 16  ;;  %v21133_v23 = vmov 0 }
  0x2f   :  { %405 = vst.msk [vmem:[#allocation2 + $0x48] sm:$0xff] %vm396_vm5, %v268_v58  ;;  %406 = vst.msk [vmem:[#allocation2 + $0x50] sm:$0xff] %vm396_vm5, %v277_v40  ;;  %v21134_v23 = vsel %vm16934_vm8, 4294967295, %v21133_v23  ;;  %v351_v24 = vshrl.u32 %v16498_v16, 16  ;;  %v331_v25 = vsel %vm179_vm4, %v321_v4, %v330_v17  ;;  %v26_v26 = vsel %vm16934_vm8, 0, %v25_v19 }
  0x30   :  { %21135 = vst [vmem:[#allocation5_spill] sm:$0xff] %v21134_v23  ;;  %v354_v27 = vshll.u32 %v16498_v16, 16  ;;  %412 = vst.msk [vmem:[#allocation2 + $0x80] sm:$0xff] %vm396_vm5, %v331_v25  ;;  %v339_v28 = vor.u32 %v338_v20, %v335_v18  ;;  %v344_v29 = vrot.slane %v342_v21, 1  ;;  %v347_v30 = vrot.slane %v345_v22, 2 }
  0x31   :  { %27 = vst [vmem:[#allocation2 + $0x98] sm:$0x80] %v26_v26  ;;  %v353_v31 = vrot.slane %v351_v24, 1 }
  0x32   :  { %v356_v32 = vrot.slane %v354_v27, 2  ;;  %v340_v33 = vsel %vm179_vm4, %v330_v17, %v339_v28  ;;  %v348_v34 = vor.u32 %v347_v30, %v344_v29 }
  0x33   :  { %413 = vst.msk [vmem:[#allocation2 + $0x88] sm:$0xff] %vm396_vm5, %v340_v33 }
  0x34   :  { %v16944_v58 = vor.u32 %v356_v32, %v353_v31  ;;  %v349_v5 = vsel %vm179_vm4, %v339_v28, %v348_v34  ;;  %v16482_v28 = vld [vmem:[%s21081_s1 + $0xd0] sm:$0xff]  }
  0x35   :  { %414 = vst.msk [vmem:[#allocation2 + $0x90] sm:$0xff] %vm396_vm5, %v349_v5 }
  0x36   :  { %v358_v35 = vsel %vm179_vm4, %v348_v34, %v16944_v58  ;;  %v16484_v34 = vld [vmem:[%s21081_s1 + $0x148] sm:$0xff]  }
  0x37   :  { %415 = vst.msk [vmem:[#allocation2 + $0x98] sm:$0xff] %vm396_vm5, %v358_v35 }
  0x76   :  { %v610_v37 = vpop.permute.xlu0 %609 }
  0x77   :  { %v678_v38 = vsel %vm676_vm10, %v610_v37, %v677_v36 }
  0x78   :  { %679 = vst [vmem:[#allocation2] sm:$0xc0] %v678_v38  ;;  %v614_v39 = vpop.permute.xlu1 %613 }
  0x79   :  { %682 = vst.msk [vmem:[#allocation2 + $0x10] sm:$0xff] %vm680_vm11, %v614_v39 }
  0x7a   :  { %v612_v40 = vpop.permute.xlu0 %611 }
  0x7b   :  { %681 = vst.msk [vmem:[#allocation2 + $0x8] sm:$0xff] %vm680_vm11, %v612_v40 }
  0x7c   :  { %v616_v41 = vpop.permute.xlu1 %615 }
  0x7d   :  { %683 = vst.msk [vmem:[#allocation2 + $0x18] sm:$0xff] %vm680_vm11, %v616_v41 }
  0x7e   :  { %v618_v42 = vpop.permute.xlu0 %617 }
  0x7f   :  { %684 = vst.msk [vmem:[#allocation2 + $0x20] sm:$0xff] %vm680_vm11, %v618_v42  ;;  %v807_v43 = vld [vmem:[#allocation2] sm:$0x80] }
  0x80   :  { %v788_v44 = vld [vmem:[#allocation2] sm:$0xc0]  ;;  %v620_v47 = vpop.permute.xlu1 %619  ;;  %v861_v48 = vrot.slane %v807_v43, 7  ;;  %v16956_v49 = vld [vmem:[#allocation2 + $0x10] sm:$0xff] }
  0x81   :  { %v1143_v45 = vshrl.u32 %v788_v44, 16  ;;  %v1146_v46 = vshll.u32 %v788_v44, 16  ;;  %685 = vst.msk [vmem:[#allocation2 + $0x28] sm:$0xff] %vm680_vm11, %v620_v47  ;;  %v864_v51 = vrot.slane %v16956_v49, 7  ;;  %v1160_v56 = vshrl.u32 %v16956_v49, 16 }
  0x82   :  { %v789_v50 = vld [vmem:[#allocation2 + $0x8] sm:$0xff]  ;;  %v622_v52 = vpop.permute.xlu0 %621  ;;  %v1163_v61 = vshll.u32 %v16956_v49, 16 }
  0x83   :  { %v1145_v54 = vrot.slane %v1143_v45, 6  ;;  %v1148_v55 = vrot.slane %v1146_v46, 7  ;;  %v862_v57 = vrot.slane %v789_v50, 7  ;;  %686 = vst.msk [vmem:[#allocation2 + $0x30] sm:$0xff] %vm680_vm11, %v622_v52  ;;  %v1151_v59 = vshrl.u32 %v789_v50, 16 }
  0x84   :  { %v1154_v60 = vshll.u32 %v789_v50, 16  ;;  %v1162_v63 = vrot.slane %v1160_v56, 6  ;;  %v16967_v3 = vld [vmem:[#allocation2 + $0x18] sm:$0xff]  ;;  %v624_v4 = vpop.permute.xlu1 %623  ;;  %v1165_v10 = vrot.slane %v1163_v61, 7 }
  0x85   :  { %v1149_v62 = vor.u32 %v1148_v55, %v1145_v54  ;;  %v863_v0 = vsel %vm860_vm12, %v861_v48, %v862_v57  ;;  %v865_v2 = vsel %vm860_vm12, %v862_v57, %v864_v51  ;;  %v1153_v6 = vrot.slane %v1151_v59, 6  ;;  %687 = vst.msk [vmem:[#allocation2 + $0x38] sm:$0xff] %vm680_vm11, %v624_v4  ;;  %v16488_v48 = vld [vmem:[%s21081_s1 + $0x150] sm:$0xff]  }
  0x86   :  { %v1156_v7 = vrot.slane %v1154_v60, 7  ;;  %15179 = vmatprep.mubr.bf16.mxu1 %v863_v0  ;;  %v866_v9 = vrot.slane %v16967_v3, 7  ;;  %v1169_v11 = vshrl.u32 %v16967_v3, 16  ;;  %v21094_v12 = vshll.u32 %v16967_v3, 16  ;;  %v16978_v13 = vld [vmem:[#allocation2 + $0x20] sm:$0xff]  ;;  %v626_v14 = vpop.permute.xlu0 %625 }
  0x87   :  { %15180 = vmatmul.mubr.bf16.vlgmr.msra.gmra.mrb[0].mxu1 %v865_v2  ;;  %v868_v16 = vrot.slane %v16978_v13, 7  ;;  %688 = vst.msk [vmem:[#allocation2 + $0x40] sm:$0xff] %vm680_vm11, %v626_v14  ;;  %v1178_v17 = vshrl.u32 %v16978_v13, 16  ;;  %v21093_v18 = vshll.u32 %v16978_v13, 16  ;;  %v1166_v20 = vor.u32 %v1165_v10, %v1162_v63  ;;  %v16491_v2 = vld [vmem:[%s21081_s1 + $0xe0] sm:$0xff]  }
  0x88   :  { %v1157_v15 = vor.u32 %v1156_v7, %v1153_v6  ;;  %15268 = vmatpush3.bf16.msra.mxu1 %v16850_v53  ;;  %v867_v19 = vsel %vm860_vm12, %v864_v51, %v866_v9  ;;  %v1171_v21 = vrot.slane %v1169_v11, 6  ;;  %v1174_v22 = vrot.slane %v21094_v12, 7  ;;  %v16991_v25 = vld [vmem:[#allocation2 + $0x28] sm:$0xff]  ;;  %v628_v26 = vpop.permute.xlu1 %627  ;;  %v16492_v6 = vld [vmem:[%s21081_s1 + $0x158] sm:$0xff]  }
  0x89   :  { %15183 = vmatprep.mubr.bf16.mxu1 %v867_v19  ;;  %15269 = vmatprep.subr.bf16.mxu1 %v16476_v8  ;;  %v1180_v27 = vrot.slane %v1178_v17, 6  ;;  %v1183_v53 = vrot.slane %v21093_v18, 7  ;;  %v870_v31 = vrot.slane %v16991_v25, 7  ;;  %689 = vst.msk [vmem:[#allocation2 + $0x48] sm:$0xff] %vm680_vm11, %v628_v26  ;;  %v1187_v32 = vshrl.u32 %v16991_v25, 16  ;;  %v16496_v26 = vld [vmem:[%s21081_s1 + $0x160] sm:$0xff]  }
  0x8a   :  { %v1158_v24 = vsel %vm1141_vm13, %v1149_v62, %v1157_v15  ;;  %v1167_v29 = vsel %vm1141_vm13, %v1157_v15, %v1166_v20  ;;  %v1175_v30 = vor.u32 %v1174_v22, %v1171_v21  ;;  %v630_v33 = vpop.permute.xlu0 %629  ;;  %v869_v5 = vsel %vm860_vm12, %v866_v9, %v868_v16  ;;  %v17009_v36 = vld [vmem:[#allocation2 + $0x30] sm:$0xff]  ;;  %v16495_v21 = vld [vmem:[%s21081_s1 + $0xe8] sm:$0xff]  }
  0x8b   :  { %15231 = vmatprep.mubr.bf16.mxu0 %v1158_v24  ;;  %v21092_v35 = vshll.u32 %v16991_v25, 16  ;;  %690 = vst.msk [vmem:[#allocation2 + $0x50] sm:$0xff] %vm680_vm11, %v630_v33  ;;  %v1184_v38 = vor.u32 %v1183_v53, %v1180_v27  ;;  %v1189_v39 = vrot.slane %v1187_v32, 6  ;;  %v21089_v40 = vshll.u32 %v17009_v36, 16 }
  0x8c   :  { %15232 = vmatmul.mubr.bf16.vlgmr.msra.gmra.mrb[0].mxu0 %v1167_v29  ;;  %v1176_v37 = vsel %vm1141_vm13, %v1166_v20, %v1175_v30  ;;  %15270 = vmatpush3.bf16.msra.mxu1 %v16476_v8  ;;  %v871_v41 = vsel %vm860_vm12, %v868_v16, %v870_v31  ;;  %v17020_v43 = vld [vmem:[#allocation2 + $0x38] sm:$0xff]  ;;  %v632_v44 = vpop.permute.xlu1 %631  ;;  %v1196_v45 = vshrl.u32 %v17009_v36, 16  ;;  %v872_v51 = vrot.slane %v17009_v36, 7 }
  0x8d   :  { %15372 = vmatpush3.bf16.msra.mxu0 %v16864_v1  ;;  %15235 = vmatprep.mubr.bf16.mxu0 %v1176_v37  ;;  %v1192_v42 = vrot.slane %v21092_v35, 7  ;;  %v16487_v1 = vld [vmem:[%s21081_s1 + $0xd8] sm:$0xff]   ;;  %691 = vst.msk [vmem:[#allocation2 + $0x58] sm:$0xff] %vm680_vm11, %v632_v44  ;;  %v21087_v46 = vshll.u32 %v17020_v43, 16  ;;  %v21091_v52 = vshrl.u32 %v17020_v43, 16  ;;  %v1185_v54 = vsel %vm1141_vm13, %v1175_v30, %v1184_v38 }
  0x8e   :  { %15271 = vmatprep.subr.bf16.mxu1 %v16482_v28  ;;  %15373 = vmatprep.subr.bf16.mxu0 %v16484_v34  ;;  %v634_v47 = vpop.permute.xlu0 %633  ;;  %v1198_v55 = vrot.slane %v1196_v45, 6  ;;  %v1201_v57 = vrot.slane %v21089_v40, 7  ;;  %v874_v60 = vrot.slane %v17020_v43, 7  ;;  %v17052_v7 = vld [vmem:[#allocation2 + $0x40] sm:$0xff]  ;;  %v873_v8 = vsel %vm860_vm12, %v870_v31, %v872_v51 }
  0x8f   :  { %15184 = vmatmul.mubr.bf16.gmra.mrb[4].mxu1 %v869_v5  ;;  %v1193_v50 = vor.u32 %v1192_v42, %v1189_v39  ;;  %692 = vst.msk [vmem:[#allocation2 + $0x60] sm:$0xff] %vm680_vm11, %v634_v47  ;;  %v1207_v62 = vrot.slane %v21091_v52, 6  ;;  %v1210_v63 = vrot.slane %v21087_v46, 7  ;;  %v21086_v14 = vshll.u32 %v17052_v7, 16  ;;  %v16500_v42 = vld [vmem:[%s21081_s1 + $0x168] sm:$0xff]  }
  0x90   :  { %15187 = vmatprep.mubr.bf16.mxu1 %v871_v41  ;;  %15272 = vmatpush3.bf16.msra.mxu1 %v16482_v28  ;;  %v636_v0 = vpop.permute.xlu1 %635  ;;  %v1202_v9 = vor.u32 %v1201_v57, %v1198_v55  ;;  %v17056_v10 = vld [vmem:[#allocation2 + $0x48] sm:$0xff]  ;;  %v875_v15 = vsel %vm860_vm12, %v872_v51, %v874_v60  ;;  %v21090_v22 = vshrl.u32 %v17052_v7, 16  ;;  %v876_v27 = vrot.slane %v17052_v7, 7 }
  0x91   :  { %v1194_v59 = vsel %vm1141_vm13, %v1184_v38, %v1193_v50  ;;  %15374 = vmatpush3.bf16.msra.mxu0 %v16484_v34  ;;  %15273 = vmatprep.subr.bf16.mxu1 %v16487_v1  ;;  %693 = vst.msk [vmem:[#allocation2 + $0x68] sm:$0xff] %vm680_vm11, %v636_v0  ;;  %v1211_v16 = vor.u32 %v1210_v63, %v1207_v62  ;;  %v21085_v19 = vshll.u32 %v17056_v10, 16  ;;  %v21088_v53 = vshrl.u32 %v17056_v10, 16  ;;  %v16499_v38 = vld [vmem:[%s21081_s1 + $0xf0] sm:$0xff]  }
  0x92   :  { %15375 = vmatprep.subr.bf16.mxu0 %v16488_v48  ;;  %v638_v4 = vpop.permute.xlu0 %637  ;;  %v1203_v28 = vsel %vm1141_vm13, %v1193_v50, %v1202_v9  ;;  %v1216_v29 = vrot.slane %v21090_v22, 6  ;;  %v1219_v30 = vrot.slane %v21086_v14, 7  ;;  %v878_v33 = vrot.slane %v17056_v10, 7  ;;  %v17086_v39 = vld [vmem:[#allocation2 + $0x50] sm:$0xff] }
  0x93   :  { %694 = vst.msk [vmem:[#allocation2 + $0x70] sm:$0xff] %vm680_vm11, %v638_v4  ;;  %v1212_v31 = vsel %vm1141_vm13, %v1202_v9, %v1211_v16  ;;  %v1225_v34 = vrot.slane %v21088_v53, 6  ;;  %v1228_v5 = vrot.slane %v21085_v19, 7  ;;  %v877_v44 = vsel %vm860_vm12, %v874_v60, %v876_v27  ;;  %v16502_v60 = vld [vmem:[%s21081_s1 + $0x170] sm:$0xff]  }
  0x94   :  { %15236 = vmatmul.mubr.bf16.gmra.mrb[4].mxu0 %v1185_v54  ;;  %15274 = vmatpush3.bf16.msra.mxu1 %v16487_v1  ;;  %v640_v20 = vpop.permute.xlu1 %639  ;;  %v1220_v1 = vor.u32 %v1219_v30, %v1216_v29  ;;  %v17094_v47 = vld [vmem:[#allocation2 + $0x58] sm:$0xff]  ;;  %v879_v50 = vsel %vm860_vm12, %v876_v27, %v878_v33  ;;  %v17101_v54 = vshrl.u32 %v17086_v39, 16  ;;  %v880_v62 = vrot.slane %v17086_v39, 7 }
  0x95   :  { %15239 = vmatprep.mubr.bf16.mxu0 %v1194_v59  ;;  %15376 = vmatpush3.bf16.msra.mxu0 %v16488_v48  ;;  %695 = vst.msk [vmem:[#allocation2 + $0x78] sm:$0xff] %vm680_vm11, %v640_v20  ;;  %v17097_v48 = vshll.u32 %v17086_v39, 16  ;;  %v1229_v51 = vor.u32 %v1228_v5, %v1225_v34  ;;  %v17104_v55 = vshll.u32 %v17094_v47, 16  ;;  %v16501_v59 = vld [vmem:[%s21081_s1 + $0xf8] sm:$0xff]   ;;  %v17116_v0 = vshrl.u32 %v17094_v47, 16 }
  0x96   :  { %15275 = vmatprep.subr.bf16.mxu1 %v16491_v2  ;;  %15377 = vmatprep.subr.bf16.mxu0 %v16492_v6  ;;  %v642_v24 = vpop.permute.xlu0 %641  ;;  %v1234_v63 = vrot.slane %v17101_v54, 6  ;;  %v882_v9 = vrot.slane %v17094_v47, 7 }
  0x97   :  { %15188 = vmatmul.mubr.bf16.gmra.mrb[8].mxu1 %v873_v8  ;;  %696 = vst.msk [vmem:[#allocation2 + $0x80] sm:$0xff] %vm680_vm11, %v642_v24  ;;  %v1237_v4 = vrot.slane %v17097_v48, 7  ;;  %v1230_v8 = vsel %vm1141_vm13, %v1220_v1, %v1229_v51  ;;  %v1246_v20 = vrot.slane %v17104_v55, 7 }
  0x98   :  { %15191 = vmatprep.mubr.bf16.mxu1 %v875_v15  ;;  %15276 = vmatpush3.bf16.msra.mxu1 %v16491_v2  ;;  %v644_v37 = vpop.permute.xlu1 %643  ;;  %v1221_v2 = vsel %vm1141_vm13, %v1211_v16, %v1220_v1  ;;  %v1243_v15 = vrot.slane %v17116_v0, 6  ;;  %v16504_v16 = vld [vmem:[%s21081_s1 + $0x178] sm:$0xff]   ;;  %v883_v29 = vsel %vm860_vm12, %v880_v62, %v882_v9 }
  0x99   :  { %15378 = vmatpush3.bf16.msra.mxu0 %v16492_v6  ;;  %15277 = vmatprep.subr.bf16.mxu1 %v16495_v21  ;;  %697 = vst.msk [vmem:[#allocation2 + $0x88] sm:$0xff] %vm680_vm11, %v644_v37  ;;  %v17120_v6 = vld [vmem:[#allocation2 + $0x60] sm:$0xff]  ;;  %v1238_v27 = vor.u32 %v1237_v4, %v1234_v63 }
  0x9a   :  { %15379 = vmatprep.subr.bf16.mxu0 %v16496_v26  ;;  %v646_v41 = vpop.permute.xlu0 %645  ;;  %v17135_v24 = vshll.u32 %v17120_v6, 16  ;;  %v1247_v30 = vor.u32 %v1246_v20, %v1243_v15  ;;  %v884_v5 = vrot.slane %v17120_v6, 7  ;;  %v17161_v1 = vld [vmem:[#allocation2 + $0x70] sm:$0xff]  ;;  %v16516_v4 = vld [vmem:[%s21080_s0 + $0xa0] ss:$0 sps:$4 sm:$0x33]  }
  0x9b   :  { %698 = vst.msk [vmem:[#allocation2 + $0x90] sm:$0xff] %vm680_vm11, %v646_v41  ;;  %v363_v46 = vshll.u32 %v16516_v4, 16 }
  0x9c   :  { %15240 = vmatmul.mubr.bf16.gmra.mrb[8].mxu0 %v1203_v28  ;;  %15278 = vmatpush3.bf16.msra.mxu1 %v16495_v21  ;;  %v648_v57 = vpop.permute.xlu1 %647  ;;  %v17129_v21 = vld [vmem:[%s21081_s1 + $0x80] sm:$0xff]   ;;  %v17138_v28 = vld [vmem:[#allocation2 + $0x68] sm:$0xff]  ;;  %v17171_v63 = vld [vmem:[#allocation2 + $0x78] sm:$0xff] }
  0x9d   :  { %15243 = vmatprep.mubr.bf16.mxu0 %v1212_v31  ;;  %15380 = vmatpush3.bf16.msra.mxu0 %v16496_v26  ;;  %699 = vst.msk [vmem:[#allocation2 + $0x98] sm:$0xff] %vm680_vm11, %v648_v57  ;;  %v881_v26 = vsel %vm860_vm12, %v878_v33, %v880_v62  ;;  %v17142_v31 = vshrl.u32 %v17120_v6, 16  ;;  %v17145_v34 = vshll.u32 %v17138_v28, 16  ;;  %v17151_v33 = vld [vmem:[%s21081_s1 + $0x100] sm:$0xff]   ;;  %v17157_v41 = vshrl.u32 %v17138_v28, 16 }
  0x9e   :  { %15279 = vmatprep.subr.bf16.mxu1 %v16499_v38  ;;  %15381 = vmatprep.subr.bf16.mxu0 %v16500_v42  ;;  %v17181_v20 = vshll.u32 %v17171_v63, 16 }
  0x9f   :  { %15192 = vmatmul.mubr.bf16.gmra.mrb[12].mxu1 %v877_v44  ;;  %v1252_v37 = vrot.slane %v17142_v31, 6  ;;  %v886_v44 = vrot.slane %v17138_v28, 7  ;;  %v1261_v57 = vrot.slane %v17157_v41, 6 }
  0xa0   :  { %15195 = vmatprep.mubr.bf16.mxu1 %v879_v50  ;;  %15280 = vmatpush3.bf16.msra.mxu1 %v16499_v38  ;;  %v1255_v38 = vrot.slane %v17135_v24, 7  ;;  %v1248_v50 = vsel %vm1141_vm13, %v1238_v27, %v1247_v30  ;;  %v17205_v14 = vld [vmem:[#allocation2 + $0x88] sm:$0xff] }
  0xa1   :  { %15382 = vmatpush3.bf16.msra.mxu0 %v16500_v42  ;;  %15281 = vmatprep.subr.bf16.mxu1 %v16501_v59  ;;  %v1239_v42 = vsel %vm1141_vm13, %v1229_v51, %v1238_v27  ;;  %v885_v51 = vsel %vm860_vm12, %v882_v9, %v884_v5  ;;  %v888_v9 = vrot.slane %v17161_v1, 7  ;;  %v890_v27 = vrot.slane %v17171_v63, 7 }
  0xa2   :  { %15383 = vmatprep.subr.bf16.mxu0 %v16502_v60  ;;  %v1256_v62 = vor.u32 %v1255_v38, %v1252_v37 }
  0xa3   :  { %v889_v19 = vsel %vm860_vm12, %v886_v44, %v888_v9 }
  0xa4   :  { %15244 = vmatmul.mubr.bf16.gmra.mrb[12].mxu0 %v1221_v2  ;;  %15282 = vmatpush3.bf16.msra.mxu1 %v16501_v59  ;;  %v1264_v59 = vrot.slane %v17145_v34, 7  ;;  %v17174_v2 = vshrl.u32 %v17161_v1, 16  ;;  %v1257_v38 = vsel %vm1141_vm13, %v1247_v30, %v1256_v62  ;;  %v891_v30 = vsel %vm860_vm12, %v888_v9, %v890_v27 }
  0xa5   :  { %15247 = vmatprep.mubr.bf16.mxu0 %v1230_v8  ;;  %15384 = vmatpush3.bf16.msra.mxu0 %v16502_v60  ;;  %v17168_v60 = vshll.u32 %v17161_v1, 16  ;;  %v887_v8 = vsel %vm860_vm12, %v884_v5, %v886_v44  ;;  %v17192_v5 = vshrl.u32 %v17171_v63, 16  ;;  %v17219_v9 = vshrl.u32 %v17205_v14, 16 }
  0xa6   :  { %15319 = vmatprep.subr.bf16.mxu1 %v17129_v21  ;;  %15385 = vmatprep.subr.bf16.mxu0 %v16504_v16  ;;  %v1265_v15 = vor.u32 %v1264_v59, %v1261_v57  ;;  %v1282_v59 = vrot.slane %v17181_v20, 7 }
  0xa7   :  { %15196 = vmatmul.mubr.bf16.gmra.mrb[16].mxu1 %v881_v26  ;;  %v1876_v26 = vrot.slane %v1160_v56, 7  ;;  %v1273_v37 = vrot.slane %v17168_v60, 7  ;;  %v1279_v57 = vrot.slane %v17192_v5, 6 }
  0xa8   :  { %15199 = vmatprep.mubr.bf16.mxu1 %v883_v29  ;;  %v1270_v29 = vrot.slane %v17174_v2, 6  ;;  %v1266_v56 = vsel %vm1141_vm13, %v1256_v62, %v1265_v15 }
  0xa9   :  { %15386 = vmatpush3.bf16.msra.mxu0 %v16504_v16  ;;  %v17183_v16 = vld [vmem:[#allocation2 + $0x80] sm:$0xff]  ;;  %v1283_v35 = vor.u32 %v1282_v59, %v1279_v57  ;;  %v17230_v12 = vor.u32 %v1876_v26, %v1163_v61  ;;  %v806_v57 = vld [vmem:[#allocation2 + $0x90] sm:$0x7f]  ;;  %v1900_v59 = vrot.slane %v1187_v32, 7  ;;  %v21140_v32 = vshll.u32 %v16978_v13, 16 }
  0xaa   :  { %15423 = vmatprep.subr.bf16.mxu0 %v17151_v33  ;;  %v1274_v53 = vor.u32 %v1273_v37, %v1270_v29  ;;  %v892_v40 = vrot.slane %v17183_v16, 7  ;;  %v17222_v29 = vshll.u32 %v17205_v14, 16  ;;  %v1892_v37 = vrot.slane %v1178_v17, 7 }
  0xab   :  { %21138 = vst [vmem:[#allocation6_spill] sm:$0xff] %v17230_v12  ;;  %v1297_v17 = vrot.slane %v17219_v9, 6 }
  0xac   :  { %15248 = vmatmul.mubr.bf16.gmra.mrb[16].mxu0 %v1239_v42  ;;  %v17196_v42 = vshrl.u32 %v17183_v16, 16 }
  0xad   :  { %15251 = vmatprep.mubr.bf16.mxu0 %v1248_v50  ;;  %v17199_v50 = vshll.u32 %v17183_v16, 16 }
  0xae   :  { %v1288_v62 = vrot.slane %v17196_v42, 6 }
  0xaf   :  { %15200 = vmatmul.mubr.bf16.gmra.mrb[20].mxu1 %v885_v51  ;;  %v420_v51 = vld [vmem:[#allocation2 + $0xa8] sm:$0x1]  ;;  %v1291_v44 = vrot.slane %v17199_v50, 7 }
  0xb0   :  { %15203 = vmatprep.mubr.bf16.mxu1 %v887_v8  ;;  %v360_v8 = vshrl.u32 %v16516_v4, 16  ;;  %v1884_v4 = vrot.slane %v1169_v11, 7  ;;  %v1275_v11 = vsel %vm1141_vm13, %v1265_v15, %v1274_v53  ;;  %v1284_v15 = vsel %vm1141_vm13, %v1274_v53, %v1283_v35 }
  0xb2   :  { %v362_v52 = vrot.slane %v360_v8, 1  ;;  %v650_v8 = vpop.permute.xlu0 %649 }
  0xb4   :  { %15252 = vmatmul.mubr.bf16.gmra.mrb[20].mxu0 %v1257_v38  ;;  %v365_v38 = vrot.slane %v363_v46, 2  ;;  %v894_v46 = vrot.slane %v17205_v14, 7 }
  0xb5   :  { %15255 = vmatprep.mubr.bf16.mxu0 %v1266_v56  ;;  %v421_v56 = vsel %vm17211_vm0, %v362_v52, %v420_v51  ;;  %v1300_v51 = vrot.slane %v17222_v29, 7 }
  0xb6   :  { %v366_v18 = vor.u32 %v365_v38, %v362_v52  ;;  %422 = vst [vmem:[#allocation2 + $0xa8] sm:$0x1] %v421_v56  ;;  %v1908_v52 = vrot.slane %v1196_v45, 7  ;;  %v1304_v38 = vshrl.u32 %v806_v57, 16  ;;  %v21143_v56 = vshll.u32 %v16991_v25, 16 }
  0xb7   :  { %15204 = vmatmul.mubr.bf16.gmra.mrb[24].mxu1 %v889_v19  ;;  %v21139_v19 = vshll.u32 %v16967_v3, 16 }
  0xb8   :  { %15207 = vmatprep.mubr.bf16.mxu1 %v891_v30  ;;  %v367_v61 = vsel %vm179_vm4, %v16944_v58, %v366_v18  ;;  %v1895_v30 = vor.u32 %v1892_v37, %v21140_v32  ;;  %v893_v58 = vsel %vm860_vm12, %v890_v27, %v892_v40  ;;  %v1307_v18 = vshll.u32 %v806_v57, 16  ;;  %v652_v27 = vpop.permute.xlu1 %651 }
  0xb9   :  { %v1887_v22 = vor.u32 %v1884_v4, %v21139_v19  ;;  %416 = vst.msk [vmem:[#allocation2 + $0xa0] sm:$0xff] %vm396_vm5, %v367_v61  ;;  %v1903_v61 = vor.u32 %v1900_v59, %v21143_v56  ;;  %v1292_v19 = vor.u32 %v1291_v44, %v1288_v62  ;;  %v21144_v32 = vshrl.u32 %v17020_v43, 16 }
  0xba   :  { %700 = vst.msk [vmem:[#allocation2 + $0xa0] sm:$0xff] %vm680_vm11, %v650_v8  ;;  %v17254_v53 = vsel %vm418_vm14, %v1884_v4, %v1895_v30  ;;  %v21145_v8 = vshrl.u32 %v17052_v7, 16  ;;  %v21148_v4 = vshll.u32 %v17009_v36, 16  ;;  %v1301_v30 = vor.u32 %v1300_v51, %v1297_v17 }
  0xbb   :  { %v17250_v45 = vsel %vm418_vm14, %v1876_v26, %v1887_v22  ;;  %21142 = vst [vmem:[#allocation8_spill] sm:$0xff] %v17254_v53  ;;  %v1916_v23 = vrot.slane %v21144_v32, 7  ;;  %v895_v22 = vsel %vm860_vm12, %v892_v40, %v894_v46  ;;  %v17271_v62 = vsel %vm418_vm14, %v1892_v37, %v1903_v61 }
  0xbc   :  { %21141 = vst [vmem:[#allocation7_spill] sm:$0xff] %v17250_v45  ;;  %15256 = vmatmul.mubr.bf16.gmra.mrb[24].mxu0 %v1275_v11  ;;  %v1924_v12 = vrot.slane %v21145_v8, 7  ;;  %v1911_v11 = vor.u32 %v1908_v52, %v21148_v4  ;;  %v896_v44 = vrot.slane %v806_v57, 7  ;;  %v1309_v8 = vrot.slane %v1307_v18, 7 }
  0xbd   :  { %15259 = vmatprep.mubr.bf16.mxu0 %v1284_v15  ;;  %v1306_v15 = vrot.slane %v1304_v38, 6  ;;  %v703_v56 = vld [vmem:[#allocation2 + $0xa8] sm:$0x1]  ;;  %v21149_v53 = vshrl.u32 %v17056_v10, 16  ;;  %v1293_v40 = vsel %vm1141_vm13, %v1283_v35, %v1292_v19  ;;  %v1940_v37 = vrot.slane %v17101_v54, 7 }
  0xbe   :  { %v17274_v32 = vsel %vm418_vm14, %v1900_v59, %v1911_v11  ;;  %v704_v4 = vsel %vm17263_vm2, %v652_v27, %v703_v56  ;;  %v21150_v57 = vshll.u32 %v17020_v43, 16  ;;  %v21151_v59 = vshll.u32 %v17052_v7, 16  ;;  %vm18347_vm2 = vmand %vm5319_vm1, %vm23_vm7 }
  0xbf   :  { %15208 = vmatmul.mubr.bf16.gmra.mrb[28].mxu1 %v893_v58  ;;  %v1932_v45 = vrot.slane %v21149_v53, 7  ;;  %705 = vst [vmem:[#allocation2 + $0xa8] sm:$0x1] %v704_v4  ;;  %v1302_v38 = vsel %vm1141_vm13, %v1292_v19, %v1301_v30  ;;  %v2387_v58 = vld [vmem:[#allocation2 + $0x18] sm:$0xfe]  ;;  %v1948_v18 = vrot.slane %v17116_v0, 7  ;;  %v1310_v35 = vor.u32 %v1309_v8, %v1306_v15 }
  0xc0   :  { %15211 = vmatprep.mubr.bf16.mxu1 %v895_v22  ;;  %v1919_v17 = vor.u32 %v1916_v23, %v21150_v57  ;;  %v1927_v51 = vor.u32 %v1924_v12, %v21151_v59  ;;  %v1956_v26 = vrot.slane %v17142_v31, 7  ;;  %v21152_v27 = vshll.u32 %v17056_v10, 16 }
  0xc1   :  { %v897_v19 = vsel %vm860_vm12, %v894_v46, %v896_v44  ;;  %vm2722_vm4 = vsmask.f32 7424  ;;  %v1943_v22 = vor.u32 %v1940_v37, %v17097_v48  ;;  %v2442_v56 = vrot.slane %v2387_v58, 1 }
  0xc2   :  { %v17289_v53 = vsel %vm418_vm14, %v1908_v52, %v1919_v17  ;;  %v17292_v61 = vsel %vm418_vm14, %v1916_v23, %v1927_v51  ;;  %v1935_v11 = vor.u32 %v1932_v45, %v21152_v27  ;;  %v2443_v52 = vrot.slane %v16978_v13, 1  ;;  %vm18695_vm7 = vmand %vm680_vm11, %vm2722_vm4 }
  0xc3   :  { %v1964_v15 = vrot.slane %v17157_v41, 7  ;;  %v17305_v8 = vsel %vm418_vm14, %v1932_v45, %v1943_v22  ;;  %v2797_v4 = vrot.slane %v17135_v24, 1  ;;  %v1311_v46 = vsel %vm1141_vm13, %v1301_v30, %v1310_v35  ;;  %v16505_v22 = vld [vmem:[%s21081_s1 + $0x88] sm:$0xff]  }
  0xc4   :  { %15260 = vmatmul.mubr.bf16.gmra.mrb[28].mxu0 %v1293_v40  ;;  %v17301_v23 = vsel %vm418_vm14, %v1924_v12, %v1935_v11  ;;  %v1951_v40 = vor.u32 %v1948_v18, %v17104_v55  ;;  %v2445_v44 = vrot.slane %v16991_v25, 1  ;;  %v1972_v57 = vrot.slane %v17174_v2, 7 }
  0xc5   :  { %15263 = vmatprep.mubr.bf16.mxu0 %v1302_v38  ;;  %v1959_v17 = vor.u32 %v1956_v26, %v17135_v24  ;;  %v1980_v12 = vrot.slane %v17192_v5, 7  ;;  %v2801_v59 = vor.u32 %v2797_v4, %v17142_v31  ;;  %v2805_v51 = vrot.slane %v17145_v34, 1 }
  0xc6   :  { %v17316_v45 = vsel %vm418_vm14, %v1940_v37, %v1951_v40  ;;  %v1988_v30 = vrot.slane %v17196_v42, 7  ;;  %v2813_v58 = vrot.slane %v17168_v60, 1  ;;  %v1967_v27 = vor.u32 %v1964_v15, %v17145_v34 }
  0xc7   :  { %15212 = vmatmul.mubr.bf16.gmra.mrb[32].mxu1 %v897_v19  ;;  %v17324_v38 = vsel %vm418_vm14, %v1948_v18, %v1959_v17  ;;  %v17329_v35 = vsel %vm2722_vm4, %v2801_v59, %v2805_v51  ;;  %v2809_v37 = vor.u32 %v2805_v51, %v17157_v41  ;;  %v1996_v31 = vrot.slane %v17219_v9, 7  ;;  %v17356_v59 = vld [vmem:[#allocation2 + $0xa0] sm:$0xff] }
  0xc8   :  { %15283 = vmatprep.mubr.bf16.mxu1 %v16956_v49  ;;  %v2444_v49 = vsel %vm2441_vm3, %v2442_v56, %v2443_v52  ;;  %v1975_v11 = vor.u32 %v1972_v57, %v17168_v60  ;;  %v2817_v19 = vor.u32 %v2813_v58, %v17174_v2  ;;  %v2821_v18 = vrot.slane %v17181_v20, 1 }
  0xc9   :  { %v17341_v56 = vsel %vm2722_vm4, %v2809_v37, %v2813_v58  ;;  %v17344_v41 = vsel %vm418_vm14, %v1956_v26, %v1967_v27  ;;  %v2829_v34 = vrot.slane %v17199_v50, 1  ;;  %v1983_v40 = vor.u32 %v1980_v12, %v17181_v20 }
  0xca   :  { %v17349_v60 = vsel %vm418_vm14, %v1964_v15, %v1975_v11  ;;  %v17352_v2 = vsel %vm2722_vm4, %v2817_v19, %v2821_v18  ;;  %v1991_v17 = vor.u32 %v1988_v30, %v17199_v50  ;;  %v2837_v58 = vrot.slane %v17222_v29, 1 }
  0xcb   :  { %v17359_v51 = vsel %vm418_vm14, %v1972_v57, %v1983_v40  ;;  %v2833_v26 = vor.u32 %v2829_v34, %v17196_v42  ;;  %v2447_v20 = vrot.slane %v17009_v36, 1  ;;  %v1999_v50 = vor.u32 %v1996_v31, %v17222_v29  ;;  %v16507_v57 = vld [vmem:[%s21081_s1 + $0x90] sm:$0xff]   ;;  %v16511_v40 = vld [vmem:[%s21081_s1 + $0xa0] sm:$0xff]  }
  0xcc   :  { %15264 = vmatmul.mubr.bf16.gmra.mrb[32].mxu0 %v1311_v46  ;;  %v2825_v46 = vor.u32 %v2821_v18, %v17192_v5  ;;  %v17369_v5 = vsel %vm418_vm14, %v1980_v12, %v1991_v17  ;;  %v2859_v29 = vshll.u32 %v17356_v59, 16  ;;  %v2863_v37 = vshrl.u32 %v17356_v59, 16 }
  0xcd   :  { %15387 = vmatprep.mubr.bf16.mxu0 %v2444_v49  ;;  %v17377_v42 = vsel %vm2722_vm4, %v2833_v26, %v2837_v58  ;;  %v17386_v12 = vsel %vm418_vm14, %v1988_v30, %v1999_v50  ;;  %v17393_v49 = vld [vmem:[#allocation2 + $0xa8] sm:$0x1]  ;;  %v2448_v27 = vsel %vm2441_vm3, %v2445_v44, %v2447_v20  ;;  %v2453_v26 = vrot.slane %v17056_v10, 1  ;;  %v16515_v50 = vld [vmem:[%s21081_s1 + $0xb0] sm:$0xff]  }
  0xce   :  { %v17366_v15 = vsel %vm2722_vm4, %v2825_v46, %v2829_v34  ;;  %v17397_v11 = vrot.slane %v2859_v29, 1  ;;  %v2867_v30 = vshll.u32 %v17393_v49, 16  ;;  %v2449_v34 = vrot.slane %v17020_v43, 1  ;;  %v16517_v29 = vld [vmem:[%s21081_s1 + $0x128] sm:$0xff]  }
  0xcf   :  { %15284 = vmatmul.mubr.bf16.vlgmr.msra.gmra.mrb[36].mxu1 %v16967_v3  ;;  %v17380_v3 = vor.u32 %v2837_v58, %v17219_v9  ;;  %v16514_v58 = vld [vmem:[%s21081_s1 + $0x120] sm:$0xff]  }
  0xd0   :  { %15320 = vmatpush3.bf16.msra.mxu1 %v17129_v21  ;;  %15287 = vmatprep.mubr.bf16.mxu1 %v16978_v13  ;;  %v2446_v21 = vsel %vm2441_vm3, %v2443_v52, %v2445_v44  ;;  %v16508_v13 = vld [vmem:[%s21081_s1 + $0x108] sm:$0xff]   ;;  %v16509_v52 = vld [vmem:[%s21081_s1 + $0x98] sm:$0xff]   ;;  %v2865_v19 = vor.u32 %v2863_v37, %v17397_v11  ;;  %v2869_v18 = vrot.slane %v2867_v30, 1  ;;  %v16510_v44 = vld [vmem:[%s21081_s1 + $0x110] sm:$0xff]   ;;  %v2450_v46 = vsel %vm2441_vm3, %v2447_v20, %v2449_v34 }
  0xd1   :  { %15321 = vmatprep.subr.bf16.mxu1 %v16505_v22  ;;  %v2455_v20 = vrot.slane %v17086_v39, 1  ;;  %v2459_v37 = vrot.slane %v17120_v6, 1  ;;  %v16520_v30 = vld [vmem:[%s21081_s1 + $0x138] sm:$0xff]  }
  0xd4   :  { %15388 = vmatmul.mubr.bf16.vlgmr.msra.gmra.mrb[36].mxu0 %v2446_v21  ;;  %15322 = vmatpush3.bf16.msra.mxu1 %v16505_v22  ;;  %v2451_v22 = vrot.slane %v17052_v7, 1  ;;  %v2457_v21 = vrot.slane %v17094_v47, 1 }
  0xd5   :  { %15391 = vmatprep.mubr.bf16.mxu0 %v2448_v27  ;;  %15424 = vmatpush3.bf16.msra.mxu0 %v17151_v33  ;;  %v17412_v33 = vsel %vm2722_vm4, %v2865_v19, %v2869_v18 }
  0xd6   :  { %15323 = vmatprep.subr.bf16.mxu1 %v16507_v57  ;;  %15425 = vmatprep.subr.bf16.mxu0 %v16508_v13  ;;  %v2452_v17 = vsel %vm2441_vm3, %v2449_v34, %v2451_v22  ;;  %v2458_v27 = vsel %vm2441_vm3, %v2455_v20, %v2457_v21  ;;  %v2465_v34 = vrot.slane %v17171_v63, 1 }
  0xd7   :  { %15288 = vmatmul.mubr.bf16.gmra.mrb[40].mxu1 %v16991_v25  ;;  %v16512_v25 = vld [vmem:[%s21081_s1 + $0x118] sm:$0xff]  }
  0xd8   :  { %15291 = vmatprep.mubr.bf16.mxu1 %v17009_v36  ;;  %15324 = vmatpush3.bf16.msra.mxu1 %v16507_v57  ;;  %v16513_v36 = vld [vmem:[%s21081_s1 + $0xa8] sm:$0xff]   ;;  %v2454_v57 = vsel %vm2441_vm3, %v2451_v22, %v2453_v26  ;;  %v2469_v22 = vrot.slane %v17205_v14, 1 }
  0xd9   :  { %15426 = vmatpush3.bf16.msra.mxu0 %v16508_v13  ;;  %15325 = vmatprep.subr.bf16.mxu1 %v16509_v52  ;;  %v16519_v13 = vld [vmem:[%s21081_s1 + $0x130] sm:$0xff]  }
  0xda   :  { %15427 = vmatprep.subr.bf16.mxu0 %v16510_v44 }
  0xdc   :  { %15392 = vmatmul.mubr.bf16.gmra.mrb[40].mxu0 %v2450_v46  ;;  %15326 = vmatpush3.bf16.msra.mxu1 %v16509_v52  ;;  %v2460_v52 = vsel %vm2441_vm3, %v2457_v21, %v2459_v37 }
  0xdd   :  { %15395 = vmatprep.mubr.bf16.mxu0 %v2452_v17  ;;  %15428 = vmatpush3.bf16.msra.mxu0 %v16510_v44  ;;  %v2467_v44 = vrot.slane %v17183_v16, 1  ;;  %v2368_v17 = vld [vmem:[#allocation2 + $0x18] sm:$0xff] }
  0xde   :  { %15327 = vmatprep.subr.bf16.mxu1 %v16511_v40  ;;  %15429 = vmatprep.subr.bf16.mxu0 %v16512_v25 }
  0xdf   :  { %15292 = vmatmul.mubr.bf16.gmra.mrb[44].mxu1 %v17020_v43  ;;  %v2456_v43 = vsel %vm2441_vm3, %v2453_v26, %v2455_v20  ;;  %v2475_v26 = vrot.slane %v17356_v59, 1  ;;  %v2726_v20 = vshll.u32 %v2368_v17, 16  ;;  %v2477_v59 = vrot.slane %v17393_v49, 1 }
  0xe0   :  { %15295 = vmatprep.mubr.bf16.mxu1 %v17052_v7  ;;  %15328 = vmatpush3.bf16.msra.mxu1 %v16511_v40  ;;  %v16518_v7 = vld [vmem:[%s21081_s1 + $0xb8] sm:$0xff]   ;;  %v17469_v40 = vld [vmem:[#allocation2 + $0x90] sm:$0xff] }
  0xe1   :  { %15430 = vmatpush3.bf16.msra.mxu0 %v16512_v25  ;;  %15329 = vmatprep.subr.bf16.mxu1 %v16513_v36  ;;  %v2471_v46 = vrot.slane %v17469_v40, 1  ;;  %v1591_v25 = vld [vmem:[#allocation2 + $0x8] sm:$0x80] }
  0xe2   :  { %15431 = vmatprep.subr.bf16.mxu0 %v16514_v58 }
  0xe4   :  { %15396 = vmatmul.mubr.bf16.gmra.mrb[44].mxu0 %v2454_v57  ;;  %15330 = vmatpush3.bf16.msra.mxu1 %v16513_v36  ;;  %v17476_v36 = vld [vmem:[#allocation2 + $0x98] sm:$0xff] }
  0xe5   :  { %15399 = vmatprep.mubr.bf16.mxu0 %v2456_v43  ;;  %15432 = vmatpush3.bf16.msra.mxu0 %v16514_v58  ;;  %v2473_v58 = vrot.slane %v17476_v36, 1  ;;  %v2728_v43 = vrot.slane %v2726_v20, 1  ;;  %v16621_v20 = vld [vmem:[#allocation2 + $0x40] sm:$0xff] }
  0xe6   :  { %15331 = vmatprep.subr.bf16.mxu1 %v16515_v50  ;;  %15433 = vmatprep.subr.bf16.mxu0 %v16517_v29 }
  0xe7   :  { %15296 = vmatmul.mubr.bf16.gmra.mrb[48].mxu1 %v17056_v10  ;;  %v2461_v10 = vrot.slane %v17138_v28, 1 }
  0xe8   :  { %15299 = vmatprep.mubr.bf16.mxu1 %v17086_v39  ;;  %15332 = vmatpush3.bf16.msra.mxu1 %v16515_v50  ;;  %v2463_v39 = vrot.slane %v17161_v1, 1  ;;  %v2474_v50 = vsel %vm2441_vm3, %v2471_v46, %v2473_v58 }
  0xe9   :  { %15434 = vmatpush3.bf16.msra.mxu0 %v16517_v29  ;;  %15333 = vmatprep.subr.bf16.mxu1 %v16518_v7  ;;  %v2462_v19 = vsel %vm2441_vm3, %v2459_v37, %v2461_v10  ;;  %v2724_v29 = vshrl.u32 %v2368_v17, 16 }
  0xea   :  { %15435 = vmatprep.subr.bf16.mxu0 %v16519_v13  ;;  %v2464_v18 = vsel %vm2441_vm3, %v2461_v10, %v2463_v39 }
  0xeb   :  { %v2729_v37 = vor.u32 %v2728_v43, %v2724_v29 }
  0xec   :  { %15400 = vmatmul.mubr.bf16.gmra.mrb[48].mxu0 %v2458_v27  ;;  %15334 = vmatpush3.bf16.msra.mxu1 %v16518_v7  ;;  %v16617_v7 = vld [vmem:[#allocation2 + $0x20] sm:$0xff] }
  0xed   :  { %15403 = vmatprep.mubr.bf16.mxu0 %v2460_v52  ;;  %15436 = vmatpush3.bf16.msra.mxu0 %v16519_v13  ;;  %v2731_v21 = vshll.u32 %v16617_v7, 16  ;;  %v16618_v52 = vld [vmem:[#allocation2 + $0x28] sm:$0xff] }
  0xee   :  { %15437 = vmatprep.subr.bf16.mxu0 %v16520_v30  ;;  %v2739_v10 = vshll.u32 %v16618_v52, 16 }
  0xef   :  { %15300 = vmatmul.mubr.bf16.gmra.mrb[52].mxu1 %v17094_v47  ;;  %v2466_v47 = vsel %vm2441_vm3, %v2463_v39, %v2465_v34  ;;  %v2733_v27 = vrot.slane %v2731_v21, 1  ;;  %v2735_v39 = vshrl.u32 %v16617_v7, 16  ;;  %v16622_v7 = vld [vmem:[#allocation2 + $0x48] sm:$0xff] }
  0xf0   :  { %15303 = vmatprep.mubr.bf16.mxu1 %v17120_v6  ;;  %v2468_v6 = vsel %vm2441_vm3, %v2465_v34, %v2467_v44  ;;  %v16619_v34 = vld [vmem:[#allocation2 + $0x30] sm:$0xff]  ;;  %v2741_v49 = vrot.slane %v2739_v10, 1  ;;  %v2771_v21 = vshll.u32 %v16622_v7, 16 }
  0xf1   :  { %15438 = vmatpush3.bf16.msra.mxu0 %v16520_v30  ;;  %v2478_v30 = vsel %vm2441_vm3, %v2475_v26, %v2477_v59 }
  0xf4   :  { %15404 = vmatmul.mubr.bf16.gmra.mrb[52].mxu0 %v2462_v19  ;;  %v2734_v19 = vsel %vm2722_vm4, %v2729_v37, %v2733_v27  ;;  %v2775_v37 = vshrl.u32 %v16622_v7, 16 }
  0xf5   :  { %15407 = vmatprep.mubr.bf16.mxu0 %v2464_v18  ;;  %v2743_v18 = vshrl.u32 %v16618_v52, 16 }
  0xf7   :  { %15304 = vmatmul.mubr.bf16.gmra.mrb[56].mxu1 %v17138_v28  ;;  %v2470_v28 = vsel %vm2441_vm3, %v2467_v44, %v2469_v22  ;;  %v2747_v44 = vshll.u32 %v16619_v34, 16 }
  0xf8   :  { %15307 = vmatprep.mubr.bf16.mxu1 %v17161_v1  ;;  %v2472_v1 = vsel %vm2441_vm3, %v2469_v22, %v2471_v46  ;;  %v2745_v22 = vor.u32 %v2743_v18, %v2741_v49 }
  0xf9   :  { %v2749_v46 = vrot.slane %v2747_v44, 1 }
  0xfc   :  { %15408 = vmatmul.mubr.bf16.gmra.mrb[56].mxu0 %v2466_v47  ;;  %v2737_v47 = vor.u32 %v2735_v39, %v2733_v27  ;;  %v2773_v27 = vrot.slane %v2771_v21, 1  ;;  %v2789_v39 = vrot.slane %v17104_v55, 1  ;;  %v2005_v55 = vshll.u32 %v17469_v40, 16 }
  0xfd   :  { %15411 = vmatprep.mubr.bf16.mxu0 %v2468_v6  ;;  %v21154_v6 = vld [vmem:[#allocation7_spill] sm:$0xff] }
  0xfe   :  { %v2742_v17 = vsel %vm2722_vm4, %v2737_v47, %v2741_v49  ;;  %v2777_v52 = vor.u32 %v2775_v37, %v2773_v27  ;;  %v2793_v18 = vor.u32 %v2789_v39, %v17116_v0  ;;  %v2845_v24 = vrot.slane %v2005_v55, 1 }
  0xff   :  { %15308 = vmatmul.mubr.bf16.gmra.mrb[60].mxu1 %v17171_v63  ;;  %v1870_v63 = vshrl.u32 %v1591_v25, 16 }
 0x100   :  { %15311 = vmatprep.mubr.bf16.mxu1 %v17183_v16  ;;  %v2476_v16 = vsel %vm2441_vm3, %v2473_v58, %v2475_v26  ;;  %v2751_v26 = vshrl.u32 %v16619_v34, 16  ;;  %v2750_v58 = vsel %vm2722_vm4, %v2745_v22, %v2749_v46 }
 0x101   :  { %v1872_v57 = vrot.slane %v1870_v63, 7 }
 0x104   :  { %15412 = vmatmul.mubr.bf16.gmra.mrb[60].mxu0 %v2470_v28  ;;  %v21155_v28 = vld [vmem:[#allocation8_spill] sm:$0xff] }
 0x105   :  { %15415 = vmatprep.mubr.bf16.mxu0 %v2472_v1  ;;  %v16620_v1 = vld [vmem:[#allocation2 + $0x38] sm:$0xff] }
 0x106   :  { %v2755_v25 = vshll.u32 %v16620_v1, 16  ;;  %v2759_v63 = vshrl.u32 %v16620_v1, 16 }
 0x107   :  { %15312 = vmatmul.mubr.bf16.gmra.mrb[64].mxu1 %v17205_v14  ;;  %v21153_v14 = vld [vmem:[#allocation6_spill] sm:$0xff] }
 0x108   :  { %15315 = vmatprep.mubr.bf16.mxu1 %v17469_v40  ;;  %v1880_v13 = vsel %vm418_vm14, %v1872_v57, %v21153_v14  ;;  %v2753_v57 = vor.u32 %v2751_v26, %v2749_v46  ;;  %v2767_v14 = vshrl.u32 %v16621_v20, 16 }
 0x10c   :  { %15416 = vmatmul.mubr.bf16.gmra.mrb[64].mxu0 %v2474_v50  ;;  %v2757_v50 = vrot.slane %v2755_v25, 1 }
 0x10d   :  { %15419 = vmatprep.mubr.bf16.mxu0 %v2476_v16  ;;  %v2763_v16 = vshll.u32 %v16621_v20, 16 }
 0x10e   :  { %v2761_v29 = vor.u32 %v2759_v63, %v2757_v50  ;;  %v2758_v59 = vsel %vm2722_vm4, %v2753_v57, %v2757_v50 }
 0x10f   :  { %15316 = vmatmul.mubr.bf16.gmra.mrb[68].mxu1 %v17476_v36  ;;  %v2765_v43 = vrot.slane %v2763_v16, 1 }
 0x110   :  { %15335 = vmatprep.mubr.bf16.mxu1 %v1880_v13 }
 0x111   :  { %v2766_v13 = vsel %vm2722_vm4, %v2761_v29, %v2765_v43 }
 0x114   :  { %15420 = vmatmul.mubr.bf16.gmra.mrb[68].mxu0 %v2478_v30  ;;  %v2769_v30 = vor.u32 %v2767_v14, %v2765_v43 }
 0x115   :  { %15439 = vmatprep.mubr.bf16.mxu0 %v2734_v19 }
 0x117   :  { %15336 = vmatmul.mubr.bf16.vlgmr.msra.gmra.mrb[36].mxu1 %v21154_v6  ;;  %v11477_v6 = vld [vmem:[#allocation2 + $0xa8] sm:$0x1] }
 0x118   :  { %15339 = vmatprep.mubr.bf16.mxu1 %v21155_v28  ;;  %v11956_v25 = vshll.u32 %v11477_v6, 16 }
 0x11a   :  { %v11958_v63 = vrot.slane %v11956_v25, 1 }
 0x11c   :  { %15440 = vmatmul.mubr.bf16.vlgmr.msra.gmra.mrb[36].mxu0 %v2742_v17 }
 0x11d   :  { %15443 = vmatprep.mubr.bf16.mxu0 %v2750_v58 }
 0x11f   :  { %15340 = vmatmul.mubr.bf16.gmra.mrb[40].mxu1 %v17271_v62  ;;  %v2781_v62 = vrot.slane %v17097_v48, 1 }
 0x120   :  { %15343 = vmatprep.mubr.bf16.mxu1 %v17274_v32  ;;  %v2774_v32 = vsel %vm2722_vm4, %v2769_v30, %v2773_v27 }
 0x121   :  { %v2782_v10 = vsel %vm2722_vm4, %v2777_v52, %v2781_v62  ;;  %v2785_v19 = vor.u32 %v2781_v62, %v17101_v54  ;;  %v2002_v54 = vshrl.u32 %v17469_v40, 16 }
 0x123   :  { %v2790_v48 = vsel %vm2722_vm4, %v2785_v19, %v2789_v39  ;;  %v2004_v0 = vrot.slane %v2002_v54, 7 }
 0x124   :  { %15444 = vmatmul.mubr.bf16.gmra.mrb[40].mxu0 %v2758_v59 }
 0x125   :  { %15447 = vmatprep.mubr.bf16.mxu0 %v2766_v13 }
 0x127   :  { %15344 = vmatmul.mubr.bf16.gmra.mrb[44].mxu1 %v17289_v53  ;;  %v2798_v53 = vsel %vm2722_vm4, %v2793_v18, %v2797_v4  ;;  %v2007_v4 = vor.u32 %v2005_v55, %v2004_v0 }
 0x128   :  { %15347 = vmatprep.mubr.bf16.mxu1 %v17292_v61  ;;  %v2013_v61 = vshll.u32 %v17476_v36, 16 }
 0x12c   :  { %15448 = vmatmul.mubr.bf16.gmra.mrb[44].mxu0 %v2774_v32 }
 0x12d   :  { %15451 = vmatprep.mubr.bf16.mxu0 %v2782_v10 }
 0x12f   :  { %15348 = vmatmul.mubr.bf16.gmra.mrb[48].mxu1 %v17301_v23  ;;  %v2010_v23 = vshrl.u32 %v17476_v36, 16  ;;  %v11476_v36 = vld [vmem:[#allocation2 + $0xa0] sm:$0xff] }
 0x130   :  { %15351 = vmatprep.mubr.bf16.mxu1 %v17305_v8  ;;  %v2846_v8 = vsel %vm2722_vm4, %v17380_v3, %v2845_v24  ;;  %v11948_v49 = vshll.u32 %v11476_v36, 16  ;;  %v11952_v1 = vshrl.u32 %v11476_v36, 16 }
 0x132   :  { %v17540_v28 = vrot.slane %v11948_v49, 1 }
 0x134   :  { %15452 = vmatmul.mubr.bf16.gmra.mrb[48].mxu0 %v2790_v48  ;;  %21156 = vst [vmem:[#allocation6_spill] sm:$0xff] %v17540_v28  ;;  %v11954_v58 = vor.u32 %v11952_v1, %v17540_v28 }
 0x135   :  { %15455 = vmatprep.mubr.bf16.mxu0 %v2798_v53 }
 0x136   :  { %v17546_v57 = vsel %vm2722_vm4, %v11954_v58, %v11958_v63 }
 0x137   :  { %15352 = vmatmul.mubr.bf16.gmra.mrb[52].mxu1 %v17316_v45  ;;  %v2853_v45 = vrot.slane %v2013_v61, 1  ;;  %21157 = vst [vmem:[#allocation7_spill] sm:$0xff] %v17546_v57 }
 0x138   :  { %15355 = vmatprep.mubr.bf16.mxu1 %v17324_v38  ;;  %v2012_v38 = vrot.slane %v2010_v23, 7 }
 0x13c   :  { %15456 = vmatmul.mubr.bf16.gmra.mrb[52].mxu0 %v17329_v35  ;;  %v2849_v35 = vor.u32 %v2845_v24, %v2002_v54 }
 0x13d   :  { %15459 = vmatprep.mubr.bf16.mxu0 %v17341_v56  ;;  %v2008_v56 = vsel %vm418_vm14, %v1996_v31, %v2007_v4 }
 0x13f   :  { %15356 = vmatmul.mubr.bf16.gmra.mrb[56].mxu1 %v17344_v41  ;;  %v2857_v41 = vor.u32 %v2853_v45, %v2010_v23 }
 0x140   :  { %15359 = vmatprep.mubr.bf16.mxu1 %v17349_v60  ;;  %v2854_v60 = vsel %vm2722_vm4, %v2849_v35, %v2853_v45 }
 0x144   :  { %15460 = vmatmul.mubr.bf16.gmra.mrb[56].mxu0 %v17352_v2  ;;  %v2015_v2 = vor.u32 %v2013_v61, %v2012_v38 }
 0x145   :  { %15463 = vmatprep.mubr.bf16.mxu0 %v17366_v15 }
 0x146   :  { %v2016_v15 = vsel %vm418_vm14, %v2004_v0, %v2015_v2 }
 0x147   :  { %15360 = vmatmul.mubr.bf16.gmra.mrb[60].mxu1 %v17359_v51  ;;  %v2862_v51 = vsel %vm2722_vm4, %v2857_v41, %v17397_v11 }
 0x148   :  { %15363 = vmatprep.mubr.bf16.mxu1 %v17369_v5 }
 0x14c   :  { %15464 = vmatmul.mubr.bf16.gmra.mrb[60].mxu0 %v17377_v42 }
 0x14d   :  { %15467 = vmatprep.mubr.bf16.mxu0 %v2846_v8 }
 0x14f   :  { %15364 = vmatmul.mubr.bf16.gmra.mrb[64].mxu1 %v17386_v12 }
 0x150   :  { %15367 = vmatprep.mubr.bf16.mxu1 %v2008_v56 }
 0x154   :  { %15468 = vmatmul.mubr.bf16.gmra.mrb[64].mxu0 %v2854_v60 }
 0x155   :  { %15471 = vmatprep.mubr.bf16.mxu0 %v2862_v51 }
 0x157   :  { %15368 = vmatmul.mubr.bf16.gmra.mrb[68].mxu1 %v2016_v15 }
 0x15a   :  { %v15181_v5 = vpop.f32.mrb[0].mxu1 }
 0x15b   :  { %v998_v42 = vpop.f32.mrb[1].mxu1 }
 0x15c   :  { %15472 = vmatmul.mubr.bf16.gmra.mrb[68].mxu0 %v17412_v33  ;;  %v15182_v9 = vpop.f32.mrb[2].mxu1 }
 0x15d   :  { %v1001_v3 = vpop.f32.mrb[3].mxu1 }
 0x15f   :  { %v15233_v31 = vpop.f32.mrb[0].mxu0 }
 0x160   :  { %v1421_v12 = vadd.f32 %v15233_v31, %v15181_v5  ;;  %v1412_v40 = vpop.f32.mrb[1].mxu0 }
 0x161   :  { %v1413_v34 = vadd.f32 %v1412_v40, %v998_v42  ;;  %v15234_v44 = vpop.f32.mrb[2].mxu0 }
 0x162   :  { %1557 = vst.msk [vmem:[#allocation4 + $0x10] sm:$0xff] %vm396_vm5, %v1421_v12  ;;  %v1424_v11 = vadd.f32 %v15234_v44, %v15182_v9  ;;  %v1415_v47 = vpop.f32.mrb[3].mxu0  ;;  %v15185_v46 = vpop.f32.mrb[4].mxu1 }
 0x163   :  { %1555 = vst.msk [vmem:[#allocation4] sm:$0xff] %vm396_vm5, %v1413_v34  ;;  %v1416_v22 = vadd.f32 %v1415_v47, %v1001_v3  ;;  %v1014_v33 = vpop.f32.mrb[5].mxu1 }
 0x164   :  { %1558 = vst.msk [vmem:[#allocation4 + $0x18] sm:$0xff] %vm396_vm5, %v1424_v11  ;;  %v15186_v17 = vpop.f32.mrb[6].mxu1 }
 0x165   :  { %1556 = vst.msk [vmem:[#allocation4 + $0x8] sm:$0xff] %vm396_vm5, %v1416_v22  ;;  %v1017_v26 = vpop.f32.mrb[7].mxu1 }
 0x167   :  { %v15237_v20 = vpop.f32.mrb[4].mxu0 }
 0x168   :  { %v1437_v16 = vadd.f32 %v15237_v20, %v15185_v46  ;;  %v1428_v50 = vpop.f32.mrb[5].mxu0 }
 0x169   :  { %v1429_v29 = vadd.f32 %v1428_v50, %v1014_v33  ;;  %v15238_v43 = vpop.f32.mrb[6].mxu0 }
 0x16a   :  { %1561 = vst.msk [vmem:[#allocation4 + $0x30] sm:$0xff] %vm396_vm5, %v1437_v16  ;;  %v1440_v7 = vadd.f32 %v15238_v43, %v15186_v17  ;;  %v1431_v21 = vpop.f32.mrb[7].mxu0  ;;  %v15189_v14 = vpop.f32.mrb[8].mxu1 }
 0x16b   :  { %1559 = vst.msk [vmem:[#allocation4 + $0x20] sm:$0xff] %vm396_vm5, %v1429_v29  ;;  %v1432_v59 = vadd.f32 %v1431_v21, %v1017_v26  ;;  %v1030_v13 = vpop.f32.mrb[9].mxu1 }
 0x16c   :  { %1562 = vst.msk [vmem:[#allocation4 + $0x38] sm:$0xff] %vm396_vm5, %v1440_v7  ;;  %v15190_v37 = vpop.f32.mrb[10].mxu1 }
 0x16d   :  { %1560 = vst.msk [vmem:[#allocation4 + $0x28] sm:$0xff] %vm396_vm5, %v1432_v59  ;;  %v1033_v27 = vpop.f32.mrb[11].mxu1 }
 0x16f   :  { %v15241_v30 = vpop.f32.mrb[8].mxu0 }
 0x170   :  { %v1453_v52 = vadd.f32 %v15241_v30, %v15189_v14  ;;  %v1444_v62 = vpop.f32.mrb[9].mxu0 }
 0x171   :  { %v1445_v32 = vadd.f32 %v1444_v62, %v1030_v13  ;;  %v15242_v10 = vpop.f32.mrb[10].mxu0 }
 0x172   :  { %1565 = vst.msk [vmem:[#allocation4 + $0x50] sm:$0xff] %vm396_vm5, %v1453_v52  ;;  %v1456_v39 = vadd.f32 %v15242_v10, %v15190_v37  ;;  %v1447_v19 = vpop.f32.mrb[11].mxu0  ;;  %v15193_v48 = vpop.f32.mrb[12].mxu1 }
 0x173   :  { %1563 = vst.msk [vmem:[#allocation4 + $0x40] sm:$0xff] %vm396_vm5, %v1445_v32  ;;  %v1448_v18 = vadd.f32 %v1447_v19, %v1033_v27  ;;  %v1046_v53 = vpop.f32.mrb[13].mxu1 }
 0x174   :  { %1566 = vst.msk [vmem:[#allocation4 + $0x58] sm:$0xff] %vm396_vm5, %v1456_v39  ;;  %v15194_v54 = vpop.f32.mrb[14].mxu1 }
 0x175   :  { %1564 = vst.msk [vmem:[#allocation4 + $0x48] sm:$0xff] %vm396_vm5, %v1448_v18  ;;  %v1049_v55 = vpop.f32.mrb[15].mxu1 }
 0x177   :  { %v15245_v0 = vpop.f32.mrb[12].mxu0 }
 0x178   :  { %v1469_v24 = vadd.f32 %v15245_v0, %v15193_v48  ;;  %v1460_v61 = vpop.f32.mrb[13].mxu0 }
 0x179   :  { %v1461_v23 = vadd.f32 %v1460_v61, %v1046_v53  ;;  %v15246_v8 = vpop.f32.mrb[14].mxu0 }
 0x17a   :  { %1569 = vst.msk [vmem:[#allocation4 + $0x70] sm:$0xff] %vm396_vm5, %v1469_v24  ;;  %v1472_v4 = vadd.f32 %v15246_v8, %v15194_v54  ;;  %v1463_v45 = vpop.f32.mrb[15].mxu0  ;;  %v15197_v35 = vpop.f32.mrb[16].mxu1 }
 0x17b   :  { %1567 = vst.msk [vmem:[#allocation4 + $0x60] sm:$0xff] %vm396_vm5, %v1461_v23  ;;  %v1464_v38 = vadd.f32 %v1463_v45, %v1049_v55  ;;  %v1062_v56 = vpop.f32.mrb[17].mxu1 }
 0x17c   :  { %1570 = vst.msk [vmem:[#allocation4 + $0x78] sm:$0xff] %vm396_vm5, %v1472_v4  ;;  %v15198_v41 = vpop.f32.mrb[18].mxu1 }
 0x17d   :  { %1568 = vst.msk [vmem:[#allocation4 + $0x68] sm:$0xff] %vm396_vm5, %v1464_v38  ;;  %v1065_v60 = vpop.f32.mrb[19].mxu1  ;;  %v2262_v38 = vld [vmem:[#allocation4 + $0x10] sm:$0xff] }
 0x17f   :  { %v15249_v2 = vpop.f32.mrb[16].mxu0 }
 0x180   :  { %v1485_v51 = vadd.f32 %v15249_v2, %v15197_v35  ;;  %v1476_v15 = vpop.f32.mrb[17].mxu0 }
 0x181   :  { %v1477_v5 = vadd.f32 %v1476_v15, %v1062_v56  ;;  %v15250_v42 = vpop.f32.mrb[18].mxu0 }
 0x182   :  { %1573 = vst.msk [vmem:[#allocation4 + $0x90] sm:$0xff] %vm396_vm5, %v1485_v51  ;;  %v1488_v9 = vadd.f32 %v15250_v42, %v15198_v41  ;;  %v1479_v3 = vpop.f32.mrb[19].mxu0  ;;  %v15201_v12 = vpop.f32.mrb[20].mxu1  ;;  %v2260_v41 = vld [vmem:[#allocation4] sm:$0xff]  ;;  %v2263_v51 = vld [vmem:[#allocation4 + $0x18] sm:$0xff]  ;;  %v2261_v42 = vld [vmem:[#allocation4 + $0x8] sm:$0xff] }
 0x183   :  { %1571 = vst.msk [vmem:[#allocation4 + $0x80] sm:$0xff] %vm396_vm5, %v1477_v5  ;;  %v1480_v31 = vadd.f32 %v1479_v3, %v1065_v60  ;;  %v1078_v40 = vpop.f32.mrb[21].mxu1 }
 0x184   :  { %1574 = vst.msk [vmem:[#allocation4 + $0x98] sm:$0xff] %vm396_vm5, %v1488_v9  ;;  %v15202_v36 = vpop.f32.mrb[22].mxu1 }
 0x185   :  { %1572 = vst.msk [vmem:[#allocation4 + $0x88] sm:$0xff] %vm396_vm5, %v1480_v31  ;;  %v1081_v34 = vpop.f32.mrb[23].mxu1 }
 0x187   :  { %v15253_v44 = vpop.f32.mrb[20].mxu0 }
 0x188   :  { %v1501_v49 = vadd.f32 %v15253_v44, %v15201_v12  ;;  %v1492_v11 = vpop.f32.mrb[21].mxu0  ;;  %v719_v12 = vlaneseq  ;;  %v16633_v44 = vmov 842150450  }
 0x189   :  { %v1493_v47 = vadd.f32 %v1492_v11, %v1078_v40  ;;  %v15254_v6 = vpop.f32.mrb[22].mxu0 }
 0x18a   :  { %1577 = vst.msk [vmem:[#allocation4 + $0xb0] sm:$0xff] %vm396_vm5, %v1501_v49  ;;  %v1504_v22 = vadd.f32 %v15254_v6, %v15202_v36  ;;  %v1495_v46 = vpop.f32.mrb[23].mxu0  ;;  %v15205_v1 = vpop.f32.mrb[24].mxu1  ;;  %v16632_v36 = vmov 269488144   ;;  %v724_v49 = vunpack.c.l.s4 %v16633_v44 }
 0x18b   :  { %1575 = vst.msk [vmem:[#allocation4 + $0xa0] sm:$0xff] %vm396_vm5, %v1493_v47  ;;  %v1496_v33 = vadd.f32 %v1495_v46, %v1081_v34  ;;  %v1094_v25 = vpop.f32.mrb[25].mxu1  ;;  %v717_v34 = vunpack.c.l.s4 %v16632_v36  ;;  %v16634_v47 = vmov 1414812756   ;;  %v2269_v36 = vld [vmem:[#allocation4 + $0x48] sm:$0xff] }
 0x18c   :  { %1578 = vst.msk [vmem:[#allocation4 + $0xb8] sm:$0xff] %vm396_vm5, %v1504_v22  ;;  %v15206_v17 = vpop.f32.mrb[26].mxu1  ;;  %v731_v6 = vunpack.c.l.s4 %v16634_v47  ;;  %v16635_v22 = vmov 1987475062  }
 0x18d   :  { %1576 = vst.msk [vmem:[#allocation4 + $0xa8] sm:$0xff] %vm396_vm5, %v1496_v33  ;;  %v1097_v26 = vpop.f32.mrb[27].mxu1  ;;  %v738_v46 = vunpack.c.l.s4 %v16635_v22 }
 0x18f   :  { %v15257_v58 = vpop.f32.mrb[24].mxu0 }
 0x190   :  { %v1517_v63 = vadd.f32 %v15257_v58, %v15205_v1  ;;  %v1508_v20 = vpop.f32.mrb[25].mxu0  ;;  %v2266_v1 = vld [vmem:[#allocation4 + $0x30] sm:$0xff]  ;;  %v17584_v58 = vshrl.u32 %v719_v12, 7 }
 0x191   :  { %v1509_v16 = vadd.f32 %v1508_v20, %v1094_v25  ;;  %v15258_v50 = vpop.f32.mrb[26].mxu0 }
 0x192   :  { %1581 = vst.msk [vmem:[#allocation4 + $0xd0] sm:$0xff] %vm396_vm5, %v1517_v63  ;;  %v1520_v29 = vadd.f32 %v15258_v50, %v15206_v17  ;;  %v1511_v43 = vpop.f32.mrb[27].mxu0  ;;  %v15209_v21 = vpop.f32.mrb[28].mxu1  ;;  %v2267_v50 = vld [vmem:[#allocation4 + $0x38] sm:$0xff] }
 0x193   :  { %1579 = vst.msk [vmem:[#allocation4 + $0xc0] sm:$0xff] %vm396_vm5, %v1509_v16  ;;  %v1512_v7 = vadd.f32 %v1511_v43, %v1097_v26  ;;  %v1110_v59 = vpop.f32.mrb[29].mxu1  ;;  %v2264_v26 = vld [vmem:[#allocation4 + $0x20] sm:$0xff]  ;;  %v725_v43 = vunpack.c.0.s8 %v724_v49 }
 0x194   :  { %1582 = vst.msk [vmem:[#allocation4 + $0xd8] sm:$0xff] %vm396_vm5, %v1520_v29  ;;  %v15210_v14 = vpop.f32.mrb[30].mxu1  ;;  %v718_v29 = vunpack.c.0.s8 %v717_v34 }
 0x195   :  { %1580 = vst.msk [vmem:[#allocation4 + $0xc8] sm:$0xff] %vm396_vm5, %v1512_v7  ;;  %v1113_v13 = vpop.f32.mrb[31].mxu1 }
 0x197   :  { %v15261_v37 = vpop.f32.mrb[28].mxu0 }
 0x198   :  { %v1533_v27 = vadd.f32 %v15261_v37, %v15209_v21  ;;  %v1524_v30 = vpop.f32.mrb[29].mxu0  ;;  %v732_v37 = vunpack.c.0.s8 %v731_v6 }
 0x199   :  { %v1525_v52 = vadd.f32 %v1524_v30, %v1110_v59  ;;  %v15262_v62 = vpop.f32.mrb[30].mxu0 }
 0x19a   :  { %1585 = vst.msk [vmem:[#allocation4 + $0xf0] sm:$0xff] %vm396_vm5, %v1533_v27  ;;  %v1536_v32 = vadd.f32 %v15262_v62, %v15210_v14  ;;  %v1527_v10 = vpop.f32.mrb[31].mxu0  ;;  %v15213_v19 = vpop.f32.mrb[32].mxu1  ;;  %v739_v27 = vunpack.c.0.s8 %v738_v46 }
 0x19b   :  { %1583 = vst.msk [vmem:[#allocation4 + $0xe0] sm:$0xff] %vm396_vm5, %v1525_v52  ;;  %v1528_v39 = vadd.f32 %v1527_v10, %v1113_v13  ;;  %v1126_v18 = vpop.f32.mrb[33].mxu1  ;;  %v2265_v13 = vld [vmem:[#allocation4 + $0x28] sm:$0xff]  ;;  %v16636_v10 = vmov 1983009808  }
 0x19c   :  { %1586 = vst.msk [vmem:[#allocation4 + $0xf8] sm:$0xff] %vm396_vm5, %v1536_v32  ;;  %v15214_v48 = vpop.f32.mrb[34].mxu1 }
 0x19d   :  { %1584 = vst.msk [vmem:[#allocation4 + $0xe8] sm:$0xff] %vm396_vm5, %v1528_v39  ;;  %v1129_v53 = vpop.f32.mrb[35].mxu1  ;;  %v3393_v39 = vunpack.c.l.s4 %v16636_v10 }
 0x19f   :  { %v15265_v54 = vpop.f32.mrb[32].mxu0 }
 0x1a0   :  { %v1549_v55 = vadd.f32 %v15265_v54, %v15213_v19  ;;  %v1540_v0 = vpop.f32.mrb[33].mxu0 }
 0x1a1   :  { %v1541_v24 = vadd.f32 %v1540_v0, %v1126_v18  ;;  %v15266_v61 = vpop.f32.mrb[34].mxu0  ;;  %v728_v0 = vsub.s32 %v725_v43, %v17584_v58 }
 0x1a2   :  { %1589 = vst.msk [vmem:[#allocation4 + $0x110] sm:$0xff] %vm396_vm5, %v1549_v55  ;;  %v1552_v23 = vadd.f32 %v15266_v61, %v15214_v48  ;;  %v1543_v8 = vpop.f32.mrb[35].mxu0  ;;  %v17593_v55 = vsub.s32 %v718_v29, %v17584_v58  ;;  %v735_v61 = vsub.s32 %v732_v37, %v17584_v58 }
 0x1a3   :  { %1587 = vst.msk [vmem:[#allocation4 + $0x100] sm:$0xff] %vm396_vm5, %v1541_v24  ;;  %v1544_v4 = vadd.f32 %v1543_v8, %v1129_v53 }
 0x1a4   :  { %1590 = vst.msk [vmem:[#allocation4 + $0x118] sm:$0xff] %vm396_vm5, %v1552_v23  ;;  %v742_v23 = vsub.s32 %v739_v27, %v17584_v58 }
 0x1a5   :  { %1588 = vst.msk [vmem:[#allocation4 + $0x108] sm:$0xff] %vm396_vm5, %v1544_v4  ;;  %v2270_v4 = vld [vmem:[#allocation4 + $0x50] sm:$0xff] }
 0x1ea   :  { %v15337_v45 = vpop.f32.mrb[36].mxu1 }
 0x1eb   :  { %v2298_v35 = vadd.f32 %v15337_v45, %v2262_v38  ;;  %v2117_v56 = vpop.f32.mrb[37].mxu1  ;;  %v3394_v45 = vunpack.c.0.s8 %v3393_v39 }
 0x1ec   :  { %v2296_v60 = vadd.f32 %v2260_v41, %v2117_v56  ;;  %v15338_v2 = vpop.f32.mrb[38].mxu1  ;;  %v2268_v56 = vld [vmem:[#allocation4 + $0x40] sm:$0xff] }
 0x1ed   :  { %2334 = vst.msk [vmem:[#allocation4 + $0x10] sm:$0xff] %vm396_vm5, %v2298_v35  ;;  %v2299_v15 = vadd.f32 %v15338_v2, %v2263_v51  ;;  %v2120_v5 = vpop.f32.mrb[39].mxu1  ;;  %v2271_v51 = vld [vmem:[#allocation4 + $0x58] sm:$0xff]  ;;  %v17617_v46 = vsub.s32 %v3394_v45, %v17584_v58  ;;  %v2273_v45 = vld [vmem:[#allocation4 + $0x68] sm:$0xff] }
 0x1ee   :  { %2332 = vst.msk [vmem:[#allocation4] sm:$0xff] %vm396_vm5, %v2296_v60  ;;  %v2297_v9 = vadd.f32 %v2261_v42, %v2120_v5  ;;  %v16637_v5 = vmov 1  }
 0x1ef   :  { %v15441_v3 = vpop.f32.mrb[36].mxu0  ;;  %2335 = vst.msk [vmem:[#allocation4 + $0x18] sm:$0xff] %vm396_vm5, %v2299_v15  ;;  %v17603_v15 = vld [vmem:[%s21082_s2] ss:$0 sm:$0xff]  ;;  %v17606_v42 = vrot.slane %v16637_v5, %v17593_v55  ;;  %v17611_v34 = vrot.slane %v16637_v5, %v735_v61  ;;  %v17613_v44 = vrot.slane %v16637_v5, %v742_v23  ;;  %21162 = vst [vmem:[#allocation12_spill] sm:$0xff] %v17617_v46 }
 0x1f0   :  { %v2971_v31 = vpop.f32.mrb[37].mxu0  ;;  %2333 = vst.msk [vmem:[#allocation4 + $0x8] sm:$0xff] %vm396_vm5, %v2297_v9  ;;  %v17608_v9 = vrot.slane %v16637_v5, %v728_v0 }
 0x1f1   :  { %v15442_v40 = vpop.f32.mrb[38].mxu0  ;;  %21158 = vst [vmem:[#allocation8_spill] sm:$0xff] %v17606_v42  ;;  %21160 = vst [vmem:[#allocation10_spill] sm:$0xff] %v17611_v34  ;;  %vm779_vm6 = vcmp.ne.s32.totalorder %v17606_v42, 0  ;;  %vm781_vm10 = vcmp.ne.s32.totalorder %v17611_v34, 0  ;;  %vm782_vm15 = vcmp.ne.s32.totalorder %v17613_v44, 0 }
 0x1f2   :  { %v2974_v11 = vpop.f32.mrb[39].mxu0  ;;  %v15341_v33 = vpop.f32.mrb[40].mxu1  ;;  %21159 = vst [vmem:[#allocation9_spill] sm:$0xff] %v17608_v9  ;;  %21161 = vst [vmem:[#allocation11_spill] sm:$0xff] %v17613_v44  ;;  %vm780_vm9 = vcmp.ne.s32.totalorder %v17608_v9, 0 }
 0x1f3   :  { %v2302_v25 = vadd.f32 %v15341_v33, %v2266_v1  ;;  %v2133_v17 = vpop.f32.mrb[41].mxu1 }
 0x1f4   :  { %v3116_v63 = vld [vmem:[#allocation4 + $0x10] sm:$0xff]  ;;  %v2300_v20 = vadd.f32 %v2264_v26, %v2133_v17  ;;  %v15342_v16 = vpop.f32.mrb[42].mxu1 }
 0x1f5   :  { %v3152_v7 = vadd.f32 %v15441_v3, %v3116_v63  ;;  %v3114_v21 = vld [vmem:[#allocation4] sm:$0xff]  ;;  %2338 = vst.msk [vmem:[#allocation4 + $0x30] sm:$0xff] %vm396_vm5, %v2302_v25  ;;  %v2303_v59 = vadd.f32 %v15342_v16, %v2267_v50  ;;  %v2136_v14 = vpop.f32.mrb[43].mxu1  ;;  %v16623_v63 = vld [vmem:[#allocation3] sm:$0xff] }
 0x1f6   :  { %v3150_v30 = vadd.f32 %v3114_v21, %v2971_v31  ;;  %v3117_v52 = vld [vmem:[#allocation4 + $0x18] sm:$0xff]  ;;  %2336 = vst.msk [vmem:[#allocation4 + $0x20] sm:$0xff] %vm396_vm5, %v2300_v20  ;;  %v2301_v62 = vadd.f32 %v2265_v13, %v2136_v14  ;;  %v778_v20 = vrot.slane %v16623_v63, %v17593_v55  ;;  %v2274_v13 = vld [vmem:[#allocation4 + $0x70] sm:$0xff] }
 0x1f7   :  { %v15445_v32 = vpop.f32.mrb[40].mxu0  ;;  %3188 = vst.msk [vmem:[#allocation4 + $0x10] sm:$0xff] %vm396_vm5, %v3152_v7  ;;  %v3153_v19 = vadd.f32 %v15442_v40, %v3117_v52  ;;  %v3115_v18 = vld [vmem:[#allocation4 + $0x8] sm:$0xff]  ;;  %2339 = vst.msk [vmem:[#allocation4 + $0x38] sm:$0xff] %vm396_vm5, %v2303_v59 }
 0x1f8   :  { %v2987_v48 = vpop.f32.mrb[41].mxu0  ;;  %3186 = vst.msk [vmem:[#allocation4] sm:$0xff] %vm396_vm5, %v3150_v30  ;;  %v3151_v53 = vadd.f32 %v3115_v18, %v2974_v11  ;;  %2337 = vst.msk [vmem:[#allocation4 + $0x28] sm:$0xff] %vm396_vm5, %v2301_v62  ;;  %v2272_v62 = vld [vmem:[#allocation4 + $0x60] sm:$0xff]  ;;  %vm17640_vm0 = vcmp.ne.s32.totalorder %v778_v20, 0 }
 0x1f9   :  { %v15446_v54 = vpop.f32.mrb[42].mxu0  ;;  %3189 = vst.msk [vmem:[#allocation4 + $0x18] sm:$0xff] %vm396_vm5, %v3153_v19 }
 0x1fa   :  { %v2990_v24 = vpop.f32.mrb[43].mxu0  ;;  %3187 = vst.msk [vmem:[#allocation4 + $0x8] sm:$0xff] %vm396_vm5, %v3151_v53  ;;  %v15345_v8 = vpop.f32.mrb[44].mxu1  ;;  %v2275_v53 = vld [vmem:[#allocation4 + $0x78] sm:$0xff] }
 0x1fb   :  { %v2306_v38 = vadd.f32 %v15345_v8, %v2270_v4  ;;  %v2149_v35 = vpop.f32.mrb[45].mxu1 }
 0x1fc   :  { %v3120_v41 = vld [vmem:[#allocation4 + $0x30] sm:$0xff]  ;;  %v2304_v60 = vadd.f32 %v2268_v56, %v2149_v35  ;;  %v15346_v2 = vpop.f32.mrb[46].mxu1 }
 0x1fd   :  { %v3156_v3 = vadd.f32 %v15445_v32, %v3120_v41  ;;  %v3118_v31 = vld [vmem:[#allocation4 + $0x20] sm:$0xff]  ;;  %2342 = vst.msk [vmem:[#allocation4 + $0x50] sm:$0xff] %vm396_vm5, %v2306_v38  ;;  %v2307_v12 = vadd.f32 %v15346_v2, %v2271_v51  ;;  %v2152_v40 = vpop.f32.mrb[47].mxu1 }
 0x1fe   :  { %v3154_v49 = vadd.f32 %v3118_v31, %v2987_v48  ;;  %v3121_v11 = vld [vmem:[#allocation4 + $0x38] sm:$0xff]  ;;  %2340 = vst.msk [vmem:[#allocation4 + $0x40] sm:$0xff] %vm396_vm5, %v2304_v60  ;;  %v2305_v47 = vadd.f32 %v2269_v36, %v2152_v40  ;;  %v3224_v22 = vld [vmem:[#allocation4 + $0x10] sm:$0xff] }
 0x1ff   :  { %v15449_v6 = vpop.f32.mrb[44].mxu0  ;;  %3192 = vst.msk [vmem:[#allocation4 + $0x30] sm:$0xff] %vm396_vm5, %v3156_v3  ;;  %v3157_v33 = vadd.f32 %v15446_v54, %v3121_v11  ;;  %v3119_v1 = vld [vmem:[#allocation4 + $0x28] sm:$0xff]  ;;  %2343 = vst.msk [vmem:[#allocation4 + $0x58] sm:$0xff] %vm396_vm5, %v2307_v12  ;;  %v3222_v17 = vld [vmem:[#allocation4] sm:$0xff]  ;;  %v3267_v26 = vadd.f32 %v17603_v15, %v3224_v22 }
 0x200   :  { %v3003_v25 = vpop.f32.mrb[45].mxu0  ;;  %3190 = vst.msk [vmem:[#allocation4 + $0x20] sm:$0xff] %vm396_vm5, %v3154_v49  ;;  %v3155_v16 = vadd.f32 %v3119_v1, %v2990_v24  ;;  %2341 = vst.msk [vmem:[#allocation4 + $0x48] sm:$0xff] %vm396_vm5, %v2305_v47  ;;  %v3265_v50 = vadd.f32 %v17603_v15, %v3222_v17  ;;  %v3225_v29 = vld [vmem:[#allocation4 + $0x18] sm:$0xff]  ;;  %v21163_v24 = vmov 0 }
 0x201   :  { %v15450_v58 = vpop.f32.mrb[46].mxu0  ;;  %3193 = vst.msk [vmem:[#allocation4 + $0x38] sm:$0xff] %vm396_vm5, %v3157_v33  ;;  %v3223_v7 = vld [vmem:[#allocation4 + $0x8] sm:$0xff]  ;;  %v3268_v21 = vadd.f32 %v17603_v15, %v3225_v29  ;;  %v3303_v59 = vmax.f32 %v3267_v26, 0.0  ;;  %v21164_v24 = vsel %vm17640_vm0, 4294967295, %v21163_v24 }
 0x202   :  { %v3006_v43 = vpop.f32.mrb[47].mxu0  ;;  %3191 = vst.msk [vmem:[#allocation4 + $0x28] sm:$0xff] %vm396_vm5, %v3155_v16  ;;  %v15349_v14 = vpop.f32.mrb[48].mxu1  ;;  %v3266_v37 = vadd.f32 %v17603_v15, %v3223_v7  ;;  %v3301_v27 = vmax.f32 %v3265_v50, 0.0  ;;  %21165 = vst [vmem:[#allocation13_spill] sm:$0xff] %v21164_v24  ;;  %v2278_v16 = vld [vmem:[#allocation4 + $0x90] sm:$0xff] }
 0x203   :  { %v2310_v30 = vadd.f32 %v15349_v14, %v2274_v13  ;;  %v2165_v52 = vpop.f32.mrb[49].mxu1  ;;  %v17634_v32 = vmax.f32 %v3268_v21, 0.0  ;;  %v3425_v10 = vcombine.high %v3303_v59, %v3303_v59  ;;  %v17637_v39 = vrot.slane %v3303_v59, %v17617_v46  ;;  %v2276_v59 = vld [vmem:[#allocation4 + $0x80] sm:$0xff] }
 0x204   :  { %v3124_v19 = vld [vmem:[#allocation4 + $0x50] sm:$0xff]  ;;  %v2308_v18 = vadd.f32 %v2272_v62, %v2165_v52  ;;  %v15350_v48 = vpop.f32.mrb[50].mxu1  ;;  %v3302_v54 = vmax.f32 %v3266_v37, 0.0  ;;  %v3391_v55 = vcombine.high %v3301_v27, %v3301_v27  ;;  %v3398_v0 = vrot.slane %v3301_v27, %v17617_v46  ;;  %v2279_v62 = vld [vmem:[#allocation4 + $0x98] sm:$0xff] }
 0x205   :  { %v3160_v61 = vadd.f32 %v15449_v6, %v3124_v19  ;;  %v3122_v23 = vld [vmem:[#allocation4 + $0x40] sm:$0xff]  ;;  %2346 = vst.msk [vmem:[#allocation4 + $0x70] sm:$0xff] %vm396_vm5, %v2310_v30  ;;  %v2311_v8 = vadd.f32 %v15350_v48, %v2275_v53  ;;  %v2168_v4 = vpop.f32.mrb[51].mxu1  ;;  %v17646_v38 = vrot.slane %v3425_v10, %v17617_v46  ;;  %v3440_v35 = vcombine.high %v17637_v39, %v17637_v39 }
 0x206   :  { %v3158_v56 = vadd.f32 %v3122_v23, %v3003_v25  ;;  %v3125_v41 = vld [vmem:[#allocation4 + $0x58] sm:$0xff]  ;;  %2344 = vst.msk [vmem:[#allocation4 + $0x60] sm:$0xff] %vm396_vm5, %v2308_v18  ;;  %v2309_v60 = vadd.f32 %v2273_v45, %v2168_v4  ;;  %v3405_v51 = vrot.slane %v3391_v55, %v17617_v46  ;;  %v3406_v5 = vcombine.high %v3398_v0, %v3398_v0  ;;  %v2277_v55 = vld [vmem:[#allocation4 + $0x88] sm:$0xff] }
 0x207   :  { %v15453_v2 = vpop.f32.mrb[48].mxu0  ;;  %3196 = vst.msk [vmem:[#allocation4 + $0x50] sm:$0xff] %vm396_vm5, %v3160_v61  ;;  %v3161_v3 = vadd.f32 %v15450_v58, %v3125_v41  ;;  %v3123_v31 = vld [vmem:[#allocation4 + $0x48] sm:$0xff]  ;;  %2347 = vst.msk [vmem:[#allocation4 + $0x78] sm:$0xff] %vm396_vm5, %v2311_v8  ;;  %v3408_v40 = vcombine.high %v3302_v54, %v3302_v54  ;;  %v3415_v36 = vrot.slane %v3302_v54, %v17617_v46  ;;  %v4147_v49 = vsel %vm779_vm6, %v3398_v0, 0.0 }
 0x208   :  { %v3019_v12 = vpop.f32.mrb[49].mxu0  ;;  %3194 = vst.msk [vmem:[#allocation4 + $0x40] sm:$0xff] %vm396_vm5, %v3158_v56  ;;  %v3159_v11 = vadd.f32 %v3123_v31, %v3006_v43  ;;  %2345 = vst.msk [vmem:[#allocation4 + $0x68] sm:$0xff] %vm396_vm5, %v2309_v60  ;;  %v3407_v6 = vcombine.high %v3405_v51, %v3405_v51  ;;  %v4148_v22 = vsel %vm780_vm9, %v3406_v5, 0.0  ;;  %v4149_v33 = vsel %vm781_vm10, %v3405_v51, 0.0 }
 0x209   :  { %v15454_v47 = vpop.f32.mrb[50].mxu0  ;;  %3197 = vst.msk [vmem:[#allocation4 + $0x58] sm:$0xff] %vm396_vm5, %v3161_v3  ;;  %v3422_v25 = vrot.slane %v3408_v40, %v17617_v46  ;;  %v3423_v17 = vcombine.high %v3415_v36, %v3415_v36  ;;  %v4151_v26 = vsel %vm779_vm6, %v3415_v36, 0.0  ;;  %v4435_v63 = vcombine.low %v4147_v49, %v4148_v22 }
 0x20a   :  { %v3022_v1 = vpop.f32.mrb[51].mxu0  ;;  %3195 = vst.msk [vmem:[#allocation4 + $0x48] sm:$0xff] %vm396_vm5, %v3159_v11  ;;  %v15353_v20 = vpop.f32.mrb[52].mxu1  ;;  %v4150_v58 = vsel %vm782_vm15, %v3407_v6, 0.0  ;;  %v3441_v50 = vcombine.high %v17646_v38, %v17646_v38  ;;  %v3442_v29 = vcombine.high %v17634_v32, %v17634_v32  ;;  %v3449_v43 = vrot.slane %v17634_v32, %v17617_v46 }
 0x20b   :  { %v2314_v7 = vadd.f32 %v15353_v20, %v2278_v16  ;;  %v2181_v21 = vpop.f32.mrb[53].mxu1  ;;  %v3424_v14 = vcombine.high %v3422_v25, %v3422_v25  ;;  %v4152_v13 = vsel %vm780_vm9, %v3423_v17, 0.0  ;;  %v4153_v37 = vsel %vm781_vm10, %v3422_v25, 0.0  ;;  %v3226_v25 = vld [vmem:[#allocation4 + $0x20] sm:$0xff] }
 0x20c   :  { %v3128_v27 = vld [vmem:[#allocation4 + $0x70] sm:$0xff]  ;;  %v2312_v30 = vadd.f32 %v2276_v59, %v2181_v21  ;;  %v15354_v52 = vpop.f32.mrb[54].mxu1  ;;  %v4436_v10 = vcombine.low %v4149_v33, %v4150_v58  ;;  %v4443_v19 = vrot.slane %v4435_v63, %v17617_v46  ;;  %v4452_v18 = vcombine.low %v4151_v26, %v4152_v13  ;;  %v2280_v58 = vld [vmem:[#allocation4 + $0xa0] sm:$0xff]  ;;  %v2281_v13 = vld [vmem:[#allocation4 + $0xa8] sm:$0xff] }
 0x20d   :  { %v3164_v48 = vadd.f32 %v15453_v2, %v3128_v27  ;;  %v3126_v32 = vld [vmem:[#allocation4 + $0x60] sm:$0xff]  ;;  %2350 = vst.msk [vmem:[#allocation4 + $0x90] sm:$0xff] %vm396_vm5, %v2314_v7  ;;  %v2315_v53 = vadd.f32 %v15354_v52, %v2279_v62  ;;  %v2184_v54 = vpop.f32.mrb[55].mxu1  ;;  %v4154_v0 = vsel %vm782_vm15, %v3424_v14, 0.0  ;;  %v3456_v61 = vrot.slane %v3442_v29, %v17617_v46  ;;  %v2282_v26 = vld [vmem:[#allocation4 + $0xb0] sm:$0xff]  ;;  %v2283_v14 = vld [vmem:[#allocation4 + $0xb8] sm:$0xff] }
 0x20e   :  { %v3162_v23 = vadd.f32 %v3126_v32, %v3019_v12  ;;  %v3129_v8 = vld [vmem:[#allocation4 + $0x78] sm:$0xff]  ;;  %2348 = vst.msk [vmem:[#allocation4 + $0x80] sm:$0xff] %vm396_vm5, %v2312_v30  ;;  %v2313_v4 = vadd.f32 %v2277_v55, %v2184_v54  ;;  %v4450_v56 = vrot.slane %v4436_v10, %v17617_v46  ;;  %v4453_v41 = vcombine.low %v4153_v37, %v4154_v0  ;;  %v3227_v32 = vld [vmem:[#allocation4 + $0x28] sm:$0xff] }
 0x20f   :  { %v15457_v45 = vpop.f32.mrb[52].mxu0  ;;  %3200 = vst.msk [vmem:[#allocation4 + $0x70] sm:$0xff] %vm396_vm5, %v3164_v48  ;;  %v3165_v60 = vadd.f32 %v15454_v47, %v3129_v8  ;;  %v3127_v2 = vld [vmem:[#allocation4 + $0x68] sm:$0xff]  ;;  %2351 = vst.msk [vmem:[#allocation4 + $0x98] sm:$0xff] %vm396_vm5, %v2315_v53  ;;  %v4460_v5 = vrot.slane %v4452_v18, %v17617_v46  ;;  %v3457_v3 = vcombine.high %v3449_v43, %v3449_v43  ;;  %v4155_v11 = vsel %vm17640_vm0, %v17637_v39, 0.0  ;;  %v3228_v53 = vld [vmem:[#allocation4 + $0x30] sm:$0xff] }
 0x210   :  { %v3035_v51 = vpop.f32.mrb[53].mxu0  ;;  %v3458_v31 = vcombine.high %v3456_v61, %v3456_v61  ;;  %3198 = vst.msk [vmem:[#allocation4 + $0x60] sm:$0xff] %vm396_vm5, %v3162_v23  ;;  %v3163_v12 = vadd.f32 %v3127_v2, %v3022_v1  ;;  %2349 = vst.msk [vmem:[#allocation4 + $0x88] sm:$0xff] %vm396_vm5, %v2313_v4  ;;  %v4451_v36 = vcombine.low %v4443_v19, %v4450_v56  ;;  %v4156_v6 = vsel %vm779_vm6, %v3440_v35, 0.0  ;;  %v3229_v4 = vld [vmem:[#allocation4 + $0x38] sm:$0xff] }
 0x211   :  { %v15458_v40 = vpop.f32.mrb[54].mxu0  ;;  %v4467_v49 = vrot.slane %v4453_v41, %v17617_v46  ;;  %3201 = vst.msk [vmem:[#allocation4 + $0x78] sm:$0xff] %vm396_vm5, %v3165_v60  ;;  %v4157_v22 = vsel %vm780_vm9, %v17646_v38, 0.0  ;;  %v4158_v33 = vsel %vm781_vm10, %v3441_v50, 0.0  ;;  %v4159_v1 = vsel %vm782_vm15, %v3449_v43, 0.0 }
 0x212   :  { %v3038_v47 = vpop.f32.mrb[55].mxu0  ;;  %3199 = vst.msk [vmem:[#allocation4 + $0x68] sm:$0xff] %vm396_vm5, %v3163_v12  ;;  %v15357_v17 = vpop.f32.mrb[56].mxu1  ;;  %v4160_v39 = vsel %vm779_vm6, %v3457_v3, 0.0  ;;  %v4161_v35 = vsel %vm780_vm9, %v3456_v61, 0.0  ;;  %v4162_v38 = vsel %vm781_vm10, %v3458_v31, 0.0  ;;  %v4469_v50 = vcombine.low %v4155_v11, %v4156_v6 }
 0x213   :  { %v4468_v63 = vcombine.low %v4460_v5, %v4467_v49  ;;  %v2318_v20 = vadd.f32 %v15357_v17, %v2282_v26  ;;  %v2197_v16 = vpop.f32.mrb[57].mxu1  ;;  %v4470_v29 = vcombine.low %v4157_v22, %v4158_v33  ;;  %v4486_v43 = vcombine.low %v4159_v1, %v4160_v39 }
 0x214   :  { %v3132_v7 = vld [vmem:[#allocation4 + $0x90] sm:$0xff]  ;;  %v2316_v21 = vadd.f32 %v2280_v58, %v2197_v16  ;;  %v15358_v59 = vpop.f32.mrb[58].mxu1  ;;  %v4487_v27 = vcombine.low %v4161_v35, %v4162_v38  ;;  %v3269_v30 = vadd.f32 %v17603_v15, %v3226_v25  ;;  %v4477_v18 = vrot.slane %v4469_v50, %v17617_v46  ;;  %v2284_v38 = vld [vmem:[#allocation4 + $0xc0] sm:$0xff] }
 0x215   :  { %v5083_v37 = vpack.c.bf16 %v4468_v63, %v4451_v36  ;;  %v3168_v52 = vadd.f32 %v15457_v45, %v3132_v7  ;;  %v3130_v62 = vld [vmem:[#allocation4 + $0x80] sm:$0xff]  ;;  %2354 = vst.msk [vmem:[#allocation4 + $0xb0] sm:$0xff] %vm396_vm5, %v2318_v20  ;;  %v2319_v10 = vadd.f32 %v15358_v59, %v2283_v14  ;;  %v2200_v19 = vpop.f32.mrb[59].mxu1  ;;  %v4484_v48 = vrot.slane %v4470_v29, %v17617_v46  ;;  %v2286_v25 = vld [vmem:[#allocation4 + $0xd0] sm:$0xff]  ;;  %v2287_v7 = vld [vmem:[#allocation4 + $0xd8] sm:$0xff] }
 0x216   :  { %v3166_v54 = vadd.f32 %v3130_v62, %v3035_v51  ;;  %v3133_v55 = vld [vmem:[#allocation4 + $0x98] sm:$0xff]  ;;  %2352 = vst.msk [vmem:[#allocation4 + $0xa0] sm:$0xff] %vm396_vm5, %v2316_v21  ;;  %v2317_v0 = vadd.f32 %v2281_v13, %v2200_v19  ;;  %v3230_v45 = vld [vmem:[#allocation4 + $0x40] sm:$0xff]  ;;  %v4494_v51 = vrot.slane %v4486_v43, %v17617_v46  ;;  %v4501_v5 = vrot.slane %v4487_v27, %v17617_v46  ;;  %v2285_v62 = vld [vmem:[#allocation4 + $0xc8] sm:$0xff] }
 0x217   :  { %v15461_v61 = vpop.f32.mrb[56].mxu0  ;;  %v5120_v23 = vshll.u32 %v5083_v37, 16  ;;  %v5123_v8 = vshrl.u32 %v5083_v37, 16  ;;  %5101 = vst.msk [vmem:[#allocation3 + $0x10] sm:$0xff] %vm396_vm5, %v5083_v37  ;;  %3204 = vst.msk [vmem:[#allocation4 + $0x90] sm:$0xff] %vm396_vm5, %v3168_v52  ;;  %v3169_v56 = vadd.f32 %v15458_v40, %v3133_v55  ;;  %v3131_v41 = vld [vmem:[#allocation4 + $0x88] sm:$0xff]  ;;  %v4485_v2 = vcombine.low %v4477_v18, %v4484_v48 }
 0x218   :  { %2355 = vst.msk [vmem:[#allocation4 + $0xb8] sm:$0xff] %vm396_vm5, %v2319_v10  ;;  %v3051_v60 = vpop.f32.mrb[57].mxu0  ;;  %3202 = vst.msk [vmem:[#allocation4 + $0x80] sm:$0xff] %vm396_vm5, %v3166_v54  ;;  %v3167_v3 = vadd.f32 %v3131_v41, %v3038_v47  ;;  %v3270_v36 = vadd.f32 %v17603_v15, %v3227_v32  ;;  %v3305_v49 = vmax.f32 %v3269_v30, 0.0  ;;  %v4502_v11 = vcombine.low %v4494_v51, %v4501_v5  ;;  %v16521_v19 = vld [vmem:[%s21081_s1 + $0x1c0] sm:$0xff]  }
 0x219   :  { %2353 = vst.msk [vmem:[#allocation4 + $0xa8] sm:$0xff] %vm396_vm5, %v2317_v0  ;;  %v15462_v31 = vpop.f32.mrb[58].mxu0  ;;  %v5122_v12 = vrot.slane %v5120_v23, 1  ;;  %3205 = vst.msk [vmem:[#allocation4 + $0x98] sm:$0xff] %vm396_vm5, %v3169_v56  ;;  %v3271_v6 = vadd.f32 %v17603_v15, %v3228_v53  ;;  %v3272_v22 = vadd.f32 %v17603_v15, %v3229_v4  ;;  %v17733_v33 = vadd.f32 %v17603_v15, %v3230_v45 }
 0x21a   :  { %v3054_v40 = vpop.f32.mrb[59].mxu0  ;;  %3203 = vst.msk [vmem:[#allocation4 + $0x88] sm:$0xff] %vm396_vm5, %v3167_v3  ;;  %v15361_v1 = vpop.f32.mrb[60].mxu1  ;;  %v3306_v17 = vmax.f32 %v3270_v36, 0.0  ;;  %v3459_v26 = vcombine.high %v3305_v49, %v3305_v49  ;;  %v3466_v63 = vrot.slane %v3305_v49, %v17617_v46  ;;  %v17738_v20 = vpack.c.bf16 %v4502_v11, %v4485_v2  ;;  %15475 = vmatprep.subr.bf16.mxu1 %v16521_v19 }
 0x21b   :  { %5262 = vrot.lane.b32.xlu0 %v5122_v12, %s16631_s23  ;;  %v5125_v47 = vor.u32 %v5123_v8, %v5122_v12  ;;  %v2322_v39 = vadd.f32 %v15361_v1, %v2286_v25  ;;  %v2213_v35 = vpop.f32.mrb[61].mxu1  ;;  %v17740_v16 = vmax.f32 %v3271_v6, 0.0  ;;  %v17742_v58 = vmax.f32 %v3272_v22, 0.0  ;;  %15476 = vmatpush3.bf16.msra.mxu1 %v16521_v19 }
 0x21c   :  { %v3136_v50 = vld [vmem:[#allocation4 + $0xb0] sm:$0xff]  ;;  %v2320_v29 = vadd.f32 %v2284_v38, %v2213_v35  ;;  %v15362_v43 = vpop.f32.mrb[62].mxu1  ;;  %v3473_v21 = vrot.slane %v3459_v26, %v17617_v46  ;;  %v3474_v59 = vcombine.high %v3466_v63, %v3466_v63  ;;  %v3476_v14 = vcombine.high %v3306_v17, %v3306_v17  ;;  %5102 = vst.msk [vmem:[#allocation3 + $0x18] sm:$0xff] %vm396_vm5, %v17738_v20 }
 0x21d   :  { %v3172_v13 = vadd.f32 %v15461_v61, %v3136_v50  ;;  %v3134_v37 = vld [vmem:[#allocation4 + $0xa0] sm:$0xff]  ;;  %2358 = vst.msk [vmem:[#allocation4 + $0xd0] sm:$0xff] %vm396_vm5, %v2322_v39  ;;  %v5127_v27 = vshll.u32 %v17738_v20, 16  ;;  %v2323_v30 = vadd.f32 %v15362_v43, %v2287_v7  ;;  %v2216_v52 = vpop.f32.mrb[63].mxu1  ;;  %v3483_v10 = vrot.slane %v3306_v17, %v17617_v46 }
 0x21e   :  { %v3170_v18 = vadd.f32 %v3134_v37, %v3051_v60  ;;  %2356 = vst.msk [vmem:[#allocation4 + $0xc0] sm:$0xff] %vm396_vm5, %v2320_v29  ;;  %v2321_v32 = vadd.f32 %v2285_v62, %v2216_v52  ;;  %v3475_v54 = vcombine.high %v3473_v21, %v3473_v21  ;;  %v3490_v55 = vrot.slane %v3476_v14, %v17617_v46  ;;  %v2288_v39 = vld [vmem:[#allocation4 + $0xe0] sm:$0xff] }
 0x21f   :  { %v3137_v48 = vld [vmem:[#allocation4 + $0xb8] sm:$0xff]  ;;  %v15465_v53 = vpop.f32.mrb[60].mxu0  ;;  %3208 = vst.msk [vmem:[#allocation4 + $0xb0] sm:$0xff] %vm396_vm5, %v3172_v13  ;;  %v5129_v23 = vrot.slane %v5127_v27, 1  ;;  %2359 = vst.msk [vmem:[#allocation4 + $0xd8] sm:$0xff] %vm396_vm5, %v2323_v30  ;;  %v3491_v4 = vcombine.high %v3483_v10, %v3483_v10  ;;  %v4163_v45 = vsel %vm782_vm15, %v3466_v63, 0.0  ;;  %v3493_v43 = vcombine.high %v17740_v16, %v17740_v16 }
 0x220   :  { %v3173_v0 = vadd.f32 %v15462_v31, %v3137_v48  ;;  %v3135_v61 = vld [vmem:[#allocation4 + $0xa8] sm:$0xff]  ;;  %v3067_v8 = vpop.f32.mrb[61].mxu0  ;;  %3206 = vst.msk [vmem:[#allocation4 + $0xa0] sm:$0xff] %vm396_vm5, %v3170_v18  ;;  %2357 = vst.msk [vmem:[#allocation4 + $0xc8] sm:$0xff] %vm396_vm5, %v2321_v32  ;;  %v3492_v60 = vcombine.high %v3490_v55, %v3490_v55  ;;  %v4164_v2 = vsel %vm17640_vm0, %v3474_v59, 0.0  ;;  %v4165_v51 = vsel %vm779_vm6, %v3473_v21, 0.0 }
 0x221   :  { %v3171_v56 = vadd.f32 %v3135_v61, %v3054_v40  ;;  %v15466_v41 = vpop.f32.mrb[62].mxu0  ;;  %v5130_v5 = vsel %vm2722_vm4, %v5125_v47, %v5129_v23  ;;  %v4166_v31 = vsel %vm780_vm9, %v3475_v54, 0.0  ;;  %v4167_v12 = vsel %vm781_vm10, %v3483_v10, 0.0  ;;  %v2290_v47 = vld [vmem:[#allocation4 + $0xf0] sm:$0xff] }
 0x222   :  { %3209 = vst.msk [vmem:[#allocation4 + $0xb8] sm:$0xff] %vm396_vm5, %v3173_v0  ;;  %v3070_v3 = vpop.f32.mrb[63].mxu0  ;;  %v4168_v36 = vsel %vm782_vm15, %v3491_v4, 0.0  ;;  %5264 = vrot.lane.b32.xlu1 %v5130_v5, %s16631_s23  ;;  %v4169_v49 = vsel %vm779_vm6, %v3490_v55, 0.0  ;;  %v4170_v40 = vsel %vm780_vm9, %v3492_v60, 0.0  ;;  %v4503_v11 = vcombine.low %v4163_v45, %v4164_v2  ;;  %v15365_v22 = vpop.f32.mrb[64].mxu1 }
 0x223   :  { %3207 = vst.msk [vmem:[#allocation4 + $0xa8] sm:$0xff] %vm396_vm5, %v3171_v56  ;;  %v4504_v6 = vcombine.low %v4165_v51, %v4166_v31  ;;  %v4520_v1 = vcombine.low %v4167_v12, %v4168_v36  ;;  %v4521_v25 = vcombine.low %v4169_v49, %v4170_v40  ;;  %v5131_v17 = vshrl.u32 %v17738_v20, 16  ;;  %v2229_v63 = vpop.f32.mrb[65].mxu1 }
 0x224   :  { %v2326_v26 = vadd.f32 %v15365_v22, %v2290_v47  ;;  %v3140_v35 = vld [vmem:[#allocation4 + $0xd0] sm:$0xff]  ;;  %v4511_v38 = vrot.slane %v4503_v11, %v17617_v46  ;;  %v2324_v29 = vadd.f32 %v2288_v39, %v2229_v63  ;;  %v15366_v7 = vpop.f32.mrb[66].mxu1  ;;  %v3500_v62 = vrot.slane %v17740_v16, %v17617_v46 }
 0x225   :  { %v4518_v50 = vrot.slane %v4504_v6, %v17617_v46  ;;  %v3176_v21 = vadd.f32 %v15465_v53, %v3140_v35  ;;  %v3138_v59 = vld [vmem:[#allocation4 + $0xc0] sm:$0xff]  ;;  %v4528_v14 = vrot.slane %v4520_v1, %v17617_v46  ;;  %v4535_v13 = vrot.slane %v4521_v25, %v17617_v46  ;;  %v2232_v37 = vpop.f32.mrb[67].mxu1  ;;  %v2289_v25 = vld [vmem:[#allocation4 + $0xe8] sm:$0xff] }
 0x226   :  { %v17786_v20 = vor.u32 %v5131_v17, %v5129_v23  ;;  %2362 = vst.msk [vmem:[#allocation4 + $0xf0] sm:$0xff] %vm396_vm5, %v2326_v26  ;;  %v3174_v27 = vadd.f32 %v3138_v59, %v3067_v8  ;;  %v3141_v30 = vld [vmem:[#allocation4 + $0xd8] sm:$0xff]  ;;  %2360 = vst.msk [vmem:[#allocation4 + $0xe0] sm:$0xff] %vm396_vm5, %v2324_v29  ;;  %v3507_v10 = vrot.slane %v3493_v43, %v17617_v46  ;;  %v4171_v23 = vsel %vm781_vm10, %v3500_v62, 0.0  ;;  %v3231_v26 = vld [vmem:[#allocation4 + $0x48] sm:$0xff] }
 0x227   :  { %v4519_v52 = vcombine.low %v4511_v38, %v4518_v50  ;;  %v15469_v19 = vpop.f32.mrb[64].mxu0  ;;  %3212 = vst.msk [vmem:[#allocation4 + $0xd0] sm:$0xff] %vm396_vm5, %v3176_v21  ;;  %v3177_v18 = vadd.f32 %v15466_v41, %v3141_v30  ;;  %v3139_v48 = vld [vmem:[#allocation4 + $0xc8] sm:$0xff]  ;;  %v4536_v32 = vcombine.low %v4528_v14, %v4535_v13  ;;  %v3510_v53 = vcombine.high %v17742_v58, %v17742_v58  ;;  %v2291_v41 = vld [vmem:[#allocation4 + $0xf8] sm:$0xff]  ;;  %v3232_v13 = vld [vmem:[#allocation4 + $0x50] sm:$0xff] }
 0x228   :  { %v3517_v54 = vrot.slane %v17742_v58, %v17617_v46  ;;  %v3083_v55 = vpop.f32.mrb[65].mxu0  ;;  %3210 = vst.msk [vmem:[#allocation4 + $0xc0] sm:$0xff] %vm396_vm5, %v3174_v27  ;;  %v3175_v0 = vadd.f32 %v3139_v48, %v3070_v3  ;;  %v3508_v61 = vcombine.high %v3500_v62, %v3500_v62  ;;  %v3509_v16 = vcombine.high %v3507_v10, %v3507_v10  ;;  %v3233_v27 = vld [vmem:[#allocation4 + $0x58] sm:$0xff] }
 0x229   :  { %v17801_v8 = vpop.f32.mrb[66].mxu0  ;;  %3213 = vst.msk [vmem:[#allocation4 + $0xd8] sm:$0xff] %vm396_vm5, %v3177_v18  ;;  %v5085_v4 = vpack.c.bf16 %v4536_v32, %v4519_v52  ;;  %v3524_v45 = vrot.slane %v3510_v53, %v17617_v46  ;;  %v4173_v58 = vsel %vm17640_vm0, %v3507_v10, 0.0  ;;  %v2327_v3 = vadd.f32 %v15366_v7, %v2291_v41 }
 0x22a   :  { %v3525_v56 = vcombine.high %v3517_v54, %v3517_v54  ;;  %v17807_v60 = vpop.f32.mrb[67].mxu0  ;;  %3211 = vst.msk [vmem:[#allocation4 + $0xc8] sm:$0xff] %vm396_vm5, %v3175_v0  ;;  %v4172_v2 = vsel %vm782_vm15, %v3508_v61, 0.0  ;;  %v4174_v51 = vsel %vm779_vm6, %v3509_v16, 0.0  ;;  %v4175_v5 = vsel %vm780_vm9, %v3517_v54, 0.0  ;;  %v15369_v31 = vpop.f32.mrb[68].mxu1 }
 0x22b   :  { %v5135_v12 = vshll.u32 %v5085_v4, 16  ;;  %5103 = vst.msk [vmem:[#allocation3 + $0x20] sm:$0xff] %vm396_vm5, %v5085_v4  ;;  %v3526_v36 = vcombine.high %v3524_v45, %v3524_v45  ;;  %v4177_v40 = vsel %vm782_vm15, %v3524_v45, 0.0  ;;  %v2245_v11 = vpop.f32.mrb[69].mxu1  ;;  %v4537_v6 = vcombine.low %v4171_v23, %v4172_v2  ;;  %2363 = vst.msk [vmem:[#allocation4 + $0xf8] sm:$0xff] %vm396_vm5, %v2327_v3  ;;  %v2292_v54 = vld [vmem:[#allocation4 + $0x100] sm:$0xff] }
 0x22c   :  { %v4176_v49 = vsel %vm781_vm10, %v3525_v56, 0.0  ;;  %v4538_v22 = vcombine.low %v4173_v58, %v4174_v51  ;;  %v5139_v1 = vshrl.u32 %v5085_v4, 16  ;;  %v15370_v63 = vpop.f32.mrb[70].mxu1  ;;  %v2325_v38 = vadd.f32 %v2289_v25, %v2232_v37  ;;  %v2295_v45 = vld [vmem:[#allocation4 + $0x118] sm:$0xff] }
 0x22d   :  { %v4554_v47 = vcombine.low %v4175_v5, %v4176_v49  ;;  %v3144_v17 = vld [vmem:[#allocation4 + $0xf0] sm:$0xff]  ;;  %v5137_v39 = vrot.slane %v5135_v12, 1  ;;  %v4178_v35 = vsel %vm779_vm6, %v3526_v36, 0.0  ;;  %v3142_v29 = vld [vmem:[#allocation4 + $0xe0] sm:$0xff]  ;;  %v17824_v43 = vpop.f32.mrb[71].mxu1  ;;  %v4545_v7 = vrot.slane %v4537_v6, %v17617_v46 }
 0x22e   :  { %v3180_v50 = vadd.f32 %v15469_v19, %v3144_v17  ;;  %v4552_v21 = vrot.slane %v4538_v22, %v17617_v46  ;;  %v4555_v59 = vcombine.low %v4177_v40, %v4178_v35  ;;  %2361 = vst.msk [vmem:[#allocation4 + $0xe8] sm:$0xff] %vm396_vm5, %v2325_v38  ;;  %v3178_v37 = vadd.f32 %v3142_v29, %v3083_v55  ;;  %v2294_v19 = vld [vmem:[#allocation4 + $0x110] sm:$0xff]  ;;  %v16522_v55 = vld [vmem:[%s21081_s1 + $0x1c8] sm:$0xff]  }
 0x22f   :  { %v4562_v14 = vrot.slane %v4554_v47, %v17617_v46  ;;  %v17829_v30 = vpop.f32.mrb[68].mxu0  ;;  %v5138_v52 = vsel %vm2722_vm4, %v17786_v20, %v5137_v39  ;;  %v17833_v62 = vor.u32 %v5139_v1, %v5137_v39  ;;  %v3274_v10 = vadd.f32 %v17603_v15, %v3231_v26  ;;  %15477 = vmatprep.subr.bf16.mxu1 %v16522_v55 }
 0x230   :  { %3216 = vst.msk [vmem:[#allocation4 + $0xf0] sm:$0xff] %vm396_vm5, %v3180_v50  ;;  %v17838_v18 = vpop.f32.mrb[69].mxu0  ;;  %5266 = vrot.lane.b32.xlu0 %v5138_v52, %s16631_s23  ;;  %v4553_v48 = vcombine.low %v4545_v7, %v4552_v21  ;;  %v4569_v32 = vrot.slane %v4555_v59, %v17617_v46  ;;  %v3309_v53 = vmax.f32 %v17733_v33, 0.0  ;;  %v2330_v20 = vadd.f32 %v15369_v31, %v2294_v19 }
 0x231   :  { %v17843_v0 = vpop.f32.mrb[70].mxu0  ;;  %3214 = vst.msk [vmem:[#allocation4 + $0xe0] sm:$0xff] %vm396_vm5, %v3178_v37  ;;  %v3310_v61 = vmax.f32 %v3274_v10, 0.0  ;;  %v2328_v16 = vadd.f32 %v2292_v54, %v2245_v11  ;;  %v3275_v23 = vadd.f32 %v17603_v15, %v3232_v13  ;;  %v3276_v4 = vadd.f32 %v17603_v15, %v3233_v27  ;;  %15478 = vmatpush3.bf16.msra.mxu1 %v16522_v55  ;;  %v2293_v54 = vld [vmem:[#allocation4 + $0x108] sm:$0xff] }
 0x232   :  { %v17851_v56 = vpop.f32.mrb[71].mxu0  ;;  %v4570_v33 = vcombine.low %v4562_v14, %v4569_v32  ;;  %v3527_v58 = vcombine.high %v3309_v53, %v3309_v53  ;;  %v3534_v41 = vrot.slane %v3309_v53, %v17617_v46  ;;  %2366 = vst.msk [vmem:[#allocation4 + $0x110] sm:$0xff] %vm396_vm5, %v2330_v20  ;;  %v2331_v2 = vadd.f32 %v15370_v63, %v2295_v45  ;;  %v3145_v51 = vld [vmem:[#allocation4 + $0xf8] sm:$0xff] }
 0x233   :  { %v3544_v5 = vcombine.high %v3310_v61, %v3310_v61  ;;  %v3551_v3 = vrot.slane %v3310_v61, %v17617_v46  ;;  %2364 = vst.msk [vmem:[#allocation4 + $0x100] sm:$0xff] %vm396_vm5, %v2328_v16  ;;  %v3311_v31 = vmax.f32 %v3275_v23, 0.0  ;;  %v3312_v12 = vmax.f32 %v3276_v4, 0.0 }
 0x234   :  { %v5086_v36 = vpack.c.bf16 %v4570_v33, %v4553_v48  ;;  %v3181_v49 = vadd.f32 %v17801_v8, %v3145_v51  ;;  %v3541_v40 = vrot.slane %v3527_v58, %v17617_v46  ;;  %v3542_v11 = vcombine.high %v3534_v41, %v3534_v41  ;;  %2367 = vst.msk [vmem:[#allocation4 + $0x118] sm:$0xff] %vm396_vm5, %v2331_v2 }
 0x235   :  { %v3558_v6 = vrot.slane %v3544_v5, %v17617_v46  ;;  %v3559_v22 = vcombine.high %v3551_v3, %v3551_v3  ;;  %v4179_v47 = vsel %vm780_vm9, %v3534_v41, 0.0  ;;  %v4183_v1 = vsel %vm779_vm6, %v3551_v3, 0.0  ;;  %v3143_v8 = vld [vmem:[#allocation4 + $0xe8] sm:$0xff] }
 0x236   :  { %v5143_v25 = vshll.u32 %v5086_v36, 16  ;;  %5104 = vst.msk [vmem:[#allocation3 + $0x28] sm:$0xff] %vm396_vm5, %v5086_v36  ;;  %3217 = vst.msk [vmem:[#allocation4 + $0xf8] sm:$0xff] %vm396_vm5, %v3181_v49  ;;  %v3543_v17 = vcombine.high %v3541_v40, %v3541_v40  ;;  %v4180_v26 = vsel %vm781_vm10, %v3542_v11, 0.0  ;;  %v4181_v63 = vsel %vm782_vm15, %v3541_v40, 0.0 }
 0x237   :  { %v3179_v39 = vadd.f32 %v3143_v8, %v17807_v60  ;;  %v3560_v35 = vcombine.high %v3558_v6, %v3558_v6  ;;  %v4184_v38 = vsel %vm780_vm9, %v3559_v22, 0.0  ;;  %v4185_v50 = vsel %vm781_vm10, %v3558_v6, 0.0 }
 0x238   :  { %v5145_v29 = vrot.slane %v5143_v25, 1  ;;  %v4182_v7 = vsel %vm17640_vm0, %v3543_v17, 0.0  ;;  %v4571_v21 = vcombine.low %v4179_v47, %v4180_v26  ;;  %v4588_v59 = vcombine.low %v4183_v1, %v4184_v38  ;;  %v3234_v17 = vld [vmem:[#allocation4 + $0x60] sm:$0xff]  ;;  %v3235_v26 = vld [vmem:[#allocation4 + $0x68] sm:$0xff] }
 0x239   :  { %3215 = vst.msk [vmem:[#allocation4 + $0xe8] sm:$0xff] %vm396_vm5, %v3179_v39  ;;  %v4186_v14 = vsel %vm782_vm15, %v3560_v35, 0.0  ;;  %v4572_v13 = vcombine.low %v4181_v63, %v4182_v7  ;;  %v5147_v60 = vshrl.u32 %v5086_v36, 16  ;;  %v3561_v27 = vcombine.high %v3311_v31, %v3311_v31  ;;  %v3148_v23 = vld [vmem:[#allocation4 + $0x110] sm:$0xff] }
 0x23a   :  { %v5146_v52 = vsel %vm2722_vm4, %v17833_v62, %v5145_v29  ;;  %v4579_v37 = vrot.slane %v4571_v21, %v17617_v46  ;;  %v4589_v10 = vcombine.low %v4185_v50, %v4186_v14  ;;  %v4596_v19 = vrot.slane %v4588_v59, %v17617_v46  ;;  %v3146_v3 = vld [vmem:[#allocation4 + $0x100] sm:$0xff]  ;;  %v3236_v63 = vld [vmem:[#allocation4 + $0x70] sm:$0xff]  ;;  %v3237_v50 = vld [vmem:[#allocation4 + $0x78] sm:$0xff] }
 0x23b   :  { %5268 = vrot.lane.b32.xlu1 %v5146_v52, %s16631_s23  ;;  %v4586_v48 = vrot.slane %v4572_v13, %v17617_v46  ;;  %v17887_v32 = vor.u32 %v5147_v60, %v5145_v29  ;;  %v3568_v53 = vrot.slane %v3311_v31, %v17617_v46  ;;  %v3575_v20 = vrot.slane %v3561_v27, %v17617_v46  ;;  %v3149_v49 = vld [vmem:[#allocation4 + $0x118] sm:$0xff]  ;;  %v3238_v29 = vld [vmem:[#allocation4 + $0x80] sm:$0xff]  ;;  %v16523_v27 = vld [vmem:[%s21081_s1 + $0x1d0] sm:$0xff]  }
 0x23c   :  { %v4603_v55 = vrot.slane %v4589_v10, %v17617_v46  ;;  %v3578_v61 = vcombine.high %v3312_v12, %v3312_v12  ;;  %v3585_v62 = vrot.slane %v3312_v12, %v17617_v46  ;;  %v2329_v16 = vadd.f32 %v2293_v54, %v17824_v43  ;;  %v16524_v52 = vld [vmem:[%s21081_s1 + $0x1d8] sm:$0xff]   ;;  %v16526_v54 = vld [vmem:[%s21081_s1 + $0x240] sm:$0xff]   ;;  %15479 = vmatprep.subr.bf16.mxu1 %v16523_v27 }
 0x23d   :  { %v4587_v4 = vcombine.low %v4579_v37, %v4586_v48  ;;  %v3576_v45 = vcombine.high %v3568_v53, %v3568_v53  ;;  %v3577_v33 = vcombine.high %v3575_v20, %v3575_v20  ;;  %v4187_v58 = vsel %vm779_vm6, %v3568_v53, 0.0  ;;  %v3239_v53 = vld [vmem:[#allocation4 + $0x88] sm:$0xff]  ;;  %15480 = vmatpush3.bf16.msra.mxu1 %v16523_v27  ;;  %15579 = vmatprep.subr.bf16.mxu0 %v16526_v54 }
 0x23e   :  { %v4604_v41 = vcombine.low %v4596_v19, %v4603_v55  ;;  %v3592_v2 = vrot.slane %v3578_v61, %v17617_v46  ;;  %v3593_v51 = vcombine.high %v3585_v62, %v3585_v62  ;;  %v4189_v5 = vsel %vm781_vm10, %v3575_v20, 0.0  ;;  %2365 = vst.msk [vmem:[#allocation4 + $0x108] sm:$0xff] %vm396_vm5, %v2329_v16  ;;  %15481 = vmatprep.subr.bf16.mxu1 %v16524_v52 }
 0x23f   :  { %v4188_v43 = vsel %vm780_vm9, %v3576_v45, 0.0  ;;  %v4190_v31 = vsel %vm782_vm15, %v3577_v33, 0.0  ;;  %v4191_v12 = vsel %vm17640_vm0, %v3585_v62, 0.0  ;;  %v3184_v36 = vadd.f32 %v17829_v30, %v3148_v23  ;;  %v16528_v23 = vld [vmem:[%s21081_s1 + $0x248] sm:$0xff]   ;;  %15580 = vmatpush3.bf16.msra.mxu0 %v16526_v54 }
 0x240   :  { %v5087_v40 = vpack.c.bf16 %v4604_v41, %v4587_v4  ;;  %v3594_v11 = vcombine.high %v3592_v2, %v3592_v2  ;;  %v4192_v6 = vsel %vm779_vm6, %v3593_v51, 0.0  ;;  %v4193_v22 = vsel %vm780_vm9, %v3592_v2, 0.0  ;;  %v16525_v51 = vld [vmem:[%s21081_s1 + $0x1e0] sm:$0xff]   ;;  %15581 = vmatprep.subr.bf16.mxu0 %v16528_v23 }
 0x241   :  { %v4605_v47 = vcombine.low %v4187_v58, %v4188_v43  ;;  %v4606_v1 = vcombine.low %v4189_v5, %v4190_v31  ;;  %v4622_v25 = vcombine.low %v4191_v12, %v4192_v6  ;;  %3220 = vst.msk [vmem:[#allocation4 + $0x110] sm:$0xff] %vm396_vm5, %v3184_v36  ;;  %v3182_v8 = vadd.f32 %v3146_v3, %v17838_v18 }
 0x242   :  { %v5151_v30 = vshll.u32 %v5087_v40, 16  ;;  %5105 = vst.msk [vmem:[#allocation3 + $0x30] sm:$0xff] %vm396_vm5, %v5087_v40  ;;  %v4194_v39 = vsel %vm781_vm10, %v3594_v11, 0.0  ;;  %v5155_v35 = vshrl.u32 %v5087_v40, 16  ;;  %v3185_v38 = vadd.f32 %v17843_v0, %v3149_v49  ;;  %v16529_v40 = vld [vmem:[%s21081_s1 + $0x250] sm:$0xff]   ;;  %15482 = vmatpush3.bf16.msra.mxu1 %v16524_v52 }
 0x243   :  { %v4613_v7 = vrot.slane %v4605_v47, %v17617_v46  ;;  %v4620_v21 = vrot.slane %v4606_v1, %v17617_v46  ;;  %v4623_v59 = vcombine.low %v4193_v22, %v4194_v39  ;;  %v4630_v18 = vrot.slane %v4622_v25, %v17617_v46  ;;  %3218 = vst.msk [vmem:[#allocation4 + $0x100] sm:$0xff] %vm396_vm5, %v3182_v8 }
 0x244   :  { %v5153_v14 = vrot.slane %v5151_v30, 1  ;;  %3221 = vst.msk [vmem:[#allocation4 + $0x118] sm:$0xff] %vm396_vm5, %v3185_v38  ;;  %v3277_v13 = vadd.f32 %v17603_v15, %v3234_v17  ;;  %v3278_v60 = vadd.f32 %v17603_v15, %v3235_v26  ;;  %v3279_v0 = vadd.f32 %v17603_v15, %v3236_v63  ;;  %15483 = vmatprep.subr.bf16.mxu1 %v16525_v51 }
 0x245   :  { %v4621_v37 = vcombine.low %v4613_v7, %v4620_v21  ;;  %v4637_v10 = vrot.slane %v4623_v59, %v17617_v46  ;;  %v3147_v19 = vld [vmem:[#allocation4 + $0x108] sm:$0xff]  ;;  %v3280_v48 = vadd.f32 %v17603_v15, %v3237_v50  ;;  %v3281_v20 = vadd.f32 %v17603_v15, %v3238_v29  ;;  %15582 = vmatpush3.bf16.msra.mxu0 %v16528_v23 }
 0x246   :  { %v5154_v55 = vsel %vm2722_vm4, %v17887_v32, %v5153_v14  ;;  %v5157_v61 = vor.u32 %v5155_v35, %v5153_v14  ;;  %v3183_v62 = vadd.f32 %v3147_v19, %v17851_v56  ;;  %v3313_v16 = vmax.f32 %v3277_v13, 0.0  ;;  %v16527_v35 = vld [vmem:[%s21081_s1 + $0x1e8] sm:$0xff]   ;;  %15583 = vmatprep.subr.bf16.mxu0 %v16529_v40  ;;  %15484 = vmatpush3.bf16.msra.mxu1 %v16525_v51  ;;  %v16531_v13 = vld [vmem:[%s21081_s1 + $0x258] sm:$0xff]  }
 0x247   :  { %5270 = vrot.lane.b32.xlu0 %v5154_v55, %s16631_s23  ;;  %v4638_v4 = vcombine.low %v4630_v18, %v4637_v10  ;;  %v3314_v45 = vmax.f32 %v3278_v60, 0.0  ;;  %v3315_v33 = vmax.f32 %v3279_v0, 0.0  ;;  %v17944_v58 = vmax.f32 %v3280_v48, 0.0  ;;  %15485 = vmatprep.subr.bf16.mxu1 %v16527_v35  ;;  %v16533_v51 = vld [vmem:[%s21081_s1 + $0x1f8] sm:$0xff]  }
 0x248   :  { %3219 = vst.msk [vmem:[#allocation4 + $0x108] sm:$0xff] %vm396_vm5, %v3183_v62  ;;  %v3595_v32 = vcombine.high %v3313_v16, %v3313_v16  ;;  %v3602_v41 = vrot.slane %v3313_v16, %v17617_v46  ;;  %v17949_v56 = vadd.f32 %v17603_v15, %v3239_v53  ;;  %v17951_v2 = vmax.f32 %v3281_v20, 0.0 }
 0x249   :  { %v5088_v5 = vpack.c.bf16 %v4638_v4, %v4621_v37  ;;  %v3612_v3 = vcombine.high %v3314_v45, %v3314_v45  ;;  %v3619_v43 = vrot.slane %v3314_v45, %v17617_v46  ;;  %v3629_v31 = vcombine.high %v3315_v33, %v3315_v33  ;;  %v16530_v37 = vld [vmem:[%s21081_s1 + $0x1f0] sm:$0xff]   ;;  %15584 = vmatpush3.bf16.msra.mxu0 %v16529_v40  ;;  %v16532_v45 = vld [vmem:[%s21081_s1 + $0x260] sm:$0xff]  }
 0x24a   :  { %v3609_v12 = vrot.slane %v3595_v32, %v17617_v46  ;;  %v3610_v36 = vcombine.high %v3602_v41, %v3602_v41  ;;  %v4195_v15 = vsel %vm782_vm15, %v3602_v41, 0.0  ;;  %v3636_v49 = vrot.slane %v3315_v33, %v17617_v46  ;;  %15486 = vmatpush3.bf16.msra.mxu1 %v16527_v35  ;;  %15585 = vmatprep.subr.bf16.mxu0 %v16531_v13 }
 0x24b   :  { %v5159_v11 = vshll.u32 %v5088_v5, 16  ;;  %5106 = vst.msk [vmem:[#allocation3 + $0x38] sm:$0xff] %vm396_vm5, %v5088_v5  ;;  %v3626_v6 = vrot.slane %v3612_v3, %v17617_v46  ;;  %v3627_v22 = vcombine.high %v3619_v43, %v3619_v43  ;;  %v4199_v47 = vsel %vm782_vm15, %v3619_v43, 0.0  ;;  %15487 = vmatprep.subr.bf16.mxu1 %v16530_v37 }
 0x24c   :  { %v3611_v1 = vcombine.high %v3609_v12, %v3609_v12  ;;  %v4196_v25 = vsel %vm779_vm6, %v3610_v36, 0.0  ;;  %v4197_v8 = vsel %vm780_vm9, %v3609_v12, 0.0  ;;  %v5163_v17 = vshrl.u32 %v5088_v5, 16 }
 0x24d   :  { %v5161_v26 = vrot.slane %v5159_v11, 1  ;;  %v3628_v63 = vcombine.high %v3626_v6, %v3626_v6  ;;  %v4200_v30 = vsel %vm17640_vm0, %v3627_v22, 0.0  ;;  %v4201_v39 = vsel %vm779_vm6, %v3626_v6, 0.0  ;;  %15586 = vmatpush3.bf16.msra.mxu0 %v16531_v13 }
 0x24e   :  { %v4198_v38 = vsel %vm781_vm10, %v3611_v1, 0.0  ;;  %v4639_v50 = vcombine.low %v4195_v15, %v4196_v25  ;;  %v4656_v29 = vcombine.low %v4199_v47, %v4200_v30  ;;  %v3643_v7 = vrot.slane %v3629_v31, %v17617_v46  ;;  %15488 = vmatpush3.bf16.msra.mxu1 %v16530_v37  ;;  %15587 = vmatprep.subr.bf16.mxu0 %v16532_v45  ;;  %v3241_v37 = vld [vmem:[#allocation4 + $0x98] sm:$0xff] }
 0x24f   :  { %v5162_v21 = vsel %vm2722_vm4, %v5157_v61, %v5161_v26  ;;  %v4202_v59 = vsel %vm780_vm9, %v3628_v63, 0.0  ;;  %v4640_v18 = vcombine.low %v4197_v8, %v4198_v38  ;;  %v17985_v14 = vor.u32 %v5163_v17, %v5161_v26  ;;  %15489 = vmatprep.subr.bf16.mxu1 %v16533_v51  ;;  %v18040_v17 = vld [vmem:[%s21081_s1 + $0x180] sm:$0xff]  }
 0x250   :  { %5272 = vrot.lane.b32.xlu1 %v5162_v21, %s16631_s23  ;;  %v4647_v60 = vrot.slane %v4639_v50, %v17617_v46  ;;  %v4657_v0 = vcombine.low %v4201_v39, %v4202_v59  ;;  %v4664_v27 = vrot.slane %v4656_v29, %v17617_v46  ;;  %v3644_v52 = vcombine.high %v3636_v49, %v3636_v49 }
 0x251   :  { %v4654_v10 = vrot.slane %v4640_v18, %v17617_v46  ;;  %v3645_v19 = vcombine.high %v3643_v7, %v3643_v7  ;;  %v3646_v48 = vcombine.high %v17944_v58, %v17944_v58  ;;  %v3653_v53 = vrot.slane %v17944_v58, %v17617_v46  ;;  %15588 = vmatpush3.bf16.msra.mxu0 %v16532_v45  ;;  %v16535_v18 = vld [vmem:[%s21081_s1 + $0x270] sm:$0xff]   ;;  %v3242_v45 = vld [vmem:[#allocation4 + $0xa0] sm:$0xff] }
 0x252   :  { %v4671_v20 = vrot.slane %v4657_v0, %v17617_v46  ;;  %v4203_v54 = vsel %vm781_vm10, %v3636_v49, 0.0  ;;  %v4204_v55 = vsel %vm782_vm15, %v3644_v52, 0.0  ;;  %v4205_v61 = vsel %vm779_vm6, %v3643_v7, 0.0  ;;  %15490 = vmatpush3.bf16.msra.mxu1 %v16533_v51  ;;  %v3240_v52 = vld [vmem:[#allocation4 + $0x90] sm:$0xff] }
 0x253   :  { %v4655_v62 = vcombine.low %v4647_v60, %v4654_v10  ;;  %v3660_v16 = vrot.slane %v3646_v48, %v17617_v46  ;;  %v3661_v23 = vcombine.high %v3653_v53, %v3653_v53  ;;  %v4206_v4 = vsel %vm780_vm9, %v3645_v19, 0.0  ;;  %15527 = vmatprep.subr.bf16.mxu1 %v18040_v17 }
 0x254   :  { %v4672_v33 = vcombine.low %v4664_v27, %v4671_v20  ;;  %v4207_v58 = vsel %vm781_vm10, %v3653_v53, 0.0  ;;  %v4673_v32 = vcombine.low %v4203_v54, %v4204_v55  ;;  %v4674_v41 = vcombine.low %v4205_v61, %v4206_v4 }
 0x255   :  { %v3662_v5 = vcombine.high %v3660_v16, %v3660_v16  ;;  %v4208_v3 = vsel %vm782_vm15, %v3661_v23, 0.0  ;;  %v4209_v43 = vsel %vm17640_vm0, %v3660_v16, 0.0  ;;  %v3318_v31 = vmax.f32 %v17949_v56, 0.0  ;;  %v16534_v56 = vld [vmem:[%s21081_s1 + $0x268] sm:$0xff]   ;;  %v18072_v16 = vld [vmem:[%s21082_s2] ss:$0 sm:$0xff] }
 0x256   :  { %v5089_v12 = vpack.c.bf16 %v4672_v33, %v4655_v62  ;;  %v4681_v36 = vrot.slane %v4673_v32, %v17617_v46  ;;  %v4688_v15 = vrot.slane %v4674_v41, %v17617_v46  ;;  %v4690_v49 = vcombine.low %v4207_v58, %v4208_v3  ;;  %15589 = vmatprep.subr.bf16.mxu0 %v16534_v56  ;;  %v3243_v33 = vld [vmem:[#allocation4 + $0xa8] sm:$0xff]  ;;  %v16537_v58 = vld [vmem:[%s21081_s1 + $0x278] sm:$0xff]  }
 0x257   :  { %v4210_v40 = vsel %vm779_vm6, %v3662_v5, 0.0  ;;  %v3663_v11 = vcombine.high %v17951_v2, %v17951_v2  ;;  %v3670_v6 = vrot.slane %v17951_v2, %v17617_v46  ;;  %v3680_v22 = vcombine.high %v3318_v31, %v3318_v31  ;;  %15590 = vmatpush3.bf16.msra.mxu0 %v16534_v56 }
 0x258   :  { %v5167_v47 = vshll.u32 %v5089_v12, 16  ;;  %5107 = vst.msk [vmem:[#allocation3 + $0x40] sm:$0xff] %vm396_vm5, %v5089_v12  ;;  %v4689_v1 = vcombine.low %v4681_v36, %v4688_v15  ;;  %v4691_v25 = vcombine.low %v4209_v43, %v4210_v40  ;;  %v4698_v8 = vrot.slane %v4690_v49, %v17617_v46  ;;  %15591 = vmatprep.subr.bf16.mxu0 %v16535_v18 }
 0x259   :  { %v5171_v2 = vshrl.u32 %v5089_v12, 16  ;;  %v3677_v26 = vrot.slane %v3663_v11, %v17617_v46  ;;  %v3678_v63 = vcombine.high %v3670_v6, %v3670_v6  ;;  %v3687_v30 = vrot.slane %v3318_v31, %v17617_v46 }
 0x25a   :  { %v5169_v39 = vrot.slane %v5167_v47, 1  ;;  %v4705_v35 = vrot.slane %v4691_v25, %v17617_v46  ;;  %v3694_v38 = vrot.slane %v3680_v22, %v17617_v46  ;;  %v4211_v50 = vsel %vm780_vm9, %v3670_v6, 0.0 }
 0x25b   :  { %v3679_v29 = vcombine.high %v3677_v26, %v3677_v26  ;;  %v3695_v7 = vcombine.high %v3687_v30, %v3687_v30  ;;  %v4212_v21 = vsel %vm781_vm10, %v3678_v63, 0.0  ;;  %v4213_v59 = vsel %vm782_vm15, %v3677_v26, 0.0  ;;  %15592 = vmatpush3.bf16.msra.mxu0 %v16535_v18 }
 0x25c   :  { %v5170_v13 = vsel %vm2722_vm4, %v17985_v14, %v5169_v39  ;;  %v4706_v60 = vcombine.low %v4698_v8, %v4705_v35  ;;  %v5173_v0 = vor.u32 %v5171_v2, %v5169_v39  ;;  %v3696_v27 = vcombine.high %v3694_v38, %v3694_v38  ;;  %15593 = vmatprep.subr.bf16.mxu0 %v16537_v58 }
 0x25d   :  { %5274 = vrot.lane.b32.xlu0 %v5170_v13, %s16631_s23  ;;  %v4214_v10 = vsel %vm779_vm6, %v3679_v29, 0.0  ;;  %v4215_v19 = vsel %vm780_vm9, %v3687_v30, 0.0  ;;  %v4216_v48 = vsel %vm781_vm10, %v3695_v7, 0.0  ;;  %v4217_v14 = vsel %vm782_vm15, %v3694_v38, 0.0 }
 0x25e   :  { %v5090_v53 = vpack.c.bf16 %v4706_v60, %v4689_v1  ;;  %v4218_v20 = vsel %vm17640_vm0, %v3696_v27, 0.0  ;;  %v4707_v54 = vcombine.low %v4211_v50, %v4212_v21  ;;  %v4708_v55 = vcombine.low %v4213_v59, %v4214_v10 }
 0x25f   :  { %v4724_v61 = vcombine.low %v4215_v19, %v4216_v48  ;;  %v4725_v62 = vcombine.low %v4217_v14, %v4218_v20  ;;  %v3283_v23 = vadd.f32 %v18072_v16, %v3240_v52  ;;  %v3284_v4 = vadd.f32 %v18072_v16, %v3241_v37  ;;  %15594 = vmatpush3.bf16.msra.mxu0 %v16537_v58 }
 0x260   :  { %v5175_v32 = vshll.u32 %v5090_v53, 16  ;;  %5108 = vst.msk [vmem:[#allocation3 + $0x48] sm:$0xff] %vm396_vm5, %v5090_v53  ;;  %v4715_v41 = vrot.slane %v4707_v54, %v17617_v46  ;;  %v4722_v51 = vrot.slane %v4708_v55, %v17617_v46  ;;  %v5179_v5 = vshrl.u32 %v5090_v53, 16 }
 0x261   :  { %v4732_v3 = vrot.slane %v4724_v61, %v17617_v46  ;;  %v4739_v43 = vrot.slane %v4725_v62, %v17617_v46  ;;  %v3319_v31 = vmax.f32 %v3283_v23, 0.0  ;;  %v3320_v12 = vmax.f32 %v3284_v4, 0.0  ;;  %v3244_v62 = vld [vmem:[#allocation4 + $0xb0] sm:$0xff] }
 0x262   :  { %v5177_v36 = vrot.slane %v5175_v32, 1  ;;  %v4723_v15 = vcombine.low %v4715_v41, %v4722_v51  ;;  %v3285_v49 = vadd.f32 %v18072_v16, %v3242_v45  ;;  %v3286_v40 = vadd.f32 %v18072_v16, %v3243_v33 }
 0x263   :  { %v4740_v11 = vcombine.low %v4732_v3, %v4739_v43  ;;  %v3697_v6 = vcombine.high %v3319_v31, %v3319_v31  ;;  %v3704_v22 = vrot.slane %v3319_v31, %v17617_v46  ;;  %v3714_v56 = vcombine.high %v3320_v12, %v3320_v12  ;;  %v3245_v31 = vld [vmem:[#allocation4 + $0xb8] sm:$0xff] }
 0x264   :  { %v5178_v47 = vsel %vm2722_vm4, %v5173_v0, %v5177_v36  ;;  %v5181_v1 = vor.u32 %v5179_v5, %v5177_v36  ;;  %v3721_v25 = vrot.slane %v3320_v12, %v17617_v46  ;;  %v3321_v8 = vmax.f32 %v3285_v49, 0.0 }
 0x265   :  { %5276 = vrot.lane.b32.xlu1 %v5178_v47, %s16631_s23  ;;  %v5091_v2 = vpack.c.bf16 %v4740_v11, %v4723_v15  ;;  %v3711_v26 = vrot.slane %v3697_v6, %v17617_v46  ;;  %v3712_v63 = vcombine.high %v3704_v22, %v3704_v22  ;;  %v3728_v30 = vrot.slane %v3714_v56, %v17617_v46 }
 0x266   :  { %v3729_v39 = vcombine.high %v3721_v25, %v3721_v25  ;;  %v4219_v35 = vsel %vm779_vm6, %v3704_v22, 0.0  ;;  %v4223_v38 = vsel %vm779_vm6, %v3721_v25, 0.0  ;;  %v3322_v50 = vmax.f32 %v3286_v40, 0.0 }
 0x267   :  { %v5183_v29 = vshll.u32 %v5091_v2, 16  ;;  %5109 = vst.msk [vmem:[#allocation3 + $0x50] sm:$0xff] %vm396_vm5, %v5091_v2  ;;  %v3713_v7 = vcombine.high %v3711_v26, %v3711_v26  ;;  %v3730_v21 = vcombine.high %v3728_v30, %v3728_v30  ;;  %v4220_v59 = vsel %vm780_vm9, %v3712_v63, 0.0 }
 0x268   :  { %v4221_v18 = vsel %vm781_vm10, %v3711_v26, 0.0  ;;  %v4224_v13 = vsel %vm780_vm9, %v3729_v39, 0.0  ;;  %v4225_v60 = vsel %vm781_vm10, %v3728_v30, 0.0  ;;  %v4741_v0 = vcombine.low %v4219_v35, %v4220_v59  ;;  %v3246_v39 = vld [vmem:[#allocation4 + $0xc0] sm:$0xff] }
 0x269   :  { %v5185_v27 = vrot.slane %v5183_v29, 1  ;;  %v4222_v52 = vsel %vm782_vm15, %v3713_v7, 0.0  ;;  %v4226_v37 = vsel %vm782_vm15, %v3730_v21, 0.0  ;;  %v4758_v10 = vcombine.low %v4223_v38, %v4224_v13 }
 0x26a   :  { %v4742_v19 = vcombine.low %v4221_v18, %v4222_v52  ;;  %v4749_v48 = vrot.slane %v4741_v0, %v17617_v46  ;;  %v4759_v14 = vcombine.low %v4225_v60, %v4226_v37  ;;  %v5187_v53 = vshrl.u32 %v5091_v2, 16 }
 0x26b   :  { %v5186_v20 = vsel %vm2722_vm4, %v5181_v1, %v5185_v27  ;;  %v4766_v54 = vrot.slane %v4758_v10, %v17617_v46  ;;  %v3731_v55 = vcombine.high %v3321_v8, %v3321_v8  ;;  %v3738_v61 = vrot.slane %v3321_v8, %v17617_v46 }
 0x26c   :  { %5278 = vrot.lane.b32.xlu0 %v5186_v20, %s16631_s23  ;;  %v4756_v23 = vrot.slane %v4742_v19, %v17617_v46  ;;  %v4773_v4 = vrot.slane %v4759_v14, %v17617_v46  ;;  %v5189_v45 = vor.u32 %v5187_v53, %v5185_v27  ;;  %v3748_v33 = vcombine.high %v3322_v50, %v3322_v50  ;;  %v3247_v27 = vld [vmem:[#allocation4 + $0xc8] sm:$0xff] }
 0x26d   :  { %v3745_v58 = vrot.slane %v3731_v55, %v17617_v46  ;;  %v3746_v32 = vcombine.high %v3738_v61, %v3738_v61  ;;  %v3755_v41 = vrot.slane %v3322_v50, %v17617_v46  ;;  %v4227_v51 = vsel %vm17640_vm0, %v3738_v61, 0.0 }
 0x26e   :  { %v4757_v5 = vcombine.low %v4749_v48, %v4756_v23  ;;  %v4774_v3 = vcombine.low %v4766_v54, %v4773_v4  ;;  %v3762_v43 = vrot.slane %v3748_v33, %v17617_v46  ;;  %v3287_v12 = vadd.f32 %v18072_v16, %v3244_v62 }
 0x26f   :  { %v3747_v36 = vcombine.high %v3745_v58, %v3745_v58  ;;  %v3763_v15 = vcombine.high %v3755_v41, %v3755_v41  ;;  %v4228_v49 = vsel %vm779_vm6, %v3746_v32, 0.0  ;;  %v4229_v40 = vsel %vm780_vm9, %v3745_v58, 0.0 }
 0x270   :  { %v5092_v11 = vpack.c.bf16 %v4774_v3, %v4757_v5  ;;  %v3764_v6 = vcombine.high %v3762_v43, %v3762_v43  ;;  %v4231_v22 = vsel %vm782_vm15, %v3755_v41, 0.0  ;;  %v4233_v56 = vsel %vm780_vm9, %v3762_v43, 0.0 }
 0x271   :  { %v4230_v47 = vsel %vm781_vm10, %v3747_v36, 0.0  ;;  %v4232_v1 = vsel %vm779_vm6, %v3763_v15, 0.0  ;;  %v4775_v25 = vcombine.low %v4227_v51, %v4228_v49  ;;  %v3288_v8 = vadd.f32 %v18072_v16, %v3245_v31 }
 0x272   :  { %v5191_v2 = vshll.u32 %v5092_v11, 16  ;;  %5110 = vst.msk [vmem:[#allocation3 + $0x58] sm:$0xff] %vm396_vm5, %v5092_v11  ;;  %v4234_v26 = vsel %vm781_vm10, %v3764_v6, 0.0  ;;  %v4776_v63 = vcombine.low %v4229_v40, %v4230_v47  ;;  %v4792_v30 = vcombine.low %v4231_v22, %v4232_v1 }
 0x273   :  { %v4783_v35 = vrot.slane %v4775_v25, %v17617_v46  ;;  %v4793_v38 = vcombine.low %v4233_v56, %v4234_v26  ;;  %v5195_v50 = vshrl.u32 %v5092_v11, 16  ;;  %v3323_v29 = vmax.f32 %v3287_v12, 0.0 }
 0x274   :  { %v5193_v7 = vrot.slane %v5191_v2, 1  ;;  %v4790_v21 = vrot.slane %v4776_v63, %v17617_v46  ;;  %v4800_v59 = vrot.slane %v4792_v30, %v17617_v46  ;;  %v3324_v18 = vmax.f32 %v3288_v8, 0.0  ;;  %v3248_v2 = vld [vmem:[#allocation4 + $0xd0] sm:$0xff] }
 0x275   :  { %v4807_v13 = vrot.slane %v4793_v38, %v17617_v46  ;;  %v3765_v60 = vcombine.high %v3323_v29, %v3323_v29  ;;  %v3772_v0 = vrot.slane %v3323_v29, %v17617_v46  ;;  %v3289_v52 = vadd.f32 %v18072_v16, %v3246_v39 }
 0x276   :  { %v5194_v37 = vsel %vm2722_vm4, %v5189_v45, %v5193_v7  ;;  %v4791_v10 = vcombine.low %v4783_v35, %v4790_v21  ;;  %v5197_v19 = vor.u32 %v5195_v50, %v5193_v7  ;;  %v3782_v48 = vcombine.high %v3324_v18, %v3324_v18 }
 0x277   :  { %5280 = vrot.lane.b32.xlu1 %v5194_v37, %s16631_s23  ;;  %v4808_v14 = vcombine.low %v4800_v59, %v4807_v13  ;;  %v3779_v53 = vrot.slane %v3765_v60, %v17617_v46  ;;  %v3780_v20 = vcombine.high %v3772_v0, %v3772_v0  ;;  %v3789_v54 = vrot.slane %v3324_v18, %v17617_v46  ;;  %v3249_v18 = vld [vmem:[#allocation4 + $0xd8] sm:$0xff] }
 0x278   :  { %v3796_v55 = vrot.slane %v3782_v48, %v17617_v46  ;;  %v4235_v61 = vsel %vm782_vm15, %v3772_v0, 0.0  ;;  %v3290_v62 = vadd.f32 %v18072_v16, %v3247_v27  ;;  %v3325_v23 = vmax.f32 %v3289_v52, 0.0 }
 0x279   :  { %v5093_v4 = vpack.c.bf16 %v4808_v14, %v4791_v10  ;;  %v3781_v45 = vcombine.high %v3779_v53, %v3779_v53  ;;  %v3797_v33 = vcombine.high %v3789_v54, %v3789_v54  ;;  %v4236_v58 = vsel %vm17640_vm0, %v3780_v20, 0.0 }
 0x27a   :  { %v3798_v32 = vcombine.high %v3796_v55, %v3796_v55  ;;  %v4237_v41 = vsel %vm779_vm6, %v3779_v53, 0.0  ;;  %v4239_v51 = vsel %vm781_vm10, %v3789_v54, 0.0  ;;  %v4241_v5 = vsel %vm779_vm6, %v3796_v55, 0.0 }
 0x27b   :  { %v5199_v3 = vshll.u32 %v5093_v4, 16  ;;  %5111 = vst.msk [vmem:[#allocation3 + $0x60] sm:$0xff] %vm396_vm5, %v5093_v4  ;;  %v4238_v43 = vsel %vm780_vm9, %v3781_v45, 0.0  ;;  %v4240_v31 = vsel %vm782_vm15, %v3797_v33, 0.0  ;;  %v4809_v12 = vcombine.low %v4235_v61, %v4236_v58 }
 0x27c   :  { %v4242_v36 = vsel %vm780_vm9, %v3798_v32, 0.0  ;;  %v4810_v15 = vcombine.low %v4237_v41, %v4238_v43  ;;  %v4826_v49 = vcombine.low %v4239_v51, %v4240_v31  ;;  %v5203_v40 = vshrl.u32 %v5093_v4, 16  ;;  %v3250_v4 = vld [vmem:[#allocation4 + $0xe0] sm:$0xff] }
 0x27d   :  { %v5201_v11 = vrot.slane %v5199_v3, 1  ;;  %v4817_v6 = vrot.slane %v4809_v12, %v17617_v46  ;;  %v4827_v22 = vcombine.low %v4241_v5, %v4242_v36  ;;  %v3326_v56 = vmax.f32 %v3290_v62, 0.0  ;;  %v3251_v36 = vld [vmem:[#allocation4 + $0xe8] sm:$0xff] }
 0x27e   :  { %v4824_v47 = vrot.slane %v4810_v15, %v17617_v46  ;;  %v4834_v1 = vrot.slane %v4826_v49, %v17617_v46  ;;  %v3799_v25 = vcombine.high %v3325_v23, %v3325_v23  ;;  %v3806_v8 = vrot.slane %v3325_v23, %v17617_v46 }
 0x27f   :  { %v5202_v26 = vsel %vm2722_vm4, %v5197_v19, %v5201_v11  ;;  %v4841_v63 = vrot.slane %v4827_v22, %v17617_v46  ;;  %v5205_v30 = vor.u32 %v5203_v40, %v5201_v11  ;;  %v3816_v39 = vcombine.high %v3326_v56, %v3326_v56 }
 0x280   :  { %5282 = vrot.lane.b32.xlu0 %v5202_v26, %s16631_s23  ;;  %v4825_v35 = vcombine.low %v4817_v6, %v4824_v47  ;;  %v3813_v38 = vrot.slane %v3799_v25, %v17617_v46  ;;  %v3814_v50 = vcombine.high %v3806_v8, %v3806_v8  ;;  %v3823_v29 = vrot.slane %v3326_v56, %v17617_v46 }
 0x281   :  { %v4842_v7 = vcombine.low %v4834_v1, %v4841_v63  ;;  %v3830_v21 = vrot.slane %v3816_v39, %v17617_v46  ;;  %v4243_v59 = vsel %vm781_vm10, %v3806_v8, 0.0  ;;  %v3291_v13 = vadd.f32 %v18072_v16, %v3248_v2 }
 0x282   :  { %v3815_v60 = vcombine.high %v3813_v38, %v3813_v38  ;;  %v3831_v0 = vcombine.high %v3823_v29, %v3823_v29  ;;  %v4244_v27 = vsel %vm782_vm15, %v3814_v50, 0.0  ;;  %v4245_v52 = vsel %vm17640_vm0, %v3813_v38, 0.0 }
 0x283   :  { %v5094_v37 = vpack.c.bf16 %v4842_v7, %v4825_v35  ;;  %v3832_v10 = vcombine.high %v3830_v21, %v3830_v21  ;;  %v4247_v19 = vsel %vm780_vm9, %v3823_v29, 0.0  ;;  %v4249_v48 = vsel %vm782_vm15, %v3830_v21, 0.0 }
 0x284   :  { %v4246_v14 = vsel %vm779_vm6, %v3815_v60, 0.0  ;;  %v4248_v53 = vsel %vm781_vm10, %v3831_v0, 0.0  ;;  %v4843_v20 = vcombine.low %v4243_v59, %v4244_v27  ;;  %v3292_v54 = vadd.f32 %v18072_v16, %v3249_v18 }
 0x285   :  { %v5207_v55 = vshll.u32 %v5094_v37, 16  ;;  %5112 = vst.msk [vmem:[#allocation3 + $0x68] sm:$0xff] %vm396_vm5, %v5094_v37  ;;  %v4250_v61 = vsel %vm779_vm6, %v3832_v10, 0.0  ;;  %v4844_v62 = vcombine.low %v4245_v52, %v4246_v14  ;;  %v4860_v23 = vcombine.low %v4247_v19, %v4248_v53 }
 0x286   :  { %v4851_v45 = vrot.slane %v4843_v20, %v17617_v46  ;;  %v4861_v33 = vcombine.low %v4249_v48, %v4250_v61  ;;  %v5211_v58 = vshrl.u32 %v5094_v37, 16  ;;  %v3327_v32 = vmax.f32 %v3291_v13, 0.0 }
 0x287   :  { %v5209_v41 = vrot.slane %v5207_v55, 1  ;;  %v4858_v51 = vrot.slane %v4844_v62, %v17617_v46  ;;  %v4868_v5 = vrot.slane %v4860_v23, %v17617_v46  ;;  %v3328_v3 = vmax.f32 %v3292_v54, 0.0  ;;  %v3252_v55 = vld [vmem:[#allocation4 + $0xf0] sm:$0xff] }
 0x288   :  { %v4875_v43 = vrot.slane %v4861_v33, %v17617_v46  ;;  %v3833_v31 = vcombine.high %v3327_v32, %v3327_v32  ;;  %v3840_v12 = vrot.slane %v3327_v32, %v17617_v46  ;;  %v3293_v15 = vadd.f32 %v18072_v16, %v3250_v4 }
 0x289   :  { %v5210_v49 = vsel %vm2722_vm4, %v5205_v30, %v5209_v41  ;;  %v4859_v40 = vcombine.low %v4851_v45, %v4858_v51  ;;  %v5213_v11 = vor.u32 %v5211_v58, %v5209_v41  ;;  %v3850_v6 = vcombine.high %v3328_v3, %v3328_v3 }
 0x28a   :  { %5284 = vrot.lane.b32.xlu1 %v5210_v49, %s16631_s23  ;;  %v4876_v22 = vcombine.low %v4868_v5, %v4875_v43  ;;  %v3847_v56 = vrot.slane %v3833_v31, %v17617_v46  ;;  %v3848_v47 = vcombine.high %v3840_v12, %v3840_v12  ;;  %v3857_v1 = vrot.slane %v3328_v3, %v17617_v46  ;;  %v3253_v3 = vld [vmem:[#allocation4 + $0xf8] sm:$0xff] }
 0x28b   :  { %v3864_v25 = vrot.slane %v3850_v6, %v17617_v46  ;;  %v4251_v8 = vsel %vm780_vm9, %v3840_v12, 0.0  ;;  %v3294_v2 = vadd.f32 %v18072_v16, %v3251_v36  ;;  %v3329_v26 = vmax.f32 %v3293_v15, 0.0 }
 0x28c   :  { %v5095_v63 = vpack.c.bf16 %v4876_v22, %v4859_v40  ;;  %v3849_v30 = vcombine.high %v3847_v56, %v3847_v56  ;;  %v3865_v39 = vcombine.high %v3857_v1, %v3857_v1  ;;  %v4252_v35 = vsel %vm781_vm10, %v3848_v47, 0.0 }
 0x28d   :  { %v3866_v38 = vcombine.high %v3864_v25, %v3864_v25  ;;  %v4253_v50 = vsel %vm782_vm15, %v3847_v56, 0.0  ;;  %v4255_v29 = vsel %vm779_vm6, %v3857_v1, 0.0  ;;  %v4257_v7 = vsel %vm781_vm10, %v3864_v25, 0.0 }
 0x28e   :  { %v5215_v21 = vshll.u32 %v5095_v63, 16  ;;  %5113 = vst.msk [vmem:[#allocation3 + $0x70] sm:$0xff] %vm396_vm5, %v5095_v63  ;;  %v4254_v59 = vsel %vm17640_vm0, %v3849_v30, 0.0  ;;  %v4256_v18 = vsel %vm780_vm9, %v3865_v39, 0.0  ;;  %v4877_v13 = vcombine.low %v4251_v8, %v4252_v35  ;;  %v3254_v30 = vld [vmem:[#allocation4 + $0x100] sm:$0xff] }
 0x28f   :  { %v4258_v60 = vsel %vm782_vm15, %v3866_v38, 0.0  ;;  %v4878_v0 = vcombine.low %v4253_v50, %v4254_v59  ;;  %v4894_v27 = vcombine.low %v4255_v29, %v4256_v18  ;;  %v5219_v52 = vshrl.u32 %v5095_v63, 16  ;;  %v18259_v29 = vld [vmem:[%s21081_s1 + $0x200] sm:$0xff]  }
 0x290   :  { %v5217_v37 = vrot.slane %v5215_v21, 1  ;;  %v4885_v10 = vrot.slane %v4877_v13, %v17617_v46  ;;  %v4895_v19 = vcombine.low %v4257_v7, %v4258_v60  ;;  %v3330_v48 = vmax.f32 %v3294_v2, 0.0  ;;  %15631 = vmatprep.subr.bf16.mxu0 %v18259_v29 }
 0x291   :  { %v4892_v14 = vrot.slane %v4878_v0, %v17617_v46  ;;  %v4902_v53 = vrot.slane %v4894_v27, %v17617_v46  ;;  %v3867_v20 = vcombine.high %v3329_v26, %v3329_v26  ;;  %v3874_v54 = vrot.slane %v3329_v26, %v17617_v46  ;;  %v3255_v27 = vld [vmem:[#allocation4 + $0x108] sm:$0xff] }
 0x292   :  { %v5218_v61 = vsel %vm2722_vm4, %v5213_v11, %v5217_v37  ;;  %v4909_v62 = vrot.slane %v4895_v19, %v17617_v46  ;;  %v5221_v23 = vor.u32 %v5219_v52, %v5217_v37  ;;  %v3884_v4 = vcombine.high %v3330_v48, %v3330_v48 }
 0x293   :  { %5286 = vrot.lane.b32.xlu0 %v5218_v61, %s16631_s23  ;;  %v4893_v45 = vcombine.low %v4885_v10, %v4892_v14  ;;  %v3881_v33 = vrot.slane %v3867_v20, %v17617_v46  ;;  %v3882_v58 = vcombine.high %v3874_v54, %v3874_v54  ;;  %v3891_v32 = vrot.slane %v3330_v48, %v17617_v46 }
 0x294   :  { %v4910_v41 = vcombine.low %v4902_v53, %v4909_v62  ;;  %v3898_v51 = vrot.slane %v3884_v4, %v17617_v46  ;;  %v4259_v5 = vsel %vm779_vm6, %v3874_v54, 0.0  ;;  %v3295_v43 = vadd.f32 %v18072_v16, %v3252_v55  ;;  %v5265_v31 = vpop.permute.xlu1 %5264 }
 0x295   :  { %v3883_v12 = vcombine.high %v3881_v33, %v3881_v33  ;;  %v3899_v36 = vcombine.high %v3891_v32, %v3891_v32  ;;  %v4260_v15 = vsel %vm780_vm9, %v3882_v58, 0.0  ;;  %v4261_v49 = vsel %vm781_vm10, %v3881_v33, 0.0  ;;  %5324 = vst.msk [vmem:[#allocation3 + $0x10] sm:$0xff] %vm680_vm11, %v5265_v31 }
 0x296   :  { %v5096_v40 = vpack.c.bf16 %v4910_v41, %v4893_v45  ;;  %v3900_v11 = vcombine.high %v3898_v51, %v3898_v51  ;;  %v4263_v6 = vsel %vm17640_vm0, %v3891_v32, 0.0  ;;  %v4265_v22 = vsel %vm780_vm9, %v3898_v51, 0.0  ;;  %v18277_v45 = vpop.permute.xlu0 %5262 }
 0x297   :  { %v4262_v56 = vsel %vm782_vm15, %v3883_v12, 0.0  ;;  %v4264_v47 = vsel %vm779_vm6, %v3899_v36, 0.0  ;;  %v4911_v1 = vcombine.low %v4259_v5, %v4260_v15  ;;  %v3296_v25 = vadd.f32 %v18072_v16, %v3253_v3 }
 0x298   :  { %v5223_v8 = vshll.u32 %v5096_v40, 16  ;;  %5114 = vst.msk [vmem:[#allocation3 + $0x78] sm:$0xff] %vm396_vm5, %v5096_v40  ;;  %v4266_v2 = vsel %vm781_vm10, %v3900_v11, 0.0  ;;  %v4912_v26 = vcombine.low %v4261_v49, %v4262_v56  ;;  %v4928_v63 = vcombine.low %v4263_v6, %v4264_v47 }
 0x299   :  { %v4919_v39 = vrot.slane %v4911_v1, %v17617_v46  ;;  %v4929_v35 = vcombine.low %v4265_v22, %v4266_v2  ;;  %v5227_v38 = vshrl.u32 %v5096_v40, 16  ;;  %v3331_v50 = vmax.f32 %v3295_v43, 0.0 }
 0x29a   :  { %v5225_v7 = vrot.slane %v5223_v8, 1  ;;  %v4926_v21 = vrot.slane %v4912_v26, %v17617_v46  ;;  %v4936_v59 = vrot.slane %v4928_v63, %v17617_v46  ;;  %v3332_v18 = vmax.f32 %v3296_v25, 0.0 }
 0x29b   :  { %v4943_v13 = vrot.slane %v4929_v35, %v17617_v46  ;;  %v3901_v60 = vcombine.high %v3331_v50, %v3331_v50  ;;  %v3908_v0 = vrot.slane %v3331_v50, %v17617_v46  ;;  %v3297_v52 = vadd.f32 %v18072_v16, %v3254_v30  ;;  %v3256_v30 = vld [vmem:[#allocation4 + $0x110] sm:$0xff] }
 0x29c   :  { %v5226_v37 = vsel %vm2722_vm4, %v5221_v23, %v5225_v7  ;;  %v4927_v10 = vcombine.low %v4919_v39, %v4926_v21  ;;  %v5229_v19 = vor.u32 %v5227_v38, %v5225_v7  ;;  %v3918_v48 = vcombine.high %v3332_v18, %v3332_v18  ;;  %v18268_v14 = vld [vmem:[#allocation3 + $0x10] sm:$0xff] }
 0x29d   :  { %5288 = vrot.lane.b32.xlu1 %v5226_v37, %s16631_s23  ;;  %v4944_v53 = vcombine.low %v4936_v59, %v4943_v13  ;;  %v3915_v20 = vrot.slane %v3901_v60, %v17617_v46  ;;  %v3916_v54 = vcombine.high %v3908_v0, %v3908_v0  ;;  %v3925_v55 = vrot.slane %v3332_v18, %v17617_v46 }
 0x29e   :  { %v3932_v61 = vrot.slane %v3918_v48, %v17617_v46  ;;  %v4267_v62 = vsel %vm782_vm15, %v3908_v0, 0.0  ;;  %v3298_v23 = vadd.f32 %v18072_v16, %v3255_v27  ;;  %v3333_v4 = vmax.f32 %v3297_v52, 0.0  ;;  %15595 = vmatprep.mubr.bf16.mxu0 %v18268_v14  ;;  %v3257_v27 = vld [vmem:[#allocation4 + $0x118] sm:$0xff] }
 0x29f   :  { %v5097_v33 = vpack.c.bf16 %v4944_v53, %v4927_v10  ;;  %v3917_v58 = vcombine.high %v3915_v20, %v3915_v20  ;;  %v3933_v32 = vcombine.high %v3925_v55, %v3925_v55  ;;  %v4268_v41 = vsel %vm779_vm6, %v3916_v54, 0.0 }
 0x2a0   :  { %v3934_v51 = vcombine.high %v3932_v61, %v3932_v61  ;;  %v4269_v5 = vsel %vm780_vm9, %v3915_v20, 0.0  ;;  %v4271_v3 = vsel %vm782_vm15, %v3925_v55, 0.0  ;;  %v4273_v43 = vsel %vm779_vm6, %v3932_v61, 0.0  ;;  %v16544_v61 = vld [vmem:[%s21081_s1 + $0x208] sm:$0xff]  }
 0x2a1   :  { %v5231_v31 = vshll.u32 %v5097_v33, 16  ;;  %5115 = vst.msk [vmem:[#allocation3 + $0x80] sm:$0xff] %vm396_vm5, %v5097_v33  ;;  %v4270_v12 = vsel %vm781_vm10, %v3917_v58, 0.0  ;;  %v4272_v36 = vsel %vm17640_vm0, %v3933_v32, 0.0  ;;  %v4945_v15 = vcombine.low %v4267_v62, %v4268_v41 }
 0x2a2   :  { %v4274_v49 = vsel %vm780_vm9, %v3934_v51, 0.0  ;;  %v4946_v40 = vcombine.low %v4269_v5, %v4270_v12  ;;  %v4962_v11 = vcombine.low %v4271_v3, %v4272_v36  ;;  %v5235_v6 = vshrl.u32 %v5097_v33, 16  ;;  %v5267_v22 = vpop.permute.xlu0 %5266 }
 0x2a3   :  { %v5233_v56 = vrot.slane %v5231_v31, 1  ;;  %v4953_v47 = vrot.slane %v4945_v15, %v17617_v46  ;;  %v4963_v1 = vcombine.low %v4273_v43, %v4274_v49  ;;  %v3334_v25 = vmax.f32 %v3298_v23, 0.0  ;;  %5325 = vst.msk [vmem:[#allocation3 + $0x18] sm:$0xff] %vm680_vm11, %v5267_v22  ;;  %v5321_v22 = vld [vmem:[#allocation3 + $0x8] sm:$0x80] }
 0x2a4   :  { %v4960_v8 = vrot.slane %v4946_v40, %v17617_v46  ;;  %v4970_v2 = vrot.slane %v4962_v11, %v17617_v46  ;;  %v3935_v26 = vcombine.high %v3333_v4, %v3333_v4  ;;  %v3942_v63 = vrot.slane %v3333_v4, %v17617_v46 }
 0x2a5   :  { %v5234_v39 = vsel %vm2722_vm4, %v5229_v19, %v5233_v56  ;;  %v4977_v35 = vrot.slane %v4963_v1, %v17617_v46  ;;  %v5237_v38 = vor.u32 %v5235_v6, %v5233_v56  ;;  %v3952_v50 = vcombine.high %v3334_v25, %v3334_v25 }
 0x2a6   :  { %5290 = vrot.lane.b32.xlu0 %v5234_v39, %s16631_s23  ;;  %v4961_v7 = vcombine.low %v4953_v47, %v4960_v8  ;;  %v3949_v21 = vrot.slane %v3935_v26, %v17617_v46  ;;  %v3950_v59 = vcombine.high %v3942_v63, %v3942_v63  ;;  %v3959_v18 = vrot.slane %v3334_v25, %v17617_v46 }
 0x2a7   :  { %v4978_v13 = vcombine.low %v4970_v2, %v4977_v35  ;;  %v3966_v60 = vrot.slane %v3952_v50, %v17617_v46  ;;  %v4275_v0 = vsel %vm781_vm10, %v3942_v63, 0.0  ;;  %v3299_v52 = vadd.f32 %v18072_v16, %v3256_v30 }
 0x2a8   :  { %v3951_v37 = vcombine.high %v3949_v21, %v3949_v21  ;;  %v3967_v10 = vcombine.high %v3959_v18, %v3959_v18  ;;  %v4276_v19 = vsel %vm782_vm15, %v3950_v59, 0.0  ;;  %v4277_v48 = vsel %vm779_vm6, %v3949_v21, 0.0 }
 0x2a9   :  { %v18313_v53 = vpack.c.bf16 %v4978_v13, %v4961_v7  ;;  %v3968_v20 = vcombine.high %v3966_v60, %v3966_v60  ;;  %v4279_v54 = vsel %vm781_vm10, %v3959_v18, 0.0  ;;  %v4281_v55 = vsel %vm17640_vm0, %v3966_v60, 0.0 }
 0x2aa   :  { %v4278_v62 = vsel %vm780_vm9, %v3951_v37, 0.0  ;;  %v4280_v23 = vsel %vm782_vm15, %v3967_v10, 0.0  ;;  %v4979_v4 = vcombine.low %v4275_v0, %v4276_v19  ;;  %v3300_v33 = vadd.f32 %v18072_v16, %v3257_v27  ;;  %v18327_v58 = vld [vmem:[#allocation3 + $0x18] sm:$0xff] }
 0x2ab   :  { %v5239_v32 = vshll.u32 %v18313_v53, 16  ;;  %5116 = vst.msk [vmem:[#allocation3 + $0x88] sm:$0xff] %vm396_vm5, %v18313_v53  ;;  %v4282_v41 = vsel %vm779_vm6, %v3968_v20, 0.0  ;;  %v4980_v51 = vcombine.low %v4277_v48, %v4278_v62  ;;  %v4996_v5 = vcombine.low %v4279_v54, %v4280_v23  ;;  %15596 = vmatmul.mubr.bf16.vlgmr.msra.gmra.mrb[72].mxu0 %v18327_v58 }
 0x2ac   :  { %v4987_v3 = vrot.slane %v4979_v4, %v17617_v46  ;;  %v4997_v43 = vcombine.low %v4281_v55, %v4282_v41  ;;  %v3335_v31 = vmax.f32 %v3299_v52, 0.0  ;;  %15632 = vmatpush3.bf16.msra.mxu0 %v18259_v29  ;;  %v3336_v15 = vmax.f32 %v3300_v33, 0.0  ;;  %v16545_v29 = vld [vmem:[%s21081_s1 + $0x210] sm:$0xff]  }
 0x2ad   :  { %v5241_v16 = vrot.slane %v5239_v32, 1  ;;  %v4994_v12 = vrot.slane %v4980_v51, %v17617_v46  ;;  %v5004_v36 = vrot.slane %v4996_v5, %v17617_v46  ;;  %v5269_v49 = vpop.permute.xlu1 %5268  ;;  %15633 = vmatprep.subr.bf16.mxu0 %v16544_v61  ;;  %v21166_v25 = vmov 0  ;;  %v30_v5 = vld [vmem:[#allocation3 + $0x98] sm:$0x80] }
 0x2ae   :  { %v5011_v40 = vrot.slane %v4997_v43, %v17617_v46  ;;  %v3969_v11 = vcombine.high %v3335_v31, %v3335_v31  ;;  %v3976_v6 = vrot.slane %v3335_v31, %v17617_v46  ;;  %5326 = vst.msk [vmem:[#allocation3 + $0x20] sm:$0xff] %vm680_vm11, %v5269_v49  ;;  %v3986_v1 = vcombine.high %v3336_v15, %v3336_v15  ;;  %v16548_v43 = vld [vmem:[%s21081_s1 + $0x220] sm:$0xff]  }
 0x2af   :  { %v5242_v56 = vsel %vm2722_vm4, %v5237_v38, %v5241_v16  ;;  %v4995_v47 = vcombine.low %v4987_v3, %v4994_v12  ;;  %v21167_v25 = vsel %vm18347_vm2, 4294967295, %v21166_v25  ;;  %v3993_v63 = vrot.slane %v3336_v15, %v17617_v46  ;;  %v16547_v3 = vld [vmem:[%s21081_s1 + $0x218] sm:$0xff]  }
 0x2b0   :  { %21168 = vst [vmem:[#allocation14_spill] sm:$0xff] %v21167_v25  ;;  %5292 = vrot.lane.b32.xlu1 %v5242_v56, %s16631_s23  ;;  %v5012_v8 = vcombine.low %v5004_v36, %v5011_v40  ;;  %v3983_v2 = vrot.slane %v3969_v11, %v17617_v46  ;;  %v3984_v26 = vcombine.high %v3976_v6, %v3976_v6  ;;  %v5243_v30 = vshrl.u32 %v18313_v53, 16  ;;  %v5365_v53 = vld [vmem:[#allocation3] sm:$0x80] }
 0x2b1   :  { %v4000_v39 = vrot.slane %v3986_v1, %v17617_v46  ;;  %v5322_v35 = vsel %vm18347_vm2, %v18277_v45, %v5321_v22  ;;  %15634 = vmatpush3.bf16.msra.mxu0 %v16544_v61  ;;  %v4001_v7 = vcombine.high %v3993_v63, %v3993_v63  ;;  %v4283_v18 = vsel %vm780_vm9, %v3976_v6, 0.0 }
 0x2b2   :  { %v18359_v38 = vpack.c.bf16 %v5012_v8, %v4995_v47  ;;  %v3985_v50 = vcombine.high %v3983_v2, %v3983_v2  ;;  %v4284_v21 = vsel %vm781_vm10, %v3984_v26, 0.0  ;;  %5323 = vst [vmem:[#allocation3 + $0x8] sm:$0x80] %v5322_v35  ;;  %15635 = vmatprep.subr.bf16.mxu0 %v16545_v29  ;;  %v4285_v13 = vsel %vm782_vm15, %v3983_v2, 0.0 }
 0x2b3   :  { %v4002_v59 = vcombine.high %v4000_v39, %v4000_v39  ;;  %v4287_v45 = vsel %vm780_vm9, %v3993_v63, 0.0  ;;  %v4288_v27 = vsel %vm781_vm10, %v4001_v7, 0.0  ;;  %v5013_v52 = vcombine.low %v4283_v18, %v4284_v21  ;;  %v16538_v63 = vld [vmem:[%s21081_s1 + $0x188] sm:$0xff]  }
 0x2b4   :  { %v5247_v60 = vshll.u32 %v18359_v38, 16  ;;  %5117 = vst.msk [vmem:[#allocation3 + $0x90] sm:$0xff] %vm396_vm5, %v18359_v38  ;;  %v4286_v0 = vsel %vm779_vm6, %v3985_v50, 0.0  ;;  %v4289_v37 = vsel %vm782_vm15, %v4000_v39, 0.0  ;;  %v5030_v48 = vcombine.low %v4287_v45, %v4288_v27 }
 0x2b5   :  { %v4290_v10 = vsel %vm17640_vm0, %v4002_v59, 0.0  ;;  %v5014_v19 = vcombine.low %v4285_v13, %v4286_v0  ;;  %v18380_v20 = vld [vmem:[#allocation3 + $0x20] sm:$0xff]  ;;  %15636 = vmatpush3.bf16.msra.mxu0 %v16545_v29  ;;  %v5245_v54 = vor.u32 %v5243_v30, %v5241_v16  ;;  %v5021_v62 = vrot.slane %v5013_v52, %v17617_v46 }
 0x2b6   :  { %v5249_v55 = vrot.slane %v5247_v60, 1  ;;  %v5031_v61 = vcombine.low %v4289_v37, %v4290_v10  ;;  %15599 = vmatprep.mubr.bf16.mxu0 %v18380_v20  ;;  %v5038_v4 = vrot.slane %v5030_v48, %v17617_v46  ;;  %v5419_v41 = vrot.slane %v5365_v53, 7  ;;  %15637 = vmatprep.subr.bf16.mxu0 %v16547_v3  ;;  %v16539_v60 = vld [vmem:[%s21081_s1 + $0x190] sm:$0xff]  }
 0x2b7   :  { %v5028_v23 = vrot.slane %v5014_v19, %v17617_v46  ;;  %v5422_v51 = vrot.slane %v18268_v14, 7  ;;  %v6431_v31 = vshrl.u32 %v18268_v14, 16  ;;  %v6439_v36 = vshrl.u32 %v18327_v58, 16 }
 0x2b8   :  { %v5250_v33 = vsel %vm2722_vm4, %v5245_v54, %v5249_v55  ;;  %v5045_v32 = vrot.slane %v5031_v61, %v17617_v46  ;;  %v18400_v11 = vshrl.u32 %v18380_v20, 16  ;;  %v5251_v6 = vshrl.u32 %v18359_v38, 16  ;;  %v16550_v61 = vld [vmem:[%s21081_s1 + $0x228] sm:$0xff]  }
 0x2b9   :  { %5294 = vrot.lane.b32.xlu0 %v5250_v33, %s16631_s23  ;;  %v5347_v16 = vld [vmem:[#allocation3 + $0x8] sm:$0xff]  ;;  %v5271_v12 = vpop.permute.xlu0 %5270  ;;  %v5029_v15 = vcombine.low %v5021_v62, %v5028_v23  ;;  %v18403_v22 = vrot.slane %v6439_v36, 7  ;;  %v5424_v29 = vrot.slane %v18327_v58, 7  ;;  %v31_v47 = vsel %vm16934_vm8, 0, %v30_v5  ;;  %15638 = vmatpush3.bf16.msra.mxu0 %v16547_v3  ;;  %v16551_v5 = vld [vmem:[%s21081_s1 + $0x230] sm:$0xff]  }
 0x2ba   :  { %v5046_v49 = vcombine.low %v5038_v4, %v5045_v32  ;;  %v5420_v40 = vrot.slane %v5347_v16, 7  ;;  %5327 = vst.msk [vmem:[#allocation3 + $0x28] sm:$0xff] %vm680_vm11, %v5271_v12  ;;  %v21098_v8 = vshll.u32 %v18268_v14, 16  ;;  %32 = vst [vmem:[#allocation3 + $0x98] sm:$0x80] %v31_v47  ;;  %15639 = vmatprep.subr.bf16.mxu0 %v16548_v43  ;;  %v6442_v30 = vshll.u32 %v18327_v58, 16 }
 0x2bb   :  { %v6449_v39 = vrot.slane %v18400_v11, 7  ;;  %v5425_v35 = vsel %vm860_vm12, %v5422_v51, %v5424_v29  ;;  %v5253_v38 = vor.u32 %v5251_v6, %v5249_v55  ;;  %v18418_v7 = vshll.u32 %v18380_v20, 16  ;;  %v16541_v47 = vld [vmem:[%s21081_s1 + $0x1a0] sm:$0xff]  }
 0x2bc   :  { %v5100_v1 = vpack.c.bf16 %v5046_v49, %v5029_v15  ;;  %v5421_v2 = vsel %vm860_vm12, %v5419_v41, %v5420_v40  ;;  %v5423_v26 = vsel %vm860_vm12, %v5420_v40, %v5422_v51  ;;  %v6444_v21 = vor.u32 %v6442_v30, %v18403_v22  ;;  %v16540_v51 = vld [vmem:[%s21081_s1 + $0x198] sm:$0xff]  }
 0x2bd   :  { %15491 = vmatprep.mubr.bf16.mxu1 %v5421_v2  ;;  %21170 = vst [vmem:[#allocation5_spill] sm:$0xff] %v18418_v7  ;;  %v5426_v59 = vrot.slane %v18380_v20, 7  ;;  %v5708_v58 = vshrl.u32 %v5347_v16, 16  ;;  %v5711_v18 = vshll.u32 %v5347_v16, 16  ;;  %15640 = vmatpush3.bf16.msra.mxu0 %v16548_v43  ;;  %v5719_v0 = vrot.slane %v6431_v31, 6 }
 0x2be   :  { %v5255_v50 = vshll.u32 %v5100_v1, 16  ;;  %15492 = vmatmul.mubr.bf16.vlgmr.msra.gmra.mrb[72].mxu1 %v5423_v26  ;;  %5118 = vst.msk [vmem:[#allocation3 + $0x98] sm:$0xff] %vm396_vm5, %v5100_v1  ;;  %v5259_v45 = vshrl.u32 %v5100_v1, 16  ;;  %v5722_v27 = vrot.slane %v21098_v8, 7  ;;  %v6452_v52 = vor.u32 %v18418_v7, %v6449_v39  ;;  %15641 = vmatprep.subr.bf16.mxu0 %v16550_v61  ;;  %v16552_v1 = vld [vmem:[%s21081_s1 + $0x238] sm:$0xff]  }
 0x2bf   :  { %15528 = vmatpush3.bf16.msra.mxu1 %v18040_v17  ;;  %15495 = vmatprep.mubr.bf16.mxu1 %v5425_v35  ;;  %v18429_v17 = vrot.slane %v6431_v31, 7  ;;  %v5710_v10 = vrot.slane %v5708_v58, 6  ;;  %v5713_v19 = vrot.slane %v5711_v18, 7  ;;  %v5728_v62 = vrot.slane %v6439_v36, 6 }
 0x2c0   :  { %v5257_v13 = vrot.slane %v5255_v50, 1  ;;  %15529 = vmatprep.subr.bf16.mxu1 %v16538_v63  ;;  %v5427_v23 = vsel %vm860_vm12, %v5424_v29, %v5426_v59  ;;  %v5723_v3 = vor.u32 %v5722_v27, %v5719_v0  ;;  %v5731_v43 = vrot.slane %v6442_v30, 7 }
 0x2c1   :  { %v18434_v37 = vld [vmem:[#allocation3 + $0x28] sm:$0xff]  ;;  %v18451_v32 = vor.u32 %v5713_v19, %v5710_v10  ;;  %v18463_v31 = vsel %vm418_vm14, %v18429_v17, %v6444_v21  ;;  %v18468_v12 = vsel %vm418_vm14, %v18403_v22, %v6452_v52  ;;  %v5737_v36 = vrot.slane %v18400_v11, 6  ;;  %15642 = vmatpush3.bf16.msra.mxu0 %v16550_v61 }
 0x2c2   :  { %v5258_v48 = vsel %vm2722_vm4, %v5253_v38, %v5257_v13  ;;  %v5261_v53 = vor.u32 %v5259_v45, %v5257_v13  ;;  %v5273_v54 = vpop.permute.xlu1 %5272  ;;  %15600 = vmatmul.mubr.bf16.gmra.mrb[76].mxu0 %v18434_v37  ;;  %v18439_v55 = vshrl.u32 %v18434_v37, 16  ;;  %v18448_v4 = vshll.u32 %v18434_v37, 16  ;;  %15643 = vmatprep.subr.bf16.mxu0 %v16551_v5  ;;  %v16543_v13 = vld [vmem:[%s21081_s1 + $0x1a8] sm:$0xff]  }
 0x2c3   :  { %5296 = vrot.lane.b32.xlu1 %v5258_v48, %s16631_s23  ;;  %5328 = vst.msk [vmem:[#allocation3 + $0x30] sm:$0xff] %vm680_vm11, %v5273_v54  ;;  %15530 = vmatpush3.bf16.msra.mxu1 %v16538_v63  ;;  %v5428_v33 = vrot.slane %v18434_v37, 7  ;;  %v18476_v49 = vsel %vm1141_vm13, %v18451_v32, %v5723_v3  ;;  %v5732_v40 = vor.u32 %v5731_v43, %v5728_v62  ;;  %v5740_v6 = vrot.slane %v18418_v7, 7  ;;  %v16546_v54 = vld [vmem:[%s21081_s1 + $0x1b0] sm:$0xff]  }
 0x2c4   :  { %5298 = vrot.lane.b32.xlu0 %v5261_v53, %s16631_s23  ;;  %v6457_v41 = vrot.slane %v18439_v55, 7  ;;  %15531 = vmatprep.subr.bf16.mxu1 %v16539_v60  ;;  %v5746_v22 = vrot.slane %v18439_v55, 6  ;;  %v5749_v29 = vrot.slane %v18448_v4, 7  ;;  %v21097_v56 = vrot.slane %v18380_v20, 1 }
 0x2c5   :  { %v5429_v16 = vsel %vm860_vm12, %v5426_v59, %v5428_v33  ;;  %v18489_v2 = vsel %vm1141_vm13, %v5723_v3, %v5732_v40  ;;  %v5741_v26 = vor.u32 %v5740_v6, %v5737_v36  ;;  %v7001_v30 = vrot.slane %v18434_v37, 1  ;;  %15644 = vmatpush3.bf16.msra.mxu0 %v16551_v5 }
 0x2c6   :  { %15496 = vmatmul.mubr.bf16.gmra.mrb[76].mxu1 %v5427_v23  ;;  %v6460_v15 = vor.u32 %v18448_v4, %v6457_v41  ;;  %v5750_v35 = vor.u32 %v5749_v29, %v5746_v22  ;;  %15645 = vmatprep.subr.bf16.mxu0 %v16552_v1  ;;  %v7296_v62 = vrot.slane %v18448_v4, 1  ;;  %vm14191_vm8 = vcmask 64512  }
 0x2c7   :  { %15499 = vmatprep.mubr.bf16.mxu1 %v5429_v16  ;;  %15532 = vmatpush3.bf16.msra.mxu1 %v16539_v60  ;;  %v18498_v50 = vsel %vm1141_vm13, %v5732_v40, %v5741_v26  ;;  %v18503_v21 = vsel %vm2441_vm3, %v21097_v56, %v7001_v30  ;;  %v21096_v60 = vrot.slane %v18418_v7, 1 }
 0x2c8   :  { %15533 = vmatprep.subr.bf16.mxu1 %v16540_v51  ;;  %v18494_v63 = vsel %vm418_vm14, %v6449_v39, %v6460_v15  ;;  %v18508_v39 = vsel %vm1141_vm13, %v5741_v26, %v5750_v35  ;;  %v7300_v3 = vor.u32 %v7296_v62, %v18439_v55  ;;  %v18550_v55 = vld [vmem:[%s21081_s1 + $0x2c0] sm:$0xff]  }
 0x2c9   :  { %15646 = vmatpush3.bf16.msra.mxu0 %v16552_v1  ;;  %v7292_v61 = vor.u32 %v21096_v60, %v18400_v11  ;;  %v16549_v11 = vld [vmem:[%s21081_s1 + $0x1b8] sm:$0xff]  }
 0x2ca   :  { %v6153_v38 = vld [vmem:[#allocation3 + $0x30] sm:$0xff] }
 0x2cb   :  { %15603 = vmatprep.mubr.bf16.mxu0 %v6153_v38  ;;  %v18505_v59 = vshrl.u32 %v6153_v38, 16  ;;  %v6466_v58 = vshll.u32 %v6153_v38, 16  ;;  %v5430_v18 = vrot.slane %v6153_v38, 7  ;;  %15534 = vmatpush3.bf16.msra.mxu1 %v16540_v51  ;;  %v7003_v45 = vrot.slane %v6153_v38, 1 }
 0x2cc   :  { %15535 = vmatprep.subr.bf16.mxu1 %v16541_v47  ;;  %v18537_v5 = vsel %vm2722_vm4, %v7292_v61, %v7296_v62 }
 0x2cd   :  { %v6465_v0 = vrot.slane %v18505_v59, 7  ;;  %v5431_v27 = vsel %vm860_vm12, %v5428_v33, %v5430_v18  ;;  %v5755_v52 = vrot.slane %v18505_v59, 6  ;;  %v5758_v37 = vrot.slane %v6466_v58, 7  ;;  %21171 = vst [vmem:[#allocation15_spill] sm:$0xff] %v18537_v5 }
 0x2ce   :  { %15500 = vmatmul.mubr.bf16.gmra.mrb[80].mxu1 %v5431_v27  ;;  %v18518_v10 = vsel %vm2441_vm3, %v7001_v30, %v7003_v45  ;;  %v7304_v51 = vrot.slane %v6466_v58, 1 }
 0x2cf   :  { %v5275_v19 = vpop.permute.xlu0 %5274  ;;  %v6468_v48 = vor.u32 %v6466_v58, %v6465_v0  ;;  %15536 = vmatpush3.bf16.msra.mxu1 %v16541_v47  ;;  %v5759_v53 = vor.u32 %v5758_v37, %v5755_v52 }
 0x2d0   :  { %5329 = vst.msk [vmem:[#allocation3 + $0x38] sm:$0xff] %vm680_vm11, %v5275_v19  ;;  %15537 = vmatprep.subr.bf16.mxu1 %v16543_v13  ;;  %v18544_v4 = vsel %vm2722_vm4, %v7300_v3, %v7304_v51  ;;  %v7308_v26 = vor.u32 %v7304_v51, %v18505_v59 }
 0x2d1   :  { %v18531_v23 = vsel %vm418_vm14, %v6457_v41, %v6468_v48  ;;  %v18534_v33 = vsel %vm1141_vm13, %v5750_v35, %v5759_v53  ;;  %21172 = vst [vmem:[#allocation16_spill] sm:$0xff] %v18544_v4 }
 0x2d3   :  { %15538 = vmatpush3.bf16.msra.mxu1 %v16543_v13 }
 0x2d4   :  { %15539 = vmatprep.subr.bf16.mxu1 %v16546_v54 }
 0x2d7   :  { %v5277_v41 = vpop.permute.xlu1 %5276  ;;  %v6154_v43 = vld [vmem:[#allocation3 + $0x38] sm:$0xff]  ;;  %15540 = vmatpush3.bf16.msra.mxu1 %v16546_v54 }
 0x2d8   :  { %5330 = vst.msk [vmem:[#allocation3 + $0x40] sm:$0xff] %vm680_vm11, %v5277_v41  ;;  %15604 = vmatmul.mubr.bf16.gmra.mrb[80].mxu0 %v6154_v43  ;;  %v6471_v16 = vshrl.u32 %v6154_v43, 16  ;;  %v6474_v36 = vshll.u32 %v6154_v43, 16  ;;  %v5432_v15 = vrot.slane %v6154_v43, 7  ;;  %15541 = vmatprep.subr.bf16.mxu1 %v16549_v11  ;;  %v7005_v40 = vrot.slane %v6154_v43, 1 }
 0x2da   :  { %v6473_v6 = vrot.slane %v6471_v16, 7  ;;  %v5433_v22 = vsel %vm860_vm12, %v5430_v18, %v5432_v15  ;;  %v5764_v29 = vrot.slane %v6471_v16, 6  ;;  %v5767_v47 = vrot.slane %v6474_v36, 7 }
 0x2db   :  { %15503 = vmatprep.mubr.bf16.mxu1 %v5433_v22  ;;  %15542 = vmatpush3.bf16.msra.mxu1 %v16549_v11  ;;  %v18554_v1 = vsel %vm2441_vm3, %v7003_v45, %v7005_v40  ;;  %v7312_v30 = vrot.slane %v6474_v36, 1 }
 0x2dc   :  { %v6476_v35 = vor.u32 %v6474_v36, %v6473_v6  ;;  %15683 = vmatprep.subr.bf16.mxu1 %v18550_v55  ;;  %v5768_v38 = vor.u32 %v5767_v47, %v5764_v29 }
 0x2dd   :  { %v18559_v58 = vsel %vm2722_vm4, %v7308_v26, %v7312_v30  ;;  %v7316_v48 = vor.u32 %v7312_v30, %v6471_v16 }
 0x2de   :  { %21173 = vst [vmem:[#allocation17_spill] sm:$0xff] %v18559_v58  ;;  %v5279_v13 = vpop.permute.xlu0 %5278  ;;  %v18562_v18 = vsel %vm1141_vm13, %v5759_v53, %v5768_v38  ;;  %v18565_v27 = vsel %vm418_vm14, %v6465_v0, %v6476_v35 }
 0x2df   :  { %5331 = vst.msk [vmem:[#allocation3 + $0x48] sm:$0xff] %vm680_vm11, %v5279_v13  ;;  %v6155_v45 = vld [vmem:[#allocation3 + $0x40] sm:$0xff] }
 0x2e0   :  { %15607 = vmatprep.mubr.bf16.mxu0 %v6155_v45  ;;  %v6479_v59 = vshrl.u32 %v6155_v45, 16  ;;  %v6482_v52 = vshll.u32 %v6155_v45, 16  ;;  %v5434_v37 = vrot.slane %v6155_v45, 7  ;;  %v7007_v19 = vrot.slane %v6155_v45, 1 }
 0x2e2   :  { %v6481_v54 = vrot.slane %v6479_v59, 7  ;;  %v5435_v61 = vsel %vm860_vm12, %v5432_v15, %v5434_v37  ;;  %v5773_v62 = vrot.slane %v6479_v59, 6  ;;  %v5776_v51 = vrot.slane %v6482_v52, 7 }
 0x2e3   :  { %15504 = vmatmul.mubr.bf16.gmra.mrb[84].mxu1 %v5435_v61  ;;  %v18570_v53 = vsel %vm2441_vm3, %v7005_v40, %v7007_v19  ;;  %v7320_v0 = vrot.slane %v6482_v52, 1 }
 0x2e4   :  { %21174 = vst [vmem:[#allocation18_spill] sm:$0xff] %v18570_v53  ;;  %v6484_v3 = vor.u32 %v6482_v52, %v6481_v54  ;;  %v5777_v11 = vor.u32 %v5776_v51, %v5773_v62 }
 0x2e5   :  { %v18573_v41 = vsel %vm2722_vm4, %v7316_v48, %v7320_v0  ;;  %v7324_v45 = vor.u32 %v7320_v0, %v6479_v59 }
 0x2e6   :  { %21175 = vst [vmem:[#allocation19_spill] sm:$0xff] %v18573_v41  ;;  %v6156_v43 = vld [vmem:[#allocation3 + $0x48] sm:$0xff]  ;;  %v18576_v36 = vsel %vm418_vm14, %v6473_v6, %v6484_v3  ;;  %v18579_v16 = vsel %vm1141_vm13, %v5768_v38, %v5777_v11 }
 0x2e7   :  { %15608 = vmatmul.mubr.bf16.gmra.mrb[84].mxu0 %v6156_v43  ;;  %v6487_v15 = vshrl.u32 %v6156_v43, 16  ;;  %v6490_v22 = vshll.u32 %v6156_v43, 16  ;;  %v5436_v29 = vrot.slane %v6156_v43, 7  ;;  %v7009_v47 = vrot.slane %v6156_v43, 1 }
 0x2e9   :  { %v5281_v40 = vpop.permute.xlu1 %5280  ;;  %v6489_v26 = vrot.slane %v6487_v15, 7  ;;  %v5437_v30 = vsel %vm860_vm12, %v5434_v37, %v5436_v29  ;;  %v5782_v35 = vrot.slane %v6487_v15, 6  ;;  %v5785_v13 = vrot.slane %v6490_v22, 7 }
 0x2ea   :  { %5332 = vst.msk [vmem:[#allocation3 + $0x50] sm:$0xff] %vm680_vm11, %v5281_v40  ;;  %15507 = vmatprep.mubr.bf16.mxu1 %v5437_v30  ;;  %v18584_v6 = vsel %vm2441_vm3, %v7007_v19, %v7009_v47  ;;  %v7328_v38 = vrot.slane %v6490_v22, 1 }
 0x2eb   :  { %21176 = vst [vmem:[#allocation20_spill] sm:$0xff] %v18584_v6  ;;  %v6492_v52 = vor.u32 %v6490_v22, %v6489_v26  ;;  %v5786_v48 = vor.u32 %v5785_v13, %v5782_v35 }
 0x2ec   :  { %v18587_v61 = vsel %vm2722_vm4, %v7324_v45, %v7328_v38  ;;  %v7332_v59 = vor.u32 %v7328_v38, %v6487_v15 }
 0x2ed   :  { %21177 = vst [vmem:[#allocation21_spill] sm:$0xff] %v18587_v61  ;;  %v18590_v62 = vsel %vm1141_vm13, %v5777_v11, %v5786_v48  ;;  %v18593_v37 = vsel %vm418_vm14, %v6481_v54, %v6492_v52 }
 0x2f1   :  { %v6157_v51 = vld [vmem:[#allocation3 + $0x50] sm:$0xff] }
 0x2f2   :  { %v5283_v3 = vpop.permute.xlu0 %5282  ;;  %15611 = vmatprep.mubr.bf16.mxu0 %v6157_v51  ;;  %v6495_v43 = vshrl.u32 %v6157_v51, 16  ;;  %v6498_v40 = vshll.u32 %v6157_v51, 16  ;;  %v5438_v19 = vrot.slane %v6157_v51, 7  ;;  %v7011_v30 = vrot.slane %v6157_v51, 1 }
 0x2f3   :  { %5333 = vst.msk [vmem:[#allocation3 + $0x58] sm:$0xff] %vm680_vm11, %v5283_v3 }
 0x2f4   :  { %v6497_v0 = vrot.slane %v6495_v43, 7  ;;  %v5439_v22 = vsel %vm860_vm12, %v5436_v29, %v5438_v19  ;;  %v5791_v35 = vrot.slane %v6495_v43, 6  ;;  %v5794_v13 = vrot.slane %v6498_v40, 7 }
 0x2f5   :  { %15508 = vmatmul.mubr.bf16.gmra.mrb[88].mxu1 %v5439_v22  ;;  %v18598_v11 = vsel %vm2441_vm3, %v7009_v47, %v7011_v30  ;;  %v7336_v54 = vrot.slane %v6498_v40, 1 }
 0x2f6   :  { %21178 = vst [vmem:[#allocation22_spill] sm:$0xff] %v18598_v11  ;;  %v6500_v45 = vor.u32 %v6498_v40, %v6497_v0  ;;  %v5795_v52 = vor.u32 %v5794_v13, %v5791_v35 }
 0x2f7   :  { %v18601_v60 = vsel %vm2722_vm4, %v7332_v59, %v7336_v54 }
 0x2f8   :  { %21179 = vst [vmem:[#allocation23_spill] sm:$0xff] %v18601_v60  ;;  %v18604_v51 = vsel %vm418_vm14, %v6489_v26, %v6500_v45  ;;  %v18607_v15 = vsel %vm1141_vm13, %v5786_v48, %v5795_v52  ;;  %v7340_v48 = vor.u32 %v7336_v54, %v6495_v43 }
 0x2fa   :  { %v6158_v38 = vld [vmem:[#allocation3 + $0x58] sm:$0xff] }
 0x2fb   :  { %15612 = vmatmul.mubr.bf16.gmra.mrb[88].mxu0 %v6158_v38  ;;  %v6503_v29 = vshrl.u32 %v6158_v38, 16  ;;  %v6506_v3 = vshll.u32 %v6158_v38, 16  ;;  %v5440_v22 = vrot.slane %v6158_v38, 7  ;;  %v7013_v56 = vrot.slane %v6158_v38, 1 }
 0x2fc   :  { %v5285_v47 = vpop.permute.xlu1 %5284 }
 0x2fd   :  { %5334 = vst.msk [vmem:[#allocation3 + $0x60] sm:$0xff] %vm680_vm11, %v5285_v47  ;;  %v6505_v40 = vrot.slane %v6503_v29, 7  ;;  %v5441_v35 = vsel %vm860_vm12, %v5438_v19, %v5440_v22  ;;  %v5800_v59 = vrot.slane %v6503_v29, 6  ;;  %v5803_v13 = vrot.slane %v6506_v3, 7 }
 0x2fe   :  { %15511 = vmatprep.mubr.bf16.mxu1 %v5441_v35  ;;  %v18612_v26 = vsel %vm2441_vm3, %v7011_v30, %v7013_v56  ;;  %v7344_v45 = vrot.slane %v6506_v3, 1 }
 0x2ff   :  { %21180 = vst [vmem:[#allocation24_spill] sm:$0xff] %v18612_v26  ;;  %v6508_v8 = vor.u32 %v6506_v3, %v6505_v40  ;;  %v5804_v57 = vor.u32 %v5803_v13, %v5800_v59 }
 0x300   :  { %v18615_v28 = vsel %vm2722_vm4, %v7340_v48, %v7344_v45  ;;  %v7348_v43 = vor.u32 %v7344_v45, %v6503_v29 }
 0x301   :  { %21181 = vst [vmem:[#allocation25_spill] sm:$0xff] %v18615_v28  ;;  %v18618_v38 = vsel %vm1141_vm13, %v5795_v52, %v5804_v57  ;;  %v18621_v47 = vsel %vm418_vm14, %v6497_v0, %v6508_v8 }
 0x304   :  { %v6159_v19 = vld [vmem:[#allocation3 + $0x60] sm:$0xff] }
 0x305   :  { %v5287_v25 = vpop.permute.xlu0 %5286  ;;  %15615 = vmatprep.mubr.bf16.mxu0 %v6159_v19  ;;  %v6511_v35 = vshrl.u32 %v6159_v19, 16  ;;  %v6514_v24 = vshll.u32 %v6159_v19, 16  ;;  %v5442_v30 = vrot.slane %v6159_v19, 7  ;;  %v7015_v44 = vrot.slane %v6159_v19, 1 }
 0x306   :  { %5335 = vst.msk [vmem:[#allocation3 + $0x68] sm:$0xff] %vm680_vm11, %v5287_v25 }
 0x307   :  { %v6513_v54 = vrot.slane %v6511_v35, 7  ;;  %v5443_v3 = vsel %vm860_vm12, %v5440_v22, %v5442_v30  ;;  %v5809_v59 = vrot.slane %v6511_v35, 6  ;;  %v5812_v13 = vrot.slane %v6514_v24, 7 }
 0x308   :  { %15512 = vmatmul.mubr.bf16.gmra.mrb[92].mxu1 %v5443_v3  ;;  %v18626_v52 = vsel %vm2441_vm3, %v7013_v56, %v7015_v44  ;;  %v7352_v8 = vrot.slane %v6514_v24, 1 }
 0x309   :  { %21182 = vst [vmem:[#allocation26_spill] sm:$0xff] %v18626_v52  ;;  %v6516_v0 = vor.u32 %v6514_v24, %v6513_v54  ;;  %v5813_v48 = vor.u32 %v5812_v13, %v5809_v59 }
 0x30a   :  { %v18629_v34 = vsel %vm2722_vm4, %v7348_v43, %v7352_v8 }
 0x30b   :  { %21183 = vst [vmem:[#allocation27_spill] sm:$0xff] %v18629_v34  ;;  %v18632_v19 = vsel %vm418_vm14, %v6505_v40, %v6516_v0  ;;  %v18635_v25 = vsel %vm1141_vm13, %v5804_v57, %v5813_v48  ;;  %v7356_v57 = vor.u32 %v7352_v8, %v6511_v35 }
 0x30d   :  { %v6160_v29 = vld [vmem:[#allocation3 + $0x68] sm:$0xff] }
 0x30e   :  { %15616 = vmatmul.mubr.bf16.gmra.mrb[92].mxu0 %v6160_v29  ;;  %v6519_v22 = vshrl.u32 %v6160_v29, 16  ;;  %v6522_v45 = vshll.u32 %v6160_v29, 16  ;;  %v5444_v3 = vrot.slane %v6160_v29, 7  ;;  %v7017_v9 = vrot.slane %v6160_v29, 1 }
 0x30f   :  { %v5289_v56 = vpop.permute.xlu1 %5288 }
 0x310   :  { %5336 = vst.msk [vmem:[#allocation3 + $0x70] sm:$0xff] %vm680_vm11, %v5289_v56  ;;  %v6521_v24 = vrot.slane %v6519_v22, 7  ;;  %v5445_v59 = vsel %vm860_vm12, %v5442_v30, %v5444_v3  ;;  %v5818_v43 = vrot.slane %v6519_v22, 6  ;;  %v5821_v13 = vrot.slane %v6522_v45, 7 }
 0x311   :  { %15515 = vmatprep.mubr.bf16.mxu1 %v5445_v59  ;;  %v18640_v40 = vsel %vm2441_vm3, %v7015_v44, %v7017_v9  ;;  %v7360_v0 = vrot.slane %v6522_v45, 1 }
 0x312   :  { %21184 = vst [vmem:[#allocation28_spill] sm:$0xff] %v18640_v40  ;;  %v6524_v42 = vor.u32 %v6522_v45, %v6521_v24  ;;  %v5822_v46 = vor.u32 %v5821_v13, %v5818_v43 }
 0x313   :  { %v18643_v34 = vsel %vm2722_vm4, %v7356_v57, %v7360_v0  ;;  %v7364_v35 = vor.u32 %v7360_v0, %v6519_v22 }
 0x314   :  { %21185 = vst [vmem:[#allocation29_spill] sm:$0xff] %v18643_v34  ;;  %v18646_v29 = vsel %vm1141_vm13, %v5813_v48, %v5822_v46  ;;  %v18649_v56 = vsel %vm418_vm14, %v6513_v54, %v6524_v42 }
 0x317   :  { %v6161_v30 = vld [vmem:[#allocation3 + $0x70] sm:$0xff] }
 0x318   :  { %v5291_v28 = vpop.permute.xlu0 %5290  ;;  %15619 = vmatprep.mubr.bf16.mxu0 %v6161_v30  ;;  %v6527_v59 = vshrl.u32 %v6161_v30, 16  ;;  %v6530_v60 = vshll.u32 %v6161_v30, 16  ;;  %v5446_v44 = vrot.slane %v6161_v30, 7  ;;  %v7019_v61 = vrot.slane %v6161_v30, 1 }
 0x319   :  { %5337 = vst.msk [vmem:[#allocation3 + $0x78] sm:$0xff] %vm680_vm11, %v5291_v28 }
 0x31a   :  { %v6529_v8 = vrot.slane %v6527_v59, 7  ;;  %v5447_v45 = vsel %vm860_vm12, %v5444_v3, %v5446_v44  ;;  %v5827_v43 = vrot.slane %v6527_v59, 6  ;;  %v5830_v13 = vrot.slane %v6530_v60, 7 }
 0x31b   :  { %15516 = vmatmul.mubr.bf16.gmra.mrb[96].mxu1 %v5447_v45  ;;  %v18654_v48 = vsel %vm2441_vm3, %v7017_v9, %v7019_v61  ;;  %v7368_v42 = vrot.slane %v6530_v60, 1 }
 0x31c   :  { %21186 = vst [vmem:[#allocation30_spill] sm:$0xff] %v18654_v48  ;;  %v6532_v54 = vor.u32 %v6530_v60, %v6529_v8  ;;  %v5831_v57 = vor.u32 %v5830_v13, %v5827_v43 }
 0x31d   :  { %v18657_v34 = vsel %vm2722_vm4, %v7364_v35, %v7368_v42  ;;  %v7372_v41 = vor.u32 %v7368_v42, %v6527_v59 }
 0x31e   :  { %21187 = vst [vmem:[#allocation31_spill] sm:$0xff] %v18657_v34  ;;  %v18660_v30 = vsel %vm418_vm14, %v6521_v24, %v6532_v54  ;;  %v18663_v28 = vsel %vm1141_vm13, %v5822_v46, %v5831_v57 }
 0x320   :  { %v6162_v22 = vld [vmem:[#allocation3 + $0x78] sm:$0xff] }
 0x321   :  { %15620 = vmatmul.mubr.bf16.gmra.mrb[96].mxu0 %v6162_v22  ;;  %v6535_v3 = vshrl.u32 %v6162_v22, 16  ;;  %v6538_v0 = vshll.u32 %v6162_v22, 16  ;;  %v5448_v45 = vrot.slane %v6162_v22, 7  ;;  %v7021_v9 = vrot.slane %v6162_v22, 1 }
 0x322   :  { %v5293_v58 = vpop.permute.xlu1 %5292 }
 0x323   :  { %5338 = vst.msk [vmem:[#allocation3 + $0x80] sm:$0xff] %vm680_vm11, %v5293_v58  ;;  %v6537_v60 = vrot.slane %v6535_v3, 7  ;;  %v5449_v35 = vsel %vm860_vm12, %v5446_v44, %v5448_v45  ;;  %v5836_v43 = vrot.slane %v6535_v3, 6  ;;  %v5839_v59 = vrot.slane %v6538_v0, 7 }
 0x324   :  { %15519 = vmatprep.mubr.bf16.mxu1 %v5449_v35  ;;  %v18668_v24 = vsel %vm2441_vm3, %v7019_v61, %v7021_v9  ;;  %v7376_v46 = vrot.slane %v6538_v0, 1 }
 0x325   :  { %21188 = vst [vmem:[#allocation32_spill] sm:$0xff] %v18668_v24  ;;  %v6540_v13 = vor.u32 %v6538_v0, %v6537_v60  ;;  %v5840_v42 = vor.u32 %v5839_v59, %v5836_v43 }
 0x326   :  { %v18671_v54 = vsel %vm2722_vm4, %v7372_v41, %v7376_v46  ;;  %v7380_v34 = vor.u32 %v7376_v46, %v6535_v3 }
 0x327   :  { %21189 = vst [vmem:[#allocation33_spill] sm:$0xff] %v18671_v54  ;;  %v18674_v22 = vsel %vm1141_vm13, %v5831_v57, %v5840_v42  ;;  %v18677_v58 = vsel %vm418_vm14, %v6529_v8, %v6540_v13  ;;  %v5346_v13 = vld [vmem:[#allocation3] sm:$0xc0] }
 0x328   :  { %v5700_v48 = vshrl.u32 %v5346_v13, 16 }
 0x32a   :  { %v6163_v44 = vld [vmem:[#allocation3 + $0x80] sm:$0xff]  ;;  %v5702_v26 = vrot.slane %v5700_v48, 6 }
 0x32b   :  { %v5295_v4 = vpop.permute.xlu0 %5294  ;;  %15623 = vmatprep.mubr.bf16.mxu0 %v6163_v44  ;;  %v6543_v35 = vshrl.u32 %v6163_v44, 16  ;;  %v6546_v5 = vshll.u32 %v6163_v44, 16  ;;  %v5450_v61 = vrot.slane %v6163_v44, 7  ;;  %v7023_v7 = vrot.slane %v6163_v44, 1 }
 0x32c   :  { %5339 = vst.msk [vmem:[#allocation3 + $0x88] sm:$0xff] %vm680_vm11, %v5295_v4 }
 0x32d   :  { %v6545_v0 = vrot.slane %v6543_v35, 7  ;;  %v5451_v41 = vsel %vm860_vm12, %v5448_v45, %v5450_v61  ;;  %v5845_v43 = vrot.slane %v6543_v35, 6  ;;  %v5848_v3 = vrot.slane %v6546_v5, 7 }
 0x32e   :  { %15520 = vmatmul.mubr.bf16.gmra.mrb[100].mxu1 %v5451_v41  ;;  %v18682_v57 = vsel %vm2441_vm3, %v7021_v9, %v7023_v7  ;;  %v7384_v8 = vrot.slane %v6546_v5, 1  ;;  %v21192_v9 = vmov 0 }
 0x32f   :  { %21190 = vst [vmem:[#allocation34_spill] sm:$0xff] %v18682_v57  ;;  %v6548_v59 = vor.u32 %v6546_v5, %v6545_v0  ;;  %v5849_v46 = vor.u32 %v5848_v3, %v5845_v43  ;;  %v21193_v9 = vsel %vm18695_vm7, 4294967295, %v21192_v9 }
 0x330   :  { %v18685_v54 = vsel %vm2722_vm4, %v7380_v34, %v7384_v8  ;;  %v7388_v24 = vor.u32 %v7384_v8, %v6543_v35  ;;  %21194 = vst [vmem:[#allocation36_spill] sm:$0xff] %v21193_v9 }
 0x331   :  { %21191 = vst [vmem:[#allocation35_spill] sm:$0xff] %v18685_v54  ;;  %v18688_v44 = vsel %vm418_vm14, %v6537_v60, %v6548_v59  ;;  %v18691_v4 = vsel %vm1141_vm13, %v5840_v42, %v5849_v46  ;;  %v5703_v60 = vshll.u32 %v5346_v13, 16  ;;  %v5343_v42 = vld [vmem:[#allocation3 + $0x98] sm:$0xff]  ;;  %v6148_v54 = vld [vmem:[#allocation3 + $0x8] sm:$0x80] }
 0x332   :  { %v6427_v53 = vshrl.u32 %v6148_v54, 16 }
 0x333   :  { %v6164_v45 = vld [vmem:[#allocation3 + $0x88] sm:$0xff]  ;;  %v5705_v6 = vrot.slane %v5703_v60, 7 }
 0x334   :  { %15624 = vmatmul.mubr.bf16.gmra.mrb[100].mxu0 %v6164_v45  ;;  %v18699_v5 = vshrl.u32 %v6164_v45, 16  ;;  %v6554_v34 = vshll.u32 %v6164_v45, 16  ;;  %v5452_v41 = vrot.slane %v6164_v45, 7  ;;  %v7025_v35 = vrot.slane %v6164_v45, 1 }
 0x335   :  { %v5297_v43 = vpop.permute.xlu1 %5296  ;;  %v5706_v60 = vor.u32 %v5705_v6, %v5702_v26 }
 0x336   :  { %5340 = vst.msk [vmem:[#allocation3 + $0x90] sm:$0xff] %vm680_vm11, %v5297_v43  ;;  %v5299_v3 = vpop.permute.xlu0 %5298  ;;  %v21117_v8 = vrot.slane %v18699_v5, 7  ;;  %v5453_v59 = vsel %vm860_vm12, %v5450_v61, %v5452_v41  ;;  %v5854_v57 = vrot.slane %v18699_v5, 6  ;;  %v5857_v40 = vrot.slane %v6554_v34, 7 }
 0x337   :  { %v18707_v52 = vsel %vm18695_vm7, %v5299_v3, %v5343_v42  ;;  %15523 = vmatprep.mubr.bf16.mxu1 %v5453_v59  ;;  %v18710_v45 = vsel %vm2441_vm3, %v7023_v7, %v7025_v35  ;;  %v7392_v13 = vrot.slane %v6554_v34, 1 }
 0x338   :  { %5345 = vst [vmem:[#allocation3 + $0x98] sm:$0xff] %v18707_v52  ;;  %v6556_v43 = vor.u32 %v6554_v34, %v21117_v8  ;;  %v21115_v61 = vshll.u32 %v18707_v52, 16  ;;  %v5858_v11 = vor.u32 %v5857_v40, %v5854_v57  ;;  %v21116_v7 = vshrl.u32 %v18707_v52, 16 }
 0x339   :  { %v18717_v9 = vsel %vm2722_vm4, %v7388_v24, %v7392_v13  ;;  %v7396_v42 = vor.u32 %v7392_v13, %v18699_v5  ;;  %v21195_v40 = vshll.u32 %v18268_v14, 16  ;;  %v5715_v8 = vsel %vm1141_vm13, %v5706_v60, %v18451_v32 }
 0x33a   :  { %v18722_v3 = vsel %vm1141_vm13, %v5849_v46, %v5858_v11  ;;  %v18725_v59 = vsel %vm418_vm14, %v6545_v0, %v6556_v43  ;;  %v7408_v48 = vrot.slane %v21115_v61, 1  ;;  %v6429_v46 = vrot.slane %v6427_v53, 7 }
 0x33b   :  { %v6436_v54 = vor.u32 %v21195_v40, %v18429_v17  ;;  %v7029_v61 = vrot.slane %v18707_v52, 1 }
 0x33c   :  { %v18734_v24 = vor.u32 %v7408_v48, %v21116_v7 }
 0x33d   :  { %v18736_v57 = vld [vmem:[#allocation3 + $0x90] sm:$0xff]  ;;  %v6437_v14 = vsel %vm418_vm14, %v6429_v46, %v6436_v54 }
 0x33e   :  { %21196 = vst [vmem:[#allocation37_spill] sm:$0xff] %v18734_v24  ;;  %v5364_v34 = vld [vmem:[#allocation3 + $0x90] sm:$0x7f]  ;;  %15627 = vmatprep.mubr.bf16.mxu0 %v18736_v57  ;;  %v6562_v0 = vshll.u32 %v18736_v57, 16  ;;  %v7027_v40 = vrot.slane %v18736_v57, 1  ;;  %v6559_v7 = vshrl.u32 %v18736_v57, 16 }
 0x33f   :  { %v5454_v13 = vrot.slane %v5364_v34, 7  ;;  %v5861_v43 = vshrl.u32 %v5364_v34, 16  ;;  %15628 = vmatmul.mubr.bf16.gmra.mrb[104].mxu0 %v18707_v52  ;;  %v5864_v17 = vshll.u32 %v5364_v34, 16 }
 0x340   :  { %15647 = vmatprep.mubr.bf16.mxu0 %v6437_v14  ;;  %v7400_v26 = vrot.slane %v6562_v0, 1  ;;  %v18751_v54 = vsel %vm2441_vm3, %v7025_v35, %v7027_v40  ;;  %v18756_v34 = vsel %vm2441_vm3, %v7027_v40, %v7029_v61  ;;  %v16554_v35 = vld [vmem:[%s21081_s1 + $0x2c8] sm:$0xff]   ;;  %v21210_v14 = vld [vmem:[#allocation5_spill] sm:$0xff] }
 0x341   :  { %v5455_v6 = vsel %vm860_vm12, %v5452_v41, %v5454_v13  ;;  %v5863_v53 = vrot.slane %v5861_v43, 6  ;;  %v5866_v24 = vrot.slane %v5864_v17, 7  ;;  %v21211_v17 = vrot.slane %v21210_v14, 1 }
 0x342   :  { %15524 = vmatmul.mubr.bf16.gmra.mrb[104].mxu1 %v5455_v6  ;;  %v18759_v41 = vsel %vm2722_vm4, %v7396_v42, %v7400_v26  ;;  %v7404_v46 = vor.u32 %v7400_v26, %v6559_v7  ;;  %v16625_v42 = vld [vmem:[#allocation3] sm:$0xff]  ;;  %v21216_v26 = vld [vmem:[#allocation21_spill] sm:$0xff] }
 0x343   :  { %15543 = vmatprep.mubr.bf16.mxu1 %v5715_v8  ;;  %v5867_v13 = vor.u32 %v5866_v24, %v5863_v53  ;;  %v6925_v8 = vld [vmem:[#allocation3 + $0x18] sm:$0xff]  ;;  %v21212_v6 = vld [vmem:[#allocation15_spill] sm:$0xff]  ;;  %v21213_v53 = vld [vmem:[#allocation16_spill] sm:$0xff] }
 0x344   :  { %v18764_v43 = vsel %vm2722_vm4, %v7404_v46, %v7408_v48  ;;  %v7279_v60 = vshrl.u32 %v6925_v8, 16  ;;  %v21219_v46 = vld [vmem:[#allocation27_spill] sm:$0xff] }
 0x345   :  { %v18767_v32 = vsel %vm1141_vm13, %v5858_v11, %v5867_v13  ;;  %v16555_v11 = vld [vmem:[%s21081_s1 + $0x2d0] sm:$0xff]   ;;  %v21220_v13 = vld [vmem:[#allocation29_spill] sm:$0xff] }
 0x347   :  { %15648 = vmatmul.mubr.bf16.vlgmr.msra.gmra.mrb[72].mxu0 %v18463_v31  ;;  %v16556_v31 = vld [vmem:[%s21081_s1 + $0x2d8] sm:$0xff]  }
 0x348   :  { %15651 = vmatprep.mubr.bf16.mxu0 %v18468_v12  ;;  %v16557_v12 = vld [vmem:[%s21081_s1 + $0x2e0] sm:$0xff]  }
 0x34a   :  { %15544 = vmatmul.mubr.bf16.vlgmr.msra.gmra.mrb[72].mxu1 %v18476_v49  ;;  %v16558_v49 = vld [vmem:[%s21081_s1 + $0x2e8] sm:$0xff]  }
 0x34b   :  { %15684 = vmatpush3.bf16.msra.mxu1 %v18550_v55  ;;  %15547 = vmatprep.mubr.bf16.mxu1 %v18489_v2  ;;  %v16559_v2 = vld [vmem:[%s21081_s1 + $0x2f0] sm:$0xff]  }
 0x34c   :  { %15685 = vmatprep.subr.bf16.mxu1 %v16554_v35 }
 0x34f   :  { %15686 = vmatpush3.bf16.msra.mxu1 %v16554_v35  ;;  %15652 = vmatmul.mubr.bf16.gmra.mrb[76].mxu0 %v18494_v63  ;;  %v16560_v63 = vld [vmem:[%s21081_s1 + $0x2f8] sm:$0xff]   ;;  %v21222_v35 = vld [vmem:[#allocation33_spill] sm:$0xff] }
 0x350   :  { %15687 = vmatprep.subr.bf16.mxu1 %v16555_v11  ;;  %15655 = vmatprep.mubr.bf16.mxu0 %v18531_v23 }
 0x352   :  { %15548 = vmatmul.mubr.bf16.gmra.mrb[76].mxu1 %v18498_v50  ;;  %v16561_v50 = vld [vmem:[%s21081_s1 + $0x280] sm:$0xff]  }
 0x353   :  { %15551 = vmatprep.mubr.bf16.mxu1 %v18508_v39  ;;  %15688 = vmatpush3.bf16.msra.mxu1 %v16555_v11  ;;  %v6561_v39 = vrot.slane %v6559_v7, 7  ;;  %v7031_v7 = vrot.slane %v16625_v42, 1  ;;  %v21223_v11 = vld [vmem:[#allocation35_spill] sm:$0xff] }
 0x354   :  { %15689 = vmatprep.subr.bf16.mxu1 %v16556_v31 }
 0x355   :  { %v6564_v23 = vor.u32 %v6562_v0, %v6561_v39  ;;  %v7032_v48 = vsel %vm2441_vm3, %v7029_v61, %v7031_v7  ;;  %v21215_v61 = vld [vmem:[#allocation19_spill] sm:$0xff] }
 0x357   :  { %15690 = vmatpush3.bf16.msra.mxu1 %v16556_v31  ;;  %15656 = vmatmul.mubr.bf16.gmra.mrb[80].mxu0 %v18565_v27  ;;  %v7414_v31 = vshll.u32 %v16625_v42, 16 }
 0x358   :  { %15691 = vmatprep.subr.bf16.mxu1 %v16557_v12  ;;  %15659 = vmatprep.mubr.bf16.mxu0 %v18576_v36  ;;  %v21199_v36 = vshll.u32 %v18707_v52, 16 }
 0x35a   :  { %15552 = vmatmul.mubr.bf16.gmra.mrb[80].mxu1 %v18534_v33  ;;  %v21197_v33 = vrot.slane %v18699_v5, 7  ;;  %v21209_v5 = vld [vmem:[#allocation34_spill] sm:$0xff] }
 0x35b   :  { %15555 = vmatprep.mubr.bf16.mxu1 %v18562_v18  ;;  %15692 = vmatpush3.bf16.msra.mxu1 %v16557_v12  ;;  %v21198_v18 = vshrl.u32 %v18707_v52, 16  ;;  %v21214_v52 = vld [vmem:[#allocation17_spill] sm:$0xff]  ;;  %v7416_v12 = vrot.slane %v7414_v31, 1 }
 0x35c   :  { %15693 = vmatprep.subr.bf16.mxu1 %v16558_v49  ;;  %v6565_v55 = vsel %vm418_vm14, %v21197_v33, %v6564_v23 }
 0x35d   :  { %v6569_v27 = vrot.slane %v21198_v18, 7 }
 0x35f   :  { %15694 = vmatpush3.bf16.msra.mxu1 %v16558_v49  ;;  %15660 = vmatmul.mubr.bf16.gmra.mrb[84].mxu0 %v18593_v37  ;;  %v7418_v49 = vshrl.u32 %v16625_v42, 16 }
 0x360   :  { %15695 = vmatprep.subr.bf16.mxu1 %v16559_v2  ;;  %15663 = vmatprep.mubr.bf16.mxu0 %v18604_v51 }
 0x362   :  { %15556 = vmatmul.mubr.bf16.gmra.mrb[84].mxu1 %v18579_v16  ;;  %v6572_v16 = vor.u32 %v21199_v36, %v6569_v27 }
 0x363   :  { %15559 = vmatprep.mubr.bf16.mxu1 %v18590_v62  ;;  %15696 = vmatpush3.bf16.msra.mxu1 %v16559_v2  ;;  %v6944_v62 = vld [vmem:[#allocation3 + $0x18] sm:$0xfe] }
 0x364   :  { %15697 = vmatprep.subr.bf16.mxu1 %v16560_v63  ;;  %v6573_v37 = vsel %vm418_vm14, %v6561_v39, %v6572_v16  ;;  %v6998_v51 = vrot.slane %v6944_v62, 1  ;;  %v7420_v39 = vor.u32 %v7418_v49, %v7416_v12 }
 0x367   :  { %15698 = vmatpush3.bf16.msra.mxu1 %v16560_v63  ;;  %15664 = vmatmul.mubr.bf16.gmra.mrb[88].mxu0 %v18621_v47  ;;  %v16562_v47 = vld [vmem:[%s21081_s1 + $0x288] sm:$0xff]   ;;  %v21224_v63 = vld [vmem:[#allocation37_spill] sm:$0xff] }
 0x368   :  { %15735 = vmatprep.subr.bf16.mxu1 %v16561_v50  ;;  %15667 = vmatprep.mubr.bf16.mxu0 %v18632_v19  ;;  %v16563_v19 = vld [vmem:[%s21081_s1 + $0x290] sm:$0xff]  }
 0x36a   :  { %15560 = vmatmul.mubr.bf16.gmra.mrb[88].mxu1 %v18607_v15  ;;  %v21200_v15 = vrot.slane %v18380_v20, 1  ;;  %v16564_v20 = vld [vmem:[%s21081_s1 + $0x298] sm:$0xff]  }
 0x36b   :  { %15563 = vmatprep.mubr.bf16.mxu1 %v18618_v38 }
 0x36c   :  { %v7000_v38 = vsel %vm2441_vm3, %v6998_v51, %v21200_v15 }
 0x36f   :  { %15668 = vmatmul.mubr.bf16.gmra.mrb[92].mxu0 %v18649_v56  ;;  %v21203_v56 = vld [vmem:[#allocation22_spill] sm:$0xff] }
 0x370   :  { %15671 = vmatprep.mubr.bf16.mxu0 %v18660_v30  ;;  %v16568_v30 = vld [vmem:[%s21081_s1 + $0x2b8] sm:$0xff]  }
 0x372   :  { %15564 = vmatmul.mubr.bf16.gmra.mrb[92].mxu1 %v18635_v25  ;;  %v21201_v25 = vld [vmem:[#allocation18_spill] sm:$0xff] }
 0x373   :  { %15567 = vmatprep.mubr.bf16.mxu1 %v18646_v29  ;;  %v21202_v29 = vld [vmem:[#allocation20_spill] sm:$0xff] }
 0x377   :  { %15672 = vmatmul.mubr.bf16.gmra.mrb[96].mxu0 %v18677_v58  ;;  %v21206_v58 = vld [vmem:[#allocation28_spill] sm:$0xff] }
 0x378   :  { %15675 = vmatprep.mubr.bf16.mxu0 %v18688_v44  ;;  %v21207_v44 = vld [vmem:[#allocation30_spill] sm:$0xff] }
 0x37a   :  { %15568 = vmatmul.mubr.bf16.gmra.mrb[96].mxu1 %v18663_v28  ;;  %v21204_v28 = vld [vmem:[#allocation24_spill] sm:$0xff] }
 0x37b   :  { %15571 = vmatprep.mubr.bf16.mxu1 %v18674_v22  ;;  %v21205_v22 = vld [vmem:[#allocation26_spill] sm:$0xff] }
 0x37f   :  { %15676 = vmatmul.mubr.bf16.gmra.mrb[100].mxu0 %v18725_v59  ;;  %v6943_v59 = vld [vmem:[#allocation3 + $0xa8] sm:$0x1] }
 0x380   :  { %15679 = vmatprep.mubr.bf16.mxu0 %v6565_v55  ;;  %v7033_v57 = vrot.slane %v6943_v59, 1  ;;  %v7422_v2 = vshll.u32 %v6943_v59, 16 }
 0x382   :  { %15572 = vmatmul.mubr.bf16.gmra.mrb[100].mxu1 %v18691_v4  ;;  %v21208_v4 = vld [vmem:[#allocation32_spill] sm:$0xff]  ;;  %v7424_v23 = vrot.slane %v7422_v2, 1 }
 0x383   :  { %15575 = vmatprep.mubr.bf16.mxu1 %v18722_v3  ;;  %v7281_v3 = vshll.u32 %v6925_v8, 16 }
 0x384   :  { %v7425_v33 = vsel %vm2722_vm4, %v7420_v39, %v7424_v23 }
 0x385   :  { %v7283_v24 = vrot.slane %v7281_v3, 1 }
 0x387   :  { %15680 = vmatmul.mubr.bf16.gmra.mrb[104].mxu0 %v6573_v37  ;;  %v7284_v0 = vor.u32 %v7283_v24, %v7279_v60 }
 0x389   :  { %v7289_v40 = vsel %vm2722_vm4, %v7284_v0, %v21211_v17 }
 0x38a   :  { %15576 = vmatmul.mubr.bf16.gmra.mrb[104].mxu1 %v18767_v32  ;;  %v21221_v32 = vld [vmem:[#allocation31_spill] sm:$0xff] }
 0x38b   :  { %15699 = vmatprep.mubr.bf16.mxu1 %v7000_v38 }
 0x392   :  { %15700 = vmatmul.mubr.bf16.vlgmr.msra.gmra.mrb[108].mxu1 %v18503_v21  ;;  %v16565_v21 = vld [vmem:[%s21081_s1 + $0x2a0] sm:$0xff]  }
 0x393   :  { %15736 = vmatpush3.bf16.msra.mxu1 %v16561_v50  ;;  %15703 = vmatprep.mubr.bf16.mxu1 %v18518_v10  ;;  %v16566_v10 = vld [vmem:[%s21081_s1 + $0x2a8] sm:$0xff]   ;;  %v7417_v50 = vsel %vm2722_vm4, %v21224_v63, %v7416_v12 }
 0x394   :  { %15737 = vmatprep.subr.bf16.mxu1 %v16562_v47 }
 0x397   :  { %15738 = vmatpush3.bf16.msra.mxu1 %v16562_v47 }
 0x398   :  { %15739 = vmatprep.subr.bf16.mxu1 %v16563_v19 }
 0x39a   :  { %15704 = vmatmul.mubr.bf16.gmra.mrb[112].mxu1 %v18554_v1  ;;  %v16567_v1 = vld [vmem:[%s21081_s1 + $0x2b0] sm:$0xff]  }
 0x39b   :  { %15707 = vmatprep.mubr.bf16.mxu1 %v21201_v25  ;;  %15740 = vmatpush3.bf16.msra.mxu1 %v16563_v19 }
 0x39c   :  { %15741 = vmatprep.subr.bf16.mxu1 %v16564_v20 }
 0x39f   :  { %15742 = vmatpush3.bf16.msra.mxu1 %v16564_v20 }
 0x3a0   :  { %15743 = vmatprep.subr.bf16.mxu1 %v16565_v21 }
 0x3a2   :  { %15708 = vmatmul.mubr.bf16.gmra.mrb[116].mxu1 %v21202_v29 }
 0x3a3   :  { %15711 = vmatprep.mubr.bf16.mxu1 %v21203_v56  ;;  %15744 = vmatpush3.bf16.msra.mxu1 %v16565_v21 }
 0x3a4   :  { %15745 = vmatprep.subr.bf16.mxu1 %v16566_v10 }
 0x3a7   :  { %15746 = vmatpush3.bf16.msra.mxu1 %v16566_v10 }
 0x3a8   :  { %15747 = vmatprep.subr.bf16.mxu1 %v16567_v1 }
 0x3aa   :  { %15712 = vmatmul.mubr.bf16.gmra.mrb[120].mxu1 %v21204_v28 }
 0x3ab   :  { %15715 = vmatprep.mubr.bf16.mxu1 %v21205_v22  ;;  %15748 = vmatpush3.bf16.msra.mxu1 %v16567_v1 }
 0x3ac   :  { %15749 = vmatprep.subr.bf16.mxu1 %v16568_v30 }
 0x3af   :  { %15750 = vmatpush3.bf16.msra.mxu1 %v16568_v30 }
 0x3b2   :  { %15716 = vmatmul.mubr.bf16.gmra.mrb[124].mxu1 %v21206_v58 }
 0x3b3   :  { %15719 = vmatprep.mubr.bf16.mxu1 %v21207_v44 }
 0x3ba   :  { %15720 = vmatmul.mubr.bf16.gmra.mrb[128].mxu1 %v21208_v4 }
 0x3bb   :  { %15723 = vmatprep.mubr.bf16.mxu1 %v21209_v5 }
 0x3c2   :  { %15724 = vmatmul.mubr.bf16.gmra.mrb[132].mxu1 %v18710_v45  ;;  %v7034_v45 = vsel %vm2441_vm3, %v7031_v7, %v7033_v57 }
 0x3c3   :  { %15727 = vmatprep.mubr.bf16.mxu1 %v18751_v54  ;;  %v21217_v54 = vld [vmem:[#allocation23_spill] sm:$0xff] }
 0x3ca   :  { %15728 = vmatmul.mubr.bf16.gmra.mrb[136].mxu1 %v18756_v34  ;;  %v21218_v34 = vld [vmem:[#allocation25_spill] sm:$0xff] }
 0x3cb   :  { %15731 = vmatprep.mubr.bf16.mxu1 %v7032_v48 }
 0x3d2   :  { %15732 = vmatmul.mubr.bf16.gmra.mrb[140].mxu1 %v7034_v45 }
 0x3d3   :  { %15751 = vmatprep.mubr.bf16.mxu1 %v7289_v40 }
 0x3da   :  { %15752 = vmatmul.mubr.bf16.vlgmr.msra.gmra.mrb[108].mxu1 %v21212_v6 }
 0x3db   :  { %15755 = vmatprep.mubr.bf16.mxu1 %v21213_v53 }
 0x3e2   :  { %15756 = vmatmul.mubr.bf16.gmra.mrb[112].mxu1 %v21214_v52 }
 0x3e3   :  { %15759 = vmatprep.mubr.bf16.mxu1 %v21215_v61 }
 0x3ea   :  { %15760 = vmatmul.mubr.bf16.gmra.mrb[116].mxu1 %v21216_v26 }
 0x3eb   :  { %15763 = vmatprep.mubr.bf16.mxu1 %v21217_v54 }
 0x3f2   :  { %15764 = vmatmul.mubr.bf16.gmra.mrb[120].mxu1 %v21218_v34 }
 0x3f3   :  { %15767 = vmatprep.mubr.bf16.mxu1 %v21219_v46 }
 0x3fa   :  { %15768 = vmatmul.mubr.bf16.gmra.mrb[124].mxu1 %v21220_v13 }
 0x3fb   :  { %15771 = vmatprep.mubr.bf16.mxu1 %v21221_v32 }
 0x402   :  { %15772 = vmatmul.mubr.bf16.gmra.mrb[128].mxu1 %v21222_v35 }
 0x403   :  { %15775 = vmatprep.mubr.bf16.mxu1 %v21223_v11 }
 0x40a   :  { %15776 = vmatmul.mubr.bf16.gmra.mrb[132].mxu1 %v18717_v9 }
 0x40b   :  { %15779 = vmatprep.mubr.bf16.mxu1 %v18759_v41 }
 0x412   :  { %15780 = vmatmul.mubr.bf16.gmra.mrb[136].mxu1 %v18764_v43 }
 0x413   :  { %15783 = vmatprep.mubr.bf16.mxu1 %v7417_v50 }
 0x41a   :  { %15784 = vmatmul.mubr.bf16.gmra.mrb[140].mxu1 %v7425_v33  ;;  %v15649_v55 = vpop.f32.mrb[72].mxu0 }
 0x41b   :  { %v6674_v18 = vpop.f32.mrb[73].mxu0 }
 0x41c   :  { %v15650_v27 = vpop.f32.mrb[74].mxu0 }
 0x41d   :  { %v15545_v9 = vpop.f32.mrb[72].mxu1  ;;  %v6677_v36 = vpop.f32.mrb[75].mxu0 }
 0x41e   :  { %6114 = vst.msk [vmem:[#allocation4 + $0x10] sm:$0xff] %vm396_vm5, %v15545_v9  ;;  %v5969_v41 = vpop.f32.mrb[73].mxu1 }
 0x41f   :  { %6112 = vst.msk [vmem:[#allocation4] sm:$0xff] %vm396_vm5, %v5969_v41  ;;  %v15546_v43 = vpop.f32.mrb[74].mxu1 }
 0x420   :  { %6115 = vst.msk [vmem:[#allocation4 + $0x18] sm:$0xff] %vm396_vm5, %v15546_v43  ;;  %v5972_v16 = vpop.f32.mrb[75].mxu1 }
 0x421   :  { %6113 = vst.msk [vmem:[#allocation4 + $0x8] sm:$0xff] %vm396_vm5, %v5972_v16 }
 0x422   :  { %v15653_v62 = vpop.f32.mrb[76].mxu0 }
 0x423   :  { %v6690_v37 = vpop.f32.mrb[77].mxu0 }
 0x424   :  { %v15654_v38 = vpop.f32.mrb[78].mxu0 }
 0x425   :  { %v6819_v51 = vld [vmem:[#allocation4 + $0x10] sm:$0xff]  ;;  %v15549_v15 = vpop.f32.mrb[76].mxu1  ;;  %v6693_v25 = vpop.f32.mrb[79].mxu0 }
 0x426   :  { %v6855_v47 = vadd.f32 %v15649_v55, %v6819_v51  ;;  %v6817_v19 = vld [vmem:[#allocation4] sm:$0xff]  ;;  %6118 = vst.msk [vmem:[#allocation4 + $0x30] sm:$0xff] %vm396_vm5, %v15549_v15  ;;  %v5985_v20 = vpop.f32.mrb[77].mxu1 }
 0x427   :  { %v6853_v21 = vadd.f32 %v6817_v19, %v6674_v18  ;;  %v6820_v10 = vld [vmem:[#allocation4 + $0x18] sm:$0xff]  ;;  %6116 = vst.msk [vmem:[#allocation4 + $0x20] sm:$0xff] %vm396_vm5, %v5985_v20  ;;  %v15550_v29 = vpop.f32.mrb[78].mxu1 }
 0x428   :  { %6891 = vst.msk [vmem:[#allocation4 + $0x10] sm:$0xff] %vm396_vm5, %v6855_v47  ;;  %v6856_v56 = vadd.f32 %v15650_v27, %v6820_v10  ;;  %v6818_v1 = vld [vmem:[#allocation4 + $0x8] sm:$0xff]  ;;  %6119 = vst.msk [vmem:[#allocation4 + $0x38] sm:$0xff] %vm396_vm5, %v15550_v29  ;;  %v5988_v30 = vpop.f32.mrb[79].mxu1 }
 0x429   :  { %6889 = vst.msk [vmem:[#allocation4] sm:$0xff] %vm396_vm5, %v6853_v21  ;;  %v6854_v28 = vadd.f32 %v6818_v1, %v6677_v36  ;;  %6117 = vst.msk [vmem:[#allocation4 + $0x28] sm:$0xff] %vm396_vm5, %v5988_v30 }
 0x42a   :  { %6892 = vst.msk [vmem:[#allocation4 + $0x18] sm:$0xff] %vm396_vm5, %v6856_v56  ;;  %v15657_v22 = vpop.f32.mrb[80].mxu0 }
 0x42b   :  { %6890 = vst.msk [vmem:[#allocation4 + $0x8] sm:$0xff] %vm396_vm5, %v6854_v28  ;;  %v6706_v58 = vpop.f32.mrb[81].mxu0 }
 0x42c   :  { %v15658_v5 = vpop.f32.mrb[82].mxu0 }
 0x42d   :  { %v6823_v44 = vld [vmem:[#allocation4 + $0x30] sm:$0xff]  ;;  %v15553_v4 = vpop.f32.mrb[80].mxu1  ;;  %v6709_v3 = vpop.f32.mrb[83].mxu0 }
 0x42e   :  { %v6859_v8 = vadd.f32 %v15653_v62, %v6823_v44  ;;  %v6821_v42 = vld [vmem:[#allocation4 + $0x20] sm:$0xff]  ;;  %6122 = vst.msk [vmem:[#allocation4 + $0x50] sm:$0xff] %vm396_vm5, %v15553_v4  ;;  %v6001_v7 = vpop.f32.mrb[81].mxu1 }
 0x42f   :  { %v6857_v59 = vadd.f32 %v6821_v42, %v6690_v37  ;;  %v6824_v48 = vld [vmem:[#allocation4 + $0x38] sm:$0xff]  ;;  %6120 = vst.msk [vmem:[#allocation4 + $0x40] sm:$0xff] %vm396_vm5, %v6001_v7  ;;  %v15554_v24 = vpop.f32.mrb[82].mxu1 }
 0x430   :  { %6895 = vst.msk [vmem:[#allocation4 + $0x30] sm:$0xff] %vm396_vm5, %v6859_v8  ;;  %v6860_v57 = vadd.f32 %v15654_v38, %v6824_v48  ;;  %v6822_v60 = vld [vmem:[#allocation4 + $0x28] sm:$0xff]  ;;  %6123 = vst.msk [vmem:[#allocation4 + $0x58] sm:$0xff] %vm396_vm5, %v15554_v24  ;;  %v6004_v0 = vpop.f32.mrb[83].mxu1 }
 0x431   :  { %6893 = vst.msk [vmem:[#allocation4 + $0x20] sm:$0xff] %vm396_vm5, %v6857_v59  ;;  %v6858_v45 = vadd.f32 %v6822_v60, %v6693_v25  ;;  %6121 = vst.msk [vmem:[#allocation4 + $0x48] sm:$0xff] %vm396_vm5, %v6004_v0 }
 0x432   :  { %6896 = vst.msk [vmem:[#allocation4 + $0x38] sm:$0xff] %vm396_vm5, %v6860_v57  ;;  %v15661_v14 = vpop.f32.mrb[84].mxu0 }
 0x433   :  { %6894 = vst.msk [vmem:[#allocation4 + $0x28] sm:$0xff] %vm396_vm5, %v6858_v45  ;;  %v6722_v17 = vpop.f32.mrb[85].mxu0 }
 0x434   :  { %v15662_v53 = vpop.f32.mrb[86].mxu0 }
 0x435   :  { %v6827_v40 = vld [vmem:[#allocation4 + $0x50] sm:$0xff]  ;;  %v15557_v6 = vpop.f32.mrb[84].mxu1  ;;  %v6725_v54 = vpop.f32.mrb[87].mxu0 }
 0x436   :  { %v6863_v52 = vadd.f32 %v15657_v22, %v6827_v40  ;;  %v6825_v61 = vld [vmem:[#allocation4 + $0x40] sm:$0xff]  ;;  %6126 = vst.msk [vmem:[#allocation4 + $0x70] sm:$0xff] %vm396_vm5, %v15557_v6  ;;  %v6017_v26 = vpop.f32.mrb[85].mxu1 }
 0x437   :  { %v6861_v34 = vadd.f32 %v6825_v61, %v6706_v58  ;;  %v6828_v46 = vld [vmem:[#allocation4 + $0x58] sm:$0xff]  ;;  %6124 = vst.msk [vmem:[#allocation4 + $0x60] sm:$0xff] %vm396_vm5, %v6017_v26  ;;  %v15558_v13 = vpop.f32.mrb[86].mxu1 }
 0x438   :  { %6899 = vst.msk [vmem:[#allocation4 + $0x50] sm:$0xff] %vm396_vm5, %v6863_v52  ;;  %v6864_v32 = vadd.f32 %v15658_v5, %v6828_v46  ;;  %v6826_v35 = vld [vmem:[#allocation4 + $0x48] sm:$0xff]  ;;  %6127 = vst.msk [vmem:[#allocation4 + $0x78] sm:$0xff] %vm396_vm5, %v15558_v13  ;;  %v6020_v11 = vpop.f32.mrb[87].mxu1 }
 0x439   :  { %6897 = vst.msk [vmem:[#allocation4 + $0x40] sm:$0xff] %vm396_vm5, %v6861_v34  ;;  %v6862_v31 = vadd.f32 %v6826_v35, %v6709_v3  ;;  %6125 = vst.msk [vmem:[#allocation4 + $0x68] sm:$0xff] %vm396_vm5, %v6020_v11 }
 0x43a   :  { %6900 = vst.msk [vmem:[#allocation4 + $0x58] sm:$0xff] %vm396_vm5, %v6864_v32  ;;  %v15665_v12 = vpop.f32.mrb[88].mxu0 }
 0x43b   :  { %6898 = vst.msk [vmem:[#allocation4 + $0x48] sm:$0xff] %vm396_vm5, %v6862_v31  ;;  %v6738_v49 = vpop.f32.mrb[89].mxu0 }
 0x43c   :  { %v15666_v50 = vpop.f32.mrb[90].mxu0 }
 0x43d   :  { %v6831_v2 = vld [vmem:[#allocation4 + $0x70] sm:$0xff]  ;;  %v15561_v63 = vpop.f32.mrb[88].mxu1  ;;  %v6741_v55 = vpop.f32.mrb[91].mxu0 }
 0x43e   :  { %v6867_v39 = vadd.f32 %v15661_v14, %v6831_v2  ;;  %v6829_v23 = vld [vmem:[#allocation4 + $0x60] sm:$0xff]  ;;  %6130 = vst.msk [vmem:[#allocation4 + $0x90] sm:$0xff] %vm396_vm5, %v15561_v63  ;;  %v6033_v33 = vpop.f32.mrb[89].mxu1 }
 0x43f   :  { %v6865_v18 = vadd.f32 %v6829_v23, %v6722_v17  ;;  %v6832_v9 = vld [vmem:[#allocation4 + $0x78] sm:$0xff]  ;;  %6128 = vst.msk [vmem:[#allocation4 + $0x80] sm:$0xff] %vm396_vm5, %v6033_v33  ;;  %v15562_v27 = vpop.f32.mrb[90].mxu1 }
 0x440   :  { %6903 = vst.msk [vmem:[#allocation4 + $0x70] sm:$0xff] %vm396_vm5, %v6867_v39  ;;  %v6868_v41 = vadd.f32 %v15662_v53, %v6832_v9  ;;  %v6830_v36 = vld [vmem:[#allocation4 + $0x68] sm:$0xff]  ;;  %6131 = vst.msk [vmem:[#allocation4 + $0x98] sm:$0xff] %vm396_vm5, %v15562_v27  ;;  %v6036_v43 = vpop.f32.mrb[91].mxu1 }
 0x441   :  { %6901 = vst.msk [vmem:[#allocation4 + $0x60] sm:$0xff] %vm396_vm5, %v6865_v18  ;;  %v6866_v16 = vadd.f32 %v6830_v36, %v6725_v54  ;;  %6129 = vst.msk [vmem:[#allocation4 + $0x88] sm:$0xff] %vm396_vm5, %v6036_v43 }
 0x442   :  { %6904 = vst.msk [vmem:[#allocation4 + $0x78] sm:$0xff] %vm396_vm5, %v6868_v41  ;;  %v15669_v62 = vpop.f32.mrb[92].mxu0 }
 0x443   :  { %6902 = vst.msk [vmem:[#allocation4 + $0x68] sm:$0xff] %vm396_vm5, %v6866_v16  ;;  %v6754_v37 = vpop.f32.mrb[93].mxu0 }
 0x444   :  { %v15670_v38 = vpop.f32.mrb[94].mxu0 }
 0x445   :  { %v6835_v51 = vld [vmem:[#allocation4 + $0x90] sm:$0xff]  ;;  %v15565_v15 = vpop.f32.mrb[92].mxu1  ;;  %v6757_v25 = vpop.f32.mrb[95].mxu0 }
 0x446   :  { %v6871_v47 = vadd.f32 %v15665_v12, %v6835_v51  ;;  %v6833_v19 = vld [vmem:[#allocation4 + $0x80] sm:$0xff]  ;;  %6134 = vst.msk [vmem:[#allocation4 + $0xb0] sm:$0xff] %vm396_vm5, %v15565_v15  ;;  %v6049_v20 = vpop.f32.mrb[93].mxu1 }
 0x447   :  { %v6869_v21 = vadd.f32 %v6833_v19, %v6738_v49  ;;  %v6836_v10 = vld [vmem:[#allocation4 + $0x98] sm:$0xff]  ;;  %6132 = vst.msk [vmem:[#allocation4 + $0xa0] sm:$0xff] %vm396_vm5, %v6049_v20  ;;  %v15566_v29 = vpop.f32.mrb[94].mxu1 }
 0x448   :  { %6907 = vst.msk [vmem:[#allocation4 + $0x90] sm:$0xff] %vm396_vm5, %v6871_v47  ;;  %v6872_v56 = vadd.f32 %v15666_v50, %v6836_v10  ;;  %v6834_v1 = vld [vmem:[#allocation4 + $0x88] sm:$0xff]  ;;  %6135 = vst.msk [vmem:[#allocation4 + $0xb8] sm:$0xff] %vm396_vm5, %v15566_v29  ;;  %v6052_v30 = vpop.f32.mrb[95].mxu1 }
 0x449   :  { %6905 = vst.msk [vmem:[#allocation4 + $0x80] sm:$0xff] %vm396_vm5, %v6869_v21  ;;  %v6870_v28 = vadd.f32 %v6834_v1, %v6741_v55  ;;  %6133 = vst.msk [vmem:[#allocation4 + $0xa8] sm:$0xff] %vm396_vm5, %v6052_v30  ;;  %v7671_v21 = vld [vmem:[#allocation4 + $0x10] sm:$0xff] }
 0x44a   :  { %6908 = vst.msk [vmem:[#allocation4 + $0x98] sm:$0xff] %vm396_vm5, %v6872_v56  ;;  %v15673_v22 = vpop.f32.mrb[96].mxu0  ;;  %v7669_v56 = vld [vmem:[#allocation4] sm:$0xff] }
 0x44b   :  { %6906 = vst.msk [vmem:[#allocation4 + $0x88] sm:$0xff] %vm396_vm5, %v6870_v28  ;;  %v6770_v58 = vpop.f32.mrb[97].mxu0  ;;  %v7672_v28 = vld [vmem:[#allocation4 + $0x18] sm:$0xff] }
 0x44c   :  { %v15674_v5 = vpop.f32.mrb[98].mxu0 }
 0x44d   :  { %v6839_v44 = vld [vmem:[#allocation4 + $0xb0] sm:$0xff]  ;;  %v15569_v4 = vpop.f32.mrb[96].mxu1  ;;  %v6773_v3 = vpop.f32.mrb[99].mxu0 }
 0x44e   :  { %v6875_v8 = vadd.f32 %v15669_v62, %v6839_v44  ;;  %v6837_v42 = vld [vmem:[#allocation4 + $0xa0] sm:$0xff]  ;;  %6138 = vst.msk [vmem:[#allocation4 + $0xd0] sm:$0xff] %vm396_vm5, %v15569_v4  ;;  %v6065_v7 = vpop.f32.mrb[97].mxu1  ;;  %v7670_v44 = vld [vmem:[#allocation4 + $0x8] sm:$0xff] }
 0x44f   :  { %v6873_v59 = vadd.f32 %v6837_v42, %v6754_v37  ;;  %v6840_v48 = vld [vmem:[#allocation4 + $0xb8] sm:$0xff]  ;;  %6136 = vst.msk [vmem:[#allocation4 + $0xc0] sm:$0xff] %vm396_vm5, %v6065_v7  ;;  %v15570_v24 = vpop.f32.mrb[98].mxu1  ;;  %v18981_v42 = vld [vmem:[%s21082_s2 + $0x1] ss:$0 sm:$0xff] }
 0x450   :  { %6911 = vst.msk [vmem:[#allocation4 + $0xb0] sm:$0xff] %vm396_vm5, %v6875_v8  ;;  %v6876_v57 = vadd.f32 %v15670_v38, %v6840_v48  ;;  %v6838_v60 = vld [vmem:[#allocation4 + $0xa8] sm:$0xff]  ;;  %6139 = vst.msk [vmem:[#allocation4 + $0xd8] sm:$0xff] %vm396_vm5, %v15570_v24  ;;  %v6068_v0 = vpop.f32.mrb[99].mxu1  ;;  %v7675_v8 = vld [vmem:[#allocation4 + $0x30] sm:$0xff] }
 0x451   :  { %6909 = vst.msk [vmem:[#allocation4 + $0xa0] sm:$0xff] %vm396_vm5, %v6873_v59  ;;  %v6874_v45 = vadd.f32 %v6838_v60, %v6757_v25  ;;  %6137 = vst.msk [vmem:[#allocation4 + $0xc8] sm:$0xff] %vm396_vm5, %v6068_v0  ;;  %v7673_v59 = vld [vmem:[#allocation4 + $0x20] sm:$0xff] }
 0x452   :  { %6912 = vst.msk [vmem:[#allocation4 + $0xb8] sm:$0xff] %vm396_vm5, %v6876_v57  ;;  %v15677_v14 = vpop.f32.mrb[100].mxu0  ;;  %v7676_v57 = vld [vmem:[#allocation4 + $0x38] sm:$0xff] }
 0x453   :  { %6910 = vst.msk [vmem:[#allocation4 + $0xa8] sm:$0xff] %vm396_vm5, %v6874_v45  ;;  %v6786_v17 = vpop.f32.mrb[101].mxu0 }
 0x454   :  { %v15678_v53 = vpop.f32.mrb[102].mxu0 }
 0x455   :  { %v6843_v40 = vld [vmem:[#allocation4 + $0xd0] sm:$0xff]  ;;  %v15573_v6 = vpop.f32.mrb[100].mxu1  ;;  %v6789_v54 = vpop.f32.mrb[103].mxu0 }
 0x456   :  { %v6879_v52 = vadd.f32 %v15673_v22, %v6843_v40  ;;  %v6841_v61 = vld [vmem:[#allocation4 + $0xc0] sm:$0xff]  ;;  %6142 = vst.msk [vmem:[#allocation4 + $0xf0] sm:$0xff] %vm396_vm5, %v15573_v6  ;;  %v6081_v26 = vpop.f32.mrb[101].mxu1 }
 0x457   :  { %v6877_v34 = vadd.f32 %v6841_v61, %v6770_v58  ;;  %v6844_v46 = vld [vmem:[#allocation4 + $0xd8] sm:$0xff]  ;;  %6140 = vst.msk [vmem:[#allocation4 + $0xe0] sm:$0xff] %vm396_vm5, %v6081_v26  ;;  %v15574_v13 = vpop.f32.mrb[102].mxu1 }
 0x458   :  { %6915 = vst.msk [vmem:[#allocation4 + $0xd0] sm:$0xff] %vm396_vm5, %v6879_v52  ;;  %v6880_v32 = vadd.f32 %v15674_v5, %v6844_v46  ;;  %v6842_v35 = vld [vmem:[#allocation4 + $0xc8] sm:$0xff]  ;;  %6143 = vst.msk [vmem:[#allocation4 + $0xf8] sm:$0xff] %vm396_vm5, %v15574_v13  ;;  %v6084_v11 = vpop.f32.mrb[103].mxu1 }
 0x459   :  { %6913 = vst.msk [vmem:[#allocation4 + $0xc0] sm:$0xff] %vm396_vm5, %v6877_v34  ;;  %v6878_v31 = vadd.f32 %v6842_v35, %v6773_v3  ;;  %6141 = vst.msk [vmem:[#allocation4 + $0xe8] sm:$0xff] %vm396_vm5, %v6084_v11  ;;  %v21225_v35 = vld [vmem:[#allocation12_spill] sm:$0xff] }
 0x45a   :  { %6916 = vst.msk [vmem:[#allocation4 + $0xd8] sm:$0xff] %vm396_vm5, %v6880_v32  ;;  %v15681_v12 = vpop.f32.mrb[104].mxu0 }
 0x45b   :  { %6914 = vst.msk [vmem:[#allocation4 + $0xc8] sm:$0xff] %vm396_vm5, %v6878_v31  ;;  %v6802_v49 = vpop.f32.mrb[105].mxu0 }
 0x45c   :  { %v15682_v50 = vpop.f32.mrb[106].mxu0 }
 0x45d   :  { %v6847_v2 = vld [vmem:[#allocation4 + $0xf0] sm:$0xff]  ;;  %v15577_v63 = vpop.f32.mrb[104].mxu1  ;;  %v6805_v55 = vpop.f32.mrb[107].mxu0 }
 0x45e   :  { %v6883_v39 = vadd.f32 %v15677_v14, %v6847_v2  ;;  %v6845_v23 = vld [vmem:[#allocation4 + $0xe0] sm:$0xff]  ;;  %6146 = vst.msk [vmem:[#allocation4 + $0x110] sm:$0xff] %vm396_vm5, %v15577_v63  ;;  %v6097_v33 = vpop.f32.mrb[105].mxu1  ;;  %v7674_v14 = vld [vmem:[#allocation4 + $0x28] sm:$0xff] }
 0x45f   :  { %v6881_v18 = vadd.f32 %v6845_v23, %v6786_v17  ;;  %v6848_v9 = vld [vmem:[#allocation4 + $0xf8] sm:$0xff]  ;;  %6144 = vst.msk [vmem:[#allocation4 + $0x100] sm:$0xff] %vm396_vm5, %v6097_v33  ;;  %v15578_v27 = vpop.f32.mrb[106].mxu1  ;;  %v7677_v23 = vld [vmem:[#allocation4 + $0x40] sm:$0xff] }
 0x460   :  { %6919 = vst.msk [vmem:[#allocation4 + $0xf0] sm:$0xff] %vm396_vm5, %v6883_v39  ;;  %v6884_v41 = vadd.f32 %v15678_v53, %v6848_v9  ;;  %v6846_v36 = vld [vmem:[#allocation4 + $0xe8] sm:$0xff]  ;;  %6147 = vst.msk [vmem:[#allocation4 + $0x118] sm:$0xff] %vm396_vm5, %v15578_v27  ;;  %v6100_v43 = vpop.f32.mrb[107].mxu1 }
 0x461   :  { %6917 = vst.msk [vmem:[#allocation4 + $0xe0] sm:$0xff] %vm396_vm5, %v6881_v18  ;;  %v6882_v16 = vadd.f32 %v6846_v36, %v6789_v54  ;;  %6145 = vst.msk [vmem:[#allocation4 + $0x108] sm:$0xff] %vm396_vm5, %v6100_v43 }
 0x462   :  { %6920 = vst.msk [vmem:[#allocation4 + $0xf8] sm:$0xff] %vm396_vm5, %v6884_v41  ;;  %v7680_v41 = vld [vmem:[#allocation4 + $0x58] sm:$0xff] }
 0x463   :  { %6918 = vst.msk [vmem:[#allocation4 + $0xe8] sm:$0xff] %vm396_vm5, %v6882_v16 }
 0x465   :  { %v6851_v62 = vld [vmem:[#allocation4 + $0x110] sm:$0xff] }
 0x466   :  { %v6887_v37 = vadd.f32 %v15681_v12, %v6851_v62  ;;  %v6849_v51 = vld [vmem:[#allocation4 + $0x100] sm:$0xff]  ;;  %v7679_v12 = vld [vmem:[#allocation4 + $0x50] sm:$0xff] }
 0x467   :  { %v6885_v15 = vadd.f32 %v6849_v51, %v6802_v49  ;;  %v6852_v38 = vld [vmem:[#allocation4 + $0x118] sm:$0xff]  ;;  %v7678_v51 = vld [vmem:[#allocation4 + $0x48] sm:$0xff] }
 0x468   :  { %6923 = vst.msk [vmem:[#allocation4 + $0x110] sm:$0xff] %vm396_vm5, %v6887_v37  ;;  %v6888_v47 = vadd.f32 %v15682_v50, %v6852_v38  ;;  %v6850_v19 = vld [vmem:[#allocation4 + $0x108] sm:$0xff] }
 0x469   :  { %6921 = vst.msk [vmem:[#allocation4 + $0x100] sm:$0xff] %vm396_vm5, %v6885_v15  ;;  %v6886_v20 = vadd.f32 %v6850_v19, %v6805_v55 }
 0x46a   :  { %6924 = vst.msk [vmem:[#allocation4 + $0x118] sm:$0xff] %vm396_vm5, %v6888_v47 }
 0x46b   :  { %6922 = vst.msk [vmem:[#allocation4 + $0x108] sm:$0xff] %vm396_vm5, %v6886_v20 }
 0x4ad   :  { %v15753_v25 = vpop.f32.mrb[108].mxu1 }
 0x4ae   :  { %v7707_v10 = vadd.f32 %v15753_v25, %v7671_v21  ;;  %v7526_v29 = vpop.f32.mrb[109].mxu1 }
 0x4af   :  { %v7705_v1 = vadd.f32 %v7669_v56, %v7526_v29  ;;  %v15754_v30 = vpop.f32.mrb[110].mxu1 }
 0x4b0   :  { %7743 = vst.msk [vmem:[#allocation4 + $0x10] sm:$0xff] %vm396_vm5, %v7707_v10  ;;  %v7708_v22 = vadd.f32 %v15754_v30, %v7672_v28  ;;  %v7529_v58 = vpop.f32.mrb[111].mxu1 }
 0x4b1   :  { %7741 = vst.msk [vmem:[#allocation4] sm:$0xff] %vm396_vm5, %v7705_v1  ;;  %v7706_v4 = vadd.f32 %v7670_v44, %v7529_v58 }
 0x4b2   :  { %7744 = vst.msk [vmem:[#allocation4 + $0x18] sm:$0xff] %vm396_vm5, %v7708_v22 }
 0x4b3   :  { %7742 = vst.msk [vmem:[#allocation4 + $0x8] sm:$0xff] %vm396_vm5, %v7706_v4 }
 0x4b5   :  { %v15757_v5 = vpop.f32.mrb[112].mxu1 }
 0x4b6   :  { %v7711_v7 = vadd.f32 %v15757_v5, %v7675_v8  ;;  %v7542_v3 = vpop.f32.mrb[113].mxu1 }
 0x4b7   :  { %v7709_v48 = vadd.f32 %v7673_v59, %v7542_v3  ;;  %v15758_v24 = vpop.f32.mrb[114].mxu1  ;;  %v7779_v60 = vld [vmem:[#allocation4 + $0x10] sm:$0xff] }
 0x4b8   :  { %7747 = vst.msk [vmem:[#allocation4 + $0x30] sm:$0xff] %vm396_vm5, %v7711_v7  ;;  %v7712_v0 = vadd.f32 %v15758_v24, %v7676_v57  ;;  %v7545_v45 = vpop.f32.mrb[115].mxu1  ;;  %v7777_v17 = vld [vmem:[#allocation4] sm:$0xff]  ;;  %v7823_v40 = vadd.f32 %v18981_v42, %v7779_v60  ;;  %v7683_v57 = vld [vmem:[#allocation4 + $0x70] sm:$0xff] }
 0x4b9   :  { %7745 = vst.msk [vmem:[#allocation4 + $0x20] sm:$0xff] %vm396_vm5, %v7709_v48  ;;  %v7710_v6 = vadd.f32 %v7674_v14, %v7545_v45  ;;  %v7821_v53 = vadd.f32 %v18981_v42, %v7777_v17  ;;  %v7780_v52 = vld [vmem:[#allocation4 + $0x18] sm:$0xff] }
 0x4ba   :  { %7748 = vst.msk [vmem:[#allocation4 + $0x38] sm:$0xff] %vm396_vm5, %v7712_v0  ;;  %v7778_v61 = vld [vmem:[#allocation4 + $0x8] sm:$0xff]  ;;  %v7824_v26 = vadd.f32 %v18981_v42, %v7780_v52  ;;  %v7859_v54 = vmax.f32 %v7823_v40, 0.0 }
 0x4bb   :  { %7746 = vst.msk [vmem:[#allocation4 + $0x28] sm:$0xff] %vm396_vm5, %v7710_v6  ;;  %v7822_v34 = vadd.f32 %v18981_v42, %v7778_v61  ;;  %v7857_v46 = vmax.f32 %v7821_v53, 0.0  ;;  %v7681_v53 = vld [vmem:[#allocation4 + $0x60] sm:$0xff] }
 0x4bc   :  { %v7860_v13 = vmax.f32 %v7824_v26, 0.0  ;;  %v7963_v32 = vcombine.high %v7859_v54, %v7859_v54  ;;  %v18992_v11 = vrot.slane %v7859_v54, %v21225_v35 }
 0x4bd   :  { %v15761_v31 = vpop.f32.mrb[116].mxu1  ;;  %v7858_v49 = vmax.f32 %v7822_v34, 0.0  ;;  %v7929_v2 = vcombine.high %v7857_v46, %v7857_v46  ;;  %v7936_v63 = vrot.slane %v7857_v46, %v21225_v35  ;;  %v7684_v46 = vld [vmem:[#allocation4 + $0x78] sm:$0xff] }
 0x4be   :  { %v7715_v50 = vadd.f32 %v15761_v31, %v7679_v12  ;;  %v7558_v39 = vpop.f32.mrb[117].mxu1  ;;  %v7977_v33 = vrot.slane %v7963_v32, %v21225_v35  ;;  %v7978_v55 = vcombine.high %v18992_v11, %v18992_v11  ;;  %v7980_v18 = vcombine.high %v7860_v13, %v7860_v13 }
 0x4bf   :  { %v7713_v9 = vadd.f32 %v7677_v23, %v7558_v39  ;;  %v15762_v27 = vpop.f32.mrb[118].mxu1  ;;  %v7943_v36 = vrot.slane %v7929_v2, %v21225_v35  ;;  %v7944_v43 = vcombine.high %v7936_v63, %v7936_v63  ;;  %v7946_v16 = vcombine.high %v7858_v49, %v7858_v49 }
 0x4c0   :  { %7751 = vst.msk [vmem:[#allocation4 + $0x50] sm:$0xff] %vm396_vm5, %v7715_v50  ;;  %v7716_v62 = vadd.f32 %v15762_v27, %v7680_v41  ;;  %v7561_v37 = vpop.f32.mrb[119].mxu1  ;;  %v7953_v15 = vrot.slane %v7858_v49, %v21225_v35  ;;  %v8685_v47 = vsel %vm779_vm6, %v7936_v63, 0.0  ;;  %v7979_v19 = vcombine.high %v7977_v33, %v7977_v33  ;;  %v7682_v49 = vld [vmem:[#allocation4 + $0x68] sm:$0xff]  ;;  %v7781_v39 = vld [vmem:[#allocation4 + $0x20] sm:$0xff]  ;;  %v7783_v27 = vld [vmem:[#allocation4 + $0x30] sm:$0xff] }
 0x4c1   :  { %7749 = vst.msk [vmem:[#allocation4 + $0x40] sm:$0xff] %vm396_vm5, %v7713_v9  ;;  %v7714_v20 = vadd.f32 %v7678_v51, %v7561_v37  ;;  %v7945_v25 = vcombine.high %v7943_v36, %v7943_v36  ;;  %v7960_v21 = vrot.slane %v7946_v16, %v21225_v35  ;;  %v8686_v29 = vsel %vm780_vm9, %v7944_v43, 0.0 }
 0x4c2   :  { %7752 = vst.msk [vmem:[#allocation4 + $0x58] sm:$0xff] %vm396_vm5, %v7716_v62  ;;  %v7961_v56 = vcombine.high %v7953_v15, %v7953_v15  ;;  %v8687_v30 = vsel %vm781_vm10, %v7943_v36, 0.0  ;;  %v8689_v28 = vsel %vm779_vm6, %v7953_v15, 0.0  ;;  %v8973_v22 = vcombine.low %v8685_v47, %v8686_v29  ;;  %v7782_v23 = vld [vmem:[#allocation4 + $0x28] sm:$0xff]  ;;  %v7687_v29 = vld [vmem:[#allocation4 + $0x90] sm:$0xff] }
 0x4c3   :  { %7750 = vst.msk [vmem:[#allocation4 + $0x48] sm:$0xff] %vm396_vm5, %v7714_v20  ;;  %v7962_v58 = vcombine.high %v7960_v21, %v7960_v21  ;;  %v8688_v4 = vsel %vm782_vm15, %v7945_v25, 0.0  ;;  %v8691_v5 = vsel %vm781_vm10, %v7960_v21, 0.0  ;;  %v7987_v8 = vrot.slane %v7860_v13, %v21225_v35 }
 0x4c4   :  { %v8690_v7 = vsel %vm780_vm9, %v7961_v56, 0.0  ;;  %v8974_v3 = vcombine.low %v8687_v30, %v8688_v4  ;;  %v8981_v59 = vrot.slane %v8973_v22, %v21225_v35  ;;  %v7994_v48 = vrot.slane %v7980_v18, %v21225_v35 }
 0x4c5   :  { %v15765_v24 = vpop.f32.mrb[120].mxu1  ;;  %v8692_v60 = vsel %vm782_vm15, %v7962_v58, 0.0  ;;  %v8990_v0 = vcombine.low %v8689_v28, %v8690_v7  ;;  %v7995_v45 = vcombine.high %v7987_v8, %v7987_v8  ;;  %v8693_v17 = vsel %vm17640_vm0, %v18992_v11, 0.0 }
 0x4c6   :  { %v7719_v40 = vadd.f32 %v15765_v24, %v7683_v57  ;;  %v7574_v6 = vpop.f32.mrb[121].mxu1  ;;  %v8988_v52 = vrot.slane %v8974_v3, %v21225_v35  ;;  %v8991_v61 = vcombine.low %v8691_v5, %v8692_v60  ;;  %v7996_v26 = vcombine.high %v7994_v48, %v7994_v48  ;;  %v7685_v5 = vld [vmem:[#allocation4 + $0x80] sm:$0xff]  ;;  %v7688_v24 = vld [vmem:[#allocation4 + $0x98] sm:$0xff] }
 0x4c7   :  { %v7717_v54 = vadd.f32 %v7681_v53, %v7574_v6  ;;  %v15766_v34 = vpop.f32.mrb[122].mxu1  ;;  %v8998_v13 = vrot.slane %v8990_v0, %v21225_v35  ;;  %v8694_v32 = vsel %vm779_vm6, %v7978_v55, 0.0  ;;  %v8695_v31 = vsel %vm780_vm9, %v7977_v33, 0.0  ;;  %v7686_v6 = vld [vmem:[#allocation4 + $0x88] sm:$0xff] }
 0x4c8   :  { %7755 = vst.msk [vmem:[#allocation4 + $0x70] sm:$0xff] %vm396_vm5, %v7719_v40  ;;  %v7720_v11 = vadd.f32 %v15766_v34, %v7684_v46  ;;  %v7577_v12 = vpop.f32.mrb[123].mxu1  ;;  %v8989_v2 = vcombine.low %v8981_v59, %v8988_v52  ;;  %v9005_v63 = vrot.slane %v8991_v61, %v21225_v35  ;;  %v8696_v50 = vsel %vm781_vm10, %v7979_v19, 0.0 }
 0x4c9   :  { %7753 = vst.msk [vmem:[#allocation4 + $0x60] sm:$0xff] %vm396_vm5, %v7717_v54  ;;  %v7718_v18 = vadd.f32 %v7682_v49, %v7577_v12  ;;  %v8697_v55 = vsel %vm782_vm15, %v7987_v8, 0.0  ;;  %v8698_v33 = vsel %vm779_vm6, %v7995_v45, 0.0  ;;  %v8699_v9 = vsel %vm780_vm9, %v7994_v48, 0.0  ;;  %v16569_v45 = vld [vmem:[%s21081_s1 + $0x340] sm:$0xff]  }
 0x4ca   :  { %7756 = vst.msk [vmem:[#allocation4 + $0x78] sm:$0xff] %vm396_vm5, %v7720_v11  ;;  %v9006_v41 = vcombine.low %v8998_v13, %v9005_v63  ;;  %v8700_v36 = vsel %vm781_vm10, %v7996_v26, 0.0  ;;  %v9007_v43 = vcombine.low %v8693_v17, %v8694_v32  ;;  %v9008_v16 = vcombine.low %v8695_v31, %v8696_v50  ;;  %15787 = vmatprep.subr.bf16.mxu0 %v16569_v45 }
 0x4cb   :  { %7754 = vst.msk [vmem:[#allocation4 + $0x68] sm:$0xff] %vm396_vm5, %v7718_v18  ;;  %v9024_v62 = vcombine.low %v8697_v55, %v8698_v33  ;;  %v9025_v37 = vcombine.low %v8699_v9, %v8700_v36  ;;  %v7825_v51 = vadd.f32 %v18981_v42, %v7781_v39  ;;  %v7826_v15 = vadd.f32 %v18981_v42, %v7782_v23  ;;  %v7691_v33 = vld [vmem:[#allocation4 + $0xb0] sm:$0xff] }
 0x4cc   :  { %v9621_v47 = vpack.c.bf16 %v9006_v41, %v8989_v2  ;;  %v9015_v19 = vrot.slane %v9007_v43, %v21225_v35  ;;  %v9022_v20 = vrot.slane %v9008_v16, %v21225_v35  ;;  %v19053_v25 = vadd.f32 %v18981_v42, %v7783_v27  ;;  %15788 = vmatpush3.bf16.msra.mxu0 %v16569_v45  ;;  %v7689_v16 = vld [vmem:[#allocation4 + $0xa0] sm:$0xff] }
 0x4cd   :  { %v15769_v21 = vpop.f32.mrb[124].mxu1  ;;  %v9032_v56 = vrot.slane %v9024_v62, %v21225_v35  ;;  %v9039_v30 = vrot.slane %v9025_v37, %v21225_v35  ;;  %v7861_v28 = vmax.f32 %v7825_v51, 0.0  ;;  %v7862_v22 = vmax.f32 %v7826_v15, 0.0  ;;  %v7692_v62 = vld [vmem:[#allocation4 + $0xb8] sm:$0xff] }
 0x4ce   :  { %v7723_v58 = vadd.f32 %v15769_v21, %v7687_v29  ;;  %v7590_v4 = vpop.f32.mrb[125].mxu1  ;;  %v9658_v8 = vshll.u32 %v9621_v47, 16  ;;  %v9661_v7 = vshrl.u32 %v9621_v47, 16  ;;  %9639 = vst.msk [vmem:[#allocation2 + $0x10] sm:$0xff] %vm396_vm5, %v9621_v47  ;;  %v9023_v3 = vcombine.low %v9015_v19, %v9022_v20  ;;  %v7784_v47 = vld [vmem:[#allocation4 + $0x38] sm:$0xff] }
 0x4cf   :  { %v7721_v59 = vadd.f32 %v7685_v5, %v7590_v4  ;;  %v15770_v48 = vpop.f32.mrb[126].mxu1  ;;  %v9040_v57 = vcombine.low %v9032_v56, %v9039_v30  ;;  %v7997_v60 = vcombine.high %v7861_v28, %v7861_v28  ;;  %v8004_v0 = vrot.slane %v7861_v28, %v21225_v35  ;;  %v7785_v30 = vld [vmem:[#allocation4 + $0x40] sm:$0xff]  ;;  %v7786_v28 = vld [vmem:[#allocation4 + $0x48] sm:$0xff] }
 0x4d0   :  { %7759 = vst.msk [vmem:[#allocation4 + $0x90] sm:$0xff] %vm396_vm5, %v7723_v58  ;;  %v7724_v17 = vadd.f32 %v15770_v48, %v7688_v24  ;;  %v7593_v40 = vpop.f32.mrb[127].mxu1  ;;  %v9660_v53 = vrot.slane %v9658_v8, 1  ;;  %v8014_v52 = vcombine.high %v7862_v22, %v7862_v22  ;;  %v8021_v61 = vrot.slane %v7862_v22, %v21225_v35  ;;  %v7787_v22 = vld [vmem:[#allocation4 + $0x50] sm:$0xff]  ;;  %v7690_v5 = vld [vmem:[#allocation4 + $0xa8] sm:$0xff] }
 0x4d1   :  { %7757 = vst.msk [vmem:[#allocation4 + $0x80] sm:$0xff] %vm396_vm5, %v7721_v59  ;;  %v7722_v26 = vadd.f32 %v7686_v6, %v7593_v40  ;;  %v19065_v54 = vpack.c.bf16 %v9040_v57, %v9023_v3  ;;  %v8011_v34 = vrot.slane %v7997_v60, %v21225_v35  ;;  %v8012_v46 = vcombine.high %v8004_v0, %v8004_v0  ;;  %v7788_v60 = vld [vmem:[#allocation4 + $0x58] sm:$0xff] }
 0x4d2   :  { %7760 = vst.msk [vmem:[#allocation4 + $0x98] sm:$0xff] %vm396_vm5, %v7724_v17  ;;  %9800 = vrot.lane.b32.xlu1 %v9660_v53, %s16631_s23  ;;  %v9663_v13 = vor.u32 %v9661_v7, %v9660_v53  ;;  %v8028_v32 = vrot.slane %v8014_v52, %v21225_v35  ;;  %v8029_v31 = vcombine.high %v8021_v61, %v8021_v61  ;;  %v8701_v49 = vsel %vm782_vm15, %v8004_v0, 0.0 }
 0x4d3   :  { %7758 = vst.msk [vmem:[#allocation4 + $0x88] sm:$0xff] %vm396_vm5, %v7722_v26  ;;  %v9665_v11 = vshll.u32 %v19065_v54, 16  ;;  %9640 = vst.msk [vmem:[#allocation2 + $0x18] sm:$0xff] %vm396_vm5, %v19065_v54  ;;  %v8013_v12 = vcombine.high %v8011_v34, %v8011_v34  ;;  %v8702_v2 = vsel %vm17640_vm0, %v8012_v46, 0.0  ;;  %v8703_v50 = vsel %vm779_vm6, %v8011_v34, 0.0 }
 0x4d4   :  { %v8030_v63 = vcombine.high %v8028_v32, %v8028_v32  ;;  %v8705_v39 = vsel %vm781_vm10, %v8021_v61, 0.0  ;;  %v8706_v23 = vsel %vm782_vm15, %v8029_v31, 0.0  ;;  %v9041_v27 = vcombine.low %v8701_v49, %v8702_v2 }
 0x4d5   :  { %v9667_v18 = vrot.slane %v9665_v11, 1  ;;  %v15773_v55 = vpop.f32.mrb[128].mxu1  ;;  %v8704_v9 = vsel %vm780_vm9, %v8013_v12, 0.0  ;;  %v9058_v41 = vcombine.low %v8705_v39, %v8706_v23  ;;  %v8707_v37 = vsel %vm779_vm6, %v8028_v32, 0.0  ;;  %v7695_v12 = vld [vmem:[#allocation4 + $0xd0] sm:$0xff] }
 0x4d6   :  { %v7727_v36 = vadd.f32 %v15773_v55, %v7691_v33  ;;  %v7606_v43 = vpop.f32.mrb[129].mxu1  ;;  %v8708_v51 = vsel %vm780_vm9, %v8030_v63, 0.0  ;;  %v9042_v15 = vcombine.low %v8703_v50, %v8704_v9  ;;  %v9669_v56 = vshrl.u32 %v19065_v54, 16 }
 0x4d7   :  { %v9668_v19 = vsel %vm2722_vm4, %v9663_v13, %v9667_v18  ;;  %v7725_v20 = vadd.f32 %v7689_v16, %v7606_v43  ;;  %v15774_v21 = vpop.f32.mrb[130].mxu1  ;;  %v9059_v29 = vcombine.low %v8707_v37, %v8708_v51  ;;  %v9049_v8 = vrot.slane %v9041_v27, %v21225_v35 }
 0x4d8   :  { %9802 = vrot.lane.b32.xlu0 %v9668_v19, %s16631_s23  ;;  %7763 = vst.msk [vmem:[#allocation4 + $0xb0] sm:$0xff] %vm396_vm5, %v7727_v36  ;;  %v7728_v58 = vadd.f32 %v15774_v21, %v7692_v62  ;;  %v7609_v4 = vpop.f32.mrb[131].mxu1  ;;  %v9056_v7 = vrot.slane %v9042_v15, %v21225_v35  ;;  %v9066_v3 = vrot.slane %v9058_v41, %v21225_v35  ;;  %v7863_v57 = vmax.f32 %v19053_v25, 0.0 }
 0x4d9   :  { %7761 = vst.msk [vmem:[#allocation4 + $0xa0] sm:$0xff] %vm396_vm5, %v7725_v20  ;;  %v7726_v59 = vadd.f32 %v7690_v5, %v7609_v4  ;;  %v9073_v48 = vrot.slane %v9059_v29, %v21225_v35  ;;  %v7828_v24 = vadd.f32 %v18981_v42, %v7784_v47  ;;  %v7829_v45 = vadd.f32 %v18981_v42, %v7785_v30  ;;  %v7693_v29 = vld [vmem:[#allocation4 + $0xc0] sm:$0xff]  ;;  %v16570_v4 = vld [vmem:[%s21081_s1 + $0x348] sm:$0xff]  }
 0x4da   :  { %7764 = vst.msk [vmem:[#allocation4 + $0xb8] sm:$0xff] %vm396_vm5, %v7728_v58  ;;  %v9057_v0 = vcombine.low %v9049_v8, %v9056_v7  ;;  %v7830_v17 = vadd.f32 %v18981_v42, %v7786_v28  ;;  %v7831_v40 = vadd.f32 %v18981_v42, %v7787_v22  ;;  %v8031_v52 = vcombine.high %v7863_v57, %v7863_v57  ;;  %v7696_v58 = vld [vmem:[#allocation4 + $0xd8] sm:$0xff] }
 0x4db   :  { %7762 = vst.msk [vmem:[#allocation4 + $0xa8] sm:$0xff] %vm396_vm5, %v7726_v59  ;;  %v9074_v6 = vcombine.low %v9066_v3, %v9073_v48  ;;  %v7864_v53 = vmax.f32 %v7828_v24, 0.0  ;;  %v8038_v61 = vrot.slane %v7863_v57, %v21225_v35  ;;  %v9671_v26 = vor.u32 %v9669_v56, %v9667_v18  ;;  %v7694_v59 = vld [vmem:[#allocation4 + $0xc8] sm:$0xff]  ;;  %15789 = vmatprep.subr.bf16.mxu0 %v16570_v4 }
 0x4dc   :  { %v7865_v54 = vmax.f32 %v7829_v45, 0.0  ;;  %v19108_v25 = vmax.f32 %v7830_v17, 0.0  ;;  %v19111_v34 = vadd.f32 %v18981_v42, %v7788_v60  ;;  %v8045_v13 = vrot.slane %v8031_v52, %v21225_v35  ;;  %15790 = vmatpush3.bf16.msra.mxu0 %v16570_v4 }
 0x4dd   :  { %v9623_v46 = vpack.c.bf16 %v9074_v6, %v9057_v0  ;;  %v8046_v32 = vcombine.high %v8038_v61, %v8038_v61  ;;  %v8048_v31 = vcombine.high %v7864_v53, %v7864_v53  ;;  %v15777_v11 = vpop.f32.mrb[132].mxu1  ;;  %v8055_v49 = vrot.slane %v7864_v53, %v21225_v35 }
 0x4de   :  { %v8709_v2 = vsel %vm781_vm10, %v8038_v61, 0.0  ;;  %v7731_v63 = vadd.f32 %v15777_v11, %v7695_v12  ;;  %v7622_v50 = vpop.f32.mrb[133].mxu1  ;;  %v19117_v39 = vmax.f32 %v7831_v40, 0.0  ;;  %v8047_v18 = vcombine.high %v8045_v13, %v8045_v13 }
 0x4df   :  { %v9673_v23 = vshll.u32 %v9623_v46, 16  ;;  %9641 = vst.msk [vmem:[#allocation2 + $0x20] sm:$0xff] %vm396_vm5, %v9623_v46  ;;  %v8062_v55 = vrot.slane %v8048_v31, %v21225_v35  ;;  %v8710_v33 = vsel %vm782_vm15, %v8046_v32, 0.0  ;;  %v15778_v9 = vpop.f32.mrb[134].mxu1  ;;  %v8063_v27 = vcombine.high %v8055_v49, %v8055_v49 }
 0x4e0   :  { %v8711_v41 = vsel %vm17640_vm0, %v8045_v13, 0.0  ;;  %v9075_v36 = vcombine.low %v8709_v2, %v8710_v33  ;;  %7767 = vst.msk [vmem:[#allocation4 + $0xd0] sm:$0xff] %vm396_vm5, %v7731_v63  ;;  %v7625_v43 = vpop.f32.mrb[135].mxu1  ;;  %v8065_v16 = vcombine.high %v7865_v54, %v7865_v54  ;;  %v8712_v51 = vsel %vm779_vm6, %v8047_v18, 0.0 }
 0x4e1   :  { %v9675_v62 = vrot.slane %v9673_v23, 1  ;;  %v8064_v37 = vcombine.high %v8062_v55, %v8062_v55  ;;  %v8713_v15 = vsel %vm780_vm9, %v8055_v49, 0.0  ;;  %v8714_v47 = vsel %vm781_vm10, %v8063_v27, 0.0 }
 0x4e2   :  { %v8715_v19 = vsel %vm782_vm15, %v8062_v55, 0.0  ;;  %v9076_v20 = vcombine.low %v8711_v41, %v8712_v51  ;;  %v9677_v21 = vshrl.u32 %v9623_v46, 16  ;;  %v9092_v28 = vcombine.low %v8713_v15, %v8714_v47 }
 0x4e3   :  { %v9676_v56 = vsel %vm2722_vm4, %v9671_v26, %v9675_v62  ;;  %v8716_v30 = vsel %vm779_vm6, %v8064_v37, 0.0  ;;  %v7729_v22 = vadd.f32 %v7693_v29, %v7622_v50  ;;  %v9083_v5 = vrot.slane %v9075_v36, %v21225_v35 }
 0x4e4   :  { %9804 = vrot.lane.b32.xlu1 %v9676_v56, %s16631_s23  ;;  %v9090_v8 = vrot.slane %v9076_v20, %v21225_v35  ;;  %v9093_v7 = vcombine.low %v8715_v19, %v8716_v30  ;;  %v7732_v3 = vadd.f32 %v15778_v9, %v7696_v58  ;;  %v9679_v48 = vor.u32 %v9677_v21, %v9675_v62 }
 0x4e5   :  { %7765 = vst.msk [vmem:[#allocation4 + $0xc0] sm:$0xff] %vm396_vm5, %v7729_v22  ;;  %v7730_v24 = vadd.f32 %v7694_v59, %v7625_v43  ;;  %v8072_v57 = vrot.slane %v7865_v54, %v21225_v35  ;;  %v8079_v60 = vrot.slane %v8065_v16, %v21225_v35  ;;  %v19146_v0 = vpop.f32.mrb[136].mxu1  ;;  %v9100_v45 = vrot.slane %v9092_v28, %v21225_v35 }
 0x4e6   :  { %v9107_v17 = vrot.slane %v9093_v7, %v21225_v35  ;;  %7768 = vst.msk [vmem:[#allocation4 + $0xd8] sm:$0xff] %vm396_vm5, %v7732_v3  ;;  %v8082_v40 = vcombine.high %v19108_v25, %v19108_v25  ;;  %v8089_v6 = vrot.slane %v19108_v25, %v21225_v35  ;;  %v19155_v53 = vpop.f32.mrb[137].mxu1  ;;  %v9091_v52 = vcombine.low %v9083_v5, %v9090_v8 }
 0x4e7   :  { %7766 = vst.msk [vmem:[#allocation4 + $0xc8] sm:$0xff] %vm396_vm5, %v7730_v24  ;;  %v8080_v61 = vcombine.high %v8072_v57, %v8072_v57  ;;  %v8081_v26 = vcombine.high %v8079_v60, %v8079_v60  ;;  %v8717_v54 = vsel %vm780_vm9, %v8072_v57, 0.0  ;;  %v19160_v46 = vpop.f32.mrb[138].mxu1  ;;  %v8719_v25 = vsel %vm782_vm15, %v8079_v60, 0.0 }
 0x4e8   :  { %v9108_v13 = vcombine.low %v9100_v45, %v9107_v17  ;;  %v8096_v32 = vrot.slane %v8082_v40, %v21225_v35  ;;  %v8097_v31 = vcombine.high %v8089_v6, %v8089_v6  ;;  %v19165_v11 = vpop.f32.mrb[139].mxu1  ;;  %v8721_v2 = vsel %vm779_vm6, %v8089_v6, 0.0  ;;  %v7699_v6 = vld [vmem:[#allocation4 + $0xf0] sm:$0xff] }
 0x4e9   :  { %v8718_v12 = vsel %vm781_vm10, %v8080_v61, 0.0  ;;  %v8720_v49 = vsel %vm17640_vm0, %v8081_v26, 0.0  ;;  %v8099_v63 = vcombine.high %v19117_v39, %v19117_v39  ;;  %v7868_v55 = vmax.f32 %v19111_v34, 0.0 }
 0x4ea   :  { %v9624_v50 = vpack.c.bf16 %v9108_v13, %v9091_v52  ;;  %v8098_v23 = vcombine.high %v8096_v32, %v8096_v32  ;;  %v8722_v18 = vsel %vm780_vm9, %v8097_v31, 0.0  ;;  %v9109_v33 = vcombine.low %v8717_v54, %v8718_v12  ;;  %v7697_v13 = vld [vmem:[#allocation4 + $0xe0] sm:$0xff] }
 0x4eb   :  { %v9110_v9 = vcombine.low %v8719_v25, %v8720_v49  ;;  %v9126_v27 = vcombine.low %v8721_v2, %v8722_v18  ;;  %v8106_v41 = vrot.slane %v19117_v39, %v21225_v35  ;;  %v8723_v43 = vsel %vm781_vm10, %v8096_v32, 0.0  ;;  %v7789_v32 = vld [vmem:[#allocation4 + $0x60] sm:$0xff]  ;;  %v7700_v2 = vld [vmem:[#allocation4 + $0xf8] sm:$0xff] }
 0x4ec   :  { %v9681_v36 = vshll.u32 %v9624_v50, 16  ;;  %9642 = vst.msk [vmem:[#allocation2 + $0x28] sm:$0xff] %vm396_vm5, %v9624_v50  ;;  %v8724_v16 = vsel %vm782_vm15, %v8098_v23, 0.0  ;;  %v8113_v62 = vrot.slane %v8099_v63, %v21225_v35  ;;  %v9117_v37 = vrot.slane %v9109_v33, %v21225_v35  ;;  %v7790_v63 = vld [vmem:[#allocation4 + $0x68] sm:$0xff]  ;;  %v7791_v33 = vld [vmem:[#allocation4 + $0x70] sm:$0xff] }
 0x4ed   :  { %v9124_v34 = vrot.slane %v9110_v9, %v21225_v35  ;;  %v9127_v51 = vcombine.low %v8723_v43, %v8724_v16  ;;  %v9685_v15 = vshrl.u32 %v9624_v50, 16  ;;  %v15785_v47 = vpop.f32.mrb[140].mxu1  ;;  %v8114_v39 = vcombine.high %v8106_v41, %v8106_v41  ;;  %v7792_v9 = vld [vmem:[#allocation4 + $0x78] sm:$0xff] }
 0x4ee   :  { %v9683_v19 = vrot.slane %v9681_v36, 1  ;;  %v8115_v20 = vcombine.high %v8113_v62, %v8113_v62  ;;  %v8116_v21 = vcombine.high %v7868_v55, %v7868_v55  ;;  %v19188_v29 = vpop.f32.mrb[141].mxu1  ;;  %v9134_v30 = vrot.slane %v9126_v27, %v21225_v35 }
 0x4ef   :  { %v9125_v56 = vcombine.low %v9117_v37, %v9124_v34  ;;  %v9141_v28 = vrot.slane %v9127_v51, %v21225_v35  ;;  %v8123_v22 = vrot.slane %v7868_v55, %v21225_v35  ;;  %v19193_v58 = vpop.f32.mrb[142].mxu1  ;;  %v8725_v8 = vsel %vm779_vm6, %v8106_v41, 0.0  ;;  %v7698_v55 = vld [vmem:[#allocation4 + $0xe8] sm:$0xff]  ;;  %v7703_v34 = vld [vmem:[#allocation4 + $0x110] sm:$0xff] }
 0x4f0   :  { %v9684_v4 = vsel %vm2722_vm4, %v9679_v48, %v9683_v19  ;;  %v8130_v5 = vrot.slane %v8116_v21, %v21225_v35  ;;  %v8726_v7 = vsel %vm780_vm9, %v8114_v39, 0.0  ;;  %v19201_v3 = vpop.f32.mrb[143].mxu1  ;;  %v9687_v24 = vor.u32 %v9685_v15, %v9683_v19  ;;  %v16571_v19 = vld [vmem:[%s21081_s1 + $0x350] sm:$0xff]   ;;  %v16572_v39 = vld [vmem:[%s21081_s1 + $0x358] sm:$0xff]  }
 0x4f1   :  { %9806 = vrot.lane.b32.xlu0 %v9684_v4, %s16631_s23  ;;  %v9142_v59 = vcombine.low %v9134_v30, %v9141_v28  ;;  %v8131_v57 = vcombine.high %v8123_v22, %v8123_v22  ;;  %v8728_v60 = vsel %vm782_vm15, %v8115_v20, 0.0  ;;  %v8727_v48 = vsel %vm781_vm10, %v8113_v62, 0.0  ;;  %v16574_v28 = vld [vmem:[%s21081_s1 + $0x3c0] sm:$0xff]   ;;  %15791 = vmatprep.subr.bf16.mxu0 %v16571_v19 }
 0x4f2   :  { %v8132_v45 = vcombine.high %v8130_v5, %v8130_v5  ;;  %v8729_v17 = vsel %vm17640_vm0, %v8123_v22, 0.0  ;;  %v9143_v40 = vcombine.low %v8725_v8, %v8726_v7  ;;  %v9144_v26 = vcombine.low %v8727_v48, %v8728_v60  ;;  %v7701_v8 = vld [vmem:[#allocation4 + $0x100] sm:$0xff]  ;;  %v16576_v7 = vld [vmem:[%s21081_s1 + $0x3c8] sm:$0xff]   ;;  %15792 = vmatpush3.bf16.msra.mxu0 %v16571_v19  ;;  %15891 = vmatprep.subr.bf16.mxu1 %v16574_v28 }
 0x4f3   :  { %v9625_v52 = vpack.c.bf16 %v9142_v59, %v9125_v56  ;;  %v8730_v61 = vsel %vm779_vm6, %v8131_v57, 0.0  ;;  %v7735_v54 = vadd.f32 %v19146_v0, %v7699_v6  ;;  %v8731_v31 = vsel %vm780_vm9, %v8130_v5, 0.0  ;;  %15793 = vmatprep.subr.bf16.mxu0 %v16572_v39  ;;  %v16573_v6 = vld [vmem:[%s21081_s1 + $0x360] sm:$0xff]   ;;  %15892 = vmatpush3.bf16.msra.mxu1 %v16574_v28 }
 0x4f4   :  { %v8732_v25 = vsel %vm781_vm10, %v8132_v45, 0.0  ;;  %v9160_v12 = vcombine.low %v8729_v17, %v8730_v61  ;;  %v7733_v49 = vadd.f32 %v7697_v13, %v19155_v53  ;;  %v9151_v23 = vrot.slane %v9143_v40, %v21225_v35  ;;  %15893 = vmatprep.subr.bf16.mxu1 %v16576_v7 }
 0x4f5   :  { %v9689_v50 = vshll.u32 %v9625_v52, 16  ;;  %9643 = vst.msk [vmem:[#allocation2 + $0x30] sm:$0xff] %vm396_vm5, %v9625_v52  ;;  %v9158_v0 = vrot.slane %v9144_v26, %v21225_v35  ;;  %v9161_v18 = vcombine.low %v8731_v31, %v8732_v25  ;;  %7771 = vst.msk [vmem:[#allocation4 + $0xf0] sm:$0xff] %vm396_vm5, %v7735_v54  ;;  %v9693_v27 = vshrl.u32 %v9625_v52, 16 }
 0x4f6   :  { %7769 = vst.msk [vmem:[#allocation4 + $0xe0] sm:$0xff] %vm396_vm5, %v7733_v49  ;;  %v7736_v53 = vadd.f32 %v19160_v46, %v7700_v2  ;;  %v7734_v41 = vadd.f32 %v7698_v55, %v19165_v11  ;;  %v7833_v36 = vadd.f32 %v18981_v42, %v7789_v32  ;;  %v9168_v16 = vrot.slane %v9160_v12, %v21225_v35  ;;  %v16577_v55 = vld [vmem:[%s21081_s1 + $0x3d0] sm:$0xff]  }
 0x4f7   :  { %v9691_v43 = vrot.slane %v9689_v50, 1  ;;  %v9175_v62 = vrot.slane %v9161_v18, %v21225_v35  ;;  %v7834_v37 = vadd.f32 %v18981_v42, %v7790_v63  ;;  %v7835_v15 = vadd.f32 %v18981_v42, %v7791_v33  ;;  %15794 = vmatpush3.bf16.msra.mxu0 %v16572_v39  ;;  %v16575_v18 = vld [vmem:[%s21081_s1 + $0x368] sm:$0xff]   ;;  %15894 = vmatpush3.bf16.msra.mxu1 %v16576_v7  ;;  %v16580_v7 = vld [vmem:[%s21081_s1 + $0x3e0] sm:$0xff]  }
 0x4f8   :  { %7772 = vst.msk [vmem:[#allocation4 + $0xf8] sm:$0xff] %vm396_vm5, %v7736_v53  ;;  %7770 = vst.msk [vmem:[#allocation4 + $0xe8] sm:$0xff] %vm396_vm5, %v7734_v41  ;;  %v7869_v51 = vmax.f32 %v7833_v36, 0.0  ;;  %v7836_v46 = vadd.f32 %v18981_v42, %v7792_v9  ;;  %v7739_v11 = vadd.f32 %v15785_v47, %v7703_v34  ;;  %v9159_v21 = vcombine.low %v9151_v23, %v9158_v0 }
 0x4f9   :  { %v9692_v20 = vsel %vm2722_vm4, %v9687_v24, %v9691_v43  ;;  %v9176_v56 = vcombine.low %v9168_v16, %v9175_v62  ;;  %v7870_v30 = vmax.f32 %v7834_v37, 0.0  ;;  %v9695_v47 = vor.u32 %v9693_v27, %v9691_v43  ;;  %15795 = vmatprep.subr.bf16.mxu0 %v16573_v6  ;;  %v16579_v62 = vld [vmem:[%s21081_s1 + $0x3d8] sm:$0xff]   ;;  %15895 = vmatprep.subr.bf16.mxu1 %v16577_v55 }
 0x4fa   :  { %9808 = vrot.lane.b32.xlu1 %v9692_v20, %s16631_s23  ;;  %v8133_v22 = vcombine.high %v7869_v51, %v7869_v51  ;;  %v8140_v4 = vrot.slane %v7869_v51, %v21225_v35  ;;  %v7871_v5 = vmax.f32 %v7835_v15, 0.0  ;;  %7775 = vst.msk [vmem:[#allocation4 + $0x110] sm:$0xff] %vm396_vm5, %v7739_v11  ;;  %v7737_v60 = vadd.f32 %v7701_v8, %v19188_v29  ;;  %v16578_v20 = vld [vmem:[%s21081_s1 + $0x370] sm:$0xff]   ;;  %v7793_v8 = vld [vmem:[#allocation4 + $0x80] sm:$0xff] }
 0x4fb   :  { %v9626_v59 = vpack.c.bf16 %v9176_v56, %v9159_v21  ;;  %v8150_v24 = vcombine.high %v7870_v30, %v7870_v30  ;;  %v8157_v57 = vrot.slane %v7870_v30, %v21225_v35  ;;  %v7872_v40 = vmax.f32 %v7836_v46, 0.0  ;;  %15796 = vmatpush3.bf16.msra.mxu0 %v16573_v6  ;;  %15896 = vmatpush3.bf16.msra.mxu1 %v16577_v55 }
 0x4fc   :  { %v8147_v45 = vrot.slane %v8133_v22, %v21225_v35  ;;  %v8148_v48 = vcombine.high %v8140_v4, %v8140_v4  ;;  %v8733_v17 = vsel %vm782_vm15, %v8140_v4, 0.0  ;;  %v8167_v26 = vcombine.high %v7871_v5, %v7871_v5  ;;  %7773 = vst.msk [vmem:[#allocation4 + $0x100] sm:$0xff] %vm396_vm5, %v7737_v60  ;;  %15797 = vmatprep.subr.bf16.mxu0 %v16575_v18 }
 0x4fd   :  { %v9697_v52 = vshll.u32 %v9626_v59, 16  ;;  %9644 = vst.msk [vmem:[#allocation2 + $0x38] sm:$0xff] %vm396_vm5, %v9626_v59  ;;  %v8164_v61 = vrot.slane %v8150_v24, %v21225_v35  ;;  %v8165_v29 = vcombine.high %v8157_v57, %v8157_v57  ;;  %v8737_v31 = vsel %vm782_vm15, %v8157_v57, 0.0  ;;  %15897 = vmatprep.subr.bf16.mxu1 %v16579_v62 }
 0x4fe   :  { %v8149_v54 = vcombine.high %v8147_v45, %v8147_v45  ;;  %v8734_v13 = vsel %vm779_vm6, %v8148_v48, 0.0  ;;  %v8735_v32 = vsel %vm780_vm9, %v8147_v45, 0.0  ;;  %v9701_v2 = vshrl.u32 %v9626_v59, 16  ;;  %v7704_v45 = vld [vmem:[#allocation4 + $0x118] sm:$0xff]  ;;  %v7702_v48 = vld [vmem:[#allocation4 + $0x108] sm:$0xff] }
 0x4ff   :  { %v9699_v25 = vrot.slane %v9697_v52, 1  ;;  %v8166_v12 = vcombine.high %v8164_v61, %v8164_v61  ;;  %v8738_v49 = vsel %vm17640_vm0, %v8165_v29, 0.0  ;;  %v9177_v50 = vcombine.low %v8733_v17, %v8734_v13  ;;  %15798 = vmatpush3.bf16.msra.mxu0 %v16575_v18  ;;  %v7795_v29 = vld [vmem:[#allocation4 + $0x90] sm:$0xff]  ;;  %15898 = vmatpush3.bf16.msra.mxu1 %v16579_v62  ;;  %v7797_v18 = vld [vmem:[#allocation4 + $0xa0] sm:$0xff] }
 0x500   :  { %v8736_v63 = vsel %vm781_vm10, %v8149_v54, 0.0  ;;  %v9194_v23 = vcombine.low %v8737_v31, %v8738_v49  ;;  %v8174_v0 = vrot.slane %v7871_v5, %v21225_v35  ;;  %v8739_v9 = vsel %vm779_vm6, %v8164_v61, 0.0  ;;  %v7794_v61 = vld [vmem:[#allocation4 + $0x88] sm:$0xff]  ;;  %15799 = vmatprep.subr.bf16.mxu0 %v16578_v20  ;;  %15899 = vmatprep.subr.bf16.mxu1 %v16580_v7  ;;  %v19340_v62 = vld [vmem:[%s21081_s1 + $0x300] sm:$0xff]  }
 0x501   :  { %v9700_v33 = vsel %vm2722_vm4, %v9695_v47, %v9699_v25  ;;  %v8740_v27 = vsel %vm780_vm9, %v8166_v12, 0.0  ;;  %v9178_v53 = vcombine.low %v8735_v32, %v8736_v63  ;;  %v9185_v41 = vrot.slane %v9177_v50, %v21225_v35  ;;  %v16582_v63 = vld [vmem:[%s21081_s1 + $0x3e8] sm:$0xff]  }
 0x502   :  { %9810 = vrot.lane.b32.xlu0 %v9700_v33, %s16631_s23  ;;  %v9195_v36 = vcombine.low %v8739_v9, %v8740_v27  ;;  %v19284_v43 = vor.u32 %v9701_v2, %v9699_v25  ;;  %v8181_v16 = vrot.slane %v8167_v26, %v21225_v35  ;;  %v8182_v34 = vcombine.high %v8174_v0, %v8174_v0  ;;  %v16581_v26 = vld [vmem:[%s21081_s1 + $0x378] sm:$0xff]  }
 0x503   :  { %v9192_v37 = vrot.slane %v9178_v53, %v21225_v35  ;;  %v8184_v51 = vcombine.high %v7872_v40, %v7872_v40  ;;  %v8191_v15 = vrot.slane %v7872_v40, %v21225_v35  ;;  %v9202_v46 = vrot.slane %v9194_v23, %v21225_v35  ;;  %v7796_v25 = vld [vmem:[#allocation4 + $0x98] sm:$0xff]  ;;  %15800 = vmatpush3.bf16.msra.mxu0 %v16578_v20 }
 0x504   :  { %v9209_v11 = vrot.slane %v9195_v36, %v21225_v35  ;;  %v8183_v19 = vcombine.high %v8181_v16, %v8181_v16  ;;  %v8741_v39 = vsel %vm781_vm10, %v8174_v0, 0.0  ;;  %v8742_v30 = vsel %vm782_vm15, %v8182_v34, 0.0  ;;  %15801 = vmatprep.subr.bf16.mxu0 %v16581_v26  ;;  %15900 = vmatpush3.bf16.msra.mxu1 %v16580_v7 }
 0x505   :  { %v8198_v21 = vrot.slane %v8184_v51, %v21225_v35  ;;  %v8199_v56 = vcombine.high %v8191_v15, %v8191_v15  ;;  %v8743_v28 = vsel %vm779_vm6, %v8181_v16, 0.0  ;;  %v9193_v47 = vcombine.low %v9185_v41, %v9192_v37  ;;  %15901 = vmatprep.subr.bf16.mxu1 %v16582_v63 }
 0x506   :  { %v9210_v22 = vcombine.low %v9202_v46, %v9209_v11  ;;  %v8744_v4 = vsel %vm780_vm9, %v8183_v19, 0.0  ;;  %v9211_v5 = vcombine.low %v8741_v39, %v8742_v30  ;;  %v8745_v24 = vsel %vm781_vm10, %v8191_v15, 0.0  ;;  %v16583_v46 = vld [vmem:[%s21081_s1 + $0x3f0] sm:$0xff]  }
 0x507   :  { %v8200_v59 = vcombine.high %v8198_v21, %v8198_v21  ;;  %v8746_v57 = vsel %vm782_vm15, %v8199_v56, 0.0  ;;  %v9212_v60 = vcombine.low %v8743_v28, %v8744_v4  ;;  %v8747_v40 = vsel %vm17640_vm0, %v8198_v21, 0.0  ;;  %15802 = vmatpush3.bf16.msra.mxu0 %v16581_v26 }
 0x508   :  { %v9627_v17 = vpack.c.bf16 %v9210_v22, %v9193_v47  ;;  %v9228_v6 = vcombine.low %v8745_v24, %v8746_v57  ;;  %v7740_v52 = vadd.f32 %v19193_v58, %v7704_v45  ;;  %v7738_v32 = vadd.f32 %v7702_v48, %v19201_v3  ;;  %15902 = vmatpush3.bf16.msra.mxu1 %v16582_v63 }
 0x509   :  { %v8748_v54 = vsel %vm779_vm6, %v8200_v59, 0.0  ;;  %v9226_v13 = vrot.slane %v9212_v60, %v21225_v35  ;;  %v7837_v31 = vadd.f32 %v18981_v42, %v7793_v8  ;;  %v9219_v58 = vrot.slane %v9211_v5, %v21225_v35  ;;  %15839 = vmatprep.subr.bf16.mxu0 %v19340_v62  ;;  %15903 = vmatprep.subr.bf16.mxu1 %v16583_v46  ;;  %v16585_v59 = vld [vmem:[%s21081_s1 + $0x3f8] sm:$0xff]  }
 0x50a   :  { %v9705_v12 = vshll.u32 %v9627_v17, 16  ;;  %9645 = vst.msk [vmem:[#allocation2 + $0x40] sm:$0xff] %vm396_vm5, %v9627_v17  ;;  %v9229_v49 = vcombine.low %v8747_v40, %v8748_v54  ;;  %v9236_v2 = vrot.slane %v9228_v6, %v21225_v35  ;;  %7776 = vst.msk [vmem:[#allocation4 + $0x118] sm:$0xff] %vm396_vm5, %v7740_v52  ;;  %v9709_v3 = vshrl.u32 %v9627_v17, 16 }
 0x50b   :  { %7774 = vst.msk [vmem:[#allocation4 + $0x108] sm:$0xff] %vm396_vm5, %v7738_v32  ;;  %v7838_v50 = vadd.f32 %v18981_v42, %v7794_v61  ;;  %v7873_v23 = vmax.f32 %v7837_v31, 0.0  ;;  %v7839_v0 = vadd.f32 %v18981_v42, %v7795_v29  ;;  %v9227_v33 = vcombine.low %v9219_v58, %v9226_v13 }
 0x50c   :  { %v9707_v55 = vrot.slane %v9705_v12, 1  ;;  %v9243_v9 = vrot.slane %v9229_v49, %v21225_v35  ;;  %v7840_v27 = vadd.f32 %v18981_v42, %v7796_v25  ;;  %v19345_v15 = vadd.f32 %v18981_v42, %v7797_v18  ;;  %15904 = vmatpush3.bf16.msra.mxu1 %v16583_v46  ;;  %v7799_v46 = vld [vmem:[#allocation4 + $0xb0] sm:$0xff] }
 0x50d   :  { %v7874_v53 = vmax.f32 %v7838_v50, 0.0  ;;  %v8201_v41 = vcombine.high %v7873_v23, %v7873_v23  ;;  %v8208_v36 = vrot.slane %v7873_v23, %v21225_v35  ;;  %v7875_v16 = vmax.f32 %v7839_v0, 0.0  ;;  %15905 = vmatprep.subr.bf16.mxu1 %v16585_v59  ;;  %v7798_v23 = vld [vmem:[#allocation4 + $0xa8] sm:$0xff] }
 0x50e   :  { %v9708_v37 = vsel %vm2722_vm4, %v19284_v43, %v9707_v55  ;;  %v9244_v34 = vcombine.low %v9236_v2, %v9243_v9  ;;  %v9711_v51 = vor.u32 %v9709_v3, %v9707_v55  ;;  %v7876_v7 = vmax.f32 %v7840_v27, 0.0 }
 0x50f   :  { %9812 = vrot.lane.b32.xlu1 %v9708_v37, %s16631_s23  ;;  %v8215_v11 = vrot.slane %v8201_v41, %v21225_v35  ;;  %v8216_v19 = vcombine.high %v8208_v36, %v8208_v36  ;;  %v8218_v39 = vcombine.high %v7874_v53, %v7874_v53  ;;  %v8225_v20 = vrot.slane %v7874_v53, %v21225_v35 }
 0x510   :  { %v9628_v21 = vpack.c.bf16 %v9244_v34, %v9227_v33  ;;  %v8749_v43 = vsel %vm780_vm9, %v8208_v36, 0.0  ;;  %v8235_v56 = vcombine.high %v7875_v16, %v7875_v16  ;;  %v8242_v42 = vrot.slane %v7875_v16, %v21225_v35  ;;  %15906 = vmatpush3.bf16.msra.mxu1 %v16585_v59  ;;  %v19400_v34 = vld [vmem:[%s21082_s2 + $0x1] ss:$0 sm:$0xff] }
 0x511   :  { %v8217_v30 = vcombine.high %v8215_v11, %v8215_v11  ;;  %v8232_v28 = vrot.slane %v8218_v39, %v21225_v35  ;;  %v8233_v47 = vcombine.high %v8225_v20, %v8225_v20  ;;  %v8750_v22 = vsel %vm781_vm10, %v8216_v19, 0.0 }
 0x512   :  { %v9713_v4 = vshll.u32 %v9628_v21, 16  ;;  %9646 = vst.msk [vmem:[#allocation2 + $0x48] sm:$0xff] %vm396_vm5, %v9628_v21  ;;  %v8751_v5 = vsel %vm782_vm15, %v8215_v11, 0.0  ;;  %v9245_v8 = vcombine.low %v8749_v43, %v8750_v22  ;;  %v8753_v60 = vsel %vm780_vm9, %v8225_v20, 0.0  ;;  %v7800_v22 = vld [vmem:[#allocation4 + $0xb8] sm:$0xff] }
 0x513   :  { %v8234_v24 = vcombine.high %v8232_v28, %v8232_v28  ;;  %v8752_v57 = vsel %vm779_vm6, %v8217_v30, 0.0  ;;  %v8754_v45 = vsel %vm781_vm10, %v8233_v47, 0.0  ;;  %v8755_v17 = vsel %vm782_vm15, %v8232_v28, 0.0 }
 0x514   :  { %v9715_v48 = vrot.slane %v9713_v4, 1  ;;  %v9246_v40 = vcombine.low %v8751_v5, %v8752_v57  ;;  %v9262_v6 = vcombine.low %v8753_v60, %v8754_v45  ;;  %v9253_v61 = vrot.slane %v9245_v8, %v21225_v35 }
 0x515   :  { %v8756_v52 = vsel %vm17640_vm0, %v8234_v24, 0.0  ;;  %v8249_v29 = vrot.slane %v8235_v56, %v21225_v35  ;;  %v8250_v26 = vcombine.high %v8242_v42, %v8242_v42  ;;  %v9717_v31 = vshrl.u32 %v9628_v21, 16 }
 0x516   :  { %v9716_v54 = vsel %vm2722_vm4, %v9711_v51, %v9715_v48  ;;  %v9260_v13 = vrot.slane %v9246_v40, %v21225_v35  ;;  %v9263_v32 = vcombine.low %v8755_v17, %v8756_v52  ;;  %v9270_v25 = vrot.slane %v9262_v6, %v21225_v35 }
 0x517   :  { %9814 = vrot.lane.b32.xlu0 %v9716_v54, %s16631_s23  ;;  %v8251_v12 = vcombine.high %v8249_v29, %v8249_v29  ;;  %v8252_v58 = vcombine.high %v7876_v7, %v7876_v7  ;;  %v8259_v49 = vrot.slane %v7876_v7, %v21225_v35  ;;  %v9719_v63 = vor.u32 %v9717_v31, %v9715_v48 }
 0x518   :  { %v9277_v2 = vrot.slane %v9263_v32, %v21225_v35  ;;  %v8757_v3 = vsel %vm779_vm6, %v8242_v42, 0.0  ;;  %v8758_v50 = vsel %vm780_vm9, %v8250_v26, 0.0  ;;  %v8759_v55 = vsel %vm781_vm10, %v8249_v29, 0.0 }
 0x519   :  { %v8266_v0 = vrot.slane %v8252_v58, %v21225_v35  ;;  %v8267_v18 = vcombine.high %v8259_v49, %v8259_v49  ;;  %v8760_v33 = vsel %vm782_vm15, %v8251_v12, 0.0  ;;  %v9261_v9 = vcombine.low %v9253_v61, %v9260_v13 }
 0x51a   :  { %v9278_v27 = vcombine.low %v9270_v25, %v9277_v2  ;;  %v9279_v53 = vcombine.low %v8757_v3, %v8758_v50  ;;  %v9280_v41 = vcombine.low %v8759_v55, %v8760_v33  ;;  %v8761_v16 = vsel %vm779_vm6, %v8259_v49, 0.0 }
 0x51b   :  { %v8268_v36 = vcombine.high %v8266_v0, %v8266_v0  ;;  %v8762_v37 = vsel %vm780_vm9, %v8267_v18, 0.0  ;;  %v7842_v51 = vadd.f32 %v19400_v34, %v7798_v23  ;;  %v8763_v21 = vsel %vm781_vm10, %v8266_v0, 0.0 }
 0x51c   :  { %v9629_v11 = vpack.c.bf16 %v9278_v27, %v9261_v9  ;;  %v9287_v19 = vrot.slane %v9279_v53, %v21225_v35  ;;  %v9294_v39 = vrot.slane %v9280_v41, %v21225_v35  ;;  %v9296_v20 = vcombine.low %v8761_v16, %v8762_v37  ;;  %v7801_v53 = vld [vmem:[#allocation4 + $0xc0] sm:$0xff] }
 0x51d   :  { %v8764_v43 = vsel %vm782_vm15, %v8268_v36, 0.0  ;;  %v7877_v56 = vmax.f32 %v19345_v15, 0.0  ;;  %v7878_v42 = vmax.f32 %v7842_v51, 0.0  ;;  %v7843_v4 = vadd.f32 %v19400_v34, %v7799_v46 }
 0x51e   :  { %v9721_v30 = vshll.u32 %v9629_v11, 16  ;;  %9647 = vst.msk [vmem:[#allocation2 + $0x50] sm:$0xff] %vm396_vm5, %v9629_v11  ;;  %v9295_v28 = vcombine.low %v9287_v19, %v9294_v39  ;;  %v9297_v47 = vcombine.low %v8763_v21, %v8764_v43  ;;  %v9304_v5 = vrot.slane %v9296_v20, %v21225_v35  ;;  %v7802_v43 = vld [vmem:[#allocation4 + $0xc8] sm:$0xff] }
 0x51f   :  { %v8269_v8 = vcombine.high %v7877_v56, %v7877_v56  ;;  %v8276_v7 = vrot.slane %v7877_v56, %v21225_v35  ;;  %v8286_v59 = vcombine.high %v7878_v42, %v7878_v42  ;;  %v9725_v60 = vshrl.u32 %v9629_v11, 16 }
 0x520   :  { %v9723_v24 = vrot.slane %v9721_v30, 1  ;;  %v9311_v57 = vrot.slane %v9297_v47, %v21225_v35  ;;  %v8293_v15 = vrot.slane %v7878_v42, %v21225_v35  ;;  %v7844_v40 = vadd.f32 %v19400_v34, %v7800_v22 }
 0x521   :  { %v8283_v45 = vrot.slane %v8269_v8, %v21225_v35  ;;  %v8284_v48 = vcombine.high %v8276_v7, %v8276_v7  ;;  %v8300_v17 = vrot.slane %v8286_v59, %v21225_v35  ;;  %v8765_v29 = vsel %vm17640_vm0, %v8276_v7, 0.0 }
 0x522   :  { %v9724_v6 = vsel %vm2722_vm4, %v9719_v63, %v9723_v24  ;;  %v9312_v52 = vcombine.low %v9304_v5, %v9311_v57  ;;  %v8301_v61 = vcombine.high %v8293_v15, %v8293_v15  ;;  %v8769_v25 = vsel %vm782_vm15, %v8293_v15, 0.0 }
 0x523   :  { %9816 = vrot.lane.b32.xlu1 %v9724_v6, %s16631_s23  ;;  %v8285_v26 = vcombine.high %v8283_v45, %v8283_v45  ;;  %v8302_v54 = vcombine.high %v8300_v17, %v8300_v17  ;;  %v8766_v13 = vsel %vm779_vm6, %v8284_v48, 0.0  ;;  %v8767_v32 = vsel %vm780_vm9, %v8283_v45, 0.0 }
 0x524   :  { %v9630_v31 = vpack.c.bf16 %v9312_v52, %v9295_v28  ;;  %v8770_v12 = vsel %vm779_vm6, %v8301_v61, 0.0  ;;  %v8771_v58 = vsel %vm780_vm9, %v8300_v17, 0.0  ;;  %v9313_v63 = vcombine.low %v8765_v29, %v8766_v13  ;;  %v7803_v61 = vld [vmem:[#allocation4 + $0xd0] sm:$0xff] }
 0x525   :  { %v8768_v49 = vsel %vm781_vm10, %v8285_v26, 0.0  ;;  %v8772_v2 = vsel %vm781_vm10, %v8302_v54, 0.0  ;;  %v9330_v3 = vcombine.low %v8769_v25, %v8770_v12  ;;  %v9727_v50 = vor.u32 %v9725_v60, %v9723_v24 }
 0x526   :  { %v9729_v23 = vshll.u32 %v9630_v31, 16  ;;  %9648 = vst.msk [vmem:[#allocation2 + $0x58] sm:$0xff] %vm396_vm5, %v9630_v31  ;;  %v9314_v0 = vcombine.low %v8767_v32, %v8768_v49  ;;  %v9331_v18 = vcombine.low %v8771_v58, %v8772_v2  ;;  %v9321_v55 = vrot.slane %v9313_v63, %v21225_v35  ;;  %v7804_v58 = vld [vmem:[#allocation4 + $0xd8] sm:$0xff] }
 0x527   :  { %v9733_v33 = vshrl.u32 %v9630_v31, 16  ;;  %v7879_v9 = vmax.f32 %v7843_v4, 0.0  ;;  %v7880_v27 = vmax.f32 %v7844_v40, 0.0  ;;  %v9338_v16 = vrot.slane %v9330_v3, %v21225_v35 }
 0x528   :  { %v9731_v41 = vrot.slane %v9729_v23, 1  ;;  %v9328_v36 = vrot.slane %v9314_v0, %v21225_v35  ;;  %v9345_v37 = vrot.slane %v9331_v18, %v21225_v35  ;;  %v7845_v56 = vadd.f32 %v19400_v34, %v7801_v53 }
 0x529   :  { %v8303_v51 = vcombine.high %v7879_v9, %v7879_v9  ;;  %v8310_v46 = vrot.slane %v7879_v9, %v21225_v35  ;;  %v8320_v11 = vcombine.high %v7880_v27, %v7880_v27  ;;  %v8327_v19 = vrot.slane %v7880_v27, %v21225_v35 }
 0x52a   :  { %v9732_v39 = vsel %vm2722_vm4, %v9727_v50, %v9731_v41  ;;  %v9329_v20 = vcombine.low %v9321_v55, %v9328_v36  ;;  %v9346_v21 = vcombine.low %v9338_v16, %v9345_v37  ;;  %v9735_v4 = vor.u32 %v9733_v33, %v9731_v41 }
 0x52b   :  { %9818 = vrot.lane.b32.xlu0 %v9732_v39, %s16631_s23  ;;  %v8317_v42 = vrot.slane %v8303_v51, %v21225_v35  ;;  %v8318_v30 = vcombine.high %v8310_v46, %v8310_v46  ;;  %v8334_v28 = vrot.slane %v8320_v11, %v21225_v35  ;;  %v8335_v47 = vcombine.high %v8327_v19, %v8327_v19 }
 0x52c   :  { %v9631_v22 = vpack.c.bf16 %v9346_v21, %v9329_v20  ;;  %v8773_v5 = vsel %vm782_vm15, %v8310_v46, 0.0  ;;  %v8777_v8 = vsel %vm781_vm10, %v8327_v19, 0.0  ;;  %v7846_v57 = vadd.f32 %v19400_v34, %v7802_v43 }
 0x52d   :  { %v8319_v7 = vcombine.high %v8317_v42, %v8317_v42  ;;  %v8336_v59 = vcombine.high %v8334_v28, %v8334_v28  ;;  %v8774_v24 = vsel %vm17640_vm0, %v8318_v30, 0.0  ;;  %v8775_v15 = vsel %vm779_vm6, %v8317_v42, 0.0 }
 0x52e   :  { %v9737_v60 = vshll.u32 %v9631_v22, 16  ;;  %9649 = vst.msk [vmem:[#allocation2 + $0x60] sm:$0xff] %vm396_vm5, %v9631_v22  ;;  %v8778_v45 = vsel %vm782_vm15, %v8335_v47, 0.0  ;;  %v9347_v48 = vcombine.low %v8773_v5, %v8774_v24  ;;  %v8779_v40 = vsel %vm779_vm6, %v8334_v28, 0.0 }
 0x52f   :  { %v8776_v17 = vsel %vm780_vm9, %v8319_v7, 0.0  ;;  %v8780_v6 = vsel %vm780_vm9, %v8336_v59, 0.0  ;;  %v9364_v52 = vcombine.low %v8777_v8, %v8778_v45  ;;  %v9741_v13 = vshrl.u32 %v9631_v22, 16  ;;  %v7805_v45 = vld [vmem:[#allocation4 + $0xe0] sm:$0xff] }
 0x530   :  { %v9739_v29 = vrot.slane %v9737_v60, 1  ;;  %v9348_v26 = vcombine.low %v8775_v15, %v8776_v17  ;;  %v9365_v54 = vcombine.low %v8779_v40, %v8780_v6  ;;  %v9355_v32 = vrot.slane %v9347_v48, %v21225_v35 }
 0x531   :  { %v9372_v31 = vrot.slane %v9364_v52, %v21225_v35  ;;  %v7881_v25 = vmax.f32 %v7845_v56, 0.0  ;;  %v7882_v12 = vmax.f32 %v7846_v57, 0.0  ;;  %v7847_v3 = vadd.f32 %v19400_v34, %v7803_v61 }
 0x532   :  { %v9740_v49 = vsel %vm2722_vm4, %v9735_v4, %v9739_v29  ;;  %v9362_v2 = vrot.slane %v9348_v26, %v21225_v35  ;;  %v9379_v63 = vrot.slane %v9365_v54, %v21225_v35  ;;  %v9743_v9 = vor.u32 %v9741_v13, %v9739_v29 }
 0x533   :  { %9820 = vrot.lane.b32.xlu1 %v9740_v49, %s16631_s23  ;;  %v8337_v50 = vcombine.high %v7881_v25, %v7881_v25  ;;  %v8344_v23 = vrot.slane %v7881_v25, %v21225_v35  ;;  %v8354_v0 = vcombine.high %v7882_v12, %v7882_v12  ;;  %v8361_v18 = vrot.slane %v7882_v12, %v21225_v35 }
 0x534   :  { %v9363_v55 = vcombine.low %v9355_v32, %v9362_v2  ;;  %v9380_v33 = vcombine.low %v9372_v31, %v9379_v63  ;;  %v7848_v27 = vadd.f32 %v19400_v34, %v7804_v58  ;;  %v7883_v11 = vmax.f32 %v7847_v3, 0.0 }
 0x535   :  { %v8351_v53 = vrot.slane %v8337_v50, %v21225_v35  ;;  %v8352_v41 = vcombine.high %v8344_v23, %v8344_v23  ;;  %v8368_v36 = vrot.slane %v8354_v0, %v21225_v35  ;;  %v8369_v16 = vcombine.high %v8361_v18, %v8361_v18 }
 0x536   :  { %v9632_v37 = vpack.c.bf16 %v9380_v33, %v9363_v55  ;;  %v8781_v51 = vsel %vm781_vm10, %v8344_v23, 0.0  ;;  %v8785_v46 = vsel %vm780_vm9, %v8361_v18, 0.0  ;;  %v7884_v21 = vmax.f32 %v7848_v27, 0.0  ;;  %v7806_v23 = vld [vmem:[#allocation4 + $0xe8] sm:$0xff] }
 0x537   :  { %v8353_v19 = vcombine.high %v8351_v53, %v8351_v53  ;;  %v8370_v39 = vcombine.high %v8368_v36, %v8368_v36  ;;  %v8782_v20 = vsel %vm782_vm15, %v8352_v41, 0.0  ;;  %v8783_v56 = vsel %vm17640_vm0, %v8351_v53, 0.0 }
 0x538   :  { %v9745_v43 = vshll.u32 %v9632_v37, 16  ;;  %9650 = vst.msk [vmem:[#allocation2 + $0x68] sm:$0xff] %vm396_vm5, %v9632_v37  ;;  %v8786_v42 = vsel %vm781_vm10, %v8369_v16, 0.0  ;;  %v9381_v30 = vcombine.low %v8781_v51, %v8782_v20  ;;  %v8787_v47 = vsel %vm782_vm15, %v8368_v36, 0.0  ;;  %v7807_v36 = vld [vmem:[#allocation4 + $0xf0] sm:$0xff] }
 0x539   :  { %v8784_v28 = vsel %vm779_vm6, %v8353_v19, 0.0  ;;  %v8788_v22 = vsel %vm779_vm6, %v8370_v39, 0.0  ;;  %v9398_v4 = vcombine.low %v8785_v46, %v8786_v42  ;;  %v9749_v59 = vshrl.u32 %v9632_v37, 16  ;;  %v7808_v42 = vld [vmem:[#allocation4 + $0xf8] sm:$0xff] }
 0x53a   :  { %v9747_v5 = vrot.slane %v9745_v43, 1  ;;  %v9382_v8 = vcombine.low %v8783_v56, %v8784_v28  ;;  %v9399_v7 = vcombine.low %v8787_v47, %v8788_v22  ;;  %v9389_v24 = vrot.slane %v9381_v30, %v21225_v35 }
 0x53b   :  { %v8371_v57 = vcombine.high %v7883_v11, %v7883_v11  ;;  %v8378_v60 = vrot.slane %v7883_v11, %v21225_v35  ;;  %v8388_v15 = vcombine.high %v7884_v21, %v7884_v21  ;;  %v9406_v40 = vrot.slane %v9398_v4, %v21225_v35 }
 0x53c   :  { %v9748_v48 = vsel %vm2722_vm4, %v9743_v9, %v9747_v5  ;;  %v9396_v17 = vrot.slane %v9382_v8, %v21225_v35  ;;  %v9413_v6 = vrot.slane %v9399_v7, %v21225_v35  ;;  %v8395_v29 = vrot.slane %v7884_v21, %v21225_v35 }
 0x53d   :  { %9822 = vrot.lane.b32.xlu0 %v9748_v48, %s16631_s23  ;;  %v8385_v52 = vrot.slane %v8371_v57, %v21225_v35  ;;  %v8386_v61 = vcombine.high %v8378_v60, %v8378_v60  ;;  %v8402_v26 = vrot.slane %v8388_v15, %v21225_v35  ;;  %v8789_v32 = vsel %vm780_vm9, %v8378_v60, 0.0 }
 0x53e   :  { %v9397_v54 = vcombine.low %v9389_v24, %v9396_v17  ;;  %v9414_v13 = vcombine.low %v9406_v40, %v9413_v6  ;;  %v7849_v31 = vadd.f32 %v19400_v34, %v7805_v45  ;;  %v8403_v12 = vcombine.high %v8395_v29, %v8395_v29 }
 0x53f   :  { %v8387_v25 = vcombine.high %v8385_v52, %v8385_v52  ;;  %v8404_v58 = vcombine.high %v8402_v26, %v8402_v26  ;;  %v8790_v49 = vsel %vm781_vm10, %v8386_v61, 0.0  ;;  %v8791_v63 = vsel %vm782_vm15, %v8385_v52, 0.0 }
 0x540   :  { %v9633_v2 = vpack.c.bf16 %v9414_v13, %v9397_v54  ;;  %v8793_v3 = vsel %vm779_vm6, %v8395_v29, 0.0  ;;  %v8795_v50 = vsel %vm781_vm10, %v8402_v26, 0.0  ;;  %v8794_v18 = vsel %vm780_vm9, %v8403_v12, 0.0 }
 0x541   :  { %v8792_v0 = vsel %vm17640_vm0, %v8387_v25, 0.0  ;;  %v8796_v55 = vsel %vm782_vm15, %v8404_v58, 0.0  ;;  %v9415_v33 = vcombine.low %v8789_v32, %v8790_v49  ;;  %v9432_v53 = vcombine.low %v8793_v3, %v8794_v18 }
 0x542   :  { %v9753_v9 = vshll.u32 %v9633_v2, 16  ;;  %9651 = vst.msk [vmem:[#allocation2 + $0x70] sm:$0xff] %vm396_vm5, %v9633_v2  ;;  %v9416_v27 = vcombine.low %v8791_v63, %v8792_v0  ;;  %v9433_v41 = vcombine.low %v8795_v50, %v8796_v55  ;;  %v9751_v16 = vor.u32 %v9749_v59, %v9747_v5 }
 0x543   :  { %v9423_v37 = vrot.slane %v9415_v33, %v21225_v35  ;;  %v7850_v51 = vadd.f32 %v19400_v34, %v7806_v23  ;;  %v7885_v46 = vmax.f32 %v7849_v31, 0.0  ;;  %v9440_v39 = vrot.slane %v9432_v53, %v21225_v35  ;;  %v7809_v23 = vld [vmem:[#allocation4 + $0x100] sm:$0xff] }
 0x544   :  { %v9755_v11 = vrot.slane %v9753_v9, 1  ;;  %v9430_v19 = vrot.slane %v9416_v27, %v21225_v35  ;;  %v9447_v20 = vrot.slane %v9433_v41, %v21225_v35  ;;  %v7851_v30 = vadd.f32 %v19400_v34, %v7807_v36  ;;  %v19566_v9 = vld [vmem:[%s21081_s1 + $0x380] sm:$0xff]  }
 0x545   :  { %v7886_v21 = vmax.f32 %v7850_v51, 0.0  ;;  %v8405_v43 = vcombine.high %v7885_v46, %v7885_v46  ;;  %v8412_v56 = vrot.slane %v7885_v46, %v21225_v35  ;;  %v9757_v4 = vshrl.u32 %v9633_v2, 16  ;;  %15943 = vmatprep.subr.bf16.mxu1 %v19566_v9 }
 0x546   :  { %v9756_v28 = vsel %vm2722_vm4, %v9751_v16, %v9755_v11  ;;  %v9431_v47 = vcombine.low %v9423_v37, %v9430_v19  ;;  %v9448_v22 = vcombine.low %v9440_v39, %v9447_v20  ;;  %v7852_v60 = vadd.f32 %v19400_v34, %v7808_v42 }
 0x547   :  { %9824 = vrot.lane.b32.xlu1 %v9756_v28, %s16631_s23  ;;  %v8419_v5 = vrot.slane %v8405_v43, %v21225_v35  ;;  %v8420_v8 = vcombine.high %v8412_v56, %v8412_v56  ;;  %v8422_v7 = vcombine.high %v7886_v21, %v7886_v21  ;;  %v8429_v59 = vrot.slane %v7886_v21, %v21225_v35  ;;  %v19583_v28 = vpop.permute.xlu1 %9800 }
 0x548   :  { %v19535_v24 = vpack.c.bf16 %v9448_v22, %v9431_v47  ;;  %v8797_v57 = vsel %vm779_vm6, %v8412_v56, 0.0  ;;  %v7887_v15 = vmax.f32 %v7851_v30, 0.0  ;;  %v9759_v6 = vor.u32 %v9757_v4, %v9755_v11  ;;  %v7810_v30 = vld [vmem:[#allocation4 + $0x108] sm:$0xff] }
 0x549   :  { %v8421_v45 = vcombine.high %v8419_v5, %v8419_v5  ;;  %v8436_v48 = vrot.slane %v8422_v7, %v21225_v35  ;;  %v8437_v17 = vcombine.high %v8429_v59, %v8429_v59  ;;  %v8798_v40 = vsel %vm780_vm9, %v8420_v8, 0.0 }
 0x54a   :  { %v9761_v52 = vshll.u32 %v19535_v24, 16  ;;  %9652 = vst.msk [vmem:[#allocation2 + $0x78] sm:$0xff] %vm396_vm5, %v19535_v24  ;;  %v8799_v61 = vsel %vm781_vm10, %v8419_v5, 0.0  ;;  %v9449_v29 = vcombine.low %v8797_v57, %v8798_v40  ;;  %v9803_v26 = vpop.permute.xlu0 %9802  ;;  %v8801_v32 = vsel %vm17640_vm0, %v8429_v59, 0.0 }
 0x54b   :  { %v8438_v54 = vcombine.high %v8436_v48, %v8436_v48  ;;  %v8800_v13 = vsel %vm782_vm15, %v8421_v45, 0.0  ;;  %v8802_v31 = vsel %vm779_vm6, %v8437_v17, 0.0  ;;  %9860 = vst.msk [vmem:[#allocation2 + $0x10] sm:$0xff] %vm680_vm11, %v9803_v26  ;;  %v8803_v12 = vsel %vm780_vm9, %v8436_v48, 0.0 }
 0x54c   :  { %v9763_v25 = vrot.slane %v9761_v52, 1  ;;  %v9450_v58 = vcombine.low %v8799_v61, %v8800_v13  ;;  %v9466_v49 = vcombine.low %v8801_v32, %v8802_v31  ;;  %v9457_v63 = vrot.slane %v9449_v29, %v21225_v35  ;;  %v7811_v32 = vld [vmem:[#allocation4 + $0x110] sm:$0xff] }
 0x54d   :  { %v8804_v2 = vsel %vm781_vm10, %v8438_v54, 0.0  ;;  %v7888_v3 = vmax.f32 %v7852_v60, 0.0  ;;  %v8439_v50 = vcombine.high %v7887_v15, %v7887_v15  ;;  %v9765_v33 = vshrl.u32 %v19535_v24, 16 }
 0x54e   :  { %v9764_v0 = vsel %vm2722_vm4, %v9759_v6, %v9763_v25  ;;  %v9464_v18 = vrot.slane %v9450_v58, %v21225_v35  ;;  %v9467_v55 = vcombine.low %v8803_v12, %v8804_v2  ;;  %v9474_v27 = vrot.slane %v9466_v49, %v21225_v35 }
 0x54f   :  { %9826 = vrot.lane.b32.xlu0 %v9764_v0, %s16631_s23  ;;  %v8446_v53 = vrot.slane %v7887_v15, %v21225_v35  ;;  %v8453_v41 = vrot.slane %v8439_v50, %v21225_v35  ;;  %v8456_v36 = vcombine.high %v7888_v3, %v7888_v3  ;;  %v8463_v51 = vrot.slane %v7888_v3, %v21225_v35 }
 0x550   :  { %v9465_v16 = vcombine.low %v9457_v63, %v9464_v18  ;;  %v9481_v37 = vrot.slane %v9467_v55, %v21225_v35  ;;  %v7853_v46 = vadd.f32 %v19400_v34, %v7809_v23  ;;  %v7854_v45 = vadd.f32 %v19400_v34, %v7810_v30 }
 0x551   :  { %v8454_v11 = vcombine.high %v8446_v53, %v8446_v53  ;;  %v8455_v19 = vcombine.high %v8453_v41, %v8453_v41  ;;  %v8470_v39 = vrot.slane %v8456_v36, %v21225_v35  ;;  %v8805_v20 = vsel %vm782_vm15, %v8446_v53, 0.0 }
 0x552   :  { %v9482_v21 = vcombine.low %v9474_v27, %v9481_v37  ;;  %v8471_v43 = vcombine.high %v8463_v51, %v8463_v51  ;;  %v8807_v56 = vsel %vm780_vm9, %v8453_v41, 0.0  ;;  %v8809_v42 = vsel %vm782_vm15, %v8463_v51, 0.0  ;;  %v19585_v47 = vld [vmem:[#allocation2 + $0x10] sm:$0xff]  ;;  %v7812_v51 = vld [vmem:[#allocation4 + $0x118] sm:$0xff] }
 0x553   :  { %v8472_v22 = vcombine.high %v8470_v39, %v8470_v39  ;;  %v8806_v4 = vsel %vm779_vm6, %v8454_v11, 0.0  ;;  %v8808_v5 = vsel %vm781_vm10, %v8455_v19, 0.0  ;;  %v8811_v8 = vsel %vm779_vm6, %v8470_v39, 0.0  ;;  %15907 = vmatprep.mubr.bf16.mxu1 %v19585_v47 }
 0x554   :  { %v9635_v7 = vpack.c.bf16 %v9482_v21, %v9465_v16  ;;  %v8810_v59 = vsel %vm17640_vm0, %v8471_v43, 0.0  ;;  %v9483_v24 = vcombine.low %v8805_v20, %v8806_v4  ;;  %v9484_v57 = vcombine.low %v8807_v56, %v8808_v5  ;;  %v16592_v20 = vld [vmem:[%s21081_s1 + $0x388] sm:$0xff]  }
 0x555   :  { %v8812_v60 = vsel %vm780_vm9, %v8472_v22, 0.0  ;;  %v9500_v15 = vcombine.low %v8809_v42, %v8810_v59  ;;  %v7889_v48 = vmax.f32 %v7853_v46, 0.0  ;;  %v9767_v17 = vor.u32 %v9765_v33, %v9763_v25 }
 0x556   :  { %v9769_v40 = vshll.u32 %v9635_v7, 16  ;;  %9653 = vst.msk [vmem:[#allocation2 + $0x80] sm:$0xff] %vm396_vm5, %v9635_v7  ;;  %v9498_v6 = vrot.slane %v9484_v57, %v21225_v35  ;;  %v9501_v52 = vcombine.low %v8811_v8, %v8812_v60  ;;  %v9805_v61 = vpop.permute.xlu1 %9804  ;;  %v9491_v29 = vrot.slane %v9483_v24, %v21225_v35 }
 0x557   :  { %v9508_v26 = vrot.slane %v9500_v15, %v21225_v35  ;;  %v7890_v54 = vmax.f32 %v7854_v45, 0.0  ;;  %v8473_v13 = vcombine.high %v7889_v48, %v7889_v48  ;;  %9861 = vst.msk [vmem:[#allocation2 + $0x18] sm:$0xff] %vm680_vm11, %v9805_v61  ;;  %v9773_v25 = vshrl.u32 %v9635_v7, 16  ;;  %v16593_v45 = vld [vmem:[%s21081_s1 + $0x390] sm:$0xff]  }
 0x558   :  { %v9771_v31 = vrot.slane %v9769_v40, 1  ;;  %v9515_v12 = vrot.slane %v9501_v52, %v21225_v35  ;;  %v8480_v58 = vrot.slane %v7889_v48, %v21225_v35  ;;  %v9499_v49 = vcombine.low %v9491_v29, %v9498_v6  ;;  %v9857_v29 = vld [vmem:[#allocation2 + $0x8] sm:$0x80] }
 0x559   :  { %v8487_v2 = vrot.slane %v8473_v13, %v21225_v35  ;;  %v8490_v63 = vcombine.high %v7890_v54, %v7890_v54  ;;  %v8497_v3 = vrot.slane %v7890_v54, %v21225_v35  ;;  %v7855_v18 = vadd.f32 %v19400_v34, %v7811_v32 }
 0x55a   :  { %v9772_v50 = vsel %vm2722_vm4, %v9767_v17, %v9771_v31  ;;  %v9516_v23 = vcombine.low %v9508_v26, %v9515_v12  ;;  %v8488_v0 = vcombine.high %v8480_v58, %v8480_v58  ;;  %v9775_v55 = vor.u32 %v9773_v25, %v9771_v31 }
 0x55b   :  { %9828 = vrot.lane.b32.xlu1 %v9772_v50, %s16631_s23  ;;  %v8489_v33 = vcombine.high %v8487_v2, %v8487_v2  ;;  %v8504_v27 = vrot.slane %v8490_v63, %v21225_v35  ;;  %v8505_v53 = vcombine.high %v8497_v3, %v8497_v3  ;;  %v8813_v36 = vsel %vm781_vm10, %v8480_v58, 0.0  ;;  %v9899_v63 = vld [vmem:[#allocation2] sm:$0x80] }
 0x55c   :  { %v19612_v41 = vpack.c.bf16 %v9516_v23, %v9499_v49  ;;  %v8814_v16 = vsel %vm782_vm15, %v8488_v0, 0.0  ;;  %v8815_v37 = vsel %vm779_vm6, %v8487_v2, 0.0  ;;  %v8817_v19 = vsel %vm781_vm10, %v8497_v3, 0.0 }
 0x55d   :  { %v8506_v46 = vcombine.high %v8504_v27, %v8504_v27  ;;  %v8816_v11 = vsel %vm780_vm9, %v8489_v33, 0.0  ;;  %v8818_v39 = vsel %vm782_vm15, %v8505_v53, 0.0  ;;  %v9517_v43 = vcombine.low %v8813_v36, %v8814_v16 }
 0x55e   :  { %v9777_v21 = vshll.u32 %v19612_v41, 16  ;;  %9654 = vst.msk [vmem:[#allocation2 + $0x88] sm:$0xff] %vm396_vm5, %v19612_v41  ;;  %v9518_v56 = vcombine.low %v8815_v37, %v8816_v11  ;;  %v9534_v42 = vcombine.low %v8817_v19, %v8818_v39  ;;  %v19632_v30 = vld [vmem:[#allocation2 + $0x18] sm:$0xff]  ;;  %v8819_v22 = vsel %vm17640_vm0, %v8504_v27, 0.0 }
 0x55f   :  { %v8820_v4 = vsel %vm779_vm6, %v8506_v46, 0.0  ;;  %v7856_v5 = vadd.f32 %v19400_v34, %v7812_v51  ;;  %v7891_v8 = vmax.f32 %v7855_v18, 0.0  ;;  %15908 = vmatmul.mubr.bf16.vlgmr.msra.gmra.mrb[144].mxu1 %v19632_v30  ;;  %v9525_v48 = vrot.slane %v9517_v43, %v21225_v35 }
 0x560   :  { %v9779_v7 = vrot.slane %v9777_v21, 1  ;;  %v9532_v59 = vrot.slane %v9518_v56, %v21225_v35  ;;  %v9535_v24 = vcombine.low %v8819_v22, %v8820_v4  ;;  %15944 = vmatpush3.bf16.msra.mxu1 %v19566_v9  ;;  %v9542_v17 = vrot.slane %v9534_v42, %v21225_v35 }
 0x561   :  { %v7892_v57 = vmax.f32 %v7856_v5, 0.0  ;;  %v8507_v60 = vcombine.high %v7891_v8, %v7891_v8  ;;  %v8514_v15 = vrot.slane %v7891_v8, %v21225_v35  ;;  %15945 = vmatprep.subr.bf16.mxu1 %v16592_v20  ;;  %v9858_v12 = vsel %vm18347_vm2, %v19583_v28, %v9857_v29 }
 0x562   :  { %v9780_v34 = vsel %vm2722_vm4, %v9775_v55, %v9779_v7  ;;  %v9549_v40 = vrot.slane %v9535_v24, %v21225_v35  ;;  %v9533_v54 = vcombine.low %v9525_v48, %v9532_v59  ;;  %9859 = vst [vmem:[#allocation2 + $0x8] sm:$0x80] %v9858_v12  ;;  %v9781_v50 = vshrl.u32 %v19612_v41, 16 }
 0x563   :  { %9830 = vrot.lane.b32.xlu0 %v9780_v34, %s16631_s23  ;;  %v8521_v9 = vrot.slane %v8507_v60, %v21225_v35  ;;  %v8522_v6 = vcombine.high %v8514_v15, %v8514_v15  ;;  %v8524_v52 = vcombine.high %v7892_v57, %v7892_v57  ;;  %v8531_v61 = vrot.slane %v7892_v57, %v21225_v35  ;;  %v9807_v26 = vpop.permute.xlu0 %9806  ;;  %v16595_v57 = vld [vmem:[%s21081_s1 + $0x398] sm:$0xff]   ;;  %v16596_v60 = vld [vmem:[%s21081_s1 + $0x3a0] sm:$0xff]  }
 0x564   :  { %v9550_v13 = vcombine.low %v9542_v17, %v9549_v40  ;;  %v8821_v32 = vsel %vm780_vm9, %v8514_v15, 0.0  ;;  %9862 = vst.msk [vmem:[#allocation2 + $0x20] sm:$0xff] %vm680_vm11, %v9807_v26  ;;  %15946 = vmatpush3.bf16.msra.mxu1 %v16592_v20  ;;  %v9953_v36 = vrot.slane %v9899_v63, 7  ;;  %v9783_v16 = vor.u32 %v9781_v50, %v9779_v7 }
 0x565   :  { %v8523_v25 = vcombine.high %v8521_v9, %v8521_v9  ;;  %v8538_v58 = vrot.slane %v8524_v52, %v21225_v35  ;;  %v8539_v49 = vcombine.high %v8531_v61, %v8531_v61  ;;  %v8822_v2 = vsel %vm781_vm10, %v8522_v6, 0.0  ;;  %15947 = vmatprep.subr.bf16.mxu1 %v16593_v45 }
 0x566   :  { %v19662_v3 = vpack.c.bf16 %v9550_v13, %v9533_v54  ;;  %v8823_v28 = vsel %vm782_vm15, %v8521_v9, 0.0  ;;  %v9551_v23 = vcombine.low %v8821_v32, %v8822_v2  ;;  %v8825_v55 = vsel %vm780_vm9, %v8531_v61, 0.0  ;;  %v16586_v54 = vld [vmem:[%s21081_s1 + $0x308] sm:$0xff]  }
 0x567   :  { %v8540_v0 = vcombine.high %v8538_v58, %v8538_v58  ;;  %v8824_v18 = vsel %vm779_vm6, %v8523_v25, 0.0  ;;  %v8826_v33 = vsel %vm781_vm10, %v8539_v49, 0.0  ;;  %v8827_v37 = vsel %vm782_vm15, %v8538_v58, 0.0 }
 0x568   :  { %v9785_v27 = vshll.u32 %v19662_v3, 16  ;;  %9655 = vst.msk [vmem:[#allocation2 + $0x90] sm:$0xff] %vm396_vm5, %v19662_v3  ;;  %v9552_v53 = vcombine.low %v8823_v28, %v8824_v18  ;;  %v9568_v41 = vcombine.low %v8825_v55, %v8826_v33  ;;  %15948 = vmatpush3.bf16.msra.mxu1 %v16593_v45  ;;  %v10965_v46 = vshrl.u32 %v19585_v47, 16 }
 0x569   :  { %v8828_v51 = vsel %vm17640_vm0, %v8540_v0, 0.0  ;;  %v9559_v19 = vrot.slane %v9551_v23, %v21225_v35  ;;  %v21120_v43 = vshll.u32 %v19585_v47, 16  ;;  %v9956_v56 = vrot.slane %v19585_v47, 7  ;;  %v9881_v7 = vld [vmem:[#allocation2 + $0x8] sm:$0xff]  ;;  %15949 = vmatprep.subr.bf16.mxu1 %v16595_v57  ;;  %v16587_v23 = vld [vmem:[%s21081_s1 + $0x310] sm:$0xff]  }
 0x56a   :  { %v9787_v11 = vrot.slane %v9785_v27, 1  ;;  %v9566_v39 = vrot.slane %v9552_v53, %v21225_v35  ;;  %v9569_v20 = vcombine.low %v8827_v37, %v8828_v51  ;;  %v9576_v21 = vrot.slane %v9568_v41, %v21225_v35 }
 0x56b   :  { %v10973_v42 = vshrl.u32 %v19632_v30, 16  ;;  %v19687_v22 = vld [vmem:[#allocation2 + $0x20] sm:$0xff]  ;;  %v10976_v24 = vshll.u32 %v19632_v30, 16  ;;  %v9954_v15 = vrot.slane %v9881_v7, 7  ;;  %v9958_v40 = vrot.slane %v19632_v30, 7 }
 0x56c   :  { %v9788_v4 = vsel %vm2722_vm4, %v9783_v16, %v9787_v11  ;;  %v9567_v5 = vcombine.low %v9559_v19, %v9566_v39  ;;  %v9583_v8 = vrot.slane %v9569_v20, %v21225_v35  ;;  %v9809_v59 = vpop.permute.xlu1 %9808  ;;  %15911 = vmatprep.mubr.bf16.mxu1 %v19687_v22  ;;  %v19702_v34 = vshrl.u32 %v19687_v22, 16  ;;  %15950 = vmatpush3.bf16.msra.mxu1 %v16595_v57  ;;  %v16598_v39 = vld [vmem:[%s21081_s1 + $0x3a8] sm:$0xff]  }
 0x56d   :  { %9832 = vrot.lane.b32.xlu1 %v9788_v4, %s16631_s23  ;;  %9863 = vst.msk [vmem:[#allocation2 + $0x28] sm:$0xff] %vm680_vm11, %v9809_v59  ;;  %v10975_v45 = vrot.slane %v10973_v42, 7  ;;  %v19705_v48 = vshll.u32 %v19687_v22, 16  ;;  %v9960_v9 = vrot.slane %v19687_v22, 7  ;;  %v10242_v6 = vshrl.u32 %v9881_v7, 16  ;;  %15951 = vmatprep.subr.bf16.mxu1 %v16596_v60  ;;  %v16588_v4 = vld [vmem:[%s21081_s1 + $0x318] sm:$0xff]  }
 0x56e   :  { %v9584_v17 = vcombine.low %v9576_v21, %v9583_v8  ;;  %v9955_v52 = vsel %vm860_vm12, %v9953_v36, %v9954_v15  ;;  %v9957_v61 = vsel %vm860_vm12, %v9954_v15, %v9956_v56  ;;  %v10983_v26 = vrot.slane %v19702_v34, 7 }
 0x56f   :  { %21232 = vst [vmem:[#allocation18_spill] sm:$0xff] %v19705_v48  ;;  %v10978_v29 = vor.u32 %v10976_v24, %v10975_v45  ;;  %v9789_v32 = vshrl.u32 %v19662_v3, 16  ;;  %v19716_v30 = vrot.slane %v10965_v46, 7  ;;  %15803 = vmatprep.mubr.bf16.mxu0 %v9955_v52  ;;  %v9959_v31 = vsel %vm860_vm12, %v9956_v56, %v9958_v40 }
 0x570   :  { %v9638_v13 = vpack.c.bf16 %v9584_v17, %v9567_v5  ;;  %15804 = vmatmul.mubr.bf16.vlgmr.msra.gmra.mrb[108].mxu0 %v9957_v61  ;;  %v10986_v12 = vor.u32 %v19705_v48, %v10983_v26  ;;  %v10244_v25 = vrot.slane %v10242_v6, 6  ;;  %v10245_v58 = vshll.u32 %v9881_v7, 16  ;;  %15952 = vmatpush3.bf16.msra.mxu1 %v16596_v60  ;;  %v16599_v5 = vld [vmem:[%s21081_s1 + $0x3b0] sm:$0xff]   ;;  %v16600_v17 = vld [vmem:[%s21081_s1 + $0x3b8] sm:$0xff]   ;;  %v16589_v6 = vld [vmem:[%s21081_s1 + $0x320] sm:$0xff]  }
 0x571   :  { %v10253_v49 = vrot.slane %v10965_v46, 6  ;;  %v9791_v2 = vor.u32 %v9789_v32, %v9787_v11  ;;  %15840 = vmatpush3.bf16.msra.mxu0 %v19340_v62  ;;  %15807 = vmatprep.mubr.bf16.mxu0 %v9959_v31  ;;  %v10256_v3 = vrot.slane %v21120_v43, 7  ;;  %v10262_v50 = vrot.slane %v10973_v42, 6 }
 0x572   :  { %v9793_v63 = vshll.u32 %v9638_v13, 16  ;;  %9656 = vst.msk [vmem:[#allocation2 + $0x98] sm:$0xff] %vm396_vm5, %v9638_v13  ;;  %v9961_v28 = vsel %vm860_vm12, %v9958_v40, %v9960_v9  ;;  %15841 = vmatprep.subr.bf16.mxu0 %v16586_v54  ;;  %v10247_v0 = vrot.slane %v10245_v58, 7  ;;  %v10265_v18 = vrot.slane %v10976_v24, 7  ;;  %15953 = vmatprep.subr.bf16.mxu1 %v16598_v39 }
 0x573   :  { %v19732_v55 = vsel %vm418_vm14, %v19716_v30, %v10978_v29  ;;  %v9797_v33 = vshrl.u32 %v9638_v13, 16  ;;  %v10257_v41 = vor.u32 %v10256_v3, %v10253_v49  ;;  %v19737_v36 = vsel %vm418_vm14, %v10975_v45, %v10986_v12 }
 0x574   :  { %v9795_v62 = vrot.slane %v9793_v63, 1  ;;  %v9811_v27 = vpop.permute.xlu0 %9810  ;;  %v19734_v53 = vld [vmem:[#allocation2 + $0x28] sm:$0xff]  ;;  %v19748_v46 = vor.u32 %v10247_v0, %v10244_v25  ;;  %v10266_v20 = vor.u32 %v10265_v18, %v10262_v50  ;;  %v10271_v21 = vrot.slane %v19702_v34, 6  ;;  %15954 = vmatpush3.bf16.msra.mxu1 %v16598_v39 }
 0x575   :  { %9864 = vst.msk [vmem:[#allocation2 + $0x30] sm:$0xff] %vm680_vm11, %v9811_v27  ;;  %15912 = vmatmul.mubr.bf16.gmra.mrb[148].mxu1 %v19734_v53  ;;  %v19742_v16 = vshrl.u32 %v19734_v53, 16  ;;  %v19745_v37 = vshll.u32 %v19734_v53, 16  ;;  %v9962_v51 = vrot.slane %v19734_v53, 7  ;;  %15842 = vmatpush3.bf16.msra.mxu0 %v16586_v54  ;;  %v10274_v59 = vrot.slane %v19705_v48, 7 }
 0x576   :  { %v9796_v11 = vsel %vm2722_vm4, %v9791_v2, %v9795_v62  ;;  %v9799_v19 = vor.u32 %v9797_v33, %v9795_v62  ;;  %15843 = vmatprep.subr.bf16.mxu0 %v16587_v23  ;;  %v19766_v8 = vsel %vm1141_vm13, %v19748_v46, %v10257_v41  ;;  %v19770_v7 = vsel %vm1141_vm13, %v10257_v41, %v10266_v20  ;;  %v16591_v2 = vld [vmem:[%s21081_s1 + $0x328] sm:$0xff]  }
 0x577   :  { %9834 = vrot.lane.b32.xlu0 %v9796_v11, %s16631_s23  ;;  %v10991_v56 = vrot.slane %v19742_v16, 7  ;;  %v9963_v42 = vsel %vm860_vm12, %v9960_v9, %v9962_v51  ;;  %v10280_v24 = vrot.slane %v19742_v16, 6  ;;  %v10283_v57 = vrot.slane %v19745_v37, 7  ;;  %15955 = vmatprep.subr.bf16.mxu1 %v16599_v5 }
 0x578   :  { %9836 = vrot.lane.b32.xlu1 %v9799_v19, %s16631_s23  ;;  %15808 = vmatmul.mubr.bf16.gmra.mrb[112].mxu0 %v9961_v28  ;;  %v21119_v15 = vrot.slane %v19687_v22, 1  ;;  %v11535_v45 = vrot.slane %v19734_v53, 1  ;;  %v10275_v40 = vor.u32 %v10274_v59, %v10271_v21 }
 0x579   :  { %v10994_v60 = vor.u32 %v19745_v37, %v10991_v56  ;;  %15811 = vmatprep.mubr.bf16.mxu0 %v9963_v42  ;;  %15844 = vmatpush3.bf16.msra.mxu0 %v16587_v23  ;;  %v10284_v9 = vor.u32 %v10283_v57, %v10280_v24  ;;  %v11830_v23 = vrot.slane %v19745_v37, 1  ;;  %v19836_v42 = vld [vmem:[%s21081_s1 + $0x440] sm:$0xff]  }
 0x57a   :  { %15845 = vmatprep.subr.bf16.mxu0 %v16588_v4  ;;  %v19792_v61 = vsel %vm2441_vm3, %v21119_v15, %v11535_v45  ;;  %v19795_v54 = vsel %vm1141_vm13, %v10266_v20, %v10275_v40  ;;  %15956 = vmatpush3.bf16.msra.mxu1 %v16599_v5 }
 0x57b   :  { %v19787_v52 = vsel %vm418_vm14, %v10983_v26, %v10994_v60  ;;  %v19798_v13 = vsel %vm1141_vm13, %v10275_v40, %v10284_v9  ;;  %15957 = vmatprep.subr.bf16.mxu1 %v16600_v17  ;;  %v21118_v26 = vrot.slane %v19705_v48, 1  ;;  %v11834_v27 = vor.u32 %v11830_v23, %v19742_v16  ;;  %v16597_v16 = vld [vmem:[%s21081_s1 + $0x338] sm:$0xff]  }
 0x57c   :  { %v10687_v29 = vld [vmem:[#allocation2 + $0x30] sm:$0xff] }
 0x57d   :  { %15915 = vmatprep.mubr.bf16.mxu1 %v10687_v29  ;;  %v10997_v32 = vshrl.u32 %v10687_v29, 16  ;;  %v11000_v31 = vshll.u32 %v10687_v29, 16  ;;  %v9964_v12 = vrot.slane %v10687_v29, 7  ;;  %v11537_v25 = vrot.slane %v10687_v29, 1  ;;  %15846 = vmatpush3.bf16.msra.mxu0 %v16588_v4 }
 0x57e   :  { %15847 = vmatprep.subr.bf16.mxu0 %v16589_v6  ;;  %v11826_v28 = vor.u32 %v21118_v26, %v19702_v34  ;;  %15958 = vmatpush3.bf16.msra.mxu1 %v16600_v17  ;;  %v16594_v34 = vld [vmem:[%s21081_s1 + $0x330] sm:$0xff]  }
 0x57f   :  { %v10999_v58 = vrot.slane %v10997_v32, 7  ;;  %v9965_v49 = vsel %vm860_vm12, %v9962_v51, %v9964_v12  ;;  %v10289_v63 = vrot.slane %v10997_v32, 6  ;;  %v10292_v3 = vrot.slane %v11000_v31, 7 }
 0x580   :  { %v19806_v50 = vsel %vm2441_vm3, %v11535_v45, %v11537_v25  ;;  %15812 = vmatmul.mubr.bf16.gmra.mrb[116].mxu0 %v9965_v49  ;;  %v19814_v33 = vsel %vm2722_vm4, %v11826_v28, %v11830_v23  ;;  %v11838_v37 = vrot.slane %v11000_v31, 1 }
 0x581   :  { %v9813_v0 = vpop.permute.xlu1 %9812  ;;  %v11002_v18 = vor.u32 %v11000_v31, %v10999_v58  ;;  %v10293_v62 = vor.u32 %v10292_v3, %v10289_v63  ;;  %15848 = vmatpush3.bf16.msra.mxu0 %v16589_v6  ;;  %21233 = vst [vmem:[#allocation20_spill] sm:$0xff] %v19814_v33 }
 0x582   :  { %9865 = vst.msk [vmem:[#allocation2 + $0x38] sm:$0xff] %vm680_vm11, %v9813_v0  ;;  %15849 = vmatprep.subr.bf16.mxu0 %v16591_v2  ;;  %v19827_v51 = vsel %vm2722_vm4, %v11834_v27, %v11838_v37  ;;  %v11842_v60 = vor.u32 %v11838_v37, %v10997_v32 }
 0x583   :  { %v19821_v53 = vsel %vm418_vm14, %v10991_v56, %v11002_v18  ;;  %v19824_v41 = vsel %vm1141_vm13, %v10284_v9, %v10293_v62  ;;  %21234 = vst [vmem:[#allocation22_spill] sm:$0xff] %v19827_v51 }
 0x585   :  { %15850 = vmatpush3.bf16.msra.mxu0 %v16591_v2 }
 0x586   :  { %15851 = vmatprep.subr.bf16.mxu0 %v16594_v34 }
 0x589   :  { %v9815_v11 = vpop.permute.xlu0 %9814  ;;  %v10688_v19 = vld [vmem:[#allocation2 + $0x38] sm:$0xff]  ;;  %15852 = vmatpush3.bf16.msra.mxu0 %v16594_v34 }
 0x58a   :  { %9866 = vst.msk [vmem:[#allocation2 + $0x40] sm:$0xff] %vm680_vm11, %v9815_v11  ;;  %15916 = vmatmul.mubr.bf16.gmra.mrb[152].mxu1 %v10688_v19  ;;  %v11005_v39 = vshrl.u32 %v10688_v19, 16  ;;  %v11008_v20 = vshll.u32 %v10688_v19, 16  ;;  %v9966_v21 = vrot.slane %v10688_v19, 7  ;;  %v11539_v56 = vrot.slane %v10688_v19, 1  ;;  %15853 = vmatprep.subr.bf16.mxu0 %v16597_v16 }
 0x58c   :  { %v11007_v4 = vrot.slane %v11005_v39, 7  ;;  %v9967_v5 = vsel %vm860_vm12, %v9964_v12, %v9966_v21  ;;  %v10298_v59 = vrot.slane %v11005_v39, 6  ;;  %v10301_v24 = vrot.slane %v11008_v20, 7 }
 0x58d   :  { %15815 = vmatprep.mubr.bf16.mxu0 %v9967_v5  ;;  %v19840_v57 = vsel %vm2441_vm3, %v11537_v25, %v11539_v56  ;;  %v11846_v45 = vrot.slane %v11008_v20, 1  ;;  %15854 = vmatpush3.bf16.msra.mxu0 %v16597_v16 }
 0x58e   :  { %v11010_v17 = vor.u32 %v11008_v20, %v11007_v4  ;;  %v10302_v40 = vor.u32 %v10301_v24, %v10298_v59  ;;  %15995 = vmatprep.subr.bf16.mxu0 %v19836_v42 }
 0x58f   :  { %v19844_v9 = vsel %vm2722_vm4, %v11842_v60, %v11846_v45  ;;  %v11850_v2 = vor.u32 %v11846_v45, %v11005_v39 }
 0x590   :  { %21235 = vst [vmem:[#allocation24_spill] sm:$0xff] %v19844_v9  ;;  %v19847_v6 = vsel %vm1141_vm13, %v10293_v62, %v10302_v40  ;;  %v19850_v29 = vsel %vm418_vm14, %v10999_v58, %v11010_v17 }
 0x591   :  { %v10689_v31 = vld [vmem:[#allocation2 + $0x40] sm:$0xff] }
 0x592   :  { %15919 = vmatprep.mubr.bf16.mxu1 %v10689_v31  ;;  %v11013_v12 = vshrl.u32 %v10689_v31, 16  ;;  %v11016_v25 = vshll.u32 %v10689_v31, 16  ;;  %v9968_v32 = vrot.slane %v10689_v31, 7  ;;  %v11541_v49 = vrot.slane %v10689_v31, 1 }
 0x594   :  { %v11015_v63 = vrot.slane %v11013_v12, 7  ;;  %v9969_v3 = vsel %vm860_vm12, %v9966_v21, %v9968_v32  ;;  %v10307_v28 = vrot.slane %v11013_v12, 6  ;;  %v10310_v23 = vrot.slane %v11016_v25, 7 }
 0x595   :  { %v9817_v0 = vpop.permute.xlu1 %9816  ;;  %15816 = vmatmul.mubr.bf16.gmra.mrb[120].mxu0 %v9969_v3  ;;  %v19854_v18 = vsel %vm2441_vm3, %v11539_v56, %v11541_v49  ;;  %v11854_v62 = vrot.slane %v11016_v25, 1 }
 0x596   :  { %9867 = vst.msk [vmem:[#allocation2 + $0x48] sm:$0xff] %vm680_vm11, %v9817_v0  ;;  %v11018_v58 = vor.u32 %v11016_v25, %v11015_v63  ;;  %v10311_v27 = vor.u32 %v10310_v23, %v10307_v28 }
 0x597   :  { %v19858_v34 = vsel %vm2722_vm4, %v11850_v2, %v11854_v62  ;;  %v11858_v45 = vor.u32 %v11854_v62, %v11013_v12 }
 0x598   :  { %21236 = vst [vmem:[#allocation26_spill] sm:$0xff] %v19858_v34  ;;  %v19861_v37 = vsel %vm418_vm14, %v11007_v4, %v11018_v58  ;;  %v19864_v16 = vsel %vm1141_vm13, %v10302_v40, %v10311_v27 }
 0x59d   :  { %v9819_v11 = vpop.permute.xlu0 %9818  ;;  %v10690_v19 = vld [vmem:[#allocation2 + $0x48] sm:$0xff] }
 0x59e   :  { %9868 = vst.msk [vmem:[#allocation2 + $0x50] sm:$0xff] %vm680_vm11, %v9819_v11  ;;  %15920 = vmatmul.mubr.bf16.gmra.mrb[156].mxu1 %v10690_v19  ;;  %v11021_v39 = vshrl.u32 %v10690_v19, 16  ;;  %v11024_v20 = vshll.u32 %v10690_v19, 16  ;;  %v9970_v21 = vrot.slane %v10690_v19, 7  ;;  %v11543_v56 = vrot.slane %v10690_v19, 1 }
 0x5a0   :  { %v11023_v5 = vrot.slane %v11021_v39, 7  ;;  %v9971_v59 = vsel %vm860_vm12, %v9968_v32, %v9970_v21  ;;  %v10316_v24 = vrot.slane %v11021_v39, 6  ;;  %v10319_v60 = vrot.slane %v11024_v20, 7 }
 0x5a1   :  { %15819 = vmatprep.mubr.bf16.mxu0 %v9971_v59  ;;  %v19869_v4 = vsel %vm2441_vm3, %v11541_v49, %v11543_v56  ;;  %v11862_v17 = vrot.slane %v11024_v20, 1 }
 0x5a2   :  { %21237 = vst [vmem:[#allocation28_spill] sm:$0xff] %v19869_v4  ;;  %v11026_v40 = vor.u32 %v11024_v20, %v11023_v5  ;;  %v10320_v31 = vor.u32 %v10319_v60, %v10316_v24 }
 0x5a3   :  { %v19872_v25 = vsel %vm2722_vm4, %v11858_v45, %v11862_v17  ;;  %v11866_v62 = vor.u32 %v11862_v17, %v11021_v39 }
 0x5a4   :  { %21238 = vst [vmem:[#allocation30_spill] sm:$0xff] %v19872_v25  ;;  %v19875_v2 = vsel %vm1141_vm13, %v10311_v27, %v10320_v31  ;;  %v19878_v3 = vsel %vm418_vm14, %v11015_v63, %v11026_v40 }
 0x5a5   :  { %v9821_v32 = vpop.permute.xlu1 %9820  ;;  %v10691_v28 = vld [vmem:[#allocation2 + $0x50] sm:$0xff] }
 0x5a6   :  { %9869 = vst.msk [vmem:[#allocation2 + $0x58] sm:$0xff] %vm680_vm11, %v9821_v32  ;;  %15923 = vmatprep.mubr.bf16.mxu1 %v10691_v28  ;;  %v11029_v49 = vshrl.u32 %v10691_v28, 16  ;;  %v11032_v23 = vshll.u32 %v10691_v28, 16  ;;  %v9972_v12 = vrot.slane %v10691_v28, 7  ;;  %v11545_v0 = vrot.slane %v10691_v28, 1 }
 0x5a8   :  { %v11031_v58 = vrot.slane %v11029_v49, 7  ;;  %v9973_v11 = vsel %vm860_vm12, %v9970_v21, %v9972_v12  ;;  %v10325_v19 = vrot.slane %v11029_v49, 6  ;;  %v10328_v20 = vrot.slane %v11032_v23, 7 }
 0x5a9   :  { %15820 = vmatmul.mubr.bf16.gmra.mrb[124].mxu0 %v9973_v11  ;;  %v19883_v27 = vsel %vm2441_vm3, %v11543_v56, %v11545_v0  ;;  %v11870_v63 = vrot.slane %v11032_v23, 1 }
 0x5aa   :  { %21239 = vst [vmem:[#allocation32_spill] sm:$0xff] %v19883_v27  ;;  %v11034_v59 = vor.u32 %v11032_v23, %v11031_v58  ;;  %v10329_v24 = vor.u32 %v10328_v20, %v10325_v19 }
 0x5ab   :  { %v19886_v60 = vsel %vm2722_vm4, %v11866_v62, %v11870_v63 }
 0x5ac   :  { %21240 = vst [vmem:[#allocation34_spill] sm:$0xff] %v19886_v60  ;;  %v19889_v45 = vsel %vm418_vm14, %v11023_v5, %v11034_v59  ;;  %v19892_v39 = vsel %vm1141_vm13, %v10320_v31, %v10329_v24  ;;  %v11874_v31 = vor.u32 %v11870_v63, %v11029_v49 }
 0x5ad   :  { %v10692_v17 = vld [vmem:[#allocation2 + $0x58] sm:$0xff] }
 0x5ae   :  { %15924 = vmatmul.mubr.bf16.gmra.mrb[160].mxu1 %v10692_v17  ;;  %v11037_v21 = vshrl.u32 %v10692_v17, 16  ;;  %v11040_v40 = vshll.u32 %v10692_v17, 16  ;;  %v9974_v32 = vrot.slane %v10692_v17, 7  ;;  %v11547_v28 = vrot.slane %v10692_v17, 1 }
 0x5af   :  { %v9823_v56 = vpop.permute.xlu0 %9822 }
 0x5b0   :  { %9870 = vst.msk [vmem:[#allocation2 + $0x60] sm:$0xff] %vm680_vm11, %v9823_v56  ;;  %v11039_v23 = vrot.slane %v11037_v21, 7  ;;  %v9975_v11 = vsel %vm860_vm12, %v9972_v12, %v9974_v32  ;;  %v10334_v62 = vrot.slane %v11037_v21, 6  ;;  %v10337_v19 = vrot.slane %v11040_v40, 7 }
 0x5b1   :  { %15823 = vmatprep.mubr.bf16.mxu0 %v9975_v11  ;;  %v19897_v5 = vsel %vm2441_vm3, %v11545_v0, %v11547_v28  ;;  %v11878_v20 = vrot.slane %v11040_v40, 1 }
 0x5b2   :  { %21241 = vst [vmem:[#allocation5_spill] sm:$0xff] %v19897_v5  ;;  %v11042_v59 = vor.u32 %v11040_v40, %v11039_v23  ;;  %v10338_v26 = vor.u32 %v10337_v19, %v10334_v62 }
 0x5b3   :  { %v19900_v15 = vsel %vm2722_vm4, %v11874_v31, %v11878_v20  ;;  %v11882_v49 = vor.u32 %v11878_v20, %v11037_v21 }
 0x5b4   :  { %21242 = vst [vmem:[#allocation15_spill] sm:$0xff] %v19900_v15  ;;  %v19903_v17 = vsel %vm1141_vm13, %v10329_v24, %v10338_v26  ;;  %v19906_v56 = vsel %vm418_vm14, %v11031_v58, %v11042_v59 }
 0x5b7   :  { %v10693_v12 = vld [vmem:[#allocation2 + $0x60] sm:$0xff] }
 0x5b8   :  { %15927 = vmatprep.mubr.bf16.mxu1 %v10693_v12  ;;  %v11045_v43 = vshrl.u32 %v10693_v12, 16  ;;  %v11048_v11 = vshll.u32 %v10693_v12, 16  ;;  %v9976_v44 = vrot.slane %v10693_v12, 7  ;;  %v11549_v0 = vrot.slane %v10693_v12, 1 }
 0x5b9   :  { %v9825_v1 = vpop.permute.xlu1 %9824 }
 0x5ba   :  { %9871 = vst.msk [vmem:[#allocation2 + $0x68] sm:$0xff] %vm680_vm11, %v9825_v1  ;;  %v11047_v63 = vrot.slane %v11045_v43, 7  ;;  %v9977_v40 = vsel %vm860_vm12, %v9974_v32, %v9976_v44  ;;  %v10343_v62 = vrot.slane %v11045_v43, 6  ;;  %v10346_v19 = vrot.slane %v11048_v11, 7 }
 0x5bb   :  { %15824 = vmatmul.mubr.bf16.gmra.mrb[128].mxu0 %v9977_v40  ;;  %v19911_v24 = vsel %vm2441_vm3, %v11547_v28, %v11549_v0  ;;  %v11886_v58 = vrot.slane %v11048_v11, 1 }
 0x5bc   :  { %21243 = vst [vmem:[#allocation16_spill] sm:$0xff] %v19911_v24  ;;  %v11050_v31 = vor.u32 %v11048_v11, %v11047_v63  ;;  %v10347_v59 = vor.u32 %v10346_v19, %v10343_v62 }
 0x5bd   :  { %v19914_v10 = vsel %vm2722_vm4, %v11882_v49, %v11886_v58 }
 0x5be   :  { %21244 = vst [vmem:[#allocation17_spill] sm:$0xff] %v19914_v10  ;;  %v19917_v12 = vsel %vm418_vm14, %v11039_v23, %v11050_v31  ;;  %v19920_v1 = vsel %vm1141_vm13, %v10338_v26, %v10347_v59  ;;  %v11890_v26 = vor.u32 %v11886_v58, %v11045_v43 }
 0x5c1   :  { %v9827_v21 = vpop.permute.xlu0 %9826  ;;  %v10694_v32 = vld [vmem:[#allocation2 + $0x68] sm:$0xff] }
 0x5c2   :  { %9872 = vst.msk [vmem:[#allocation2 + $0x70] sm:$0xff] %vm680_vm11, %v9827_v21  ;;  %15928 = vmatmul.mubr.bf16.gmra.mrb[164].mxu1 %v10694_v32  ;;  %v11053_v20 = vshrl.u32 %v10694_v32, 16  ;;  %v11056_v28 = vshll.u32 %v10694_v32, 16  ;;  %v9978_v40 = vrot.slane %v10694_v32, 7  ;;  %v11551_v38 = vrot.slane %v10694_v32, 1 }
 0x5c4   :  { %v11055_v11 = vrot.slane %v11053_v20, 7  ;;  %v9979_v62 = vsel %vm860_vm12, %v9976_v44, %v9978_v40  ;;  %v10352_v49 = vrot.slane %v11053_v20, 6  ;;  %v10355_v19 = vrot.slane %v11056_v28, 7 }
 0x5c5   :  { %15827 = vmatprep.mubr.bf16.mxu0 %v9979_v62  ;;  %v19925_v23 = vsel %vm2441_vm3, %v11549_v0, %v11551_v38  ;;  %v11894_v31 = vrot.slane %v11056_v28, 1 }
 0x5c6   :  { %21245 = vst [vmem:[#allocation19_spill] sm:$0xff] %v19925_v23  ;;  %v11058_v14 = vor.u32 %v11056_v28, %v11055_v11  ;;  %v10356_v35 = vor.u32 %v10355_v19, %v10352_v49  ;;  %v21255_v23 = vshll.u32 %v19585_v47, 16 }
 0x5c7   :  { %v19928_v21 = vsel %vm2722_vm4, %v11890_v26, %v11894_v31  ;;  %v11898_v10 = vor.u32 %v11894_v31, %v11053_v20 }
 0x5c8   :  { %21246 = vst [vmem:[#allocation21_spill] sm:$0xff] %v19928_v21  ;;  %v19931_v15 = vsel %vm1141_vm13, %v10347_v59, %v10356_v35  ;;  %v19934_v32 = vsel %vm418_vm14, %v11047_v63, %v11058_v14 }
 0x5c9   :  { %v10695_v44 = vld [vmem:[#allocation2 + $0x70] sm:$0xff] }
 0x5ca   :  { %15931 = vmatprep.mubr.bf16.mxu1 %v10695_v44  ;;  %v11061_v62 = vshrl.u32 %v10695_v44, 16  ;;  %v11064_v60 = vshll.u32 %v10695_v44, 16  ;;  %v9980_v0 = vrot.slane %v10695_v44, 7  ;;  %v11553_v25 = vrot.slane %v10695_v44, 1 }
 0x5cc   :  { %v11063_v43 = vrot.slane %v11061_v62, 7  ;;  %v9981_v58 = vsel %vm860_vm12, %v9978_v40, %v9980_v0  ;;  %v10361_v28 = vrot.slane %v11061_v62, 6  ;;  %v10364_v49 = vrot.slane %v11064_v60, 7 }
 0x5cd   :  { %v9829_v19 = vpop.permute.xlu1 %9828  ;;  %15828 = vmatmul.mubr.bf16.gmra.mrb[132].mxu0 %v9981_v58  ;;  %v19938_v20 = vsel %vm2441_vm3, %v11551_v38, %v11553_v25  ;;  %v11902_v59 = vrot.slane %v11064_v60, 1 }
 0x5ce   :  { %21247 = vst [vmem:[#allocation23_spill] sm:$0xff] %v19938_v20  ;;  %9873 = vst.msk [vmem:[#allocation2 + $0x78] sm:$0xff] %vm680_vm11, %v9829_v19  ;;  %v11066_v14 = vor.u32 %v11064_v60, %v11063_v43  ;;  %v10365_v63 = vor.u32 %v10364_v49, %v10361_v28 }
 0x5cf   :  { %v19942_v26 = vsel %vm2722_vm4, %v11898_v10, %v11902_v59  ;;  %v11906_v31 = vor.u32 %v11902_v59, %v11061_v62 }
 0x5d0   :  { %21248 = vst [vmem:[#allocation25_spill] sm:$0xff] %v19942_v26  ;;  %v19945_v44 = vsel %vm418_vm14, %v11055_v11, %v11066_v14  ;;  %v19948_v40 = vsel %vm1141_vm13, %v10356_v35, %v10365_v63 }
 0x5d5   :  { %v9831_v21 = vpop.permute.xlu0 %9830  ;;  %v10696_v58 = vld [vmem:[#allocation2 + $0x78] sm:$0xff] }
 0x5d6   :  { %9874 = vst.msk [vmem:[#allocation2 + $0x80] sm:$0xff] %vm680_vm11, %v9831_v21  ;;  %15932 = vmatmul.mubr.bf16.gmra.mrb[168].mxu1 %v10696_v58  ;;  %v11069_v38 = vshrl.u32 %v10696_v58, 16  ;;  %v11072_v34 = vshll.u32 %v10696_v58, 16  ;;  %v9982_v19 = vrot.slane %v10696_v58, 7  ;;  %v11555_v60 = vrot.slane %v10696_v58, 1 }
 0x5d8   :  { %v11071_v28 = vrot.slane %v11069_v38, 7  ;;  %v9983_v10 = vsel %vm860_vm12, %v9980_v0, %v9982_v19  ;;  %v10370_v49 = vrot.slane %v11069_v38, 6  ;;  %v10373_v62 = vrot.slane %v11072_v34, 7 }
 0x5d9   :  { %15831 = vmatprep.mubr.bf16.mxu0 %v9983_v10  ;;  %v19953_v11 = vsel %vm2441_vm3, %v11553_v25, %v11555_v60  ;;  %v11910_v35 = vrot.slane %v11072_v34, 1 }
 0x5da   :  { %21249 = vst [vmem:[#allocation27_spill] sm:$0xff] %v19953_v11  ;;  %v11074_v59 = vor.u32 %v11072_v34, %v11071_v28  ;;  %v10374_v14 = vor.u32 %v10373_v62, %v10370_v49 }
 0x5db   :  { %v19956_v26 = vsel %vm2722_vm4, %v11906_v31, %v11910_v35  ;;  %v11914_v21 = vor.u32 %v11910_v35, %v11069_v38 }
 0x5dc   :  { %21250 = vst [vmem:[#allocation29_spill] sm:$0xff] %v19956_v26  ;;  %v19959_v9 = vsel %vm1141_vm13, %v10365_v63, %v10374_v14  ;;  %v19962_v58 = vsel %vm418_vm14, %v11063_v43, %v11074_v59 }
 0x5dd   :  { %v10697_v0 = vld [vmem:[#allocation2 + $0x80] sm:$0xff] }
 0x5de   :  { %15935 = vmatprep.mubr.bf16.mxu1 %v10697_v0  ;;  %v11077_v51 = vshrl.u32 %v10697_v0, 16  ;;  %v11080_v10 = vshll.u32 %v10697_v0, 16  ;;  %v9984_v33 = vrot.slane %v10697_v0, 7  ;;  %v11557_v25 = vrot.slane %v10697_v0, 1  ;;  %v9880_v0 = vld [vmem:[#allocation2] sm:$0xc0] }
 0x5df   :  { %v9833_v48 = vpop.permute.xlu1 %9832  ;;  %v10234_v20 = vshrl.u32 %v9880_v0, 16 }
 0x5e0   :  { %9875 = vst.msk [vmem:[#allocation2 + $0x88] sm:$0xff] %vm680_vm11, %v9833_v48  ;;  %v11079_v34 = vrot.slane %v11077_v51, 7  ;;  %v9985_v31 = vsel %vm860_vm12, %v9982_v19, %v9984_v33  ;;  %v10379_v49 = vrot.slane %v11077_v51, 6  ;;  %v10382_v38 = vrot.slane %v11080_v10, 7 }
 0x5e1   :  { %15832 = vmatmul.mubr.bf16.gmra.mrb[136].mxu0 %v9985_v31  ;;  %v19967_v63 = vsel %vm2441_vm3, %v11555_v60, %v11557_v25  ;;  %v11918_v43 = vrot.slane %v11080_v10, 1 }
 0x5e2   :  { %21251 = vst [vmem:[#allocation31_spill] sm:$0xff] %v19967_v63  ;;  %v11082_v62 = vor.u32 %v11080_v10, %v11079_v34  ;;  %v10383_v35 = vor.u32 %v10382_v38, %v10379_v49  ;;  %v10237_v38 = vshll.u32 %v9880_v0, 16 }
 0x5e3   :  { %v19970_v59 = vsel %vm2722_vm4, %v11914_v21, %v11918_v43  ;;  %v11922_v26 = vor.u32 %v11918_v43, %v11077_v51  ;;  %v10682_v21 = vld [vmem:[#allocation2 + $0x8] sm:$0x80]  ;;  %v9877_v51 = vld [vmem:[#allocation2 + $0x98] sm:$0xff] }
 0x5e4   :  { %21252 = vst [vmem:[#allocation33_spill] sm:$0xff] %v19970_v59  ;;  %v19973_v11 = vsel %vm418_vm14, %v11071_v28, %v11082_v62  ;;  %v19976_v48 = vsel %vm1141_vm13, %v10374_v14, %v10383_v35  ;;  %v10961_v27 = vshrl.u32 %v10682_v21, 16 }
 0x5e6   :  { %v10963_v21 = vrot.slane %v10961_v27, 7 }
 0x5e7   :  { %v10698_v19 = vld [vmem:[#allocation2 + $0x88] sm:$0xff] }
 0x5e8   :  { %15936 = vmatmul.mubr.bf16.gmra.mrb[172].mxu1 %v10698_v19  ;;  %v19978_v31 = vshrl.u32 %v10698_v19, 16  ;;  %v11088_v60 = vshll.u32 %v10698_v19, 16  ;;  %v9986_v63 = vrot.slane %v10698_v19, 7  ;;  %v11559_v10 = vrot.slane %v10698_v19, 1 }
 0x5e9   :  { %v9835_v49 = vpop.permute.xlu0 %9834  ;;  %v10236_v19 = vrot.slane %v10234_v20, 6 }
 0x5ea   :  { %9876 = vst.msk [vmem:[#allocation2 + $0x90] sm:$0xff] %vm680_vm11, %v9835_v49  ;;  %v9837_v43 = vpop.permute.xlu1 %9836  ;;  %v21130_v28 = vrot.slane %v19978_v31, 7  ;;  %v9987_v14 = vsel %vm860_vm12, %v9984_v33, %v9986_v63  ;;  %v10388_v62 = vrot.slane %v19978_v31, 6  ;;  %v10391_v59 = vrot.slane %v11088_v60, 7 }
 0x5eb   :  { %v19986_v24 = vsel %vm18695_vm7, %v9837_v43, %v9877_v51  ;;  %15835 = vmatprep.mubr.bf16.mxu0 %v9987_v14  ;;  %v19989_v0 = vsel %vm2441_vm3, %v11557_v25, %v11559_v10  ;;  %v11926_v5 = vrot.slane %v11088_v60, 1  ;;  %v10970_v51 = vor.u32 %v21255_v23, %v19716_v30 }
 0x5ec   :  { %21254 = vst [vmem:[#allocation35_spill] sm:$0xff] %v19989_v0  ;;  %9879 = vst [vmem:[#allocation2 + $0x98] sm:$0xff] %v19986_v24  ;;  %v11090_v49 = vor.u32 %v11088_v60, %v21130_v28  ;;  %v21128_v33 = vshll.u32 %v19986_v24, 16  ;;  %v10392_v4 = vor.u32 %v10391_v59, %v10388_v62  ;;  %v10239_v43 = vrot.slane %v10237_v38, 7 }
 0x5ed   :  { %v19999_v20 = vsel %vm2722_vm4, %v11922_v26, %v11926_v5  ;;  %v11930_v25 = vor.u32 %v11926_v5, %v19978_v31  ;;  %v21129_v14 = vshrl.u32 %v19986_v24, 16  ;;  %v10971_v62 = vsel %vm418_vm14, %v10963_v21, %v10970_v51 }
 0x5ee   :  { %v20004_v0 = vsel %vm1141_vm13, %v10383_v35, %v10392_v4  ;;  %v20007_v60 = vsel %vm418_vm14, %v11079_v34, %v11090_v49  ;;  %v11942_v59 = vrot.slane %v21128_v33, 1  ;;  %v10240_v38 = vor.u32 %v10239_v43, %v10236_v19  ;;  %v21256_v33 = vld [vmem:[#allocation6_spill] sm:$0xff] }
 0x5f0   :  { %v11946_v47 = vor.u32 %v11942_v59, %v21129_v14  ;;  %v10249_v21 = vsel %vm1141_vm13, %v10240_v38, %v19748_v46 }
 0x5f1   :  { %v20013_v30 = vld [vmem:[#allocation2 + $0x90] sm:$0xff] }
 0x5f2   :  { %v9898_v26 = vld [vmem:[#allocation2 + $0x90] sm:$0x7f]  ;;  %15939 = vmatprep.mubr.bf16.mxu1 %v20013_v30  ;;  %v11096_v5 = vshll.u32 %v20013_v30, 16  ;;  %v11561_v27 = vrot.slane %v20013_v30, 1  ;;  %v20023_v14 = vsel %vm2722_vm4, %v11946_v47, %v21256_v33  ;;  %v11093_v19 = vshrl.u32 %v20013_v30, 16 }
 0x5f3   :  { %v9988_v35 = vrot.slane %v9898_v26, 7  ;;  %v10395_v34 = vshrl.u32 %v9898_v26, 16  ;;  %15940 = vmatmul.mubr.bf16.gmra.mrb[176].mxu1 %v19986_v24  ;;  %v10398_v49 = vshll.u32 %v9898_v26, 16  ;;  %v21257_v33 = vrot.slane %v19986_v24, 1 }
 0x5f4   :  { %15959 = vmatprep.mubr.bf16.mxu1 %v10971_v62  ;;  %v11934_v51 = vrot.slane %v11096_v5, 1  ;;  %v20032_v23 = vsel %vm2441_vm3, %v11559_v10, %v11561_v27  ;;  %v16602_v10 = vld [vmem:[%s21081_s1 + $0x448] sm:$0xff]  }
 0x5f5   :  { %v9989_v43 = vsel %vm860_vm12, %v9986_v63, %v9988_v35  ;;  %v10397_v28 = vrot.slane %v10395_v34, 6  ;;  %v10400_v26 = vrot.slane %v10398_v49, 7  ;;  %v20037_v47 = vsel %vm2441_vm3, %v11561_v27, %v21257_v33 }
 0x5f6   :  { %15836 = vmatmul.mubr.bf16.gmra.mrb[140].mxu0 %v9989_v43  ;;  %v20040_v63 = vsel %vm2722_vm4, %v11930_v25, %v11934_v51  ;;  %v11938_v35 = vor.u32 %v11934_v51, %v11093_v19 }
 0x5f7   :  { %15855 = vmatprep.mubr.bf16.mxu0 %v10249_v21  ;;  %v10401_v62 = vor.u32 %v10400_v26, %v10397_v28  ;;  %v21274_v21 = vld [vmem:[#allocation20_spill] sm:$0xff]  ;;  %v21275_v26 = vld [vmem:[#allocation22_spill] sm:$0xff] }
 0x5f8   :  { %v20045_v34 = vsel %vm2722_vm4, %v11938_v35, %v11942_v59  ;;  %v21279_v35 = vld [vmem:[#allocation34_spill] sm:$0xff] }
 0x5f9   :  { %v20048_v46 = vsel %vm1141_vm13, %v10392_v4, %v10401_v62  ;;  %v16603_v4 = vld [vmem:[%s21081_s1 + $0x450] sm:$0xff]  }
 0x5fa   :  { %v21280_v62 = vld [vmem:[#allocation15_spill] sm:$0xff] }
 0x5fb   :  { %15960 = vmatmul.mubr.bf16.vlgmr.msra.gmra.mrb[144].mxu1 %v19732_v55  ;;  %v16604_v55 = vld [vmem:[%s21081_s1 + $0x458] sm:$0xff]  }
 0x5fc   :  { %15963 = vmatprep.mubr.bf16.mxu1 %v19737_v36  ;;  %v16605_v36 = vld [vmem:[%s21081_s1 + $0x460] sm:$0xff]  }
 0x5fe   :  { %15856 = vmatmul.mubr.bf16.vlgmr.msra.gmra.mrb[108].mxu0 %v19766_v8  ;;  %v16606_v8 = vld [vmem:[%s21081_s1 + $0x468] sm:$0xff]  }
 0x5ff   :  { %15996 = vmatpush3.bf16.msra.mxu0 %v19836_v42  ;;  %15859 = vmatprep.mubr.bf16.mxu0 %v19770_v7  ;;  %v16607_v7 = vld [vmem:[%s21081_s1 + $0x470] sm:$0xff]   ;;  %v21259_v42 = vshrl.u32 %v19986_v24, 16 }
 0x600   :  { %15997 = vmatprep.subr.bf16.mxu0 %v16602_v10 }
 0x603   :  { %15998 = vmatpush3.bf16.msra.mxu0 %v16602_v10  ;;  %15964 = vmatmul.mubr.bf16.gmra.mrb[148].mxu1 %v19787_v52  ;;  %v16608_v52 = vld [vmem:[%s21081_s1 + $0x478] sm:$0xff]   ;;  %v21282_v10 = vld [vmem:[#allocation21_spill] sm:$0xff] }
 0x604   :  { %15999 = vmatprep.subr.bf16.mxu0 %v16603_v4  ;;  %15967 = vmatprep.mubr.bf16.mxu1 %v19821_v53 }
 0x606   :  { %15860 = vmatmul.mubr.bf16.gmra.mrb[112].mxu0 %v19795_v54  ;;  %v16609_v54 = vld [vmem:[%s21081_s1 + $0x400] sm:$0xff]  }
 0x607   :  { %15863 = vmatprep.mubr.bf16.mxu0 %v19798_v13  ;;  %16000 = vmatpush3.bf16.msra.mxu0 %v16603_v4  ;;  %v11095_v13 = vrot.slane %v11093_v19, 7  ;;  %v21283_v4 = vld [vmem:[#allocation25_spill] sm:$0xff] }
 0x608   :  { %16001 = vmatprep.subr.bf16.mxu0 %v16604_v55 }
 0x609   :  { %v11098_v53 = vor.u32 %v11096_v5, %v11095_v13  ;;  %v16628_v5 = vld [vmem:[#allocation2 + $0xa8] sm:$0x1] }
 0x60a   :  { %v11567_v49 = vrot.slane %v16628_v5, 1 }
 0x60b   :  { %16002 = vmatpush3.bf16.msra.mxu0 %v16604_v55  ;;  %15968 = vmatmul.mubr.bf16.gmra.mrb[152].mxu1 %v19850_v29  ;;  %v21260_v29 = vshll.u32 %v19986_v24, 16  ;;  %v21276_v24 = vld [vmem:[#allocation24_spill] sm:$0xff]  ;;  %v21284_v55 = vld [vmem:[#allocation29_spill] sm:$0xff] }
 0x60c   :  { %16003 = vmatprep.subr.bf16.mxu0 %v16605_v36  ;;  %15971 = vmatprep.mubr.bf16.mxu1 %v19861_v37  ;;  %v11478_v37 = vld [vmem:[#allocation2 + $0x18] sm:$0xfe] }
 0x60e   :  { %15864 = vmatmul.mubr.bf16.gmra.mrb[116].mxu0 %v19824_v41  ;;  %v21258_v41 = vrot.slane %v19978_v31, 7  ;;  %v11459_v31 = vld [vmem:[#allocation2 + $0x18] sm:$0xff] }
 0x60f   :  { %15867 = vmatprep.mubr.bf16.mxu0 %v19847_v6  ;;  %16004 = vmatpush3.bf16.msra.mxu0 %v16605_v36  ;;  %v11103_v6 = vrot.slane %v21259_v42, 7  ;;  %v11815_v28 = vshll.u32 %v11459_v31, 16  ;;  %v11813_v38 = vshrl.u32 %v11459_v31, 16  ;;  %v21285_v36 = vld [vmem:[#allocation33_spill] sm:$0xff] }
 0x610   :  { %16005 = vmatprep.subr.bf16.mxu0 %v16606_v8 }
 0x611   :  { %v11817_v30 = vrot.slane %v11815_v28, 1 }
 0x613   :  { %16006 = vmatpush3.bf16.msra.mxu0 %v16606_v8  ;;  %15972 = vmatmul.mubr.bf16.gmra.mrb[156].mxu1 %v19878_v3  ;;  %v21261_v3 = vrot.slane %v19687_v22, 1  ;;  %v16612_v22 = vld [vmem:[%s21081_s1 + $0x418] sm:$0xff]   ;;  %v11818_v27 = vor.u32 %v11817_v30, %v11813_v38  ;;  %v21286_v8 = vld [vmem:[#allocation7_spill] sm:$0xff] }
 0x614   :  { %16007 = vmatprep.subr.bf16.mxu0 %v16607_v7  ;;  %15975 = vmatprep.mubr.bf16.mxu1 %v19889_v45 }
 0x616   :  { %15868 = vmatmul.mubr.bf16.gmra.mrb[120].mxu0 %v19864_v16 }
 0x617   :  { %15871 = vmatprep.mubr.bf16.mxu0 %v19875_v2  ;;  %16008 = vmatpush3.bf16.msra.mxu0 %v16607_v7  ;;  %v11532_v2 = vrot.slane %v11478_v37, 1 }
 0x618   :  { %16009 = vmatprep.subr.bf16.mxu0 %v16608_v52 }
 0x619   :  { %v11534_v45 = vsel %vm2441_vm3, %v11532_v2, %v21261_v3 }
 0x61b   :  { %16010 = vmatpush3.bf16.msra.mxu0 %v16608_v52  ;;  %15976 = vmatmul.mubr.bf16.gmra.mrb[160].mxu1 %v19906_v56  ;;  %v21262_v56 = vld [vmem:[#allocation28_spill] sm:$0xff] }
 0x61c   :  { %16047 = vmatprep.subr.bf16.mxu0 %v16609_v54  ;;  %15979 = vmatprep.mubr.bf16.mxu1 %v19917_v12  ;;  %v21263_v12 = vld [vmem:[#allocation32_spill] sm:$0xff] }
 0x61e   :  { %15872 = vmatmul.mubr.bf16.gmra.mrb[124].mxu0 %v19892_v39  ;;  %v16610_v39 = vld [vmem:[%s21081_s1 + $0x408] sm:$0xff]  }
 0x61f   :  { %15875 = vmatprep.mubr.bf16.mxu0 %v19903_v17  ;;  %v16611_v17 = vld [vmem:[%s21081_s1 + $0x410] sm:$0xff]  }
 0x623   :  { %15980 = vmatmul.mubr.bf16.gmra.mrb[164].mxu1 %v19934_v32  ;;  %v21265_v32 = vld [vmem:[#allocation16_spill] sm:$0xff] }
 0x624   :  { %15983 = vmatprep.mubr.bf16.mxu1 %v19945_v44  ;;  %v21266_v44 = vld [vmem:[#allocation19_spill] sm:$0xff] }
 0x626   :  { %15876 = vmatmul.mubr.bf16.gmra.mrb[128].mxu0 %v19920_v1  ;;  %v21264_v1 = vld [vmem:[#allocation5_spill] sm:$0xff] }
 0x627   :  { %15879 = vmatprep.mubr.bf16.mxu0 %v19931_v15  ;;  %v11099_v15 = vsel %vm418_vm14, %v21258_v41, %v11098_v53 }
 0x62b   :  { %15984 = vmatmul.mubr.bf16.gmra.mrb[168].mxu1 %v19962_v58  ;;  %v21269_v58 = vld [vmem:[#allocation31_spill] sm:$0xff] }
 0x62c   :  { %15987 = vmatprep.mubr.bf16.mxu1 %v19973_v11  ;;  %v21268_v11 = vld [vmem:[#allocation27_spill] sm:$0xff] }
 0x62e   :  { %15880 = vmatmul.mubr.bf16.gmra.mrb[132].mxu0 %v19948_v40  ;;  %v21267_v40 = vld [vmem:[#allocation23_spill] sm:$0xff] }
 0x62f   :  { %15883 = vmatprep.mubr.bf16.mxu0 %v19959_v9  ;;  %v11106_v9 = vor.u32 %v21260_v29, %v11103_v6 }
 0x631   :  { %v11107_v16 = vsel %vm418_vm14, %v11095_v13, %v11106_v9 }
 0x633   :  { %15988 = vmatmul.mubr.bf16.gmra.mrb[172].mxu1 %v20007_v60  ;;  %v21271_v60 = vmov %v21257_v33  ;;  %v21277_v33 = vld [vmem:[#allocation26_spill] sm:$0xff] }
 0x634   :  { %15991 = vmatprep.mubr.bf16.mxu1 %v11099_v15 }
 0x636   :  { %15884 = vmatmul.mubr.bf16.gmra.mrb[136].mxu0 %v19976_v48  ;;  %v21270_v48 = vld [vmem:[#allocation35_spill] sm:$0xff] }
 0x637   :  { %15887 = vmatprep.mubr.bf16.mxu0 %v20004_v0  ;;  %v16627_v0 = vld [vmem:[#allocation2 + $0xa0] sm:$0xff] }
 0x638   :  { %v11565_v25 = vrot.slane %v16627_v0, 1 }
 0x63a   :  { %v11566_v59 = vsel %vm2441_vm3, %v21271_v60, %v11565_v25  ;;  %v11568_v19 = vsel %vm2441_vm3, %v11565_v25, %v11567_v49 }
 0x63b   :  { %15992 = vmatmul.mubr.bf16.gmra.mrb[176].mxu1 %v11107_v16 }
 0x63e   :  { %15888 = vmatmul.mubr.bf16.gmra.mrb[140].mxu0 %v20048_v46  ;;  %v21281_v46 = vld [vmem:[#allocation17_spill] sm:$0xff] }
 0x63f   :  { %16011 = vmatprep.mubr.bf16.mxu0 %v11534_v45 }
 0x646   :  { %16012 = vmatmul.mubr.bf16.vlgmr.msra.gmra.mrb[144].mxu0 %v19792_v61  ;;  %v16613_v61 = vld [vmem:[%s21081_s1 + $0x420] sm:$0xff]  }
 0x647   :  { %16048 = vmatpush3.bf16.msra.mxu0 %v16609_v54  ;;  %16015 = vmatprep.mubr.bf16.mxu0 %v19806_v50  ;;  %v16614_v50 = vld [vmem:[%s21081_s1 + $0x428] sm:$0xff]  }
 0x648   :  { %16049 = vmatprep.subr.bf16.mxu0 %v16610_v39 }
 0x64b   :  { %16050 = vmatpush3.bf16.msra.mxu0 %v16610_v39 }
 0x64c   :  { %16051 = vmatprep.subr.bf16.mxu0 %v16611_v17 }
 0x64e   :  { %16016 = vmatmul.mubr.bf16.gmra.mrb[148].mxu0 %v19840_v57  ;;  %v16615_v57 = vld [vmem:[%s21081_s1 + $0x430] sm:$0xff]  }
 0x64f   :  { %16019 = vmatprep.mubr.bf16.mxu0 %v19854_v18  ;;  %16052 = vmatpush3.bf16.msra.mxu0 %v16611_v17  ;;  %v16616_v18 = vld [vmem:[%s21081_s1 + $0x438] sm:$0xff]  }
 0x650   :  { %16053 = vmatprep.subr.bf16.mxu0 %v16612_v22 }
 0x653   :  { %16054 = vmatpush3.bf16.msra.mxu0 %v16612_v22 }
 0x654   :  { %16055 = vmatprep.subr.bf16.mxu0 %v16613_v61 }
 0x656   :  { %16020 = vmatmul.mubr.bf16.gmra.mrb[152].mxu0 %v21262_v56 }
 0x657   :  { %16023 = vmatprep.mubr.bf16.mxu0 %v21263_v12  ;;  %16056 = vmatpush3.bf16.msra.mxu0 %v16613_v61 }
 0x658   :  { %16057 = vmatprep.subr.bf16.mxu0 %v16614_v50 }
 0x65b   :  { %16058 = vmatpush3.bf16.msra.mxu0 %v16614_v50 }
 0x65c   :  { %16059 = vmatprep.subr.bf16.mxu0 %v16615_v57 }
 0x65e   :  { %16024 = vmatmul.mubr.bf16.gmra.mrb[156].mxu0 %v21264_v1 }
 0x65f   :  { %16027 = vmatprep.mubr.bf16.mxu0 %v21265_v32  ;;  %16060 = vmatpush3.bf16.msra.mxu0 %v16615_v57 }
 0x660   :  { %16061 = vmatprep.subr.bf16.mxu0 %v16616_v18 }
 0x663   :  { %16062 = vmatpush3.bf16.msra.mxu0 %v16616_v18 }
 0x666   :  { %16028 = vmatmul.mubr.bf16.gmra.mrb[160].mxu0 %v21266_v44 }
 0x667   :  { %16031 = vmatprep.mubr.bf16.mxu0 %v21267_v40 }
 0x66e   :  { %16032 = vmatmul.mubr.bf16.gmra.mrb[164].mxu0 %v21268_v11 }
 0x66f   :  { %16035 = vmatprep.mubr.bf16.mxu0 %v21269_v58 }
 0x676   :  { %16036 = vmatmul.mubr.bf16.gmra.mrb[168].mxu0 %v21270_v48 }
 0x677   :  { %16039 = vmatprep.mubr.bf16.mxu0 %v20032_v23  ;;  %v21272_v23 = vld [vmem:[#allocation18_spill] sm:$0xff] }
 0x678   :  { %v21273_v43 = vrot.slane %v21272_v23, 1 }
 0x67a   :  { %v11823_v51 = vsel %vm2722_vm4, %v11818_v27, %v21273_v43 }
 0x67e   :  { %16040 = vmatmul.mubr.bf16.gmra.mrb[172].mxu0 %v20037_v47  ;;  %v21278_v47 = vld [vmem:[#allocation30_spill] sm:$0xff] }
 0x67f   :  { %16043 = vmatprep.mubr.bf16.mxu0 %v11566_v59 }
 0x686   :  { %16044 = vmatmul.mubr.bf16.gmra.mrb[176].mxu0 %v11568_v19 }
 0x687   :  { %16063 = vmatprep.mubr.bf16.mxu0 %v11823_v51 }
 0x68e   :  { %16064 = vmatmul.mubr.bf16.vlgmr.msra.gmra.mrb[144].mxu0 %v21274_v21 }
 0x68f   :  { %16067 = vmatprep.mubr.bf16.mxu0 %v21275_v26 }
 0x696   :  { %16068 = vmatmul.mubr.bf16.gmra.mrb[148].mxu0 %v21276_v24 }
 0x697   :  { %16071 = vmatprep.mubr.bf16.mxu0 %v21277_v33 }
 0x69e   :  { %16072 = vmatmul.mubr.bf16.gmra.mrb[152].mxu0 %v21278_v47 }
 0x69f   :  { %16075 = vmatprep.mubr.bf16.mxu0 %v21279_v35 }
 0x6a6   :  { %16076 = vmatmul.mubr.bf16.gmra.mrb[156].mxu0 %v21280_v62 }
 0x6a7   :  { %16079 = vmatprep.mubr.bf16.mxu0 %v21281_v46 }
 0x6ae   :  { %16080 = vmatmul.mubr.bf16.gmra.mrb[160].mxu0 %v21282_v10 }
 0x6af   :  { %16083 = vmatprep.mubr.bf16.mxu0 %v21283_v4 }
 0x6b6   :  { %16084 = vmatmul.mubr.bf16.gmra.mrb[164].mxu0 %v21284_v55 }
 0x6b7   :  { %16087 = vmatprep.mubr.bf16.mxu0 %v21285_v36 }
 0x6be   :  { %16088 = vmatmul.mubr.bf16.gmra.mrb[168].mxu0 %v19999_v20 }
 0x6bf   :  { %16091 = vmatprep.mubr.bf16.mxu0 %v20040_v63 }
 0x6c6   :  { %16092 = vmatmul.mubr.bf16.gmra.mrb[172].mxu0 %v20045_v34 }
 0x6c7   :  { %16095 = vmatprep.mubr.bf16.mxu0 %v20023_v14 }
 0x6ce   :  { %16096 = vmatmul.mubr.bf16.gmra.mrb[176].mxu0 %v21286_v8  ;;  %v15961_v7 = vpop.f32.mrb[144].mxu1 }
 0x6cf   :  { %v11208_v52 = vpop.f32.mrb[145].mxu1 }
 0x6d0   :  { %v15962_v13 = vpop.f32.mrb[146].mxu1 }
 0x6d1   :  { %v15857_v54 = vpop.f32.mrb[108].mxu0  ;;  %v11211_v41 = vpop.f32.mrb[147].mxu1 }
 0x6d2   :  { %10648 = vst.msk [vmem:[#allocation4 + $0x10] sm:$0xff] %vm396_vm5, %v15857_v54  ;;  %v10503_v53 = vpop.f32.mrb[109].mxu0 }
 0x6d3   :  { %10646 = vst.msk [vmem:[#allocation4] sm:$0xff] %vm396_vm5, %v10503_v53  ;;  %v15858_v15 = vpop.f32.mrb[110].mxu0 }
 0x6d4   :  { %10649 = vst.msk [vmem:[#allocation4 + $0x18] sm:$0xff] %vm396_vm5, %v15858_v15  ;;  %v10506_v20 = vpop.f32.mrb[111].mxu0 }
 0x6d5   :  { %10647 = vst.msk [vmem:[#allocation4 + $0x8] sm:$0xff] %vm396_vm5, %v10506_v20 }
 0x6d6   :  { %v15965_v63 = vpop.f32.mrb[148].mxu1 }
 0x6d7   :  { %v11224_v14 = vpop.f32.mrb[149].mxu1 }
 0x6d8   :  { %v15966_v6 = vpop.f32.mrb[150].mxu1 }
 0x6d9   :  { %v11353_v34 = vld [vmem:[#allocation4 + $0x10] sm:$0xff]  ;;  %v15861_v42 = vpop.f32.mrb[112].mxu0  ;;  %v11227_v16 = vpop.f32.mrb[151].mxu1 }
 0x6da   :  { %v11389_v29 = vadd.f32 %v15961_v7, %v11353_v34  ;;  %v11351_v9 = vld [vmem:[#allocation4] sm:$0xff]  ;;  %10652 = vst.msk [vmem:[#allocation4 + $0x30] sm:$0xff] %vm396_vm5, %v15861_v42  ;;  %v10519_v37 = vpop.f32.mrb[113].mxu0 }
 0x6db   :  { %v11387_v2 = vadd.f32 %v11351_v9, %v11208_v52  ;;  %v11354_v3 = vld [vmem:[#allocation4 + $0x18] sm:$0xff]  ;;  %10650 = vst.msk [vmem:[#allocation4 + $0x20] sm:$0xff] %vm396_vm5, %v10519_v37  ;;  %v15862_v45 = vpop.f32.mrb[114].mxu0 }
 0x6dc   :  { %11425 = vst.msk [vmem:[#allocation4 + $0x10] sm:$0xff] %vm396_vm5, %v11389_v29  ;;  %v11390_v39 = vadd.f32 %v15962_v13, %v11354_v3  ;;  %v11352_v17 = vld [vmem:[#allocation4 + $0x8] sm:$0xff]  ;;  %10653 = vst.msk [vmem:[#allocation4 + $0x38] sm:$0xff] %vm396_vm5, %v15862_v45  ;;  %v10522_v22 = vpop.f32.mrb[115].mxu0 }
 0x6dd   :  { %11423 = vst.msk [vmem:[#allocation4] sm:$0xff] %vm396_vm5, %v11387_v2  ;;  %v11388_v61 = vadd.f32 %v11352_v17, %v11211_v41  ;;  %10651 = vst.msk [vmem:[#allocation4 + $0x28] sm:$0xff] %vm396_vm5, %v10522_v22 }
 0x6de   :  { %11426 = vst.msk [vmem:[#allocation4 + $0x18] sm:$0xff] %vm396_vm5, %v11390_v39  ;;  %v15969_v50 = vpop.f32.mrb[152].mxu1 }
 0x6df   :  { %11424 = vst.msk [vmem:[#allocation4 + $0x8] sm:$0xff] %vm396_vm5, %v11388_v61  ;;  %v11240_v56 = vpop.f32.mrb[153].mxu1 }
 0x6e0   :  { %v15970_v18 = vpop.f32.mrb[154].mxu1 }
 0x6e1   :  { %v11357_v12 = vld [vmem:[#allocation4 + $0x30] sm:$0xff]  ;;  %v15865_v57 = vpop.f32.mrb[116].mxu0  ;;  %v11243_v40 = vpop.f32.mrb[155].mxu1 }
 0x6e2   :  { %v11393_v1 = vadd.f32 %v15965_v63, %v11357_v12  ;;  %v11355_v32 = vld [vmem:[#allocation4 + $0x20] sm:$0xff]  ;;  %10656 = vst.msk [vmem:[#allocation4 + $0x50] sm:$0xff] %vm396_vm5, %v15865_v57  ;;  %v10535_v44 = vpop.f32.mrb[117].mxu0 }
 0x6e3   :  { %v11391_v11 = vadd.f32 %v11355_v32, %v11224_v14  ;;  %v11358_v58 = vld [vmem:[#allocation4 + $0x38] sm:$0xff]  ;;  %10654 = vst.msk [vmem:[#allocation4 + $0x40] sm:$0xff] %vm396_vm5, %v10535_v44  ;;  %v15866_v48 = vpop.f32.mrb[118].mxu0 }
 0x6e4   :  { %11429 = vst.msk [vmem:[#allocation4 + $0x30] sm:$0xff] %vm396_vm5, %v11393_v1  ;;  %v11394_v31 = vadd.f32 %v15966_v6, %v11358_v58  ;;  %v11356_v28 = vld [vmem:[#allocation4 + $0x28] sm:$0xff]  ;;  %10657 = vst.msk [vmem:[#allocation4 + $0x58] sm:$0xff] %vm396_vm5, %v15866_v48  ;;  %v10538_v0 = vpop.f32.mrb[119].mxu0 }
 0x6e5   :  { %11427 = vst.msk [vmem:[#allocation4 + $0x20] sm:$0xff] %vm396_vm5, %v11391_v11  ;;  %v11392_v25 = vadd.f32 %v11356_v28, %v11227_v16  ;;  %10655 = vst.msk [vmem:[#allocation4 + $0x48] sm:$0xff] %vm396_vm5, %v10538_v0 }
 0x6e6   :  { %11430 = vst.msk [vmem:[#allocation4 + $0x38] sm:$0xff] %vm396_vm5, %v11394_v31  ;;  %v15973_v60 = vpop.f32.mrb[156].mxu1 }
 0x6e7   :  { %11428 = vst.msk [vmem:[#allocation4 + $0x28] sm:$0xff] %vm396_vm5, %v11392_v25  ;;  %v11256_v59 = vpop.f32.mrb[157].mxu1 }
 0x6e8   :  { %v15974_v5 = vpop.f32.mrb[158].mxu1 }
 0x6e9   :  { %v11361_v30 = vld [vmem:[#allocation4 + $0x50] sm:$0xff]  ;;  %v15869_v38 = vpop.f32.mrb[120].mxu0  ;;  %v11259_v23 = vpop.f32.mrb[159].mxu1 }
 0x6ea   :  { %v11397_v49 = vadd.f32 %v15969_v50, %v11361_v30  ;;  %v11359_v27 = vld [vmem:[#allocation4 + $0x40] sm:$0xff]  ;;  %10660 = vst.msk [vmem:[#allocation4 + $0x70] sm:$0xff] %vm396_vm5, %v15869_v38  ;;  %v10551_v19 = vpop.f32.mrb[121].mxu0 }
 0x6eb   :  { %v11395_v43 = vadd.f32 %v11359_v27, %v11240_v56  ;;  %v11362_v51 = vld [vmem:[#allocation4 + $0x58] sm:$0xff]  ;;  %10658 = vst.msk [vmem:[#allocation4 + $0x60] sm:$0xff] %vm396_vm5, %v10551_v19  ;;  %v15870_v21 = vpop.f32.mrb[122].mxu0 }
 0x6ec   :  { %11433 = vst.msk [vmem:[#allocation4 + $0x50] sm:$0xff] %vm396_vm5, %v11397_v49  ;;  %v11398_v26 = vadd.f32 %v15970_v18, %v11362_v51  ;;  %v11360_v24 = vld [vmem:[#allocation4 + $0x48] sm:$0xff]  ;;  %10661 = vst.msk [vmem:[#allocation4 + $0x78] sm:$0xff] %vm396_vm5, %v15870_v21  ;;  %v10554_v33 = vpop.f32.mrb[123].mxu0 }
 0x6ed   :  { %11431 = vst.msk [vmem:[#allocation4 + $0x40] sm:$0xff] %vm396_vm5, %v11395_v43  ;;  %v11396_v47 = vadd.f32 %v11360_v24, %v11243_v40  ;;  %10659 = vst.msk [vmem:[#allocation4 + $0x68] sm:$0xff] %vm396_vm5, %v10554_v33 }
 0x6ee   :  { %11434 = vst.msk [vmem:[#allocation4 + $0x58] sm:$0xff] %vm396_vm5, %v11398_v26  ;;  %v15977_v35 = vpop.f32.mrb[160].mxu1 }
 0x6ef   :  { %11432 = vst.msk [vmem:[#allocation4 + $0x48] sm:$0xff] %vm396_vm5, %v11396_v47  ;;  %v11272_v62 = vpop.f32.mrb[161].mxu1 }
 0x6f0   :  { %v15978_v4 = vpop.f32.mrb[162].mxu1 }
 0x6f1   :  { %v11365_v46 = vld [vmem:[#allocation4 + $0x70] sm:$0xff]  ;;  %v15873_v10 = vpop.f32.mrb[124].mxu0  ;;  %v11275_v7 = vpop.f32.mrb[163].mxu1 }
 0x6f2   :  { %v11401_v55 = vadd.f32 %v15973_v60, %v11365_v46  ;;  %v11363_v36 = vld [vmem:[#allocation4 + $0x60] sm:$0xff]  ;;  %10664 = vst.msk [vmem:[#allocation4 + $0x90] sm:$0xff] %vm396_vm5, %v15873_v10  ;;  %v10567_v8 = vpop.f32.mrb[125].mxu0 }
 0x6f3   :  { %v11399_v52 = vadd.f32 %v11363_v36, %v11256_v59  ;;  %v11366_v54 = vld [vmem:[#allocation4 + $0x78] sm:$0xff]  ;;  %10662 = vst.msk [vmem:[#allocation4 + $0x80] sm:$0xff] %vm396_vm5, %v10567_v8  ;;  %v15874_v13 = vpop.f32.mrb[126].mxu0 }
 0x6f4   :  { %11437 = vst.msk [vmem:[#allocation4 + $0x70] sm:$0xff] %vm396_vm5, %v11401_v55  ;;  %v11402_v53 = vadd.f32 %v15974_v5, %v11366_v54  ;;  %v11364_v41 = vld [vmem:[#allocation4 + $0x68] sm:$0xff]  ;;  %10665 = vst.msk [vmem:[#allocation4 + $0x98] sm:$0xff] %vm396_vm5, %v15874_v13  ;;  %v10570_v15 = vpop.f32.mrb[127].mxu0 }
 0x6f5   :  { %11435 = vst.msk [vmem:[#allocation4 + $0x60] sm:$0xff] %vm396_vm5, %v11399_v52  ;;  %v11400_v20 = vadd.f32 %v11364_v41, %v11259_v23  ;;  %10663 = vst.msk [vmem:[#allocation4 + $0x88] sm:$0xff] %vm396_vm5, %v10570_v15 }
 0x6f6   :  { %11438 = vst.msk [vmem:[#allocation4 + $0x78] sm:$0xff] %vm396_vm5, %v11402_v53  ;;  %v15981_v63 = vpop.f32.mrb[164].mxu1 }
 0x6f7   :  { %11436 = vst.msk [vmem:[#allocation4 + $0x68] sm:$0xff] %vm396_vm5, %v11400_v20  ;;  %v11288_v14 = vpop.f32.mrb[165].mxu1 }
 0x6f8   :  { %v15982_v6 = vpop.f32.mrb[166].mxu1 }
 0x6f9   :  { %v11369_v34 = vld [vmem:[#allocation4 + $0x90] sm:$0xff]  ;;  %v15877_v42 = vpop.f32.mrb[128].mxu0  ;;  %v11291_v16 = vpop.f32.mrb[167].mxu1 }
 0x6fa   :  { %v11405_v29 = vadd.f32 %v15977_v35, %v11369_v34  ;;  %v11367_v9 = vld [vmem:[#allocation4 + $0x80] sm:$0xff]  ;;  %10668 = vst.msk [vmem:[#allocation4 + $0xb0] sm:$0xff] %vm396_vm5, %v15877_v42  ;;  %v10583_v37 = vpop.f32.mrb[129].mxu0 }
 0x6fb   :  { %v11403_v2 = vadd.f32 %v11367_v9, %v11272_v62  ;;  %v11370_v3 = vld [vmem:[#allocation4 + $0x98] sm:$0xff]  ;;  %10666 = vst.msk [vmem:[#allocation4 + $0xa0] sm:$0xff] %vm396_vm5, %v10583_v37  ;;  %v15878_v45 = vpop.f32.mrb[130].mxu0 }
 0x6fc   :  { %11441 = vst.msk [vmem:[#allocation4 + $0x90] sm:$0xff] %vm396_vm5, %v11405_v29  ;;  %v11406_v39 = vadd.f32 %v15978_v4, %v11370_v3  ;;  %v11368_v17 = vld [vmem:[#allocation4 + $0x88] sm:$0xff]  ;;  %10669 = vst.msk [vmem:[#allocation4 + $0xb8] sm:$0xff] %vm396_vm5, %v15878_v45  ;;  %v10586_v22 = vpop.f32.mrb[131].mxu0 }
 0x6fd   :  { %11439 = vst.msk [vmem:[#allocation4 + $0x80] sm:$0xff] %vm396_vm5, %v11403_v2  ;;  %v11404_v61 = vadd.f32 %v11368_v17, %v11275_v7  ;;  %10667 = vst.msk [vmem:[#allocation4 + $0xa8] sm:$0xff] %vm396_vm5, %v10586_v22  ;;  %v12205_v2 = vld [vmem:[#allocation4 + $0x10] sm:$0xff] }
 0x6fe   :  { %11442 = vst.msk [vmem:[#allocation4 + $0x98] sm:$0xff] %vm396_vm5, %v11406_v39  ;;  %v15985_v50 = vpop.f32.mrb[168].mxu1  ;;  %v12203_v39 = vld [vmem:[#allocation4] sm:$0xff] }
 0x6ff   :  { %11440 = vst.msk [vmem:[#allocation4 + $0x88] sm:$0xff] %vm396_vm5, %v11404_v61  ;;  %v11304_v56 = vpop.f32.mrb[169].mxu1  ;;  %v12206_v61 = vld [vmem:[#allocation4 + $0x18] sm:$0xff] }
 0x700   :  { %v15986_v18 = vpop.f32.mrb[170].mxu1 }
 0x701   :  { %v11373_v12 = vld [vmem:[#allocation4 + $0xb0] sm:$0xff]  ;;  %v15881_v57 = vpop.f32.mrb[132].mxu0  ;;  %v11307_v40 = vpop.f32.mrb[171].mxu1 }
 0x702   :  { %v11409_v1 = vadd.f32 %v15981_v63, %v11373_v12  ;;  %v11371_v32 = vld [vmem:[#allocation4 + $0xa0] sm:$0xff]  ;;  %10672 = vst.msk [vmem:[#allocation4 + $0xd0] sm:$0xff] %vm396_vm5, %v15881_v57  ;;  %v10599_v44 = vpop.f32.mrb[133].mxu0  ;;  %v12204_v12 = vld [vmem:[#allocation4 + $0x8] sm:$0xff] }
 0x703   :  { %v11407_v11 = vadd.f32 %v11371_v32, %v11288_v14  ;;  %v11374_v58 = vld [vmem:[#allocation4 + $0xb8] sm:$0xff]  ;;  %10670 = vst.msk [vmem:[#allocation4 + $0xc0] sm:$0xff] %vm396_vm5, %v10599_v44  ;;  %v15882_v48 = vpop.f32.mrb[134].mxu0  ;;  %v12209_v32 = vld [vmem:[#allocation4 + $0x30] sm:$0xff] }
 0x704   :  { %11445 = vst.msk [vmem:[#allocation4 + $0xb0] sm:$0xff] %vm396_vm5, %v11409_v1  ;;  %v11410_v31 = vadd.f32 %v15982_v6, %v11374_v58  ;;  %v11372_v28 = vld [vmem:[#allocation4 + $0xa8] sm:$0xff]  ;;  %10673 = vst.msk [vmem:[#allocation4 + $0xd8] sm:$0xff] %vm396_vm5, %v15882_v48  ;;  %v10602_v0 = vpop.f32.mrb[135].mxu0  ;;  %v12393_v48 = vld [vmem:[%s21083_s3 + $0x10] sm:$0xff] }
 0x705   :  { %11443 = vst.msk [vmem:[#allocation4 + $0xa0] sm:$0xff] %vm396_vm5, %v11407_v11  ;;  %v11408_v25 = vadd.f32 %v11372_v28, %v11291_v16  ;;  %10671 = vst.msk [vmem:[#allocation4 + $0xc8] sm:$0xff] %vm396_vm5, %v10602_v0  ;;  %v12207_v11 = vld [vmem:[#allocation4 + $0x20] sm:$0xff]  ;;  %v12210_v0 = vld [vmem:[#allocation4 + $0x38] sm:$0xff] }
 0x706   :  { %11446 = vst.msk [vmem:[#allocation4 + $0xb8] sm:$0xff] %vm396_vm5, %v11410_v31  ;;  %v15989_v60 = vpop.f32.mrb[172].mxu1 }
 0x707   :  { %11444 = vst.msk [vmem:[#allocation4 + $0xa8] sm:$0xff] %vm396_vm5, %v11408_v25  ;;  %v11320_v59 = vpop.f32.mrb[173].mxu1 }
 0x708   :  { %v15990_v5 = vpop.f32.mrb[174].mxu1 }
 0x709   :  { %v11377_v30 = vld [vmem:[#allocation4 + $0xd0] sm:$0xff]  ;;  %v15885_v38 = vpop.f32.mrb[136].mxu0  ;;  %v11323_v23 = vpop.f32.mrb[175].mxu1 }
 0x70a   :  { %v11413_v49 = vadd.f32 %v15985_v50, %v11377_v30  ;;  %v11375_v27 = vld [vmem:[#allocation4 + $0xc0] sm:$0xff]  ;;  %10676 = vst.msk [vmem:[#allocation4 + $0xf0] sm:$0xff] %vm396_vm5, %v15885_v38  ;;  %v10615_v19 = vpop.f32.mrb[137].mxu0 }
 0x70b   :  { %v11411_v43 = vadd.f32 %v11375_v27, %v11304_v56  ;;  %v11378_v51 = vld [vmem:[#allocation4 + $0xd8] sm:$0xff]  ;;  %10674 = vst.msk [vmem:[#allocation4 + $0xe0] sm:$0xff] %vm396_vm5, %v10615_v19  ;;  %v15886_v21 = vpop.f32.mrb[138].mxu0 }
 0x70c   :  { %11449 = vst.msk [vmem:[#allocation4 + $0xd0] sm:$0xff] %vm396_vm5, %v11413_v49  ;;  %v11414_v26 = vadd.f32 %v15986_v18, %v11378_v51  ;;  %v11376_v24 = vld [vmem:[#allocation4 + $0xc8] sm:$0xff]  ;;  %10677 = vst.msk [vmem:[#allocation4 + $0xf8] sm:$0xff] %vm396_vm5, %v15886_v21  ;;  %v10618_v33 = vpop.f32.mrb[139].mxu0  ;;  %v20261_v18 = vld [vmem:[%s21082_s2 + $0x2] ss:$0 sm:$0xff] }
 0x70d   :  { %11447 = vst.msk [vmem:[#allocation4 + $0xc0] sm:$0xff] %vm396_vm5, %v11411_v43  ;;  %v11412_v47 = vadd.f32 %v11376_v24, %v11307_v40  ;;  %10675 = vst.msk [vmem:[#allocation4 + $0xe8] sm:$0xff] %vm396_vm5, %v10618_v33  ;;  %v12394_v19 = vld [vmem:[%s21083_s3 + $0x18] sm:$0xff] }
 0x70e   :  { %11450 = vst.msk [vmem:[#allocation4 + $0xd8] sm:$0xff] %vm396_vm5, %v11414_v26  ;;  %v15993_v35 = vpop.f32.mrb[176].mxu1  ;;  %v12392_v26 = vld [vmem:[%s21083_s3 + $0x8] sm:$0xff] }
 0x70f   :  { %11448 = vst.msk [vmem:[#allocation4 + $0xc8] sm:$0xff] %vm396_vm5, %v11412_v47  ;;  %v11336_v62 = vpop.f32.mrb[177].mxu1 }
 0x710   :  { %v15994_v4 = vpop.f32.mrb[178].mxu1 }
 0x711   :  { %v11381_v46 = vld [vmem:[#allocation4 + $0xf0] sm:$0xff]  ;;  %v15889_v10 = vpop.f32.mrb[140].mxu0  ;;  %v11339_v7 = vpop.f32.mrb[179].mxu1 }
 0x712   :  { %v11417_v55 = vadd.f32 %v15989_v60, %v11381_v46  ;;  %v11379_v36 = vld [vmem:[#allocation4 + $0xe0] sm:$0xff]  ;;  %10680 = vst.msk [vmem:[#allocation4 + $0x110] sm:$0xff] %vm396_vm5, %v15889_v10  ;;  %v10631_v8 = vpop.f32.mrb[141].mxu0 }
 0x713   :  { %v11415_v52 = vadd.f32 %v11379_v36, %v11320_v59  ;;  %v11382_v54 = vld [vmem:[#allocation4 + $0xf8] sm:$0xff]  ;;  %10678 = vst.msk [vmem:[#allocation4 + $0x100] sm:$0xff] %vm396_vm5, %v10631_v8  ;;  %v15890_v13 = vpop.f32.mrb[142].mxu0  ;;  %v12391_v59 = vld [vmem:[%s21083_s3] sm:$0xff] }
 0x714   :  { %11453 = vst.msk [vmem:[#allocation4 + $0xf0] sm:$0xff] %vm396_vm5, %v11417_v55  ;;  %v11418_v53 = vadd.f32 %v15990_v5, %v11382_v54  ;;  %v11380_v41 = vld [vmem:[#allocation4 + $0xe8] sm:$0xff]  ;;  %10681 = vst.msk [vmem:[#allocation4 + $0x118] sm:$0xff] %vm396_vm5, %v15890_v13  ;;  %v10634_v15 = vpop.f32.mrb[143].mxu0 }
 0x715   :  { %11451 = vst.msk [vmem:[#allocation4 + $0xe0] sm:$0xff] %vm396_vm5, %v11415_v52  ;;  %v11416_v20 = vadd.f32 %v11380_v41, %v11323_v23  ;;  %10679 = vst.msk [vmem:[#allocation4 + $0x108] sm:$0xff] %vm396_vm5, %v10634_v15  ;;  %v12208_v5 = vld [vmem:[#allocation4 + $0x28] sm:$0xff] }
 0x716   :  { %11454 = vst.msk [vmem:[#allocation4 + $0xf8] sm:$0xff] %vm396_vm5, %v11418_v53 }
 0x717   :  { %11452 = vst.msk [vmem:[#allocation4 + $0xe8] sm:$0xff] %vm396_vm5, %v11416_v20 }
 0x719   :  { %v11385_v63 = vld [vmem:[#allocation4 + $0x110] sm:$0xff] }
 0x71a   :  { %v11421_v14 = vadd.f32 %v15993_v35, %v11385_v63  ;;  %v11383_v34 = vld [vmem:[#allocation4 + $0x100] sm:$0xff]  ;;  %v21287_v35 = vld [vmem:[#allocation12_spill] sm:$0xff] }
 0x71b   :  { %v11419_v42 = vadd.f32 %v11383_v34, %v11336_v62  ;;  %v11386_v6 = vld [vmem:[#allocation4 + $0x118] sm:$0xff] }
 0x71c   :  { %11457 = vst.msk [vmem:[#allocation4 + $0x110] sm:$0xff] %vm396_vm5, %v11421_v14  ;;  %v11422_v29 = vadd.f32 %v15994_v4, %v11386_v6  ;;  %v11384_v9 = vld [vmem:[#allocation4 + $0x108] sm:$0xff] }
 0x71d   :  { %11455 = vst.msk [vmem:[#allocation4 + $0x100] sm:$0xff] %vm396_vm5, %v11419_v42  ;;  %v11420_v37 = vadd.f32 %v11384_v9, %v11339_v7 }
 0x71e   :  { %11458 = vst.msk [vmem:[#allocation4 + $0x118] sm:$0xff] %vm396_vm5, %v11422_v29 }
 0x71f   :  { %11456 = vst.msk [vmem:[#allocation4 + $0x108] sm:$0xff] %vm396_vm5, %v11420_v37 }
 0x761   :  { %v16065_v16 = vpop.f32.mrb[144].mxu0 }
 0x762   :  { %v12241_v3 = vadd.f32 %v16065_v16, %v12205_v2  ;;  %v12060_v45 = vpop.f32.mrb[145].mxu0 }
 0x763   :  { %v12239_v17 = vadd.f32 %v12203_v39, %v12060_v45  ;;  %v16066_v22 = vpop.f32.mrb[146].mxu0 }
 0x764   :  { %12277 = vst.msk [vmem:[#allocation4 + $0x10] sm:$0xff] %vm396_vm5, %v12241_v3  ;;  %v12242_v50 = vadd.f32 %v16066_v22, %v12206_v61  ;;  %v12063_v56 = vpop.f32.mrb[147].mxu0 }
 0x765   :  { %12275 = vst.msk [vmem:[#allocation4] sm:$0xff] %vm396_vm5, %v12239_v17  ;;  %v12240_v57 = vadd.f32 %v12204_v12, %v12063_v56 }
 0x766   :  { %12278 = vst.msk [vmem:[#allocation4 + $0x18] sm:$0xff] %vm396_vm5, %v12242_v50 }
 0x767   :  { %12276 = vst.msk [vmem:[#allocation4 + $0x8] sm:$0xff] %vm396_vm5, %v12240_v57 }
 0x769   :  { %v16069_v1 = vpop.f32.mrb[148].mxu0 }
 0x76a   :  { %v12245_v44 = vadd.f32 %v16069_v1, %v12209_v32  ;;  %v12076_v40 = vpop.f32.mrb[149].mxu0 }
 0x76b   :  { %v12313_v58 = vld [vmem:[#allocation4 + $0x10] sm:$0xff]  ;;  %v12243_v31 = vadd.f32 %v12207_v11, %v12076_v40  ;;  %v16070_v28 = vpop.f32.mrb[150].mxu0 }
 0x76c   :  { %v12357_v25 = vadd.f32 %v20261_v18, %v12313_v58  ;;  %v12311_v60 = vld [vmem:[#allocation4] sm:$0xff]  ;;  %12281 = vst.msk [vmem:[#allocation4 + $0x30] sm:$0xff] %vm396_vm5, %v12245_v44  ;;  %v12246_v30 = vadd.f32 %v16070_v28, %v12210_v0  ;;  %v12079_v38 = vpop.f32.mrb[151].mxu0 }
 0x76d   :  { %v12355_v49 = vadd.f32 %v20261_v18, %v12311_v60  ;;  %v12314_v27 = vld [vmem:[#allocation4 + $0x18] sm:$0xff]  ;;  %12279 = vst.msk [vmem:[#allocation4 + $0x20] sm:$0xff] %vm396_vm5, %v12243_v31  ;;  %v12244_v23 = vadd.f32 %v12208_v5, %v12079_v38 }
 0x76e   :  { %v12429_v43 = vsub.f32 %v12393_v48, %v12357_v25  ;;  %v12358_v51 = vadd.f32 %v20261_v18, %v12314_v27  ;;  %v12312_v21 = vld [vmem:[#allocation4 + $0x8] sm:$0xff]  ;;  %12282 = vst.msk [vmem:[#allocation4 + $0x38] sm:$0xff] %vm396_vm5, %v12246_v30 }
 0x76f   :  { %v12427_v24 = vsub.f32 %v12391_v59, %v12355_v49  ;;  %v12356_v33 = vadd.f32 %v20261_v18, %v12312_v21  ;;  %12280 = vst.msk [vmem:[#allocation4 + $0x28] sm:$0xff] %vm396_vm5, %v12244_v23  ;;  %v12395_v23 = vld [vmem:[%s21083_s3 + $0x20] sm:$0xff] }
 0x770   :  { %v12533_v47 = vcombine.high %v12429_v43, %v12429_v43  ;;  %v12540_v62 = vrot.slane %v12429_v43, %v21287_v35  ;;  %v12430_v46 = vsub.f32 %v12394_v19, %v12358_v51  ;;  %v12397_v19 = vld [vmem:[%s21083_s3 + $0x30] sm:$0xff] }
 0x771   :  { %v12499_v10 = vcombine.high %v12427_v24, %v12427_v24  ;;  %v12506_v4 = vrot.slane %v12427_v24, %v21287_v35  ;;  %v12428_v55 = vsub.f32 %v12392_v26, %v12356_v33  ;;  %v20285_v36 = vpop.f32.mrb[152].mxu0 }
 0x772   :  { %v12547_v8 = vrot.slane %v12533_v47, %v21287_v35  ;;  %v12548_v7 = vcombine.high %v12540_v62, %v12540_v62  ;;  %v13263_v54 = vsel %vm17640_vm0, %v12540_v62, 0.0  ;;  %v12550_v13 = vcombine.high %v12430_v46, %v12430_v46  ;;  %v20290_v53 = vpop.f32.mrb[153].mxu0 }
 0x773   :  { %v12513_v41 = vrot.slane %v12499_v10, %v21287_v35  ;;  %v12514_v15 = vcombine.high %v12506_v4, %v12506_v4  ;;  %v13255_v63 = vsel %vm779_vm6, %v12506_v4, 0.0  ;;  %v12557_v14 = vrot.slane %v12430_v46, %v21287_v35  ;;  %v20296_v34 = vpop.f32.mrb[154].mxu0  ;;  %v12317_v40 = vld [vmem:[#allocation4 + $0x30] sm:$0xff] }
 0x774   :  { %v12549_v42 = vcombine.high %v12547_v8, %v12547_v8  ;;  %v13264_v6 = vsel %vm779_vm6, %v12548_v7, 0.0  ;;  %v13265_v9 = vsel %vm780_vm9, %v12547_v8, 0.0  ;;  %v12564_v37 = vrot.slane %v12550_v13, %v21287_v35  ;;  %v20303_v16 = vpop.f32.mrb[155].mxu0  ;;  %v12315_v28 = vld [vmem:[#allocation4 + $0x20] sm:$0xff] }
 0x775   :  { %v13577_v2 = vcombine.low %v13263_v54, %v13264_v6  ;;  %v12515_v3 = vcombine.high %v12513_v41, %v12513_v41  ;;  %v13256_v45 = vsel %vm780_vm9, %v12514_v15, 0.0  ;;  %v13257_v17 = vsel %vm781_vm10, %v12513_v41, 0.0  ;;  %v12318_v33 = vld [vmem:[#allocation4 + $0x38] sm:$0xff] }
 0x776   :  { %v13266_v22 = vsel %vm781_vm10, %v12549_v42, 0.0  ;;  %v13543_v61 = vcombine.low %v13255_v63, %v13256_v45  ;;  %v12565_v50 = vcombine.high %v12557_v14, %v12557_v14  ;;  %v12566_v56 = vcombine.high %v12564_v37, %v12564_v37  ;;  %v12316_v47 = vld [vmem:[#allocation4 + $0x28] sm:$0xff]  ;;  %v12398_v15 = vld [vmem:[%s21083_s3 + $0x38] sm:$0xff] }
 0x777   :  { %v13578_v12 = vcombine.low %v13265_v9, %v13266_v22  ;;  %v13585_v57 = vrot.slane %v13577_v2, %v21287_v35  ;;  %v13258_v32 = vsel %vm782_vm15, %v12515_v3, 0.0  ;;  %v13267_v44 = vsel %vm782_vm15, %v12557_v14, 0.0 }
 0x778   :  { %v13544_v11 = vcombine.low %v13257_v17, %v13258_v32  ;;  %v13551_v58 = vrot.slane %v13543_v61, %v21287_v35  ;;  %v13268_v48 = vsel %vm779_vm6, %v12565_v50, 0.0  ;;  %v13269_v31 = vsel %vm780_vm9, %v12564_v37, 0.0 }
 0x779   :  { %v13592_v0 = vrot.slane %v13578_v12, %v21287_v35  ;;  %v13270_v25 = vsel %vm781_vm10, %v12566_v56, 0.0  ;;  %v13594_v60 = vcombine.low %v13267_v44, %v13268_v48  ;;  %v12516_v59 = vcombine.high %v12428_v55, %v12428_v55  ;;  %v20324_v30 = vpop.f32.mrb[156].mxu0 }
 0x77a   :  { %v13558_v38 = vrot.slane %v13544_v11, %v21287_v35  ;;  %v13595_v5 = vcombine.low %v13269_v31, %v13270_v25  ;;  %v12523_v49 = vrot.slane %v12428_v55, %v21287_v35  ;;  %v12361_v27 = vadd.f32 %v20261_v18, %v12317_v40  ;;  %v20335_v43 = vpop.f32.mrb[157].mxu0 }
 0x77b   :  { %v13593_v51 = vcombine.low %v13585_v57, %v13592_v0  ;;  %v13602_v21 = vrot.slane %v13594_v60, %v21287_v35  ;;  %v12530_v26 = vrot.slane %v12516_v59, %v21287_v35  ;;  %v12359_v24 = vadd.f32 %v20261_v18, %v12315_v28  ;;  %v20340_v62 = vpop.f32.mrb[158].mxu0 }
 0x77c   :  { %v13559_v46 = vcombine.low %v13551_v58, %v13558_v38  ;;  %v13609_v10 = vrot.slane %v13595_v5, %v21287_v35  ;;  %v12531_v4 = vcombine.high %v12523_v49, %v12523_v49  ;;  %v13259_v55 = vsel %vm779_vm6, %v12523_v49, 0.0  ;;  %v20345_v8 = vpop.f32.mrb[159].mxu0 }
 0x77d   :  { %14194 = vst.msk [vmem:[%s21084_s4 + $0x10] sm:$0xff] %vm14191_vm8, %v13593_v51  ;;  %v12532_v7 = vcombine.high %v12530_v26, %v12530_v26  ;;  %v13261_v54 = vsel %vm781_vm10, %v12530_v26, 0.0  ;;  %v12433_v13 = vsub.f32 %v12397_v19, %v12361_v27  ;;  %v12431_v41 = vsub.f32 %v12395_v23, %v12359_v24  ;;  %v12396_v26 = vld [vmem:[%s21083_s3 + $0x28] sm:$0xff] }
 0x77e   :  { %14192 = vst.msk [vmem:[%s21084_s4] sm:$0xff] %vm14191_vm8, %v13559_v46  ;;  %v13610_v63 = vcombine.low %v13602_v21, %v13609_v10  ;;  %v13260_v14 = vsel %vm780_vm9, %v12531_v4, 0.0  ;;  %v12362_v42 = vadd.f32 %v20261_v18, %v12318_v33  ;;  %v12360_v6 = vadd.f32 %v20261_v18, %v12316_v47 }
 0x77f   :  { %v13262_v9 = vsel %vm782_vm15, %v12532_v7, 0.0  ;;  %v13560_v37 = vcombine.low %v13259_v55, %v13260_v14  ;;  %v12601_v2 = vcombine.high %v12433_v13, %v12433_v13  ;;  %v12608_v3 = vrot.slane %v12433_v13, %v21287_v35  ;;  %v12211_v14 = vld [vmem:[#allocation4 + $0x40] sm:$0xff] }
 0x780   :  { %14195 = vst.msk [vmem:[%s21084_s4 + $0x18] sm:$0xff] %vm14191_vm8, %v13610_v63  ;;  %v13561_v45 = vcombine.low %v13261_v54, %v13262_v9  ;;  %v12567_v17 = vcombine.high %v12431_v41, %v12431_v41  ;;  %v12574_v22 = vrot.slane %v12431_v41, %v21287_v35  ;;  %v12434_v61 = vsub.f32 %v12398_v15, %v12362_v42  ;;  %v12213_v63 = vld [vmem:[#allocation4 + $0x50] sm:$0xff] }
 0x781   :  { %v13568_v50 = vrot.slane %v13560_v37, %v21287_v35  ;;  %v12615_v56 = vrot.slane %v12601_v2, %v21287_v35  ;;  %v12616_v12 = vcombine.high %v12608_v3, %v12608_v3  ;;  %v13279_v57 = vsel %vm781_vm10, %v12608_v3, 0.0  ;;  %v20376_v32 = vpop.f32.mrb[160].mxu0 }
 0x782   :  { %v13575_v44 = vrot.slane %v13561_v45, %v21287_v35  ;;  %v12581_v40 = vrot.slane %v12567_v17, %v21287_v35  ;;  %v12582_v11 = vcombine.high %v12574_v22, %v12574_v22  ;;  %v13271_v58 = vsel %vm782_vm15, %v12574_v22, 0.0  ;;  %v20382_v48 = vpop.f32.mrb[161].mxu0 }
 0x783   :  { %v12617_v31 = vcombine.high %v12615_v56, %v12615_v56  ;;  %v13280_v28 = vsel %vm782_vm15, %v12616_v12, 0.0  ;;  %v13281_v0 = vsel %vm17640_vm0, %v12615_v56, 0.0  ;;  %v12618_v25 = vcombine.high %v12434_v61, %v12434_v61  ;;  %v20388_v60 = vpop.f32.mrb[162].mxu0 }
 0x784   :  { %v13576_v59 = vcombine.low %v13568_v50, %v13575_v44  ;;  %v13645_v38 = vcombine.low %v13279_v57, %v13280_v28  ;;  %v12583_v5 = vcombine.high %v12581_v40, %v12581_v40  ;;  %v13272_v49 = vsel %vm17640_vm0, %v12582_v11, 0.0  ;;  %v20392_v27 = vpop.f32.mrb[163].mxu0  ;;  %v12214_v50 = vld [vmem:[#allocation4 + $0x58] sm:$0xff]  ;;  %v12217_v44 = vld [vmem:[#allocation4 + $0x70] sm:$0xff] }
 0x785   :  { %v13282_v19 = vsel %vm779_vm6, %v12617_v31, 0.0  ;;  %v13273_v23 = vsel %vm779_vm6, %v12581_v40, 0.0  ;;  %v13611_v51 = vcombine.low %v13271_v58, %v13272_v49  ;;  %v12625_v21 = vrot.slane %v12434_v61, %v21287_v35  ;;  %v12216_v49 = vld [vmem:[#allocation4 + $0x68] sm:$0xff] }
 0x786   :  { %14193 = vst.msk [vmem:[%s21084_s4 + $0x8] sm:$0xff] %vm14191_vm8, %v13576_v59  ;;  %v13646_v24 = vcombine.low %v13281_v0, %v13282_v19  ;;  %v13653_v33 = vrot.slane %v13645_v38, %v21287_v35  ;;  %v13274_v47 = vsel %vm780_vm9, %v12583_v5, 0.0  ;;  %v12632_v46 = vrot.slane %v12618_v25, %v21287_v35  ;;  %v12215_v0 = vld [vmem:[#allocation4 + $0x60] sm:$0xff] }
 0x787   :  { %v13612_v10 = vcombine.low %v13273_v23, %v13274_v47  ;;  %v13619_v4 = vrot.slane %v13611_v51, %v21287_v35  ;;  %v12633_v55 = vcombine.high %v12625_v21, %v12625_v21  ;;  %v13283_v7 = vsel %vm780_vm9, %v12625_v21, 0.0  ;;  %v12221_v21 = vld [vmem:[#allocation4 + $0x90] sm:$0xff] }
 0x788   :  { %v13660_v54 = vrot.slane %v13646_v24, %v21287_v35  ;;  %v12634_v13 = vcombine.high %v12632_v46, %v12632_v46  ;;  %v13285_v41 = vsel %vm782_vm15, %v12632_v46, 0.0  ;;  %v12432_v15 = vsub.f32 %v12396_v26, %v12360_v6  ;;  %v12219_v26 = vld [vmem:[#allocation4 + $0x80] sm:$0xff]  ;;  %v12222_v46 = vld [vmem:[#allocation4 + $0x98] sm:$0xff] }
 0x789   :  { %v13626_v42 = vrot.slane %v13612_v10, %v21287_v35  ;;  %v13284_v9 = vsel %vm781_vm10, %v12633_v55, 0.0  ;;  %v12249_v37 = vadd.f32 %v20285_v36, %v12213_v63  ;;  %v12247_v2 = vadd.f32 %v12211_v14, %v20290_v53  ;;  %v16085_v3 = vpop.f32.mrb[164].mxu0  ;;  %v12212_v53 = vld [vmem:[#allocation4 + $0x48] sm:$0xff]  ;;  %v12229_v14 = vld [vmem:[#allocation4 + $0xd0] sm:$0xff] }
 0x78a   :  { %v13661_v45 = vcombine.low %v13653_v33, %v13660_v54  ;;  %v13286_v17 = vsel %vm779_vm6, %v12634_v13, 0.0  ;;  %v13662_v22 = vcombine.low %v13283_v7, %v13284_v9  ;;  %v12584_v61 = vcombine.high %v12432_v15, %v12432_v15  ;;  %v12140_v6 = vpop.f32.mrb[165].mxu0  ;;  %v12220_v10 = vld [vmem:[#allocation4 + $0x88] sm:$0xff]  ;;  %v12223_v54 = vld [vmem:[#allocation4 + $0xa0] sm:$0xff]  ;;  %v12226_v13 = vld [vmem:[#allocation4 + $0xb8] sm:$0xff] }
 0x78b   :  { %v13627_v56 = vcombine.low %v13619_v4, %v13626_v42  ;;  %v13663_v12 = vcombine.low %v13285_v41, %v13286_v17  ;;  %v12591_v57 = vrot.slane %v12432_v15, %v21287_v35  ;;  %12285 = vst.msk [vmem:[#allocation4 + $0x50] sm:$0xff] %vm396_vm5, %v12249_v37  ;;  %12283 = vst.msk [vmem:[#allocation4 + $0x40] sm:$0xff] %vm396_vm5, %v12247_v2  ;;  %v16086_v40 = vpop.f32.mrb[166].mxu0  ;;  %v12225_v4 = vld [vmem:[#allocation4 + $0xb0] sm:$0xff]  ;;  %v12227_v42 = vld [vmem:[#allocation4 + $0xc0] sm:$0xff] }
 0x78c   :  { %v12250_v36 = vadd.f32 %v20296_v34, %v12214_v50  ;;  %14198 = vst.msk [vmem:[%s21084_s4 + $0x30] sm:$0xff] %vm14191_vm8, %v13661_v45  ;;  %v13670_v11 = vrot.slane %v13662_v22, %v21287_v35  ;;  %v12598_v58 = vrot.slane %v12584_v61, %v21287_v35  ;;  %v12248_v31 = vadd.f32 %v12212_v53, %v20303_v16  ;;  %v12143_v25 = vpop.f32.mrb[167].mxu0  ;;  %v12218_v16 = vld [vmem:[#allocation4 + $0x78] sm:$0xff]  ;;  %v12401_v41 = vld [vmem:[%s21083_s3 + $0x50] sm:$0xff]  ;;  %v12399_v45 = vld [vmem:[%s21083_s3 + $0x40] sm:$0xff] }
 0x78d   :  { %v12253_v28 = vadd.f32 %v20324_v30, %v12217_v44  ;;  %14196 = vst.msk [vmem:[%s21084_s4 + $0x20] sm:$0xff] %vm14191_vm8, %v13627_v56  ;;  %v13677_v34 = vrot.slane %v13663_v12, %v21287_v35  ;;  %v12599_v59 = vcombine.high %v12591_v57, %v12591_v57  ;;  %v13275_v38 = vsel %vm781_vm10, %v12591_v57, 0.0  ;;  %v12402_v56 = vld [vmem:[%s21083_s3 + $0x58] sm:$0xff]  ;;  %v12400_v44 = vld [vmem:[%s21083_s3 + $0x48] sm:$0xff] }
 0x78e   :  { %12286 = vst.msk [vmem:[#allocation4 + $0x58] sm:$0xff] %vm396_vm5, %v12250_v36  ;;  %v12251_v5 = vadd.f32 %v12215_v0, %v20335_v43  ;;  %v12600_v30 = vcombine.high %v12598_v58, %v12598_v58  ;;  %v13277_v19 = vsel %vm779_vm6, %v12598_v58, 0.0  ;;  %12284 = vst.msk [vmem:[#allocation4 + $0x48] sm:$0xff] %vm396_vm5, %v12248_v31  ;;  %v12254_v23 = vadd.f32 %v20340_v62, %v12218_v16  ;;  %v12230_v36 = vld [vmem:[#allocation4 + $0xd8] sm:$0xff]  ;;  %v12228_v58 = vld [vmem:[#allocation4 + $0xc8] sm:$0xff] }
 0x78f   :  { %12289 = vst.msk [vmem:[#allocation4 + $0x70] sm:$0xff] %vm396_vm5, %v12253_v28  ;;  %v12252_v51 = vadd.f32 %v12216_v49, %v20345_v8  ;;  %v13678_v24 = vcombine.low %v13670_v11, %v13677_v34  ;;  %v13276_v43 = vsel %vm782_vm15, %v12599_v59, 0.0  ;;  %v12257_v33 = vadd.f32 %v20376_v32, %v12221_v21  ;;  %v12224_v32 = vld [vmem:[#allocation4 + $0xa8] sm:$0xff] }
 0x790   :  { %12287 = vst.msk [vmem:[#allocation4 + $0x60] sm:$0xff] %vm396_vm5, %v12251_v5  ;;  %v12255_v47 = vadd.f32 %v12219_v26, %v20382_v48  ;;  %v13278_v62 = vsel %vm780_vm9, %v12600_v30, 0.0  ;;  %v13628_v55 = vcombine.low %v13275_v38, %v13276_v43  ;;  %12290 = vst.msk [vmem:[#allocation4 + $0x78] sm:$0xff] %vm396_vm5, %v12254_v23  ;;  %v12258_v8 = vadd.f32 %v20388_v60, %v12222_v46  ;;  %v12405_v38 = vld [vmem:[%s21083_s3 + $0x70] sm:$0xff] }
 0x791   :  { %12288 = vst.msk [vmem:[#allocation4 + $0x68] sm:$0xff] %vm396_vm5, %v12252_v51  ;;  %v12256_v7 = vadd.f32 %v12220_v10, %v20392_v27  ;;  %v13629_v48 = vcombine.low %v13277_v19, %v13278_v62  ;;  %12293 = vst.msk [vmem:[#allocation4 + $0x90] sm:$0xff] %vm396_vm5, %v12257_v33  ;;  %v12261_v60 = vadd.f32 %v16085_v3, %v12225_v4  ;;  %v16089_v63 = vpop.f32.mrb[168].mxu0 }
 0x792   :  { %14199 = vst.msk [vmem:[%s21084_s4 + $0x38] sm:$0xff] %vm14191_vm8, %v13678_v24  ;;  %v12259_v15 = vadd.f32 %v12223_v54, %v12140_v6  ;;  %v12262_v27 = vadd.f32 %v16086_v40, %v12226_v13  ;;  %v13636_v9 = vrot.slane %v13628_v55, %v21287_v35  ;;  %v12321_v37 = vld [vmem:[#allocation4 + $0x50] sm:$0xff]  ;;  %v12319_v2 = vld [vmem:[#allocation4 + $0x40] sm:$0xff]  ;;  %v12260_v17 = vadd.f32 %v12224_v32, %v12143_v25  ;;  %v12156_v3 = vpop.f32.mrb[169].mxu0 }
 0x793   :  { %12291 = vst.msk [vmem:[#allocation4 + $0x80] sm:$0xff] %vm396_vm5, %v12255_v47  ;;  %12294 = vst.msk [vmem:[#allocation4 + $0x98] sm:$0xff] %vm396_vm5, %v12258_v8  ;;  %v12265_v22 = vadd.f32 %v16089_v63, %v12229_v14  ;;  %v13643_v61 = vrot.slane %v13629_v48, %v21287_v35  ;;  %v12365_v50 = vadd.f32 %v20261_v18, %v12321_v37  ;;  %v16090_v57 = vpop.f32.mrb[170].mxu0 }
 0x794   :  { %12292 = vst.msk [vmem:[#allocation4 + $0x88] sm:$0xff] %vm396_vm5, %v12256_v7  ;;  %v12363_v6 = vadd.f32 %v20261_v18, %v12319_v2  ;;  %12297 = vst.msk [vmem:[#allocation4 + $0xb0] sm:$0xff] %vm396_vm5, %v12261_v60  ;;  %v12263_v12 = vadd.f32 %v12227_v42, %v12156_v3  ;;  %v12266_v40 = vadd.f32 %v16090_v57, %v12230_v36  ;;  %v12159_v11 = vpop.f32.mrb[171].mxu0 }
 0x795   :  { %12295 = vst.msk [vmem:[#allocation4 + $0xa0] sm:$0xff] %vm396_vm5, %v12259_v15  ;;  %12298 = vst.msk [vmem:[#allocation4 + $0xb8] sm:$0xff] %vm396_vm5, %v12262_v27  ;;  %v12322_v53 = vld [vmem:[#allocation4 + $0x58] sm:$0xff]  ;;  %v13644_v31 = vcombine.low %v13636_v9, %v13643_v61  ;;  %v12437_v28 = vsub.f32 %v12401_v41, %v12365_v50  ;;  %v12320_v34 = vld [vmem:[#allocation4 + $0x48] sm:$0xff]  ;;  %v12264_v30 = vadd.f32 %v12228_v58, %v12159_v11 }
 0x796   :  { %12296 = vst.msk [vmem:[#allocation4 + $0xa8] sm:$0xff] %vm396_vm5, %v12260_v17  ;;  %12301 = vst.msk [vmem:[#allocation4 + $0xd0] sm:$0xff] %vm396_vm5, %v12265_v22  ;;  %v12435_v0 = vsub.f32 %v12399_v45, %v12363_v6  ;;  %v12366_v25 = vadd.f32 %v20261_v18, %v12322_v53  ;;  %v12325_v59 = vld [vmem:[#allocation4 + $0x70] sm:$0xff]  ;;  %v12364_v5 = vadd.f32 %v20261_v18, %v12320_v34 }
 0x797   :  { %12299 = vst.msk [vmem:[#allocation4 + $0xc0] sm:$0xff] %vm396_vm5, %v12263_v12  ;;  %v12369_v16 = vadd.f32 %v20261_v18, %v12325_v59  ;;  %v12323_v49 = vld [vmem:[#allocation4 + $0x60] sm:$0xff]  ;;  %12302 = vst.msk [vmem:[#allocation4 + $0xd8] sm:$0xff] %vm396_vm5, %v12266_v40  ;;  %v12669_v19 = vcombine.high %v12437_v28, %v12437_v28  ;;  %v12676_v23 = vrot.slane %v12437_v28, %v21287_v35 }
 0x798   :  { %14197 = vst.msk [vmem:[%s21084_s4 + $0x28] sm:$0xff] %vm14191_vm8, %v13644_v31  ;;  %v12635_v51 = vcombine.high %v12435_v0, %v12435_v0  ;;  %v12642_v21 = vrot.slane %v12435_v0, %v21287_v35  ;;  %v12438_v26 = vsub.f32 %v12402_v56, %v12366_v25  ;;  %v12436_v24 = vsub.f32 %v12400_v44, %v12364_v5  ;;  %v12403_v0 = vld [vmem:[%s21083_s3 + $0x60] sm:$0xff] }
 0x799   :  { %v12441_v43 = vsub.f32 %v12405_v38, %v12369_v16  ;;  %v12367_v33 = vadd.f32 %v20261_v18, %v12323_v49  ;;  %12300 = vst.msk [vmem:[#allocation4 + $0xc8] sm:$0xff] %vm396_vm5, %v12264_v30  ;;  %v12683_v47 = vrot.slane %v12669_v19, %v21287_v35  ;;  %v12684_v46 = vcombine.high %v12676_v23, %v12676_v23  ;;  %v20510_v62 = vpop.f32.mrb[172].mxu0 }
 0x79a   :  { %v13295_v10 = vsel %vm779_vm6, %v12676_v23, 0.0  ;;  %v12649_v4 = vrot.slane %v12635_v51, %v21287_v35  ;;  %v12650_v55 = vcombine.high %v12642_v21, %v12642_v21  ;;  %v13287_v8 = vsel %vm780_vm9, %v12642_v21, 0.0  ;;  %v20515_v13 = vpop.f32.mrb[173].mxu0 }
 0x79b   :  { %v12686_v7 = vcombine.high %v12438_v26, %v12438_v26  ;;  %v12693_v54 = vrot.slane %v12438_v26, %v21287_v35  ;;  %v12685_v32 = vcombine.high %v12683_v47, %v12683_v47  ;;  %v13296_v48 = vsel %vm780_vm9, %v12684_v46, 0.0  ;;  %v20521_v15 = vpop.f32.mrb[174].mxu0 }
 0x79c   :  { %v13297_v41 = vsel %vm781_vm10, %v12683_v47, 0.0  ;;  %v12651_v60 = vcombine.high %v12649_v4, %v12649_v4  ;;  %v13713_v27 = vcombine.low %v13295_v10, %v13296_v48  ;;  %v13288_v63 = vsel %vm781_vm10, %v12650_v55, 0.0  ;;  %v20528_v9 = vpop.f32.mrb[175].mxu0 }
 0x79d   :  { %v13289_v14 = vsel %vm782_vm15, %v12649_v4, 0.0  ;;  %v12700_v42 = vrot.slane %v12686_v7, %v21287_v35  ;;  %v13298_v37 = vsel %vm782_vm15, %v12685_v32, 0.0  ;;  %v13679_v45 = vcombine.low %v13287_v8, %v13288_v63  ;;  %v12326_v8 = vld [vmem:[#allocation4 + $0x78] sm:$0xff] }
 0x79e   :  { %v13290_v2 = vsel %vm17640_vm0, %v12651_v60, 0.0  ;;  %v12701_v17 = vcombine.high %v12693_v54, %v12693_v54  ;;  %v13714_v22 = vcombine.low %v13297_v41, %v13298_v37  ;;  %v13721_v3 = vrot.slane %v13713_v27, %v21287_v35  ;;  %v12406_v63 = vld [vmem:[%s21083_s3 + $0x78] sm:$0xff] }
 0x79f   :  { %v13680_v61 = vcombine.low %v13289_v14, %v13290_v2  ;;  %v12702_v50 = vcombine.high %v12700_v42, %v12700_v42  ;;  %v13687_v6 = vrot.slane %v13679_v45, %v21287_v35  ;;  %v13299_v56 = vsel %vm17640_vm0, %v12693_v54, 0.0  ;;  %v12324_v14 = vld [vmem:[#allocation4 + $0x68] sm:$0xff] }
 0x7a0   :  { %v13300_v12 = vsel %vm779_vm6, %v12701_v17, 0.0  ;;  %v13301_v57 = vsel %vm780_vm9, %v12700_v42, 0.0  ;;  %v13728_v36 = vrot.slane %v13714_v22, %v21287_v35  ;;  %v12652_v58 = vcombine.high %v12436_v24, %v12436_v24 }
 0x7a1   :  { %v13694_v53 = vrot.slane %v13680_v61, %v21287_v35  ;;  %v13302_v44 = vsel %vm781_vm10, %v12702_v50, 0.0  ;;  %v13730_v40 = vcombine.low %v13299_v56, %v13300_v12  ;;  %v12659_v31 = vrot.slane %v12436_v24, %v21287_v35  ;;  %v20550_v25 = vpop.f32.mrb[176].mxu0 }
 0x7a2   :  { %v13731_v11 = vcombine.low %v13301_v57, %v13302_v44  ;;  %v12737_v28 = vcombine.high %v12441_v43, %v12441_v43  ;;  %v13729_v34 = vcombine.low %v13721_v3, %v13728_v36  ;;  %v12744_v5 = vrot.slane %v12441_v43, %v21287_v35  ;;  %v20554_v16 = vpop.f32.mrb[177].mxu0  ;;  %v12404_v57 = vld [vmem:[%s21083_s3 + $0x68] sm:$0xff]  ;;  %v12329_v36 = vld [vmem:[#allocation4 + $0x90] sm:$0xff] }
 0x7a3   :  { %v13695_v59 = vcombine.low %v13687_v6, %v13694_v53  ;;  %v13738_v38 = vrot.slane %v13730_v40, %v21287_v35  ;;  %v12666_v30 = vrot.slane %v12652_v58, %v21287_v35  ;;  %v12667_v19 = vcombine.high %v12659_v31, %v12659_v31  ;;  %v20560_v51 = vpop.f32.mrb[178].mxu0 }
 0x7a4   :  { %v13745_v49 = vrot.slane %v13731_v11, %v21287_v35  ;;  %v13291_v23 = vsel %vm779_vm6, %v12659_v31, 0.0  ;;  %14202 = vst.msk [vmem:[%s21084_s4 + $0x50] sm:$0xff] %vm14191_vm8, %v13729_v34  ;;  %v12751_v21 = vrot.slane %v12737_v28, %v21287_v35  ;;  %v12752_v26 = vcombine.high %v12744_v5, %v12744_v5  ;;  %v20573_v47 = vpop.f32.mrb[179].mxu0  ;;  %v12409_v34 = vld [vmem:[%s21083_s3 + $0x90] sm:$0xff] }
 0x7a5   :  { %14200 = vst.msk [vmem:[%s21084_s4 + $0x40] sm:$0xff] %vm14191_vm8, %v13695_v59  ;;  %v13311_v24 = vsel %vm781_vm10, %v12744_v5, 0.0  ;;  %v12439_v43 = vsub.f32 %v12403_v0, %v12367_v33  ;;  %v12668_v10 = vcombine.high %v12666_v30, %v12666_v30  ;;  %v13292_v4 = vsel %vm780_vm9, %v12667_v19, 0.0 }
 0x7a6   :  { %v13746_v46 = vcombine.low %v13738_v38, %v13745_v49  ;;  %v13293_v55 = vsel %vm781_vm10, %v12666_v30, 0.0  ;;  %v13696_v7 = vcombine.low %v13291_v23, %v13292_v4  ;;  %v12753_v54 = vcombine.high %v12751_v21, %v12751_v21 }
 0x7a7   :  { %v13312_v32 = vsel %vm782_vm15, %v12752_v26, 0.0  ;;  %v13313_v48 = vsel %vm779_vm6, %v12751_v21, 0.0  ;;  %v13294_v33 = vsel %vm782_vm15, %v12668_v10, 0.0  ;;  %v12703_v60 = vcombine.high %v12439_v43, %v12439_v43 }
 0x7a8   :  { %14203 = vst.msk [vmem:[%s21084_s4 + $0x58] sm:$0xff] %vm14191_vm8, %v13746_v46  ;;  %v13781_v41 = vcombine.low %v13311_v24, %v13312_v32  ;;  %v12710_v27 = vrot.slane %v12439_v43, %v21287_v35  ;;  %v13697_v42 = vcombine.low %v13293_v55, %v13294_v33  ;;  %v13704_v37 = vrot.slane %v13696_v7, %v21287_v35 }
 0x7a9   :  { %v13314_v2 = vsel %vm780_vm9, %v12753_v54, 0.0  ;;  %v12370_v45 = vadd.f32 %v20261_v18, %v12326_v8  ;;  %v12717_v3 = vrot.slane %v12703_v60, %v21287_v35  ;;  %v12368_v12 = vadd.f32 %v20261_v18, %v12324_v14 }
 0x7aa   :  { %v13782_v17 = vcombine.low %v13313_v48, %v13314_v2  ;;  %v13789_v22 = vrot.slane %v13781_v41, %v21287_v35  ;;  %v12718_v61 = vcombine.high %v12710_v27, %v12710_v27  ;;  %v13711_v50 = vrot.slane %v13697_v42, %v21287_v35 }
 0x7ab   :  { %v13303_v6 = vsel %vm782_vm15, %v12710_v27, 0.0  ;;  %v12442_v56 = vsub.f32 %v12406_v63, %v12370_v45  ;;  %v12719_v44 = vcombine.high %v12717_v3, %v12717_v3  ;;  %v13305_v11 = vsel %vm780_vm9, %v12717_v3, 0.0  ;;  %v12327_v63 = vld [vmem:[#allocation4 + $0x80] sm:$0xff] }
 0x7ac   :  { %v13796_v53 = vrot.slane %v13782_v17, %v21287_v35  ;;  %v13304_v40 = vsel %vm779_vm6, %v12718_v61, 0.0  ;;  %v13712_v58 = vcombine.low %v13704_v37, %v13711_v50  ;;  %v12440_v5 = vsub.f32 %v12404_v57, %v12368_v12  ;;  %v12407_v61 = vld [vmem:[%s21083_s3 + $0x80] sm:$0xff]  ;;  %v12330_v57 = vld [vmem:[#allocation4 + $0x98] sm:$0xff] }
 0x7ad   :  { %v13747_v31 = vcombine.low %v13303_v6, %v13304_v40  ;;  %v12754_v28 = vcombine.high %v12442_v56, %v12442_v56  ;;  %v12761_v0 = vrot.slane %v12442_v56, %v21287_v35  ;;  %v13306_v38 = vsel %vm781_vm10, %v12719_v44, 0.0 }
 0x7ae   :  { %v13797_v59 = vcombine.low %v13789_v22, %v13796_v53  ;;  %v12373_v49 = vadd.f32 %v20261_v18, %v12329_v36  ;;  %14201 = vst.msk [vmem:[%s21084_s4 + $0x48] sm:$0xff] %vm14191_vm8, %v13712_v58  ;;  %v13748_v30 = vcombine.low %v13305_v11, %v13306_v38  ;;  %v12720_v24 = vcombine.high %v12440_v5, %v12440_v5  ;;  %v12328_v36 = vld [vmem:[#allocation4 + $0x88] sm:$0xff]  ;;  %v12333_v38 = vld [vmem:[#allocation4 + $0xb0] sm:$0xff] }
 0x7af   :  { %v13755_v19 = vrot.slane %v13747_v31, %v21287_v35  ;;  %v12768_v23 = vrot.slane %v12754_v28, %v21287_v35  ;;  %v12769_v21 = vcombine.high %v12761_v0, %v12761_v0  ;;  %v13315_v26 = vsel %vm781_vm10, %v12761_v0, 0.0 }
 0x7b0   :  { %14206 = vst.msk [vmem:[%s21084_s4 + $0x70] sm:$0xff] %vm14191_vm8, %v13797_v59  ;;  %v12727_v43 = vrot.slane %v12440_v5, %v21287_v35  ;;  %v12445_v46 = vsub.f32 %v12409_v34, %v12373_v49  ;;  %v13762_v10 = vrot.slane %v13748_v30, %v21287_v35  ;;  %v12734_v54 = vrot.slane %v12720_v24, %v21287_v35  ;;  %v12410_v34 = vld [vmem:[%s21083_s3 + $0x98] sm:$0xff]  ;;  %v12408_v59 = vld [vmem:[%s21083_s3 + $0x88] sm:$0xff] }
 0x7b1   :  { %v12770_v4 = vcombine.high %v12768_v23, %v12768_v23  ;;  %v13316_v55 = vsel %vm782_vm15, %v12769_v21, 0.0  ;;  %v13317_v8 = vsel %vm17640_vm0, %v12768_v23, 0.0  ;;  %v12371_v12 = vadd.f32 %v20261_v18, %v12327_v63 }
 0x7b2   :  { %v13798_v7 = vcombine.low %v13315_v26, %v13316_v55  ;;  %v12735_v32 = vcombine.high %v12727_v43, %v12727_v43  ;;  %v13307_v48 = vsel %vm782_vm15, %v12727_v43, 0.0  ;;  %v13763_v33 = vcombine.low %v13755_v19, %v13762_v10 }
 0x7b3   :  { %v13318_v41 = vsel %vm779_vm6, %v12770_v4, 0.0  ;;  %v12805_v60 = vcombine.high %v12445_v46, %v12445_v46  ;;  %v12812_v27 = vrot.slane %v12445_v46, %v21287_v35  ;;  %v12736_v37 = vcombine.high %v12734_v54, %v12734_v54 }
 0x7b4   :  { %v13799_v14 = vcombine.low %v13317_v8, %v13318_v41  ;;  %v13806_v42 = vrot.slane %v13798_v7, %v21287_v35  ;;  %v13308_v2 = vsel %vm17640_vm0, %v12735_v32, 0.0  ;;  %14204 = vst.msk [vmem:[%s21084_s4 + $0x60] sm:$0xff] %vm14191_vm8, %v13763_v33  ;;  %v13309_v45 = vsel %vm779_vm6, %v12734_v54, 0.0 }
 0x7b5   :  { %v13764_v17 = vcombine.low %v13307_v48, %v13308_v2  ;;  %v12819_v22 = vrot.slane %v12805_v60, %v21287_v35  ;;  %v12820_v3 = vcombine.high %v12812_v27, %v12812_v27  ;;  %v13310_v6 = vsel %vm780_vm9, %v12736_v37, 0.0 }
 0x7b6   :  { %v13813_v50 = vrot.slane %v13799_v14, %v21287_v35  ;;  %v13327_v56 = vsel %vm779_vm6, %v12812_v27, 0.0  ;;  %v13765_v53 = vcombine.low %v13309_v45, %v13310_v6  ;;  %v12443_v0 = vsub.f32 %v12407_v61, %v12371_v12 }
 0x7b7   :  { %v13772_v44 = vrot.slane %v13764_v17, %v21287_v35  ;;  %v12821_v40 = vcombine.high %v12819_v22, %v12819_v22  ;;  %v13328_v11 = vsel %vm780_vm9, %v12820_v3, 0.0  ;;  %v13329_v31 = vsel %vm781_vm10, %v12819_v22, 0.0 }
 0x7b8   :  { %v13814_v58 = vcombine.low %v13806_v42, %v13813_v50  ;;  %v13849_v28 = vcombine.low %v13327_v56, %v13328_v11  ;;  %v13779_v5 = vrot.slane %v13765_v53, %v21287_v35  ;;  %v12374_v30 = vadd.f32 %v20261_v18, %v12330_v57  ;;  %v12413_v57 = vld [vmem:[%s21083_s3 + $0xb0] sm:$0xff]  ;;  %v12331_v11 = vld [vmem:[#allocation4 + $0xa0] sm:$0xff] }
 0x7b9   :  { %v13330_v49 = vsel %vm782_vm15, %v12821_v40, 0.0  ;;  %v12372_v19 = vadd.f32 %v20261_v18, %v12328_v36  ;;  %v12771_v26 = vcombine.high %v12443_v0, %v12443_v0  ;;  %v12778_v24 = vrot.slane %v12443_v0, %v21287_v35 }
 0x7ba   :  { %14207 = vst.msk [vmem:[%s21084_s4 + $0x78] sm:$0xff] %vm14191_vm8, %v13814_v58  ;;  %v13850_v23 = vcombine.low %v13329_v31, %v13330_v49  ;;  %v13857_v21 = vrot.slane %v13849_v28, %v21287_v35  ;;  %v13780_v43 = vcombine.low %v13772_v44, %v13779_v5  ;;  %v12446_v46 = vsub.f32 %v12410_v34, %v12374_v30  ;;  %v12334_v34 = vld [vmem:[#allocation4 + $0xb8] sm:$0xff]  ;;  %v12411_v30 = vld [vmem:[%s21083_s3 + $0xa0] sm:$0xff] }
 0x7bb   :  { %v12444_v10 = vsub.f32 %v12408_v59, %v12372_v19  ;;  %v12377_v4 = vadd.f32 %v20261_v18, %v12333_v38  ;;  %v12785_v8 = vrot.slane %v12771_v26, %v21287_v35  ;;  %v12786_v7 = vcombine.high %v12778_v24, %v12778_v24  ;;  %v12332_v19 = vld [vmem:[#allocation4 + $0xa8] sm:$0xff] }
 0x7bc   :  { %v13864_v55 = vrot.slane %v13850_v23, %v21287_v35  ;;  %v13319_v54 = vsel %vm780_vm9, %v12778_v24, 0.0  ;;  %14205 = vst.msk [vmem:[%s21084_s4 + $0x68] sm:$0xff] %vm14191_vm8, %v13780_v43  ;;  %v12822_v32 = vcombine.high %v12446_v46, %v12446_v46  ;;  %v12829_v48 = vrot.slane %v12446_v46, %v21287_v35  ;;  %v12337_v23 = vld [vmem:[#allocation4 + $0xd0] sm:$0xff] }
 0x7bd   :  { %v12788_v33 = vcombine.high %v12444_v10, %v12444_v10  ;;  %v12795_v41 = vrot.slane %v12444_v10, %v21287_v35  ;;  %v12787_v27 = vcombine.high %v12785_v8, %v12785_v8  ;;  %v13320_v63 = vsel %vm781_vm10, %v12786_v7, 0.0 }
 0x7be   :  { %v13865_v60 = vcombine.low %v13857_v21, %v13864_v55  ;;  %v13321_v14 = vsel %vm782_vm15, %v12785_v8, 0.0  ;;  %v13815_v42 = vcombine.low %v13319_v54, %v13320_v63  ;;  %v12836_v37 = vrot.slane %v12822_v32, %v21287_v35 }
 0x7bf   :  { %v12837_v2 = vcombine.high %v12829_v48, %v12829_v48  ;;  %v13331_v45 = vsel %vm779_vm6, %v12829_v48, 0.0  ;;  %v13322_v17 = vsel %vm779_vm6, %v12787_v27, 0.0  ;;  %v12802_v22 = vrot.slane %v12788_v33, %v21287_v35  ;;  %v12412_v48 = vld [vmem:[%s21083_s3 + $0xa8] sm:$0xff] }
 0x7c0   :  { %14210 = vst.msk [vmem:[%s21084_s4 + $0x90] sm:$0xff] %vm14191_vm8, %v13865_v60  ;;  %v12803_v3 = vcombine.high %v12795_v41, %v12795_v41  ;;  %v13323_v61 = vsel %vm780_vm9, %v12795_v41, 0.0  ;;  %v13816_v50 = vcombine.low %v13321_v14, %v13322_v17  ;;  %v13823_v6 = vrot.slane %v13815_v42, %v21287_v35 }
 0x7c1   :  { %v12838_v56 = vcombine.high %v12836_v37, %v12836_v37  ;;  %v13332_v12 = vsel %vm780_vm9, %v12837_v2, 0.0  ;;  %v13333_v36 = vsel %vm781_vm10, %v12836_v37, 0.0  ;;  %v12804_v44 = vcombine.high %v12802_v22, %v12802_v22 }
 0x7c2   :  { %v13866_v53 = vcombine.low %v13331_v45, %v13332_v12  ;;  %v13324_v40 = vsel %vm781_vm10, %v12803_v3, 0.0  ;;  %v13830_v58 = vrot.slane %v13816_v50, %v21287_v35  ;;  %v13325_v28 = vsel %vm782_vm15, %v12802_v22, 0.0 }
 0x7c3   :  { %v13334_v31 = vsel %vm782_vm15, %v12838_v56, 0.0  ;;  %v13832_v0 = vcombine.low %v13323_v61, %v13324_v40  ;;  %v13326_v5 = vsel %vm17640_vm0, %v12804_v44, 0.0  ;;  %v12449_v49 = vsub.f32 %v12413_v57, %v12377_v4  ;;  %v12414_v4 = vld [vmem:[%s21083_s3 + $0xb8] sm:$0xff] }
 0x7c4   :  { %v13867_v59 = vcombine.low %v13333_v36, %v13334_v31  ;;  %v13874_v38 = vrot.slane %v13866_v53, %v21287_v35  ;;  %v13831_v21 = vcombine.low %v13823_v6, %v13830_v58  ;;  %v13833_v26 = vcombine.low %v13325_v28, %v13326_v5 }
 0x7c5   :  { %v13840_v24 = vrot.slane %v13832_v0, %v21287_v35  ;;  %v12375_v43 = vadd.f32 %v20261_v18, %v12331_v11  ;;  %v12873_v10 = vcombine.high %v12449_v49, %v12449_v49  ;;  %v12880_v55 = vrot.slane %v12449_v49, %v21287_v35 }
 0x7c6   :  { %v13881_v46 = vrot.slane %v13867_v59, %v21287_v35  ;;  %v12378_v8 = vadd.f32 %v20261_v18, %v12334_v34  ;;  %14208 = vst.msk [vmem:[%s21084_s4 + $0x80] sm:$0xff] %vm14191_vm8, %v13831_v21  ;;  %v13847_v7 = vrot.slane %v13833_v26, %v21287_v35  ;;  %v12376_v32 = vadd.f32 %v20261_v18, %v12332_v19 }
 0x7c7   :  { %v12447_v54 = vsub.f32 %v12411_v30, %v12375_v43  ;;  %v12381_v33 = vadd.f32 %v20261_v18, %v12337_v23  ;;  %v12887_v60 = vrot.slane %v12873_v10, %v21287_v35  ;;  %v12888_v27 = vcombine.high %v12880_v55, %v12880_v55  ;;  %v12335_v10 = vld [vmem:[#allocation4 + $0xc0] sm:$0xff] }
 0x7c8   :  { %v13882_v41 = vcombine.low %v13874_v38, %v13881_v46  ;;  %v13343_v63 = vsel %vm782_vm15, %v12880_v55, 0.0  ;;  %v13848_v14 = vcombine.low %v13840_v24, %v13847_v7  ;;  %v12450_v2 = vsub.f32 %v12414_v4, %v12378_v8  ;;  %v12417_v46 = vld [vmem:[%s21083_s3 + $0xd0] sm:$0xff] }
 0x7c9   :  { %v12839_v42 = vcombine.high %v12447_v54, %v12447_v54  ;;  %v12846_v37 = vrot.slane %v12447_v54, %v21287_v35  ;;  %v12889_v45 = vcombine.high %v12887_v60, %v12887_v60  ;;  %v13344_v18 = vsel %vm17640_vm0, %v12888_v27, 0.0  ;;  %v12338_v54 = vld [vmem:[#allocation4 + $0xd8] sm:$0xff]  ;;  %v12415_v27 = vld [vmem:[%s21083_s3 + $0xc0] sm:$0xff] }
 0x7ca   :  { %14211 = vst.msk [vmem:[%s21084_s4 + $0x98] sm:$0xff] %vm14191_vm8, %v13882_v41  ;;  %v13345_v17 = vsel %vm779_vm6, %v12887_v60, 0.0  ;;  %v12448_v22 = vsub.f32 %v12412_v48, %v12376_v32  ;;  %14209 = vst.msk [vmem:[%s21084_s4 + $0x88] sm:$0xff] %vm14191_vm8, %v13848_v14  ;;  %v13917_v3 = vcombine.low %v13343_v63, %v13344_v18  ;;  %v12890_v12 = vcombine.high %v12450_v2, %v12450_v2  ;;  %v12336_v18 = vld [vmem:[#allocation4 + $0xc8] sm:$0xff] }
 0x7cb   :  { %v12853_v61 = vrot.slane %v12839_v42, %v21287_v35  ;;  %v12854_v50 = vcombine.high %v12846_v37, %v12846_v37  ;;  %v13335_v6 = vsel %vm17640_vm0, %v12846_v37, 0.0  ;;  %v13346_v56 = vsel %vm780_vm9, %v12889_v45, 0.0  ;;  %v20812_v37 = vld [vmem:[%s21082_s2 + $0x2] ss:$0 sm:$0xff]  ;;  %v12418_v45 = vld [vmem:[%s21083_s3 + $0xd8] sm:$0xff] }
 0x7cc   :  { %v12897_v57 = vrot.slane %v12450_v2, %v21287_v35  ;;  %v12856_v36 = vcombine.high %v12448_v22, %v12448_v22  ;;  %v13918_v53 = vcombine.low %v13345_v17, %v13346_v56  ;;  %v13925_v44 = vrot.slane %v13917_v3, %v21287_v35 }
 0x7cd   :  { %v12855_v40 = vcombine.high %v12853_v61, %v12853_v61  ;;  %v13336_v11 = vsel %vm779_vm6, %v12854_v50, 0.0  ;;  %v13337_v58 = vsel %vm780_vm9, %v12853_v61, 0.0  ;;  %v12904_v28 = vrot.slane %v12890_v12, %v21287_v35 }
 0x7ce   :  { %v13883_v31 = vcombine.low %v13335_v6, %v13336_v11  ;;  %v12905_v0 = vcombine.high %v12897_v57, %v12897_v57  ;;  %v13932_v34 = vrot.slane %v13918_v53, %v21287_v35  ;;  %v13347_v38 = vsel %vm781_vm10, %v12897_v57, 0.0 }
 0x7cf   :  { %v13338_v59 = vsel %vm781_vm10, %v12855_v40, 0.0  ;;  %v12863_v5 = vrot.slane %v12448_v22, %v21287_v35  ;;  %v12906_v19 = vcombine.high %v12904_v28, %v12904_v28  ;;  %v13349_v26 = vsel %vm779_vm6, %v12904_v28, 0.0 }
 0x7d0   :  { %v13884_v49 = vcombine.low %v13337_v58, %v13338_v59  ;;  %v13891_v30 = vrot.slane %v13883_v31, %v21287_v35  ;;  %v13348_v23 = vsel %vm782_vm15, %v12905_v0, 0.0  ;;  %v13933_v21 = vcombine.low %v13925_v44, %v13932_v34 }
 0x7d1   :  { %v13934_v24 = vcombine.low %v13347_v38, %v13348_v23  ;;  %v12870_v43 = vrot.slane %v12856_v36, %v21287_v35  ;;  %v13350_v8 = vsel %vm780_vm9, %v12906_v19, 0.0  ;;  %v12871_v4 = vcombine.high %v12863_v5, %v12863_v5 }
 0x7d2   :  { %v13898_v55 = vrot.slane %v13884_v49, %v21287_v35  ;;  %v13339_v7 = vsel %vm782_vm15, %v12863_v5, 0.0  ;;  %14214 = vst.msk [vmem:[%s21084_s4 + $0xb0] sm:$0xff] %vm14191_vm8, %v13933_v21  ;;  %v13935_v32 = vcombine.low %v13349_v26, %v13350_v8  ;;  %v12453_v42 = vsub.f32 %v12417_v46, %v12381_v33 }
 0x7d3   :  { %v13942_v48 = vrot.slane %v13934_v24, %v21287_v35  ;;  %v12872_v41 = vcombine.high %v12870_v43, %v12870_v43  ;;  %v13341_v60 = vsel %vm780_vm9, %v12870_v43, 0.0  ;;  %v13340_v14 = vsel %vm779_vm6, %v12871_v4, 0.0 }
 0x7d4   :  { %v13899_v63 = vcombine.low %v13891_v30, %v13898_v55  ;;  %v12379_v2 = vadd.f32 %v20812_v37, %v12335_v10  ;;  %v13949_v17 = vrot.slane %v13935_v32, %v21287_v35  ;;  %v13900_v3 = vcombine.low %v13339_v7, %v13340_v14  ;;  %v12416_v7 = vld [vmem:[%s21083_s3 + $0xc8] sm:$0xff] }
 0x7d5   :  { %v13342_v22 = vsel %vm781_vm10, %v12872_v41, 0.0  ;;  %v12382_v33 = vadd.f32 %v20812_v37, %v12338_v54  ;;  %v12941_v50 = vcombine.high %v12453_v42, %v12453_v42  ;;  %v12948_v6 = vrot.slane %v12453_v42, %v21287_v35 }
 0x7d6   :  { %14212 = vst.msk [vmem:[%s21084_s4 + $0xa0] sm:$0xff] %vm14191_vm8, %v13899_v63  ;;  %v13901_v61 = vcombine.low %v13341_v60, %v13342_v22  ;;  %v12451_v56 = vsub.f32 %v12415_v27, %v12379_v2  ;;  %v13950_v12 = vcombine.low %v13942_v48, %v13949_v17  ;;  %v13908_v57 = vrot.slane %v13900_v3, %v21287_v35  ;;  %v12233_v17 = vld [vmem:[#allocation4 + $0xf0] sm:$0xff] }
 0x7d7   :  { %v12454_v36 = vsub.f32 %v12418_v45, %v12382_v33  ;;  %v12380_v53 = vadd.f32 %v20812_v37, %v12336_v18  ;;  %v12955_v40 = vrot.slane %v12941_v50, %v21287_v35  ;;  %v12956_v11 = vcombine.high %v12948_v6, %v12948_v6  ;;  %v12231_v50 = vld [vmem:[#allocation4 + $0xe0] sm:$0xff] }
 0x7d8   :  { %v13915_v44 = vrot.slane %v13901_v61, %v21287_v35  ;;  %v13359_v58 = vsel %vm780_vm9, %v12948_v6, 0.0  ;;  %14215 = vst.msk [vmem:[%s21084_s4 + $0xb8] sm:$0xff] %vm14191_vm8, %v13950_v12  ;;  %v12907_v31 = vcombine.high %v12451_v56, %v12451_v56  ;;  %v12914_v28 = vrot.slane %v12451_v56, %v21287_v35 }
 0x7d9   :  { %v12958_v0 = vcombine.high %v12454_v36, %v12454_v36  ;;  %v12965_v34 = vrot.slane %v12454_v36, %v21287_v35  ;;  %v12957_v38 = vcombine.high %v12955_v40, %v12955_v40  ;;  %v13360_v5 = vsel %vm781_vm10, %v12956_v11, 0.0  ;;  %v12234_v36 = vld [vmem:[#allocation4 + $0xf8] sm:$0xff] }
 0x7da   :  { %v13916_v59 = vcombine.low %v13908_v57, %v13915_v44  ;;  %v13361_v49 = vsel %vm782_vm15, %v12955_v40, 0.0  ;;  %v13985_v30 = vcombine.low %v13359_v58, %v13360_v5  ;;  %v12921_v19 = vrot.slane %v12907_v31, %v21287_v35  ;;  %v12232_v44 = vld [vmem:[#allocation4 + $0xe8] sm:$0xff]  ;;  %v12237_v40 = vld [vmem:[#allocation4 + $0x110] sm:$0xff] }
 0x7db   :  { %v12922_v23 = vcombine.high %v12914_v28, %v12914_v28  ;;  %v13351_v21 = vsel %vm781_vm10, %v12914_v28, 0.0  ;;  %v13362_v26 = vsel %vm17640_vm0, %v12957_v38, 0.0  ;;  %v12972_v24 = vrot.slane %v12958_v0, %v21287_v35  ;;  %v12235_v0 = vld [vmem:[#allocation4 + $0x100] sm:$0xff] }
 0x7dc   :  { %14213 = vst.msk [vmem:[%s21084_s4 + $0xa8] sm:$0xff] %vm14191_vm8, %v13916_v59  ;;  %v12973_v43 = vcombine.high %v12965_v34, %v12965_v34  ;;  %v13363_v46 = vsel %vm779_vm6, %v12965_v34, 0.0  ;;  %v13986_v10 = vcombine.low %v13361_v49, %v13362_v26  ;;  %v13993_v55 = vrot.slane %v13985_v30, %v21287_v35  ;;  %v12238_v34 = vld [vmem:[#allocation4 + $0x118] sm:$0xff]  ;;  %v12236_v59 = vld [vmem:[#allocation4 + $0x108] sm:$0xff]  ;;  %v12419_v26 = vld [vmem:[%s21083_s3 + $0xe0] sm:$0xff] }
 0x7dd   :  { %v12923_v8 = vcombine.high %v12921_v19, %v12921_v19  ;;  %v13352_v4 = vsel %vm782_vm15, %v12922_v23, 0.0  ;;  %v13353_v54 = vsel %vm17640_vm0, %v12921_v19, 0.0  ;;  %v12974_v48 = vcombine.high %v12972_v24, %v12972_v24 }
 0x7de   :  { %v13951_v32 = vcombine.low %v13351_v21, %v13352_v4  ;;  %v13364_v41 = vsel %vm780_vm9, %v12973_v43, 0.0  ;;  %v14000_v60 = vrot.slane %v13986_v10, %v21287_v35  ;;  %v13365_v63 = vsel %vm781_vm10, %v12972_v24, 0.0  ;;  %v12421_v21 = vld [vmem:[%s21083_s3 + $0xf0] sm:$0xff] }
 0x7df   :  { %v13354_v27 = vsel %vm779_vm6, %v12923_v8, 0.0  ;;  %v14002_v14 = vcombine.low %v13363_v46, %v13364_v41  ;;  %v13366_v45 = vsel %vm782_vm15, %v12974_v48, 0.0  ;;  %v12452_v18 = vsub.f32 %v12416_v7, %v12380_v53  ;;  %v12420_v8 = vld [vmem:[%s21083_s3 + $0xe8] sm:$0xff] }
 0x7e0   :  { %v13952_v42 = vcombine.low %v13353_v54, %v13354_v27  ;;  %v13959_v2 = vrot.slane %v13951_v32, %v21287_v35  ;;  %v14001_v22 = vcombine.low %v13993_v55, %v14000_v60  ;;  %v14003_v3 = vcombine.low %v13365_v63, %v13366_v45  ;;  %v12422_v55 = vld [vmem:[%s21083_s3 + $0xf8] sm:$0xff]  ;;  %v12425_v63 = vld [vmem:[%s21083_s3 + $0x110] sm:$0xff] }
 0x7e1   :  { %v14010_v33 = vrot.slane %v14002_v14, %v21287_v35  ;;  %v12269_v61 = vadd.f32 %v20510_v62, %v12233_v17  ;;  %v12924_v56 = vcombine.high %v12452_v18, %v12452_v18  ;;  %v12931_v12 = vrot.slane %v12452_v18, %v21287_v35 }
 0x7e2   :  { %v13966_v6 = vrot.slane %v13952_v42, %v21287_v35  ;;  %v12267_v57 = vadd.f32 %v12231_v50, %v20515_v13  ;;  %14218 = vst.msk [vmem:[%s21084_s4 + $0xd0] sm:$0xff] %vm14191_vm8, %v14001_v22  ;;  %v14017_v53 = vrot.slane %v14003_v3, %v21287_v35  ;;  %v12270_v62 = vadd.f32 %v20521_v15, %v12234_v36 }
 0x7e3   :  { %12305 = vst.msk [vmem:[#allocation4 + $0xf0] sm:$0xff] %vm396_vm5, %v12269_v61  ;;  %v12268_v11 = vadd.f32 %v12232_v44, %v20528_v9  ;;  %v12273_v58 = vadd.f32 %v20550_v25, %v12237_v40  ;;  %v12938_v13 = vrot.slane %v12924_v56, %v21287_v35  ;;  %v12939_v28 = vcombine.high %v12931_v12, %v12931_v12 }
 0x7e4   :  { %v13967_v31 = vcombine.low %v13959_v2, %v13966_v6  ;;  %12303 = vst.msk [vmem:[#allocation4 + $0xe0] sm:$0xff] %vm396_vm5, %v12267_v57  ;;  %v14018_v38 = vcombine.low %v14010_v33, %v14017_v53  ;;  %12306 = vst.msk [vmem:[#allocation4 + $0xf8] sm:$0xff] %vm396_vm5, %v12270_v62  ;;  %v12271_v15 = vadd.f32 %v12235_v0, %v20554_v16  ;;  %v13355_v49 = vsel %vm780_vm9, %v12931_v12, 0.0 }
 0x7e5   :  { %12304 = vst.msk [vmem:[#allocation4 + $0xe8] sm:$0xff] %vm396_vm5, %v12268_v11  ;;  %12309 = vst.msk [vmem:[#allocation4 + $0x110] sm:$0xff] %vm396_vm5, %v12273_v58  ;;  %v12274_v9 = vadd.f32 %v20560_v51, %v12238_v34  ;;  %v12272_v25 = vadd.f32 %v12236_v59, %v20573_v47  ;;  %v12940_v5 = vcombine.high %v12938_v13, %v12938_v13  ;;  %v13356_v30 = vsel %vm781_vm10, %v12939_v28, 0.0 }
 0x7e6   :  { %14216 = vst.msk [vmem:[%s21084_s4 + $0xc0] sm:$0xff] %vm14191_vm8, %v13967_v31  ;;  %14219 = vst.msk [vmem:[%s21084_s4 + $0xd8] sm:$0xff] %vm14191_vm8, %v14018_v38  ;;  %v13968_v16 = vcombine.low %v13355_v49, %v13356_v30  ;;  %v13357_v51 = vsel %vm782_vm15, %v12938_v13, 0.0 }
 0x7e7   :  { %12307 = vst.msk [vmem:[#allocation4 + $0x100] sm:$0xff] %vm396_vm5, %v12271_v15  ;;  %12310 = vst.msk [vmem:[#allocation4 + $0x118] sm:$0xff] %vm396_vm5, %v12274_v9  ;;  %v13358_v47 = vsel %vm779_vm6, %v12940_v5, 0.0 }
 0x7e8   :  { %12308 = vst.msk [vmem:[#allocation4 + $0x108] sm:$0xff] %vm396_vm5, %v12272_v25  ;;  %v13969_v19 = vcombine.low %v13357_v51, %v13358_v47  ;;  %v13976_v24 = vrot.slane %v13968_v16, %v21287_v35 }
 0x7ea   :  { %v12341_v23 = vld [vmem:[#allocation4 + $0xf0] sm:$0xff]  ;;  %v13983_v43 = vrot.slane %v13969_v19, %v21287_v35 }
 0x7eb   :  { %v12385_v46 = vadd.f32 %v20812_v37, %v12341_v23  ;;  %v12339_v10 = vld [vmem:[#allocation4 + $0xe0] sm:$0xff]  ;;  %v12342_v7 = vld [vmem:[#allocation4 + $0xf8] sm:$0xff] }
 0x7ec   :  { %v12383_v4 = vadd.f32 %v20812_v37, %v12339_v10  ;;  %v12340_v54 = vld [vmem:[#allocation4 + $0xe8] sm:$0xff]  ;;  %v12345_v32 = vld [vmem:[#allocation4 + $0x110] sm:$0xff]  ;;  %v13984_v48 = vcombine.low %v13976_v24, %v13983_v43  ;;  %v12386_v60 = vadd.f32 %v20812_v37, %v12342_v7 }
 0x7ed   :  { %v12457_v41 = vsub.f32 %v12421_v21, %v12385_v46  ;;  %v12384_v27 = vadd.f32 %v20812_v37, %v12340_v54  ;;  %v12389_v42 = vadd.f32 %v20812_v37, %v12345_v32  ;;  %v12423_v32 = vld [vmem:[%s21083_s3 + $0x100] sm:$0xff] }
 0x7ee   :  { %v12455_v14 = vsub.f32 %v12419_v26, %v12383_v4  ;;  %v12343_v2 = vld [vmem:[#allocation4 + $0x100] sm:$0xff]  ;;  %14217 = vst.msk [vmem:[%s21084_s4 + $0xc8] sm:$0xff] %vm14191_vm8, %v13984_v48  ;;  %v12458_v17 = vsub.f32 %v12422_v55, %v12386_v60 }
 0x7ef   :  { %v13009_v45 = vcombine.high %v12457_v41, %v12457_v41  ;;  %v13016_v18 = vrot.slane %v12457_v41, %v21287_v35  ;;  %v12456_v22 = vsub.f32 %v12420_v8, %v12384_v27  ;;  %v12461_v61 = vsub.f32 %v12425_v63, %v12389_v42 }
 0x7f0   :  { %v12975_v3 = vcombine.high %v12455_v14, %v12455_v14  ;;  %v12982_v33 = vrot.slane %v12455_v14, %v21287_v35  ;;  %v12387_v50 = vadd.f32 %v20812_v37, %v12343_v2  ;;  %v13026_v57 = vcombine.high %v12458_v17, %v12458_v17 }
 0x7f1   :  { %v13023_v6 = vrot.slane %v13009_v45, %v21287_v35  ;;  %v13024_v56 = vcombine.high %v13016_v18, %v13016_v18  ;;  %v13375_v12 = vsel %vm782_vm15, %v13016_v18, 0.0  ;;  %v13033_v53 = vrot.slane %v12458_v17, %v21287_v35 }
 0x7f2   :  { %v12989_v36 = vrot.slane %v12975_v3, %v21287_v35  ;;  %v12990_v44 = vcombine.high %v12982_v33, %v12982_v33  ;;  %v13367_v40 = vsel %vm779_vm6, %v12982_v33, 0.0  ;;  %v13040_v31 = vrot.slane %v13026_v57, %v21287_v35  ;;  %v12346_v3 = vld [vmem:[#allocation4 + $0x118] sm:$0xff] }
 0x7f3   :  { %v13025_v62 = vcombine.high %v13023_v6, %v13023_v6  ;;  %v13376_v11 = vsel %vm779_vm6, %v13024_v56, 0.0  ;;  %v13377_v58 = vsel %vm780_vm9, %v13023_v6, 0.0  ;;  %v13041_v15 = vcombine.high %v13033_v53, %v13033_v53 }
 0x7f4   :  { %v14053_v13 = vcombine.low %v13375_v12, %v13376_v11  ;;  %v12991_v28 = vcombine.high %v12989_v36, %v12989_v36  ;;  %v13368_v0 = vsel %vm780_vm9, %v12990_v44, 0.0  ;;  %v13369_v34 = vsel %vm781_vm10, %v12989_v36, 0.0  ;;  %v12344_v44 = vld [vmem:[#allocation4 + $0x108] sm:$0xff] }
 0x7f5   :  { %v13378_v59 = vsel %vm781_vm10, %v13025_v62, 0.0  ;;  %v14019_v38 = vcombine.low %v13367_v40, %v13368_v0  ;;  %v13042_v9 = vcombine.high %v13040_v31, %v13040_v31  ;;  %v13379_v30 = vsel %vm782_vm15, %v13033_v53, 0.0  ;;  %v12424_v0 = vld [vmem:[%s21083_s3 + $0x108] sm:$0xff] }
 0x7f6   :  { %v14054_v25 = vcombine.low %v13377_v58, %v13378_v59  ;;  %v14061_v5 = vrot.slane %v14053_v13, %v21287_v35  ;;  %v13370_v49 = vsel %vm782_vm15, %v12991_v28, 0.0  ;;  %v13380_v47 = vsel %vm17640_vm0, %v13041_v15, 0.0 }
 0x7f7   :  { %v14020_v16 = vcombine.low %v13369_v34, %v13370_v49  ;;  %v14027_v51 = vrot.slane %v14019_v38, %v21287_v35  ;;  %v13381_v19 = vsel %vm779_vm6, %v13040_v31, 0.0  ;;  %v13382_v21 = vsel %vm780_vm9, %v13042_v9, 0.0 }
 0x7f8   :  { %v14068_v23 = vrot.slane %v14054_v25, %v21287_v35  ;;  %v14070_v26 = vcombine.low %v13379_v30, %v13380_v47  ;;  %v12992_v24 = vcombine.high %v12456_v22, %v12456_v22  ;;  %v14071_v46 = vcombine.low %v13381_v19, %v13382_v21 }
 0x7f9   :  { %v14034_v43 = vrot.slane %v14020_v16, %v21287_v35  ;;  %v12999_v10 = vrot.slane %v12456_v22, %v21287_v35  ;;  %v13077_v55 = vcombine.high %v12461_v61, %v12461_v61  ;;  %v13084_v54 = vrot.slane %v12461_v61, %v21287_v35 }
 0x7fa   :  { %v14069_v8 = vcombine.low %v14061_v5, %v14068_v23  ;;  %v14078_v4 = vrot.slane %v14070_v26, %v21287_v35  ;;  %v13006_v7 = vrot.slane %v12992_v24, %v21287_v35  ;;  %v14085_v41 = vrot.slane %v14071_v46, %v21287_v35 }
 0x7fb   :  { %v14035_v48 = vcombine.low %v14027_v51, %v14034_v43  ;;  %v13007_v60 = vcombine.high %v12999_v10, %v12999_v10  ;;  %v13371_v27 = vsel %vm17640_vm0, %v12999_v10, 0.0  ;;  %v13091_v42 = vrot.slane %v13077_v55, %v21287_v35 }
 0x7fc   :  { %14222 = vst.msk [vmem:[%s21084_s4 + $0xf0] sm:$0xff] %vm14191_vm8, %v14069_v8  ;;  %v13008_v63 = vcombine.high %v13006_v7, %v13006_v7  ;;  %v13373_v14 = vsel %vm780_vm9, %v13006_v7, 0.0  ;;  %v13092_v2 = vcombine.high %v13084_v54, %v13084_v54  ;;  %v14086_v45 = vcombine.low %v14078_v4, %v14085_v41 }
 0x7fd   :  { %14220 = vst.msk [vmem:[%s21084_s4 + $0xe0] sm:$0xff] %vm14191_vm8, %v14035_v48  ;;  %v13372_v18 = vsel %vm779_vm6, %v13007_v60, 0.0  ;;  %v13391_v17 = vsel %vm780_vm9, %v13084_v54, 0.0  ;;  %v12459_v22 = vsub.f32 %v12423_v32, %v12387_v50  ;;  %v13093_v6 = vcombine.high %v13091_v42, %v13091_v42  ;;  %v12426_v50 = vld [vmem:[%s21083_s3 + $0x118] sm:$0xff] }
 0x7fe   :  { %v13374_v33 = vsel %vm781_vm10, %v13008_v63, 0.0  ;;  %v14036_v61 = vcombine.low %v13371_v27, %v13372_v18  ;;  %v13392_v56 = vsel %vm781_vm10, %v13092_v2, 0.0  ;;  %14223 = vst.msk [vmem:[%s21084_s4 + $0xf8] sm:$0xff] %vm14191_vm8, %v14086_v45  ;;  %v13393_v40 = vsel %vm782_vm15, %v13091_v42, 0.0 }
 0x7ff   :  { %v14037_v12 = vcombine.low %v13373_v14, %v13374_v33  ;;  %v14121_v57 = vcombine.low %v13391_v17, %v13392_v56  ;;  %v13043_v36 = vcombine.high %v12459_v22, %v12459_v22  ;;  %v13394_v53 = vsel %vm779_vm6, %v13093_v6, 0.0 }
 0x800   :  { %v13050_v62 = vrot.slane %v12459_v22, %v21287_v35  ;;  %v12390_v11 = vadd.f32 %v20812_v37, %v12346_v3  ;;  %v14044_v58 = vrot.slane %v14036_v61, %v21287_v35  ;;  %v14122_v13 = vcombine.low %v13393_v40, %v13394_v53 }
 0x801   :  { %v14051_v31 = vrot.slane %v14037_v12, %v21287_v35  ;;  %v13057_v28 = vrot.slane %v13043_v36, %v21287_v35  ;;  %v14129_v34 = vrot.slane %v14121_v57, %v21287_v35  ;;  %v12388_v15 = vadd.f32 %v20812_v37, %v12344_v44 }
 0x802   :  { %v13058_v59 = vcombine.high %v13050_v62, %v13050_v62  ;;  %v12462_v38 = vsub.f32 %v12426_v50, %v12390_v11  ;;  %v14136_v25 = vrot.slane %v14122_v13, %v21287_v35  ;;  %v13383_v49 = vsel %vm781_vm10, %v13050_v62, 0.0 }
 0x803   :  { %v14052_v9 = vcombine.low %v14044_v58, %v14051_v31  ;;  %v13059_v5 = vcombine.high %v13057_v28, %v13057_v28  ;;  %v12460_v47 = vsub.f32 %v12424_v0, %v12388_v15  ;;  %v13385_v19 = vsel %vm779_vm6, %v13057_v28, 0.0 }
 0x804   :  { %v13384_v30 = vsel %vm782_vm15, %v13058_v59, 0.0  ;;  %v13094_v16 = vcombine.high %v12462_v38, %v12462_v38  ;;  %v13101_v51 = vrot.slane %v12462_v38, %v21287_v35  ;;  %v14137_v37 = vcombine.low %v14129_v34, %v14136_v25 }
 0x805   :  { %14221 = vst.msk [vmem:[%s21084_s4 + $0xe8] sm:$0xff] %vm14191_vm8, %v14052_v9  ;;  %v13386_v23 = vsel %vm780_vm9, %v13059_v5, 0.0  ;;  %v14087_v21 = vcombine.low %v13383_v49, %v13384_v30  ;;  %v13060_v10 = vcombine.high %v12460_v47, %v12460_v47  ;;  %v13067_v55 = vrot.slane %v12460_v47, %v21287_v35 }
 0x806   :  { %v14088_v26 = vcombine.low %v13385_v19, %v13386_v23  ;;  %v13108_v24 = vrot.slane %v13094_v16, %v21287_v35  ;;  %v13109_v43 = vcombine.high %v13101_v51, %v13101_v51  ;;  %14226 = vst.msk [vmem:[%s21084_s4 + $0x110] sm:$0xff] %vm14191_vm8, %v14137_v37  ;;  %v13395_v46 = vsel %vm780_vm9, %v13101_v51, 0.0 }
 0x807   :  { %v14095_v8 = vrot.slane %v14087_v21, %v21287_v35  ;;  %v13074_v48 = vrot.slane %v13060_v10, %v21287_v35  ;;  %v13075_v41 = vcombine.high %v13067_v55, %v13067_v55  ;;  %v13387_v42 = vsel %vm781_vm10, %v13067_v55, 0.0 }
 0x808   :  { %v14102_v4 = vrot.slane %v14088_v26, %v21287_v35  ;;  %v13110_v7 = vcombine.high %v13108_v24, %v13108_v24  ;;  %v13396_v54 = vsel %vm781_vm10, %v13109_v43, 0.0  ;;  %v13397_v29 = vsel %vm782_vm15, %v13108_v24, 0.0 }
 0x809   :  { %v14138_v32 = vcombine.low %v13395_v46, %v13396_v54  ;;  %v13076_v14 = vcombine.high %v13074_v48, %v13074_v48  ;;  %v13388_v2 = vsel %vm782_vm15, %v13075_v41, 0.0  ;;  %v13389_v22 = vsel %vm17640_vm0, %v13074_v48, 0.0 }
 0x80a   :  { %v14103_v60 = vcombine.low %v14095_v8, %v14102_v4  ;;  %v13398_v27 = vsel %vm17640_vm0, %v13110_v7, 0.0  ;;  %v14104_v45 = vcombine.low %v13387_v42, %v13388_v2 }
 0x80b   :  { %v14139_v63 = vcombine.low %v13397_v29, %v13398_v27  ;;  %v14146_v18 = vrot.slane %v14138_v32, %v21287_v35  ;;  %v13390_v39 = vsel %vm779_vm6, %v13076_v14, 0.0 }
 0x80c   :  { %14224 = vst.msk [vmem:[%s21084_s4 + $0x100] sm:$0xff] %vm14191_vm8, %v14103_v60  ;;  %v14105_v3 = vcombine.low %v13389_v22, %v13390_v39  ;;  %v14112_v1 = vrot.slane %v14104_v45, %v21287_v35 }
 0x80d   :  { %v14153_v17 = vrot.slane %v14139_v63, %v21287_v35 }
 0x80e   :  { %v14119_v61 = vrot.slane %v14105_v3, %v21287_v35 }
 0x80f   :  { %v14154_v33 = vcombine.low %v14146_v18, %v14153_v17 }
 0x810   :  { %v14120_v6 = vcombine.low %v14112_v1, %v14119_v61 }
 0x811   :  { %14227 = vst.msk [vmem:[%s21084_s4 + $0x118] sm:$0xff] %vm14191_vm8, %v14154_v33 }
 0x812   :  { %14225 = vst.msk [vmem:[%s21084_s4 + $0x108] sm:$0xff] %vm14191_vm8, %v14120_v6 }

</bundles_post_ra>
